<compile_context>
chip_gen: v7x
topology: tpu7x:2x2x1
jax: 0.10.0
libtpu: 0.0.40
codegen_flags: <defaults>
</compile_context>

<pallas_src>
import functools

import jax
import jax.numpy as jnp
import numpy as np
from jax.experimental import pallas as pl
from jax.experimental.pallas import tpu as pltpu


# ---------------------------------------------------------------------------
# Kernel helpers (all operands are (Sb, 128) f32 tiles)
# ---------------------------------------------------------------------------
def _cov_terms(w, h, r):
    """Covariance terms (a, b, c) of a rotated gaussian box."""
    a = (w * w) * (1.0 / 12.0)
    b = (h * h) * (1.0 / 12.0)
    cos = jnp.cos(r)
    sin = jnp.sin(r)
    cos2 = cos * cos
    sin2 = sin * sin
    return a * cos2 + b * sin2, a * sin2 + b * cos2, (a - b) * cos * sin


def _probiou_one_minus_iou(pb_ref, tb_ref):
    """Returns hd == (1 - probiou) per anchor."""
    eps = 1e-7
    f32 = jnp.float32
    x1 = pb_ref[0].astype(f32)
    y1 = pb_ref[1].astype(f32)
    a1, b1, c1 = _cov_terms(pb_ref[2].astype(f32), pb_ref[3].astype(f32),
                            pb_ref[4].astype(f32))
    x2 = tb_ref[0].astype(f32)
    y2 = tb_ref[1].astype(f32)
    a2, b2, c2 = _cov_terms(tb_ref[2].astype(f32), tb_ref[3].astype(f32),
                            tb_ref[4].astype(f32))

    dx = x1 - x2
    dy = y1 - y2
    a_s = a1 + a2
    b_s = b1 + b2
    c_s = c1 + c2
    denom = a_s * b_s - c_s * c_s
    inv_denom = pl.reciprocal(denom + eps, approx=True)      # EUP, ~free slot
    t1 = (a_s * dy * dy + b_s * dx * dx) * inv_denom * 0.25
    t2 = (c_s * (x2 - x1) * dy) * inv_denom * 0.5
    det1 = jnp.maximum(a1 * b1 - c1 * c1, 0.0)
    det2 = jnp.maximum(a2 * b2 - c2 * c2, 0.0)
    # divide -> EUP reciprocal (frees VALU bundles; sqrt/log already on EUP)
    inv_sq = pl.reciprocal(4.0 * jnp.sqrt(det1 * det2) + eps, approx=True)
    t3 = 0.5 * jnp.log(denom * inv_sq + eps)
    bd = jnp.clip(t1 + t2 + t3, eps, 100.0)
    hd = jnp.sqrt(1.0 - jnp.exp(-bd) + eps)
    return hd                                                 # == 1 - iou


def _dfl_mean(pd_ref, ap_ref, tb_ref, reg_max):
    """Mean-over-4-sides DFL per anchor (before weight/mask).

    Streaming two-pass logsumexp + hat-function gather: logits are re-loaded
    from VMEM (vld slots are idle under a VALU-bound loop) instead of being
    pinned in a 17-vreg list.
    """
    f32 = jnp.float32
    r1 = reg_max + 1
    ax = ap_ref[0].astype(f32)
    ay = ap_ref[1].astype(f32)
    cx = tb_ref[0].astype(f32)
    cy = tb_ref[1].astype(f32)
    hw = 0.5 * tb_ref[2].astype(f32)
    hh = 0.5 * tb_ref[3].astype(f32)
    # bbox2dist(anchor, xywh2xyxy(target)): l, t, r, b
    sides = (ax - (cx - hw), ay - (cy - hh), (cx + hw) - ax, (cy + hh) - ay)

    dfl = None
    for s in range(4):                                        # static unroll
        t = jnp.clip(sides[s], 0.0, reg_max - 0.01)
        # pass 1: running max over bins (reload each logit)
        m = pd_ref[s * r1].astype(f32)
        for k in range(1, r1):
            m = jnp.maximum(m, pd_ref[s * r1 + k].astype(f32))
        # pass 2: fused exp-sum + hat-weighted gather (reload each logit once)
        se = None
        gathered = None
        for k in range(r1):
            logit = pd_ref[s * r1 + k].astype(f32)
            e = jnp.exp(logit - m)
            se = e if se is None else se + e
            # hat weight: == wl at tl, wr at tl+1, 0 elsewhere (wl + wr == 1)
            wk = jnp.maximum(0.0, 1.0 - jnp.abs(t - float(k)))
            g = logit * wk
            gathered = g if gathered is None else gathered + g
        ce = m + jnp.log(se) - gathered
        dfl = ce if dfl is None else dfl + ce
    return dfl * 0.25


def _reduce_sublane_groups(val, sb):
    """(Sb, 128) -> (8, 128) partial sum over sublane groups (vreg adds)."""
    acc = val[0:8]
    for g in range(1, sb // 8):
        acc = acc + val[g * 8:(g + 1) * 8]
    return acc


# ---------------------------------------------------------------------------
# Pallas kernels
# ---------------------------------------------------------------------------
def _iou_kernel(pb_ref, tb_ref, wfg_ref, liou_ref, *, sb):
    wfg = wfg_ref[...].astype(jnp.float32)
    liou = _probiou_one_minus_iou(pb_ref, tb_ref) * wfg
    liou_ref[...] = _reduce_sublane_groups(liou, sb)


def _iou_dfl_kernel(pd_ref, pb_ref, ap_ref, tb_ref, wfg_ref,
                    liou_ref, ldfl_ref, *, reg_max, sb):
    wfg = wfg_ref[...].astype(jnp.float32)
    liou = _probiou_one_minus_iou(pb_ref, tb_ref) * wfg
    ldfl = _dfl_mean(pd_ref, ap_ref, tb_ref, reg_max) * wfg
    liou_ref[...] = _reduce_sublane_groups(liou, sb)
    ldfl_ref[...] = _reduce_sublane_groups(ldfl, sb)


# ---------------------------------------------------------------------------
# Wrapper: channel-major / lane-dense relayout + tiled pallas_call
# ---------------------------------------------------------------------------
def _pad_lane_major(x, a, a_pad):
    """x: (..., a) -> (..., a_pad // 128, 128), zero padded along anchors."""
    pad = a_pad - a
    if pad:
        pad_width = [(0, 0)] * (x.ndim - 1) + [(0, pad)]
        x = jnp.pad(x, pad_width)
    return x.reshape(x.shape[:-1] + (a_pad // 128, 128))


def rotated_bbox_loss(pred_dist, pred_bboxes, anchor_points, target_bboxes,
                      target_scores, target_scores_sum, fg_mask, *,
                      reg_max, use_dfl=True, block_anchors=2048):
    B, A = fg_mask.shape
    r1 = reg_max + 1

    # --- tiling over the anchor axis: 128 lanes x Sb sublane groups / block ---
    S = -(-A // 128)                         # 128-anchor lane groups
    S8 = -(-S // 8) * 8                      # always a multiple of 8
    sb_req = max(8, (max(1, block_anchors // 128) // 8) * 8)
    Sb = min(S8, sb_req)
    S_pad = -(-S8 // Sb) * Sb
    n_blk = S_pad // Sb
    # v7x has 2 TensorCores: guarantee >= 2 steps along a "parallel" axis.
    if B * n_blk < 2 and Sb >= 16:
        Sb = max(8, (Sb // 2 // 8) * 8)
        S_pad = -(-S8 // Sb) * Sb
        n_blk = S_pad // Sb
    A_pad = S_pad * 128

    # --- pre-fold target_scores.sum(-1) * fg_mask into one channel ---
    weight = target_scores.astype(jnp.float32).sum(-1)            # (B, A)
    wfg = weight * fg_mask.astype(jnp.float32)                    # (B, A)

    # --- channel-major, lane-dense relayout (cast in-kernel) ---
    pb = _pad_lane_major(jnp.swapaxes(pred_bboxes, -1, -2), A, A_pad)    # (B,5,S,128)
    tb = _pad_lane_major(jnp.swapaxes(target_bboxes, -1, -2), A, A_pad)  # (B,5,S,128)
    wf = _pad_lane_major(wfg, A, A_pad)                                  # (B,S,128)
    ap = _pad_lane_major(jnp.swapaxes(anchor_points, 0, 1), A, A_pad)    # (2,S,128)

    grid = (B, n_blk)
    pb_spec = pl.BlockSpec((None, 5, Sb, 128), lambda b, j: (b, 0, j, 0))
    tb_spec = pl.BlockSpec((None, 5, Sb, 128), lambda b, j: (b, 0, j, 0))
    wf_spec = pl.BlockSpec((None, Sb, 128), lambda b, j: (b, j, 0))
    out_spec = pl.BlockSpec((None, 8, 128), lambda b, j: (b, j, 0))
    out_sd = jax.ShapeDtypeStruct((B, n_blk * 8, 128), jnp.float32)
    cparams = pltpu.CompilerParams(
        dimension_semantics=("parallel", "parallel"))

    tss = jnp.asarray(target_scores_sum, jnp.float32)

    if use_dfl:
        pd = _pad_lane_major(jnp.swapaxes(pred_dist, -1, -2), A, A_pad)  # (B,4*r1,S,128)
        pd_spec = pl.BlockSpec((None, 4 * r1, Sb, 128), lambda b, j: (b, 0, j, 0))
        ap_spec = pl.BlockSpec((2, Sb, 128), lambda b, j: (0, j, 0))     # reused over batch
        kernel = functools.partial(_iou_dfl_kernel, reg_max=reg_max, sb=Sb)
        iou_part, dfl_part = pl.pallas_call(
            kernel,
            grid=grid,
            in_specs=[pd_spec, pb_spec, ap_spec, tb_spec, wf_spec],
            out_specs=(out_spec, out_spec),
            out_shape=(out_sd, out_sd),
            compiler_params=cparams,
        )(pd, pb, ap, tb, wf)
        loss_dfl = jnp.sum(dfl_part) / tss
    else:
        iou_part = pl.pallas_call(
            functools.partial(_iou_kernel, sb=Sb),
            grid=grid,
            in_specs=[pb_spec, tb_spec, wf_spec],
            out_specs=out_spec,
            out_shape=out_sd,
            compiler_params=cparams,
        )(pb, tb, wf)
        loss_dfl = jnp.zeros((), jnp.float32)

    loss_iou = jnp.sum(iou_part) / tss
    return loss_iou, loss_dfl


# ---------------------------------------------------------------------------
# Pure-numpy reference matching the PyTorch semantics (boolean indexing etc.)
# ---------------------------------------------------------------------------
def _cov_np(boxes):
    a = boxes[:, 2:3] ** 2 / 12.0
    b = boxes[:, 3:4] ** 2 / 12.0
    c = boxes[:, 4:5]
    cos, sin = np.cos(c), np.sin(c)
    return a * cos ** 2 + b * sin ** 2, a * sin ** 2 + b * cos ** 2, (a - b) * cos * sin


def reference(pred_dist, pred_bboxes, anchor_points, target_bboxes,
              target_scores, tss, fg_mask, reg_max, use_dfl):
    eps = 1e-7
    fg = np.asarray(fg_mask)
    weight = np.asarray(target_scores).sum(-1)[fg][:, None]
    pb = np.asarray(pred_bboxes)[fg]
    tb = np.asarray(target_bboxes)[fg]
    x1, y1 = pb[:, 0:1], pb[:, 1:2]
    x2, y2 = tb[:, 0:1], tb[:, 1:2]
    a1, b1, c1 = _cov_np(pb)
    a2, b2, c2 = _cov_np(tb)
    denom = (a1 + a2) * (b1 + b2) - (c1 + c2) ** 2
    t1 = ((a1 + a2) * (y1 - y2) ** 2 + (b1 + b2) * (x1 - x2) ** 2) / (denom + eps) * 0.25
    t2 = ((c1 + c2) * (x2 - x1) * (y1 - y2)) / (denom + eps) * 0.5
    t3 = np.log(denom / (4 * np.sqrt(np.clip(a1 * b1 - c1 ** 2, 0, None)
                                     * np.clip(a2 * b2 - c2 ** 2, 0, None)) + eps) + eps) * 0.5
    bd = np.clip(t1 + t2 + t3, eps, 100.0)
    hd = np.sqrt(1.0 - np.exp(-bd) + eps)
    iou = 1.0 - hd
    loss_iou = ((1.0 - iou) * weight).sum() / float(tss)

    if use_dfl:
        ap = np.asarray(anchor_points)
        tb_all = np.asarray(target_bboxes)
        xy, wh = tb_all[..., :2], tb_all[..., 2:4]
        x1y1, x2y2 = xy - wh / 2, xy + wh / 2
        ltrb = np.concatenate([ap[None] - x1y1, x2y2 - ap[None]], -1)
        ltrb = np.clip(ltrb, 0, reg_max - 0.01)
        target = ltrb[fg]                                        # (M, 4)
        pd = np.asarray(pred_dist)[fg].reshape(-1, reg_max + 1)  # (4M, R+1)
        tl = np.floor(target).astype(np.int64)
        tr = tl + 1
        wl = tr - target
        wr = 1 - wl
        mx = pd.max(-1, keepdims=True)
        lse = np.log(np.exp(pd - mx).sum(-1)) + mx[:, 0]
        rows = np.arange(pd.shape[0])
        ce_l = lse - pd[rows, tl.reshape(-1)]
        ce_r = lse - pd[rows, tr.reshape(-1)]
        dfl = (ce_l.reshape(tl.shape) * wl + ce_r.reshape(tl.shape) * wr).mean(-1, keepdims=True)
        loss_dfl = (dfl * weight).sum() / float(tss)
    else:
        loss_dfl = 0.0
    return float(loss_iou), float(loss_dfl)


# ---------------------------------------------------------------------------
if __name__ == "__main__":
    # 45x45 anchor grid -> A = 2025 anchors, padded to 2048 (16 sublane groups).
    B, A_SIDE, C, REG_MAX = 2, 45, 16, 16
    A = A_SIDE * A_SIDE
    USE_DFL = True

    key = jax.random.PRNGKey(0)
    k = jax.random.split(key, 6)

    gx, gy = jnp.meshgrid(jnp.arange(A_SIDE, dtype=jnp.float32) + 0.5,
                          jnp.arange(A_SIDE, dtype=jnp.float32) + 0.5, indexing="xy")
    anchor_points = jnp.stack([gx.reshape(-1), gy.reshape(-1)], -1)   # (A, 2)

    def rand_boxes(kk):
        kxy, kwh, kr = jax.random.split(kk, 3)
        xy = jax.random.uniform(kxy, (B, A, 2), minval=0.0, maxval=float(A_SIDE))
        wh = jax.random.uniform(kwh, (B, A, 2), minval=0.5, maxval=6.0)
        r = jax.random.uniform(kr, (B, A, 1), minval=-0.7, maxval=0.7)
        return jnp.concatenate([xy, wh, r], -1).astype(jnp.float32)

    pred_bboxes = rand_boxes(k[0])                                    # (B, A, 5) xywhr
    target_bboxes = rand_boxes(k[1])                                  # (B, A, 5) xywhr
    pred_dist = jax.random.normal(k[2], (B, A, 4 * (REG_MAX + 1)), dtype=jnp.float32)
    target_scores = jax.random.uniform(k[3], (B, A, C), dtype=jnp.float32)
    fg_mask = jax.random.bernoulli(k[4], 0.4, (B, A))                 # bool
    target_scores_sum = jnp.maximum(target_scores.sum(), 1.0)

    loss_iou, loss_dfl = rotated_bbox_loss(
        pred_dist, pred_bboxes, anchor_points, target_bboxes,
        target_scores, target_scores_sum, fg_mask,
        reg_max=REG_MAX, use_dfl=USE_DFL, block_anchors=2048)
    loss_iou, loss_dfl = jax.block_until_ready((loss_iou, loss_dfl))

    ref_iou, ref_dfl = reference(pred_dist, pred_bboxes, anchor_points, target_bboxes,
                                 target_scores, float(target_scores_sum), fg_mask,
                                 REG_MAX, USE_DFL)

    # approx=True reciprocals in the kernel perturb low bits -> modest tolerance.
    np.testing.assert_allclose(float(loss_iou), ref_iou, rtol=1e-2, atol=5e-3)
    np.testing.assert_allclose(float(loss_dfl), ref_dfl, rtol=1e-2, atol=5e-3)
    print("KERNEL_OK")
</pallas_src>

<mosaic_0001>
module attributes {stable_mosaic.version = 11 : i64} {
  func.func @_iou_dfl_kernel(%arg0: i32, %arg1: i32, %arg2: memref<1x68x16x128xf32, #tpu.memory_space<vmem>>, %arg3: memref<1x5x16x128xf32, #tpu.memory_space<vmem>>, %arg4: memref<2x16x128xf32, #tpu.memory_space<vmem>>, %arg5: memref<1x5x16x128xf32, #tpu.memory_space<vmem>>, %arg6: memref<1x16x128xf32, #tpu.memory_space<vmem>>, %arg7: memref<1x8x128xf32, #tpu.memory_space<vmem>>, %arg8: memref<1x8x128xf32, #tpu.memory_space<vmem>>) attributes {dimension_semantics = [#tpu.dimension_semantics<parallel>, #tpu.dimension_semantics<parallel>], iteration_bounds = array<i64: 2, 1>, scalar_prefetch = 0 : i64, scratch_operands = 0 : i64, tpu.core_type = #tpu.core_type<tc>, window_params = [{transform_indices = @transform_0, window_bounds = array<i64: 1, 68, 16, 128>}, {transform_indices = @transform_1, window_bounds = array<i64: 1, 5, 16, 128>}, {transform_indices = @transform_2, window_bounds = array<i64: 2, 16, 128>}, {transform_indices = @transform_3, window_bounds = array<i64: 1, 5, 16, 128>}, {transform_indices = @transform_4, window_bounds = array<i64: 1, 16, 128>}, {transform_indices = @transform_5, window_bounds = array<i64: 1, 8, 128>}, {transform_indices = @transform_6, window_bounds = array<i64: 1, 8, 128>}]} {
    %c0 = arith.constant 0 : index
    %c0_0 = arith.constant 0 : index
    %c0_1 = arith.constant 0 : index
    %0 = vector.load %arg6[%c0, %c0_0, %c0_1] : memref<1x16x128xf32, #tpu.memory_space<vmem>>, vector<1x16x128xf32>
    %1 = vector.shape_cast %0 : vector<1x16x128xf32> to vector<16x128xf32>
    %c0_2 = arith.constant 0 : index
    %c0_3 = arith.constant 0 : index
    %c0_4 = arith.constant 0 : index
    %c0_5 = arith.constant 0 : index
    %2 = vector.load %arg3[%c0_2, %c0_3, %c0_4, %c0_5] : memref<1x5x16x128xf32, #tpu.memory_space<vmem>>, vector<1x1x16x128xf32>
    %3 = vector.shape_cast %2 : vector<1x1x16x128xf32> to vector<16x128xf32>
    %c0_6 = arith.constant 0 : index
    %c1 = arith.constant 1 : index
    %c0_7 = arith.constant 0 : index
    %c0_8 = arith.constant 0 : index
    %4 = vector.load %arg3[%c0_6, %c1, %c0_7, %c0_8] : memref<1x5x16x128xf32, #tpu.memory_space<vmem>>, vector<1x1x16x128xf32>
    %5 = vector.shape_cast %4 : vector<1x1x16x128xf32> to vector<16x128xf32>
    %c0_9 = arith.constant 0 : index
    %c2 = arith.constant 2 : index
    %c0_10 = arith.constant 0 : index
    %c0_11 = arith.constant 0 : index
    %6 = vector.load %arg3[%c0_9, %c2, %c0_10, %c0_11] : memref<1x5x16x128xf32, #tpu.memory_space<vmem>>, vector<1x1x16x128xf32>
    %7 = vector.shape_cast %6 : vector<1x1x16x128xf32> to vector<16x128xf32>
    %c0_12 = arith.constant 0 : index
    %c3 = arith.constant 3 : index
    %c0_13 = arith.constant 0 : index
    %c0_14 = arith.constant 0 : index
    %8 = vector.load %arg3[%c0_12, %c3, %c0_13, %c0_14] : memref<1x5x16x128xf32, #tpu.memory_space<vmem>>, vector<1x1x16x128xf32>
    %9 = vector.shape_cast %8 : vector<1x1x16x128xf32> to vector<16x128xf32>
    %c0_15 = arith.constant 0 : index
    %c4 = arith.constant 4 : index
    %c0_16 = arith.constant 0 : index
    %c0_17 = arith.constant 0 : index
    %10 = vector.load %arg3[%c0_15, %c4, %c0_16, %c0_17] : memref<1x5x16x128xf32, #tpu.memory_space<vmem>>, vector<1x1x16x128xf32>
    %11 = vector.shape_cast %10 : vector<1x1x16x128xf32> to vector<16x128xf32>
    %12 = arith.mulf %7, %7 : vector<16x128xf32>
    %cst = arith.constant 0.0833333358 : f32
    %13 = vector.broadcast %cst : f32 to vector<16x128xf32>
    %14 = arith.mulf %12, %13 : vector<16x128xf32>
    %15 = arith.mulf %9, %9 : vector<16x128xf32>
    %cst_18 = arith.constant 0.0833333358 : f32
    %16 = vector.broadcast %cst_18 : f32 to vector<16x128xf32>
    %17 = arith.mulf %15, %16 : vector<16x128xf32>
    %18 = math.cos %11 : vector<16x128xf32>
    %19 = math.sin %11 : vector<16x128xf32>
    %20 = arith.mulf %18, %18 : vector<16x128xf32>
    %21 = arith.mulf %19, %19 : vector<16x128xf32>
    %22 = arith.mulf %14, %20 : vector<16x128xf32>
    %23 = arith.mulf %17, %21 : vector<16x128xf32>
    %24 = arith.addf %22, %23 : vector<16x128xf32>
    %25 = arith.mulf %14, %21 : vector<16x128xf32>
    %26 = arith.mulf %17, %20 : vector<16x128xf32>
    %27 = arith.addf %25, %26 : vector<16x128xf32>
    %28 = arith.subf %14, %17 : vector<16x128xf32>
    %29 = arith.mulf %28, %18 : vector<16x128xf32>
    %30 = arith.mulf %29, %19 : vector<16x128xf32>
    %c0_19 = arith.constant 0 : index
    %c0_20 = arith.constant 0 : index
    %c0_21 = arith.constant 0 : index
    %c0_22 = arith.constant 0 : index
    %31 = vector.load %arg5[%c0_19, %c0_20, %c0_21, %c0_22] : memref<1x5x16x128xf32, #tpu.memory_space<vmem>>, vector<1x1x16x128xf32>
    %32 = vector.shape_cast %31 : vector<1x1x16x128xf32> to vector<16x128xf32>
    %c0_23 = arith.constant 0 : index
    %c1_24 = arith.constant 1 : index
    %c0_25 = arith.constant 0 : index
    %c0_26 = arith.constant 0 : index
    %33 = vector.load %arg5[%c0_23, %c1_24, %c0_25, %c0_26] : memref<1x5x16x128xf32, #tpu.memory_space<vmem>>, vector<1x1x16x128xf32>
    %34 = vector.shape_cast %33 : vector<1x1x16x128xf32> to vector<16x128xf32>
    %c0_27 = arith.constant 0 : index
    %c2_28 = arith.constant 2 : index
    %c0_29 = arith.constant 0 : index
    %c0_30 = arith.constant 0 : index
    %35 = vector.load %arg5[%c0_27, %c2_28, %c0_29, %c0_30] : memref<1x5x16x128xf32, #tpu.memory_space<vmem>>, vector<1x1x16x128xf32>
    %36 = vector.shape_cast %35 : vector<1x1x16x128xf32> to vector<16x128xf32>
    %c0_31 = arith.constant 0 : index
    %c3_32 = arith.constant 3 : index
    %c0_33 = arith.constant 0 : index
    %c0_34 = arith.constant 0 : index
    %37 = vector.load %arg5[%c0_31, %c3_32, %c0_33, %c0_34] : memref<1x5x16x128xf32, #tpu.memory_space<vmem>>, vector<1x1x16x128xf32>
    %38 = vector.shape_cast %37 : vector<1x1x16x128xf32> to vector<16x128xf32>
    %c0_35 = arith.constant 0 : index
    %c4_36 = arith.constant 4 : index
    %c0_37 = arith.constant 0 : index
    %c0_38 = arith.constant 0 : index
    %39 = vector.load %arg5[%c0_35, %c4_36, %c0_37, %c0_38] : memref<1x5x16x128xf32, #tpu.memory_space<vmem>>, vector<1x1x16x128xf32>
    %40 = vector.shape_cast %39 : vector<1x1x16x128xf32> to vector<16x128xf32>
    %41 = arith.mulf %36, %36 : vector<16x128xf32>
    %cst_39 = arith.constant 0.0833333358 : f32
    %42 = vector.broadcast %cst_39 : f32 to vector<16x128xf32>
    %43 = arith.mulf %41, %42 : vector<16x128xf32>
    %44 = arith.mulf %38, %38 : vector<16x128xf32>
    %cst_40 = arith.constant 0.0833333358 : f32
    %45 = vector.broadcast %cst_40 : f32 to vector<16x128xf32>
    %46 = arith.mulf %44, %45 : vector<16x128xf32>
    %47 = math.cos %40 : vector<16x128xf32>
    %48 = math.sin %40 : vector<16x128xf32>
    %49 = arith.mulf %47, %47 : vector<16x128xf32>
    %50 = arith.mulf %48, %48 : vector<16x128xf32>
    %51 = arith.mulf %43, %49 : vector<16x128xf32>
    %52 = arith.mulf %46, %50 : vector<16x128xf32>
    %53 = arith.addf %51, %52 : vector<16x128xf32>
    %54 = arith.mulf %43, %50 : vector<16x128xf32>
    %55 = arith.mulf %46, %49 : vector<16x128xf32>
    %56 = arith.addf %54, %55 : vector<16x128xf32>
    %57 = arith.subf %43, %46 : vector<16x128xf32>
    %58 = arith.mulf %57, %47 : vector<16x128xf32>
    %59 = arith.mulf %58, %48 : vector<16x128xf32>
    %60 = arith.subf %3, %32 : vector<16x128xf32>
    %61 = arith.subf %5, %34 : vector<16x128xf32>
    %62 = arith.addf %24, %53 : vector<16x128xf32>
    %63 = arith.addf %27, %56 : vector<16x128xf32>
    %64 = arith.addf %30, %59 : vector<16x128xf32>
    %65 = arith.mulf %62, %63 : vector<16x128xf32>
    %66 = arith.mulf %64, %64 : vector<16x128xf32>
    %67 = arith.subf %65, %66 : vector<16x128xf32>
    %cst_41 = arith.constant 1.000000e-07 : f32
    %68 = vector.broadcast %cst_41 : f32 to vector<16x128xf32>
    %69 = arith.addf %67, %68 : vector<16x128xf32>
    %70 = tpu.reciprocal %69 {approx = true} : vector<16x128xf32> -> vector<16x128xf32>
    %71 = arith.mulf %62, %61 : vector<16x128xf32>
    %72 = arith.mulf %71, %61 : vector<16x128xf32>
    %73 = arith.mulf %63, %60 : vector<16x128xf32>
    %74 = arith.mulf %73, %60 : vector<16x128xf32>
    %75 = arith.addf %72, %74 : vector<16x128xf32>
    %76 = arith.mulf %75, %70 : vector<16x128xf32>
    %cst_42 = arith.constant 2.500000e-01 : f32
    %77 = vector.broadcast %cst_42 : f32 to vector<16x128xf32>
    %78 = arith.mulf %76, %77 : vector<16x128xf32>
    %79 = arith.subf %32, %3 : vector<16x128xf32>
    %80 = arith.mulf %64, %79 : vector<16x128xf32>
    %81 = arith.mulf %80, %61 : vector<16x128xf32>
    %82 = arith.mulf %81, %70 : vector<16x128xf32>
    %cst_43 = arith.constant 5.000000e-01 : f32
    %83 = vector.broadcast %cst_43 : f32 to vector<16x128xf32>
    %84 = arith.mulf %82, %83 : vector<16x128xf32>
    %85 = arith.mulf %24, %27 : vector<16x128xf32>
    %86 = arith.mulf %30, %30 : vector<16x128xf32>
    %87 = arith.subf %85, %86 : vector<16x128xf32>
    %cst_44 = arith.constant 0.000000e+00 : f32
    %88 = vector.broadcast %cst_44 : f32 to vector<16x128xf32>
    %89 = arith.maximumf %87, %88 : vector<16x128xf32>
    %90 = arith.mulf %53, %56 : vector<16x128xf32>
    %91 = arith.mulf %59, %59 : vector<16x128xf32>
    %92 = arith.subf %90, %91 : vector<16x128xf32>
    %cst_45 = arith.constant 0.000000e+00 : f32
    %93 = vector.broadcast %cst_45 : f32 to vector<16x128xf32>
    %94 = arith.maximumf %92, %93 : vector<16x128xf32>
    %95 = arith.mulf %89, %94 : vector<16x128xf32>
    %96 = math.sqrt %95 : vector<16x128xf32>
    %cst_46 = arith.constant 4.000000e+00 : f32
    %97 = vector.broadcast %cst_46 : f32 to vector<16x128xf32>
    %98 = arith.mulf %97, %96 : vector<16x128xf32>
    %cst_47 = arith.constant 1.000000e-07 : f32
    %99 = vector.broadcast %cst_47 : f32 to vector<16x128xf32>
    %100 = arith.addf %98, %99 : vector<16x128xf32>
    %101 = tpu.reciprocal %100 {approx = true} : vector<16x128xf32> -> vector<16x128xf32>
    %102 = arith.mulf %67, %101 : vector<16x128xf32>
    %cst_48 = arith.constant 1.000000e-07 : f32
    %103 = vector.broadcast %cst_48 : f32 to vector<16x128xf32>
    %104 = arith.addf %102, %103 : vector<16x128xf32>
    %105 = math.log %104 : vector<16x128xf32>
    %cst_49 = arith.constant 5.000000e-01 : f32
    %106 = vector.broadcast %cst_49 : f32 to vector<16x128xf32>
    %107 = arith.mulf %106, %105 : vector<16x128xf32>
    %108 = arith.addf %78, %84 : vector<16x128xf32>
    %109 = arith.addf %108, %107 : vector<16x128xf32>
    %cst_50 = arith.constant 1.000000e-07 : f32
    %cst_51 = arith.constant 1.000000e+02 : f32
    %110 = vector.broadcast %cst_50 : f32 to vector<16x128xf32>
    %111 = arith.maximumf %110, %109 : vector<16x128xf32>
    %112 = vector.broadcast %cst_51 : f32 to vector<16x128xf32>
    %113 = arith.minimumf %112, %111 : vector<16x128xf32>
    %cst_52 = arith.constant 0.000000e+00 : f32
    %114 = vector.broadcast %cst_52 : f32 to vector<16x128xf32>
    %115 = arith.subf %114, %113 : vector<16x128xf32>
    %116 = math.exp %115 : vector<16x128xf32>
    %cst_53 = arith.constant 1.000000e+00 : f32
    %117 = vector.broadcast %cst_53 : f32 to vector<16x128xf32>
    %118 = arith.subf %117, %116 : vector<16x128xf32>
    %cst_54 = arith.constant 1.000000e-07 : f32
    %119 = vector.broadcast %cst_54 : f32 to vector<16x128xf32>
    %120 = arith.addf %118, %119 : vector<16x128xf32>
    %121 = math.sqrt %120 : vector<16x128xf32>
    %122 = arith.mulf %121, %1 : vector<16x128xf32>
    %c0_55 = arith.constant 0 : index
    %c0_56 = arith.constant 0 : index
    %c0_57 = arith.constant 0 : index
    %123 = vector.load %arg4[%c0_55, %c0_56, %c0_57] : memref<2x16x128xf32, #tpu.memory_space<vmem>>, vector<1x16x128xf32>
    %124 = vector.shape_cast %123 : vector<1x16x128xf32> to vector<16x128xf32>
    %c1_58 = arith.constant 1 : index
    %c0_59 = arith.constant 0 : index
    %c0_60 = arith.constant 0 : index
    %125 = vector.load %arg4[%c1_58, %c0_59, %c0_60] : memref<2x16x128xf32, #tpu.memory_space<vmem>>, vector<1x16x128xf32>
    %126 = vector.shape_cast %125 : vector<1x16x128xf32> to vector<16x128xf32>
    %c0_61 = arith.constant 0 : index
    %c0_62 = arith.constant 0 : index
    %c0_63 = arith.constant 0 : index
    %c0_64 = arith.constant 0 : index
    %127 = vector.load %arg5[%c0_61, %c0_62, %c0_63, %c0_64] : memref<1x5x16x128xf32, #tpu.memory_space<vmem>>, vector<1x1x16x128xf32>
    %128 = vector.shape_cast %127 : vector<1x1x16x128xf32> to vector<16x128xf32>
    %c0_65 = arith.constant 0 : index
    %c1_66 = arith.constant 1 : index
    %c0_67 = arith.constant 0 : index
    %c0_68 = arith.constant 0 : index
    %129 = vector.load %arg5[%c0_65, %c1_66, %c0_67, %c0_68] : memref<1x5x16x128xf32, #tpu.memory_space<vmem>>, vector<1x1x16x128xf32>
    %130 = vector.shape_cast %129 : vector<1x1x16x128xf32> to vector<16x128xf32>
    %c0_69 = arith.constant 0 : index
    %c2_70 = arith.constant 2 : index
    %c0_71 = arith.constant 0 : index
    %c0_72 = arith.constant 0 : index
    %131 = vector.load %arg5[%c0_69, %c2_70, %c0_71, %c0_72] : memref<1x5x16x128xf32, #tpu.memory_space<vmem>>, vector<1x1x16x128xf32>
    %132 = vector.shape_cast %131 : vector<1x1x16x128xf32> to vector<16x128xf32>
    %cst_73 = arith.constant 5.000000e-01 : f32
    %133 = vector.broadcast %cst_73 : f32 to vector<16x128xf32>
    %134 = arith.mulf %133, %132 : vector<16x128xf32>
    %c0_74 = arith.constant 0 : index
    %c3_75 = arith.constant 3 : index
    %c0_76 = arith.constant 0 : index
    %c0_77 = arith.constant 0 : index
    %135 = vector.load %arg5[%c0_74, %c3_75, %c0_76, %c0_77] : memref<1x5x16x128xf32, #tpu.memory_space<vmem>>, vector<1x1x16x128xf32>
    %136 = vector.shape_cast %135 : vector<1x1x16x128xf32> to vector<16x128xf32>
    %cst_78 = arith.constant 5.000000e-01 : f32
    %137 = vector.broadcast %cst_78 : f32 to vector<16x128xf32>
    %138 = arith.mulf %137, %136 : vector<16x128xf32>
    %139 = arith.subf %128, %134 : vector<16x128xf32>
    %140 = arith.subf %124, %139 : vector<16x128xf32>
    %141 = arith.subf %130, %138 : vector<16x128xf32>
    %142 = arith.subf %126, %141 : vector<16x128xf32>
    %143 = arith.addf %128, %134 : vector<16x128xf32>
    %144 = arith.subf %143, %124 : vector<16x128xf32>
    %145 = arith.addf %130, %138 : vector<16x128xf32>
    %146 = arith.subf %145, %126 : vector<16x128xf32>
    %cst_79 = arith.constant 0.000000e+00 : f32
    %cst_80 = arith.constant 1.599000e+01 : f32
    %147 = vector.broadcast %cst_79 : f32 to vector<16x128xf32>
    %148 = arith.maximumf %147, %140 : vector<16x128xf32>
    %149 = vector.broadcast %cst_80 : f32 to vector<16x128xf32>
    %150 = arith.minimumf %149, %148 : vector<16x128xf32>
    %c0_81 = arith.constant 0 : index
    %c0_82 = arith.constant 0 : index
    %c0_83 = arith.constant 0 : index
    %c0_84 = arith.constant 0 : index
    %151 = vector.load %arg2[%c0_81, %c0_82, %c0_83, %c0_84] : memref<1x68x16x128xf32, #tpu.memory_space<vmem>>, vector<1x1x16x128xf32>
    %152 = vector.shape_cast %151 : vector<1x1x16x128xf32> to vector<16x128xf32>
    %c0_85 = arith.constant 0 : index
    %c1_86 = arith.constant 1 : index
    %c0_87 = arith.constant 0 : index
    %c0_88 = arith.constant 0 : index
    %153 = vector.load %arg2[%c0_85, %c1_86, %c0_87, %c0_88] : memref<1x68x16x128xf32, #tpu.memory_space<vmem>>, vector<1x1x16x128xf32>
    %154 = vector.shape_cast %153 : vector<1x1x16x128xf32> to vector<16x128xf32>
    %155 = arith.maximumf %152, %154 : vector<16x128xf32>
    %c0_89 = arith.constant 0 : index
    %c2_90 = arith.constant 2 : index
    %c0_91 = arith.constant 0 : index
    %c0_92 = arith.constant 0 : index
    %156 = vector.load %arg2[%c0_89, %c2_90, %c0_91, %c0_92] : memref<1x68x16x128xf32, #tpu.memory_space<vmem>>, vector<1x1x16x128xf32>
    %157 = vector.shape_cast %156 : vector<1x1x16x128xf32> to vector<16x128xf32>
    %158 = arith.maximumf %155, %157 : vector<16x128xf32>
    %c0_93 = arith.constant 0 : index
    %c3_94 = arith.constant 3 : index
    %c0_95 = arith.constant 0 : index
    %c0_96 = arith.constant 0 : index
    %159 = vector.load %arg2[%c0_93, %c3_94, %c0_95, %c0_96] : memref<1x68x16x128xf32, #tpu.memory_space<vmem>>, vector<1x1x16x128xf32>
    %160 = vector.shape_cast %159 : vector<1x1x16x128xf32> to vector<16x128xf32>
    %161 = arith.maximumf %158, %160 : vector<16x128xf32>
    %c0_97 = arith.constant 0 : index
    %c4_98 = arith.constant 4 : index
    %c0_99 = arith.constant 0 : index
    %c0_100 = arith.constant 0 : index
    %162 = vector.load %arg2[%c0_97, %c4_98, %c0_99, %c0_100] : memref<1x68x16x128xf32, #tpu.memory_space<vmem>>, vector<1x1x16x128xf32>
    %163 = vector.shape_cast %162 : vector<1x1x16x128xf32> to vector<16x128xf32>
    %164 = arith.maximumf %161, %163 : vector<16x128xf32>
    %c0_101 = arith.constant 0 : index
    %c5 = arith.constant 5 : index
    %c0_102 = arith.constant 0 : index
    %c0_103 = arith.constant 0 : index
    %165 = vector.load %arg2[%c0_101, %c5, %c0_102, %c0_103] : memref<1x68x16x128xf32, #tpu.memory_space<vmem>>, vector<1x1x16x128xf32>
    %166 = vector.shape_cast %165 : vector<1x1x16x128xf32> to vector<16x128xf32>
    %167 = arith.maximumf %164, %166 : vector<16x128xf32>
    %c0_104 = arith.constant 0 : index
    %c6 = arith.constant 6 : index
    %c0_105 = arith.constant 0 : index
    %c0_106 = arith.constant 0 : index
    %168 = vector.load %arg2[%c0_104, %c6, %c0_105, %c0_106] : memref<1x68x16x128xf32, #tpu.memory_space<vmem>>, vector<1x1x16x128xf32>
    %169 = vector.shape_cast %168 : vector<1x1x16x128xf32> to vector<16x128xf32>
    %170 = arith.maximumf %167, %169 : vector<16x128xf32>
    %c0_107 = arith.constant 0 : index
    %c7 = arith.constant 7 : index
    %c0_108 = arith.constant 0 : index
    %c0_109 = arith.constant 0 : index
    %171 = vector.load %arg2[%c0_107, %c7, %c0_108, %c0_109] : memref<1x68x16x128xf32, #tpu.memory_space<vmem>>, vector<1x1x16x128xf32>
    %172 = vector.shape_cast %171 : vector<1x1x16x128xf32> to vector<16x128xf32>
    %173 = arith.maximumf %170, %172 : vector<16x128xf32>
    %c0_110 = arith.constant 0 : index
    %c8 = arith.constant 8 : index
    %c0_111 = arith.constant 0 : index
    %c0_112 = arith.constant 0 : index
    %174 = vector.load %arg2[%c0_110, %c8, %c0_111, %c0_112] : memref<1x68x16x128xf32, #tpu.memory_space<vmem>>, vector<1x1x16x128xf32>
    %175 = vector.shape_cast %174 : vector<1x1x16x128xf32> to vector<16x128xf32>
    %176 = arith.maximumf %173, %175 : vector<16x128xf32>
    %c0_113 = arith.constant 0 : index
    %c9 = arith.constant 9 : index
    %c0_114 = arith.constant 0 : index
    %c0_115 = arith.constant 0 : index
    %177 = vector.load %arg2[%c0_113, %c9, %c0_114, %c0_115] : memref<1x68x16x128xf32, #tpu.memory_space<vmem>>, vector<1x1x16x128xf32>
    %178 = vector.shape_cast %177 : vector<1x1x16x128xf32> to vector<16x128xf32>
    %179 = arith.maximumf %176, %178 : vector<16x128xf32>
    %c0_116 = arith.constant 0 : index
    %c10 = arith.constant 10 : index
    %c0_117 = arith.constant 0 : index
    %c0_118 = arith.constant 0 : index
    %180 = vector.load %arg2[%c0_116, %c10, %c0_117, %c0_118] : memref<1x68x16x128xf32, #tpu.memory_space<vmem>>, vector<1x1x16x128xf32>
    %181 = vector.shape_cast %180 : vector<1x1x16x128xf32> to vector<16x128xf32>
    %182 = arith.maximumf %179, %181 : vector<16x128xf32>
    %c0_119 = arith.constant 0 : index
    %c11 = arith.constant 11 : index
    %c0_120 = arith.constant 0 : index
    %c0_121 = arith.constant 0 : index
    %183 = vector.load %arg2[%c0_119, %c11, %c0_120, %c0_121] : memref<1x68x16x128xf32, #tpu.memory_space<vmem>>, vector<1x1x16x128xf32>
    %184 = vector.shape_cast %183 : vector<1x1x16x128xf32> to vector<16x128xf32>
    %185 = arith.maximumf %182, %184 : vector<16x128xf32>
    %c0_122 = arith.constant 0 : index
    %c12 = arith.constant 12 : index
    %c0_123 = arith.constant 0 : index
    %c0_124 = arith.constant 0 : index
    %186 = vector.load %arg2[%c0_122, %c12, %c0_123, %c0_124] : memref<1x68x16x128xf32, #tpu.memory_space<vmem>>, vector<1x1x16x128xf32>
    %187 = vector.shape_cast %186 : vector<1x1x16x128xf32> to vector<16x128xf32>
    %188 = arith.maximumf %185, %187 : vector<16x128xf32>
    %c0_125 = arith.constant 0 : index
    %c13 = arith.constant 13 : index
    %c0_126 = arith.constant 0 : index
    %c0_127 = arith.constant 0 : index
    %189 = vector.load %arg2[%c0_125, %c13, %c0_126, %c0_127] : memref<1x68x16x128xf32, #tpu.memory_space<vmem>>, vector<1x1x16x128xf32>
    %190 = vector.shape_cast %189 : vector<1x1x16x128xf32> to vector<16x128xf32>
    %191 = arith.maximumf %188, %190 : vector<16x128xf32>
    %c0_128 = arith.constant 0 : index
    %c14 = arith.constant 14 : index
    %c0_129 = arith.constant 0 : index
    %c0_130 = arith.constant 0 : index
    %192 = vector.load %arg2[%c0_128, %c14, %c0_129, %c0_130] : memref<1x68x16x128xf32, #tpu.memory_space<vmem>>, vector<1x1x16x128xf32>
    %193 = vector.shape_cast %192 : vector<1x1x16x128xf32> to vector<16x128xf32>
    %194 = arith.maximumf %191, %193 : vector<16x128xf32>
    %c0_131 = arith.constant 0 : index
    %c15 = arith.constant 15 : index
    %c0_132 = arith.constant 0 : index
    %c0_133 = arith.constant 0 : index
    %195 = vector.load %arg2[%c0_131, %c15, %c0_132, %c0_133] : memref<1x68x16x128xf32, #tpu.memory_space<vmem>>, vector<1x1x16x128xf32>
    %196 = vector.shape_cast %195 : vector<1x1x16x128xf32> to vector<16x128xf32>
    %197 = arith.maximumf %194, %196 : vector<16x128xf32>
    %c0_134 = arith.constant 0 : index
    %c16 = arith.constant 16 : index
    %c0_135 = arith.constant 0 : index
    %c0_136 = arith.constant 0 : index
    %198 = vector.load %arg2[%c0_134, %c16, %c0_135, %c0_136] : memref<1x68x16x128xf32, #tpu.memory_space<vmem>>, vector<1x1x16x128xf32>
    %199 = vector.shape_cast %198 : vector<1x1x16x128xf32> to vector<16x128xf32>
    %200 = arith.maximumf %197, %199 : vector<16x128xf32>
    %c0_137 = arith.constant 0 : index
    %c0_138 = arith.constant 0 : index
    %c0_139 = arith.constant 0 : index
    %c0_140 = arith.constant 0 : index
    %201 = vector.load %arg2[%c0_137, %c0_138, %c0_139, %c0_140] : memref<1x68x16x128xf32, #tpu.memory_space<vmem>>, vector<1x1x16x128xf32>
    %202 = vector.shape_cast %201 : vector<1x1x16x128xf32> to vector<16x128xf32>
    %203 = arith.subf %202, %200 : vector<16x128xf32>
    %204 = math.exp %203 : vector<16x128xf32>
    %cst_141 = arith.constant 0.000000e+00 : f32
    %205 = vector.broadcast %cst_141 : f32 to vector<16x128xf32>
    %206 = arith.subf %150, %205 : vector<16x128xf32>
    %207 = math.absf %206 : vector<16x128xf32>
    %cst_142 = arith.constant 1.000000e+00 : f32
    %208 = vector.broadcast %cst_142 : f32 to vector<16x128xf32>
    %209 = arith.subf %208, %207 : vector<16x128xf32>
    %cst_143 = arith.constant 0.000000e+00 : f32
    %210 = vector.broadcast %cst_143 : f32 to vector<16x128xf32>
    %211 = arith.maximumf %210, %209 : vector<16x128xf32>
    %212 = arith.mulf %202, %211 : vector<16x128xf32>
    %c0_144 = arith.constant 0 : index
    %c1_145 = arith.constant 1 : index
    %c0_146 = arith.constant 0 : index
    %c0_147 = arith.constant 0 : index
    %213 = vector.load %arg2[%c0_144, %c1_145, %c0_146, %c0_147] : memref<1x68x16x128xf32, #tpu.memory_space<vmem>>, vector<1x1x16x128xf32>
    %214 = vector.shape_cast %213 : vector<1x1x16x128xf32> to vector<16x128xf32>
    %215 = arith.subf %214, %200 : vector<16x128xf32>
    %216 = math.exp %215 : vector<16x128xf32>
    %217 = arith.addf %204, %216 : vector<16x128xf32>
    %cst_148 = arith.constant 1.000000e+00 : f32
    %218 = vector.broadcast %cst_148 : f32 to vector<16x128xf32>
    %219 = arith.subf %150, %218 : vector<16x128xf32>
    %220 = math.absf %219 : vector<16x128xf32>
    %cst_149 = arith.constant 1.000000e+00 : f32
    %221 = vector.broadcast %cst_149 : f32 to vector<16x128xf32>
    %222 = arith.subf %221, %220 : vector<16x128xf32>
    %cst_150 = arith.constant 0.000000e+00 : f32
    %223 = vector.broadcast %cst_150 : f32 to vector<16x128xf32>
    %224 = arith.maximumf %223, %222 : vector<16x128xf32>
    %225 = arith.mulf %214, %224 : vector<16x128xf32>
    %226 = arith.addf %212, %225 : vector<16x128xf32>
    %c0_151 = arith.constant 0 : index
    %c2_152 = arith.constant 2 : index
    %c0_153 = arith.constant 0 : index
    %c0_154 = arith.constant 0 : index
    %227 = vector.load %arg2[%c0_151, %c2_152, %c0_153, %c0_154] : memref<1x68x16x128xf32, #tpu.memory_space<vmem>>, vector<1x1x16x128xf32>
    %228 = vector.shape_cast %227 : vector<1x1x16x128xf32> to vector<16x128xf32>
    %229 = arith.subf %228, %200 : vector<16x128xf32>
    %230 = math.exp %229 : vector<16x128xf32>
    %231 = arith.addf %217, %230 : vector<16x128xf32>
    %cst_155 = arith.constant 2.000000e+00 : f32
    %232 = vector.broadcast %cst_155 : f32 to vector<16x128xf32>
    %233 = arith.subf %150, %232 : vector<16x128xf32>
    %234 = math.absf %233 : vector<16x128xf32>
    %cst_156 = arith.constant 1.000000e+00 : f32
    %235 = vector.broadcast %cst_156 : f32 to vector<16x128xf32>
    %236 = arith.subf %235, %234 : vector<16x128xf32>
    %cst_157 = arith.constant 0.000000e+00 : f32
    %237 = vector.broadcast %cst_157 : f32 to vector<16x128xf32>
    %238 = arith.maximumf %237, %236 : vector<16x128xf32>
    %239 = arith.mulf %228, %238 : vector<16x128xf32>
    %240 = arith.addf %226, %239 : vector<16x128xf32>
    %c0_158 = arith.constant 0 : index
    %c3_159 = arith.constant 3 : index
    %c0_160 = arith.constant 0 : index
    %c0_161 = arith.constant 0 : index
    %241 = vector.load %arg2[%c0_158, %c3_159, %c0_160, %c0_161] : memref<1x68x16x128xf32, #tpu.memory_space<vmem>>, vector<1x1x16x128xf32>
    %242 = vector.shape_cast %241 : vector<1x1x16x128xf32> to vector<16x128xf32>
    %243 = arith.subf %242, %200 : vector<16x128xf32>
    %244 = math.exp %243 : vector<16x128xf32>
    %245 = arith.addf %231, %244 : vector<16x128xf32>
    %cst_162 = arith.constant 3.000000e+00 : f32
    %246 = vector.broadcast %cst_162 : f32 to vector<16x128xf32>
    %247 = arith.subf %150, %246 : vector<16x128xf32>
    %248 = math.absf %247 : vector<16x128xf32>
    %cst_163 = arith.constant 1.000000e+00 : f32
    %249 = vector.broadcast %cst_163 : f32 to vector<16x128xf32>
    %250 = arith.subf %249, %248 : vector<16x128xf32>
    %cst_164 = arith.constant 0.000000e+00 : f32
    %251 = vector.broadcast %cst_164 : f32 to vector<16x128xf32>
    %252 = arith.maximumf %251, %250 : vector<16x128xf32>
    %253 = arith.mulf %242, %252 : vector<16x128xf32>
    %254 = arith.addf %240, %253 : vector<16x128xf32>
    %c0_165 = arith.constant 0 : index
    %c4_166 = arith.constant 4 : index
    %c0_167 = arith.constant 0 : index
    %c0_168 = arith.constant 0 : index
    %255 = vector.load %arg2[%c0_165, %c4_166, %c0_167, %c0_168] : memref<1x68x16x128xf32, #tpu.memory_space<vmem>>, vector<1x1x16x128xf32>
    %256 = vector.shape_cast %255 : vector<1x1x16x128xf32> to vector<16x128xf32>
    %257 = arith.subf %256, %200 : vector<16x128xf32>
    %258 = math.exp %257 : vector<16x128xf32>
    %259 = arith.addf %245, %258 : vector<16x128xf32>
    %cst_169 = arith.constant 4.000000e+00 : f32
    %260 = vector.broadcast %cst_169 : f32 to vector<16x128xf32>
    %261 = arith.subf %150, %260 : vector<16x128xf32>
    %262 = math.absf %261 : vector<16x128xf32>
    %cst_170 = arith.constant 1.000000e+00 : f32
    %263 = vector.broadcast %cst_170 : f32 to vector<16x128xf32>
    %264 = arith.subf %263, %262 : vector<16x128xf32>
    %cst_171 = arith.constant 0.000000e+00 : f32
    %265 = vector.broadcast %cst_171 : f32 to vector<16x128xf32>
    %266 = arith.maximumf %265, %264 : vector<16x128xf32>
    %267 = arith.mulf %256, %266 : vector<16x128xf32>
    %268 = arith.addf %254, %267 : vector<16x128xf32>
    %c0_172 = arith.constant 0 : index
    %c5_173 = arith.constant 5 : index
    %c0_174 = arith.constant 0 : index
    %c0_175 = arith.constant 0 : index
    %269 = vector.load %arg2[%c0_172, %c5_173, %c0_174, %c0_175] : memref<1x68x16x128xf32, #tpu.memory_space<vmem>>, vector<1x1x16x128xf32>
    %270 = vector.shape_cast %269 : vector<1x1x16x128xf32> to vector<16x128xf32>
    %271 = arith.subf %270, %200 : vector<16x128xf32>
    %272 = math.exp %271 : vector<16x128xf32>
    %273 = arith.addf %259, %272 : vector<16x128xf32>
    %cst_176 = arith.constant 5.000000e+00 : f32
    %274 = vector.broadcast %cst_176 : f32 to vector<16x128xf32>
    %275 = arith.subf %150, %274 : vector<16x128xf32>
    %276 = math.absf %275 : vector<16x128xf32>
    %cst_177 = arith.constant 1.000000e+00 : f32
    %277 = vector.broadcast %cst_177 : f32 to vector<16x128xf32>
    %278 = arith.subf %277, %276 : vector<16x128xf32>
    %cst_178 = arith.constant 0.000000e+00 : f32
    %279 = vector.broadcast %cst_178 : f32 to vector<16x128xf32>
    %280 = arith.maximumf %279, %278 : vector<16x128xf32>
    %281 = arith.mulf %270, %280 : vector<16x128xf32>
    %282 = arith.addf %268, %281 : vector<16x128xf32>
    %c0_179 = arith.constant 0 : index
    %c6_180 = arith.constant 6 : index
    %c0_181 = arith.constant 0 : index
    %c0_182 = arith.constant 0 : index
    %283 = vector.load %arg2[%c0_179, %c6_180, %c0_181, %c0_182] : memref<1x68x16x128xf32, #tpu.memory_space<vmem>>, vector<1x1x16x128xf32>
    %284 = vector.shape_cast %283 : vector<1x1x16x128xf32> to vector<16x128xf32>
    %285 = arith.subf %284, %200 : vector<16x128xf32>
    %286 = math.exp %285 : vector<16x128xf32>
    %287 = arith.addf %273, %286 : vector<16x128xf32>
    %cst_183 = arith.constant 6.000000e+00 : f32
    %288 = vector.broadcast %cst_183 : f32 to vector<16x128xf32>
    %289 = arith.subf %150, %288 : vector<16x128xf32>
    %290 = math.absf %289 : vector<16x128xf32>
    %cst_184 = arith.constant 1.000000e+00 : f32
    %291 = vector.broadcast %cst_184 : f32 to vector<16x128xf32>
    %292 = arith.subf %291, %290 : vector<16x128xf32>
    %cst_185 = arith.constant 0.000000e+00 : f32
    %293 = vector.broadcast %cst_185 : f32 to vector<16x128xf32>
    %294 = arith.maximumf %293, %292 : vector<16x128xf32>
    %295 = arith.mulf %284, %294 : vector<16x128xf32>
    %296 = arith.addf %282, %295 : vector<16x128xf32>
    %c0_186 = arith.constant 0 : index
    %c7_187 = arith.constant 7 : index
    %c0_188 = arith.constant 0 : index
    %c0_189 = arith.constant 0 : index
    %297 = vector.load %arg2[%c0_186, %c7_187, %c0_188, %c0_189] : memref<1x68x16x128xf32, #tpu.memory_space<vmem>>, vector<1x1x16x128xf32>
    %298 = vector.shape_cast %297 : vector<1x1x16x128xf32> to vector<16x128xf32>
    %299 = arith.subf %298, %200 : vector<16x128xf32>
    %300 = math.exp %299 : vector<16x128xf32>
    %301 = arith.addf %287, %300 : vector<16x128xf32>
    %cst_190 = arith.constant 7.000000e+00 : f32
    %302 = vector.broadcast %cst_190 : f32 to vector<16x128xf32>
    %303 = arith.subf %150, %302 : vector<16x128xf32>
    %304 = math.absf %303 : vector<16x128xf32>
    %cst_191 = arith.constant 1.000000e+00 : f32
    %305 = vector.broadcast %cst_191 : f32 to vector<16x128xf32>
    %306 = arith.subf %305, %304 : vector<16x128xf32>
    %cst_192 = arith.constant 0.000000e+00 : f32
    %307 = vector.broadcast %cst_192 : f32 to vector<16x128xf32>
    %308 = arith.maximumf %307, %306 : vector<16x128xf32>
    %309 = arith.mulf %298, %308 : vector<16x128xf32>
    %310 = arith.addf %296, %309 : vector<16x128xf32>
    %c0_193 = arith.constant 0 : index
    %c8_194 = arith.constant 8 : index
    %c0_195 = arith.constant 0 : index
    %c0_196 = arith.constant 0 : index
    %311 = vector.load %arg2[%c0_193, %c8_194, %c0_195, %c0_196] : memref<1x68x16x128xf32, #tpu.memory_space<vmem>>, vector<1x1x16x128xf32>
    %312 = vector.shape_cast %311 : vector<1x1x16x128xf32> to vector<16x128xf32>
    %313 = arith.subf %312, %200 : vector<16x128xf32>
    %314 = math.exp %313 : vector<16x128xf32>
    %315 = arith.addf %301, %314 : vector<16x128xf32>
    %cst_197 = arith.constant 8.000000e+00 : f32
    %316 = vector.broadcast %cst_197 : f32 to vector<16x128xf32>
    %317 = arith.subf %150, %316 : vector<16x128xf32>
    %318 = math.absf %317 : vector<16x128xf32>
    %cst_198 = arith.constant 1.000000e+00 : f32
    %319 = vector.broadcast %cst_198 : f32 to vector<16x128xf32>
    %320 = arith.subf %319, %318 : vector<16x128xf32>
    %cst_199 = arith.constant 0.000000e+00 : f32
    %321 = vector.broadcast %cst_199 : f32 to vector<16x128xf32>
    %322 = arith.maximumf %321, %320 : vector<16x128xf32>
    %323 = arith.mulf %312, %322 : vector<16x128xf32>
    %324 = arith.addf %310, %323 : vector<16x128xf32>
    %c0_200 = arith.constant 0 : index
    %c9_201 = arith.constant 9 : index
    %c0_202 = arith.constant 0 : index
    %c0_203 = arith.constant 0 : index
    %325 = vector.load %arg2[%c0_200, %c9_201, %c0_202, %c0_203] : memref<1x68x16x128xf32, #tpu.memory_space<vmem>>, vector<1x1x16x128xf32>
    %326 = vector.shape_cast %325 : vector<1x1x16x128xf32> to vector<16x128xf32>
    %327 = arith.subf %326, %200 : vector<16x128xf32>
    %328 = math.exp %327 : vector<16x128xf32>
    %329 = arith.addf %315, %328 : vector<16x128xf32>
    %cst_204 = arith.constant 9.000000e+00 : f32
    %330 = vector.broadcast %cst_204 : f32 to vector<16x128xf32>
    %331 = arith.subf %150, %330 : vector<16x128xf32>
    %332 = math.absf %331 : vector<16x128xf32>
    %cst_205 = arith.constant 1.000000e+00 : f32
    %333 = vector.broadcast %cst_205 : f32 to vector<16x128xf32>
    %334 = arith.subf %333, %332 : vector<16x128xf32>
    %cst_206 = arith.constant 0.000000e+00 : f32
    %335 = vector.broadcast %cst_206 : f32 to vector<16x128xf32>
    %336 = arith.maximumf %335, %334 : vector<16x128xf32>
    %337 = arith.mulf %326, %336 : vector<16x128xf32>
    %338 = arith.addf %324, %337 : vector<16x128xf32>
    %c0_207 = arith.constant 0 : index
    %c10_208 = arith.constant 10 : index
    %c0_209 = arith.constant 0 : index
    %c0_210 = arith.constant 0 : index
    %339 = vector.load %arg2[%c0_207, %c10_208, %c0_209, %c0_210] : memref<1x68x16x128xf32, #tpu.memory_space<vmem>>, vector<1x1x16x128xf32>
    %340 = vector.shape_cast %339 : vector<1x1x16x128xf32> to vector<16x128xf32>
    %341 = arith.subf %340, %200 : vector<16x128xf32>
    %342 = math.exp %341 : vector<16x128xf32>
    %343 = arith.addf %329, %342 : vector<16x128xf32>
    %cst_211 = arith.constant 1.000000e+01 : f32
    %344 = vector.broadcast %cst_211 : f32 to vector<16x128xf32>
    %345 = arith.subf %150, %344 : vector<16x128xf32>
    %346 = math.absf %345 : vector<16x128xf32>
    %cst_212 = arith.constant 1.000000e+00 : f32
    %347 = vector.broadcast %cst_212 : f32 to vector<16x128xf32>
    %348 = arith.subf %347, %346 : vector<16x128xf32>
    %cst_213 = arith.constant 0.000000e+00 : f32
    %349 = vector.broadcast %cst_213 : f32 to vector<16x128xf32>
    %350 = arith.maximumf %349, %348 : vector<16x128xf32>
    %351 = arith.mulf %340, %350 : vector<16x128xf32>
    %352 = arith.addf %338, %351 : vector<16x128xf32>
    %c0_214 = arith.constant 0 : index
    %c11_215 = arith.constant 11 : index
    %c0_216 = arith.constant 0 : index
    %c0_217 = arith.constant 0 : index
    %353 = vector.load %arg2[%c0_214, %c11_215, %c0_216, %c0_217] : memref<1x68x16x128xf32, #tpu.memory_space<vmem>>, vector<1x1x16x128xf32>
    %354 = vector.shape_cast %353 : vector<1x1x16x128xf32> to vector<16x128xf32>
    %355 = arith.subf %354, %200 : vector<16x128xf32>
    %356 = math.exp %355 : vector<16x128xf32>
    %357 = arith.addf %343, %356 : vector<16x128xf32>
    %cst_218 = arith.constant 1.100000e+01 : f32
    %358 = vector.broadcast %cst_218 : f32 to vector<16x128xf32>
    %359 = arith.subf %150, %358 : vector<16x128xf32>
    %360 = math.absf %359 : vector<16x128xf32>
    %cst_219 = arith.constant 1.000000e+00 : f32
    %361 = vector.broadcast %cst_219 : f32 to vector<16x128xf32>
    %362 = arith.subf %361, %360 : vector<16x128xf32>
    %cst_220 = arith.constant 0.000000e+00 : f32
    %363 = vector.broadcast %cst_220 : f32 to vector<16x128xf32>
    %364 = arith.maximumf %363, %362 : vector<16x128xf32>
    %365 = arith.mulf %354, %364 : vector<16x128xf32>
    %366 = arith.addf %352, %365 : vector<16x128xf32>
    %c0_221 = arith.constant 0 : index
    %c12_222 = arith.constant 12 : index
    %c0_223 = arith.constant 0 : index
    %c0_224 = arith.constant 0 : index
    %367 = vector.load %arg2[%c0_221, %c12_222, %c0_223, %c0_224] : memref<1x68x16x128xf32, #tpu.memory_space<vmem>>, vector<1x1x16x128xf32>
    %368 = vector.shape_cast %367 : vector<1x1x16x128xf32> to vector<16x128xf32>
    %369 = arith.subf %368, %200 : vector<16x128xf32>
    %370 = math.exp %369 : vector<16x128xf32>
    %371 = arith.addf %357, %370 : vector<16x128xf32>
    %cst_225 = arith.constant 1.200000e+01 : f32
    %372 = vector.broadcast %cst_225 : f32 to vector<16x128xf32>
    %373 = arith.subf %150, %372 : vector<16x128xf32>
    %374 = math.absf %373 : vector<16x128xf32>
    %cst_226 = arith.constant 1.000000e+00 : f32
    %375 = vector.broadcast %cst_226 : f32 to vector<16x128xf32>
    %376 = arith.subf %375, %374 : vector<16x128xf32>
    %cst_227 = arith.constant 0.000000e+00 : f32
    %377 = vector.broadcast %cst_227 : f32 to vector<16x128xf32>
    %378 = arith.maximumf %377, %376 : vector<16x128xf32>
    %379 = arith.mulf %368, %378 : vector<16x128xf32>
    %380 = arith.addf %366, %379 : vector<16x128xf32>
    %c0_228 = arith.constant 0 : index
    %c13_229 = arith.constant 13 : index
    %c0_230 = arith.constant 0 : index
    %c0_231 = arith.constant 0 : index
    %381 = vector.load %arg2[%c0_228, %c13_229, %c0_230, %c0_231] : memref<1x68x16x128xf32, #tpu.memory_space<vmem>>, vector<1x1x16x128xf32>
    %382 = vector.shape_cast %381 : vector<1x1x16x128xf32> to vector<16x128xf32>
    %383 = arith.subf %382, %200 : vector<16x128xf32>
    %384 = math.exp %383 : vector<16x128xf32>
    %385 = arith.addf %371, %384 : vector<16x128xf32>
    %cst_232 = arith.constant 1.300000e+01 : f32
    %386 = vector.broadcast %cst_232 : f32 to vector<16x128xf32>
    %387 = arith.subf %150, %386 : vector<16x128xf32>
    %388 = math.absf %387 : vector<16x128xf32>
    %cst_233 = arith.constant 1.000000e+00 : f32
    %389 = vector.broadcast %cst_233 : f32 to vector<16x128xf32>
    %390 = arith.subf %389, %388 : vector<16x128xf32>
    %cst_234 = arith.constant 0.000000e+00 : f32
    %391 = vector.broadcast %cst_234 : f32 to vector<16x128xf32>
    %392 = arith.maximumf %391, %390 : vector<16x128xf32>
    %393 = arith.mulf %382, %392 : vector<16x128xf32>
    %394 = arith.addf %380, %393 : vector<16x128xf32>
    %c0_235 = arith.constant 0 : index
    %c14_236 = arith.constant 14 : index
    %c0_237 = arith.constant 0 : index
    %c0_238 = arith.constant 0 : index
    %395 = vector.load %arg2[%c0_235, %c14_236, %c0_237, %c0_238] : memref<1x68x16x128xf32, #tpu.memory_space<vmem>>, vector<1x1x16x128xf32>
    %396 = vector.shape_cast %395 : vector<1x1x16x128xf32> to vector<16x128xf32>
    %397 = arith.subf %396, %200 : vector<16x128xf32>
    %398 = math.exp %397 : vector<16x128xf32>
    %399 = arith.addf %385, %398 : vector<16x128xf32>
    %cst_239 = arith.constant 1.400000e+01 : f32
    %400 = vector.broadcast %cst_239 : f32 to vector<16x128xf32>
    %401 = arith.subf %150, %400 : vector<16x128xf32>
    %402 = math.absf %401 : vector<16x128xf32>
    %cst_240 = arith.constant 1.000000e+00 : f32
    %403 = vector.broadcast %cst_240 : f32 to vector<16x128xf32>
    %404 = arith.subf %403, %402 : vector<16x128xf32>
    %cst_241 = arith.constant 0.000000e+00 : f32
    %405 = vector.broadcast %cst_241 : f32 to vector<16x128xf32>
    %406 = arith.maximumf %405, %404 : vector<16x128xf32>
    %407 = arith.mulf %396, %406 : vector<16x128xf32>
    %408 = arith.addf %394, %407 : vector<16x128xf32>
    %c0_242 = arith.constant 0 : index
    %c15_243 = arith.constant 15 : index
    %c0_244 = arith.constant 0 : index
    %c0_245 = arith.constant 0 : index
    %409 = vector.load %arg2[%c0_242, %c15_243, %c0_244, %c0_245] : memref<1x68x16x128xf32, #tpu.memory_space<vmem>>, vector<1x1x16x128xf32>
    %410 = vector.shape_cast %409 : vector<1x1x16x128xf32> to vector<16x128xf32>
    %411 = arith.subf %410, %200 : vector<16x128xf32>
    %412 = math.exp %411 : vector<16x128xf32>
    %413 = arith.addf %399, %412 : vector<16x128xf32>
    %cst_246 = arith.constant 1.500000e+01 : f32
    %414 = vector.broadcast %cst_246 : f32 to vector<16x128xf32>
    %415 = arith.subf %150, %414 : vector<16x128xf32>
    %416 = math.absf %415 : vector<16x128xf32>
    %cst_247 = arith.constant 1.000000e+00 : f32
    %417 = vector.broadcast %cst_247 : f32 to vector<16x128xf32>
    %418 = arith.subf %417, %416 : vector<16x128xf32>
    %cst_248 = arith.constant 0.000000e+00 : f32
    %419 = vector.broadcast %cst_248 : f32 to vector<16x128xf32>
    %420 = arith.maximumf %419, %418 : vector<16x128xf32>
    %421 = arith.mulf %410, %420 : vector<16x128xf32>
    %422 = arith.addf %408, %421 : vector<16x128xf32>
    %c0_249 = arith.constant 0 : index
    %c16_250 = arith.constant 16 : index
    %c0_251 = arith.constant 0 : index
    %c0_252 = arith.constant 0 : index
    %423 = vector.load %arg2[%c0_249, %c16_250, %c0_251, %c0_252] : memref<1x68x16x128xf32, #tpu.memory_space<vmem>>, vector<1x1x16x128xf32>
    %424 = vector.shape_cast %423 : vector<1x1x16x128xf32> to vector<16x128xf32>
    %425 = arith.subf %424, %200 : vector<16x128xf32>
    %426 = math.exp %425 : vector<16x128xf32>
    %427 = arith.addf %413, %426 : vector<16x128xf32>
    %cst_253 = arith.constant 1.600000e+01 : f32
    %428 = vector.broadcast %cst_253 : f32 to vector<16x128xf32>
    %429 = arith.subf %150, %428 : vector<16x128xf32>
    %430 = math.absf %429 : vector<16x128xf32>
    %cst_254 = arith.constant 1.000000e+00 : f32
    %431 = vector.broadcast %cst_254 : f32 to vector<16x128xf32>
    %432 = arith.subf %431, %430 : vector<16x128xf32>
    %cst_255 = arith.constant 0.000000e+00 : f32
    %433 = vector.broadcast %cst_255 : f32 to vector<16x128xf32>
    %434 = arith.maximumf %433, %432 : vector<16x128xf32>
    %435 = arith.mulf %424, %434 : vector<16x128xf32>
    %436 = arith.addf %422, %435 : vector<16x128xf32>
    %437 = math.log %427 : vector<16x128xf32>
    %438 = arith.addf %200, %437 : vector<16x128xf32>
    %439 = arith.subf %438, %436 : vector<16x128xf32>
    %cst_256 = arith.constant 0.000000e+00 : f32
    %cst_257 = arith.constant 1.599000e+01 : f32
    %440 = vector.broadcast %cst_256 : f32 to vector<16x128xf32>
    %441 = arith.maximumf %440, %142 : vector<16x128xf32>
    %442 = vector.broadcast %cst_257 : f32 to vector<16x128xf32>
    %443 = arith.minimumf %442, %441 : vector<16x128xf32>
    %c0_258 = arith.constant 0 : index
    %c17 = arith.constant 17 : index
    %c0_259 = arith.constant 0 : index
    %c0_260 = arith.constant 0 : index
    %444 = vector.load %arg2[%c0_258, %c17, %c0_259, %c0_260] : memref<1x68x16x128xf32, #tpu.memory_space<vmem>>, vector<1x1x16x128xf32>
    %445 = vector.shape_cast %444 : vector<1x1x16x128xf32> to vector<16x128xf32>
    %c0_261 = arith.constant 0 : index
    %c18 = arith.constant 18 : index
    %c0_262 = arith.constant 0 : index
    %c0_263 = arith.constant 0 : index
    %446 = vector.load %arg2[%c0_261, %c18, %c0_262, %c0_263] : memref<1x68x16x128xf32, #tpu.memory_space<vmem>>, vector<1x1x16x128xf32>
    %447 = vector.shape_cast %446 : vector<1x1x16x128xf32> to vector<16x128xf32>
    %448 = arith.maximumf %445, %447 : vector<16x128xf32>
    %c0_264 = arith.constant 0 : index
    %c19 = arith.constant 19 : index
    %c0_265 = arith.constant 0 : index
    %c0_266 = arith.constant 0 : index
    %449 = vector.load %arg2[%c0_264, %c19, %c0_265, %c0_266] : memref<1x68x16x128xf32, #tpu.memory_space<vmem>>, vector<1x1x16x128xf32>
    %450 = vector.shape_cast %449 : vector<1x1x16x128xf32> to vector<16x128xf32>
    %451 = arith.maximumf %448, %450 : vector<16x128xf32>
    %c0_267 = arith.constant 0 : index
    %c20 = arith.constant 20 : index
    %c0_268 = arith.constant 0 : index
    %c0_269 = arith.constant 0 : index
    %452 = vector.load %arg2[%c0_267, %c20, %c0_268, %c0_269] : memref<1x68x16x128xf32, #tpu.memory_space<vmem>>, vector<1x1x16x128xf32>
    %453 = vector.shape_cast %452 : vector<1x1x16x128xf32> to vector<16x128xf32>
    %454 = arith.maximumf %451, %453 : vector<16x128xf32>
    %c0_270 = arith.constant 0 : index
    %c21 = arith.constant 21 : index
    %c0_271 = arith.constant 0 : index
    %c0_272 = arith.constant 0 : index
    %455 = vector.load %arg2[%c0_270, %c21, %c0_271, %c0_272] : memref<1x68x16x128xf32, #tpu.memory_space<vmem>>, vector<1x1x16x128xf32>
    %456 = vector.shape_cast %455 : vector<1x1x16x128xf32> to vector<16x128xf32>
    %457 = arith.maximumf %454, %456 : vector<16x128xf32>
    %c0_273 = arith.constant 0 : index
    %c22 = arith.constant 22 : index
    %c0_274 = arith.constant 0 : index
    %c0_275 = arith.constant 0 : index
    %458 = vector.load %arg2[%c0_273, %c22, %c0_274, %c0_275] : memref<1x68x16x128xf32, #tpu.memory_space<vmem>>, vector<1x1x16x128xf32>
    %459 = vector.shape_cast %458 : vector<1x1x16x128xf32> to vector<16x128xf32>
    %460 = arith.maximumf %457, %459 : vector<16x128xf32>
    %c0_276 = arith.constant 0 : index
    %c23 = arith.constant 23 : index
    %c0_277 = arith.constant 0 : index
    %c0_278 = arith.constant 0 : index
    %461 = vector.load %arg2[%c0_276, %c23, %c0_277, %c0_278] : memref<1x68x16x128xf32, #tpu.memory_space<vmem>>, vector<1x1x16x128xf32>
    %462 = vector.shape_cast %461 : vector<1x1x16x128xf32> to vector<16x128xf32>
    %463 = arith.maximumf %460, %462 : vector<16x128xf32>
    %c0_279 = arith.constant 0 : index
    %c24 = arith.constant 24 : index
    %c0_280 = arith.constant 0 : index
    %c0_281 = arith.constant 0 : index
    %464 = vector.load %arg2[%c0_279, %c24, %c0_280, %c0_281] : memref<1x68x16x128xf32, #tpu.memory_space<vmem>>, vector<1x1x16x128xf32>
    %465 = vector.shape_cast %464 : vector<1x1x16x128xf32> to vector<16x128xf32>
    %466 = arith.maximumf %463, %465 : vector<16x128xf32>
    %c0_282 = arith.constant 0 : index
    %c25 = arith.constant 25 : index
    %c0_283 = arith.constant 0 : index
    %c0_284 = arith.constant 0 : index
    %467 = vector.load %arg2[%c0_282, %c25, %c0_283, %c0_284] : memref<1x68x16x128xf32, #tpu.memory_space<vmem>>, vector<1x1x16x128xf32>
    %468 = vector.shape_cast %467 : vector<1x1x16x128xf32> to vector<16x128xf32>
    %469 = arith.maximumf %466, %468 : vector<16x128xf32>
    %c0_285 = arith.constant 0 : index
    %c26 = arith.constant 26 : index
    %c0_286 = arith.constant 0 : index
    %c0_287 = arith.constant 0 : index
    %470 = vector.load %arg2[%c0_285, %c26, %c0_286, %c0_287] : memref<1x68x16x128xf32, #tpu.memory_space<vmem>>, vector<1x1x16x128xf32>
    %471 = vector.shape_cast %470 : vector<1x1x16x128xf32> to vector<16x128xf32>
    %472 = arith.maximumf %469, %471 : vector<16x128xf32>
    %c0_288 = arith.constant 0 : index
    %c27 = arith.constant 27 : index
    %c0_289 = arith.constant 0 : index
    %c0_290 = arith.constant 0 : index
    %473 = vector.load %arg2[%c0_288, %c27, %c0_289, %c0_290] : memref<1x68x16x128xf32, #tpu.memory_space<vmem>>, vector<1x1x16x128xf32>
    %474 = vector.shape_cast %473 : vector<1x1x16x128xf32> to vector<16x128xf32>
    %475 = arith.maximumf %472, %474 : vector<16x128xf32>
    %c0_291 = arith.constant 0 : index
    %c28 = arith.constant 28 : index
    %c0_292 = arith.constant 0 : index
    %c0_293 = arith.constant 0 : index
    %476 = vector.load %arg2[%c0_291, %c28, %c0_292, %c0_293] : memref<1x68x16x128xf32, #tpu.memory_space<vmem>>, vector<1x1x16x128xf32>
    %477 = vector.shape_cast %476 : vector<1x1x16x128xf32> to vector<16x128xf32>
    %478 = arith.maximumf %475, %477 : vector<16x128xf32>
    %c0_294 = arith.constant 0 : index
    %c29 = arith.constant 29 : index
    %c0_295 = arith.constant 0 : index
    %c0_296 = arith.constant 0 : index
    %479 = vector.load %arg2[%c0_294, %c29, %c0_295, %c0_296] : memref<1x68x16x128xf32, #tpu.memory_space<vmem>>, vector<1x1x16x128xf32>
    %480 = vector.shape_cast %479 : vector<1x1x16x128xf32> to vector<16x128xf32>
    %481 = arith.maximumf %478, %480 : vector<16x128xf32>
    %c0_297 = arith.constant 0 : index
    %c30 = arith.constant 30 : index
    %c0_298 = arith.constant 0 : index
    %c0_299 = arith.constant 0 : index
    %482 = vector.load %arg2[%c0_297, %c30, %c0_298, %c0_299] : memref<1x68x16x128xf32, #tpu.memory_space<vmem>>, vector<1x1x16x128xf32>
    %483 = vector.shape_cast %482 : vector<1x1x16x128xf32> to vector<16x128xf32>
    %484 = arith.maximumf %481, %483 : vector<16x128xf32>
    %c0_300 = arith.constant 0 : index
    %c31 = arith.constant 31 : index
    %c0_301 = arith.constant 0 : index
    %c0_302 = arith.constant 0 : index
    %485 = vector.load %arg2[%c0_300, %c31, %c0_301, %c0_302] : memref<1x68x16x128xf32, #tpu.memory_space<vmem>>, vector<1x1x16x128xf32>
    %486 = vector.shape_cast %485 : vector<1x1x16x128xf32> to vector<16x128xf32>
    %487 = arith.maximumf %484, %486 : vector<16x128xf32>
    %c0_303 = arith.constant 0 : index
    %c32 = arith.constant 32 : index
    %c0_304 = arith.constant 0 : index
    %c0_305 = arith.constant 0 : index
    %488 = vector.load %arg2[%c0_303, %c32, %c0_304, %c0_305] : memref<1x68x16x128xf32, #tpu.memory_space<vmem>>, vector<1x1x16x128xf32>
    %489 = vector.shape_cast %488 : vector<1x1x16x128xf32> to vector<16x128xf32>
    %490 = arith.maximumf %487, %489 : vector<16x128xf32>
    %c0_306 = arith.constant 0 : index
    %c33 = arith.constant 33 : index
    %c0_307 = arith.constant 0 : index
    %c0_308 = arith.constant 0 : index
    %491 = vector.load %arg2[%c0_306, %c33, %c0_307, %c0_308] : memref<1x68x16x128xf32, #tpu.memory_space<vmem>>, vector<1x1x16x128xf32>
    %492 = vector.shape_cast %491 : vector<1x1x16x128xf32> to vector<16x128xf32>
    %493 = arith.maximumf %490, %492 : vector<16x128xf32>
    %c0_309 = arith.constant 0 : index
    %c17_310 = arith.constant 17 : index
    %c0_311 = arith.constant 0 : index
    %c0_312 = arith.constant 0 : index
    %494 = vector.load %arg2[%c0_309, %c17_310, %c0_311, %c0_312] : memref<1x68x16x128xf32, #tpu.memory_space<vmem>>, vector<1x1x16x128xf32>
    %495 = vector.shape_cast %494 : vector<1x1x16x128xf32> to vector<16x128xf32>
    %496 = arith.subf %495, %493 : vector<16x128xf32>
    %497 = math.exp %496 : vector<16x128xf32>
    %cst_313 = arith.constant 0.000000e+00 : f32
    %498 = vector.broadcast %cst_313 : f32 to vector<16x128xf32>
    %499 = arith.subf %443, %498 : vector<16x128xf32>
    %500 = math.absf %499 : vector<16x128xf32>
    %cst_314 = arith.constant 1.000000e+00 : f32
    %501 = vector.broadcast %cst_314 : f32 to vector<16x128xf32>
    %502 = arith.subf %501, %500 : vector<16x128xf32>
    %cst_315 = arith.constant 0.000000e+00 : f32
    %503 = vector.broadcast %cst_315 : f32 to vector<16x128xf32>
    %504 = arith.maximumf %503, %502 : vector<16x128xf32>
    %505 = arith.mulf %495, %504 : vector<16x128xf32>
    %c0_316 = arith.constant 0 : index
    %c18_317 = arith.constant 18 : index
    %c0_318 = arith.constant 0 : index
    %c0_319 = arith.constant 0 : index
    %506 = vector.load %arg2[%c0_316, %c18_317, %c0_318, %c0_319] : memref<1x68x16x128xf32, #tpu.memory_space<vmem>>, vector<1x1x16x128xf32>
    %507 = vector.shape_cast %506 : vector<1x1x16x128xf32> to vector<16x128xf32>
    %508 = arith.subf %507, %493 : vector<16x128xf32>
    %509 = math.exp %508 : vector<16x128xf32>
    %510 = arith.addf %497, %509 : vector<16x128xf32>
    %cst_320 = arith.constant 1.000000e+00 : f32
    %511 = vector.broadcast %cst_320 : f32 to vector<16x128xf32>
    %512 = arith.subf %443, %511 : vector<16x128xf32>
    %513 = math.absf %512 : vector<16x128xf32>
    %cst_321 = arith.constant 1.000000e+00 : f32
    %514 = vector.broadcast %cst_321 : f32 to vector<16x128xf32>
    %515 = arith.subf %514, %513 : vector<16x128xf32>
    %cst_322 = arith.constant 0.000000e+00 : f32
    %516 = vector.broadcast %cst_322 : f32 to vector<16x128xf32>
    %517 = arith.maximumf %516, %515 : vector<16x128xf32>
    %518 = arith.mulf %507, %517 : vector<16x128xf32>
    %519 = arith.addf %505, %518 : vector<16x128xf32>
    %c0_323 = arith.constant 0 : index
    %c19_324 = arith.constant 19 : index
    %c0_325 = arith.constant 0 : index
    %c0_326 = arith.constant 0 : index
    %520 = vector.load %arg2[%c0_323, %c19_324, %c0_325, %c0_326] : memref<1x68x16x128xf32, #tpu.memory_space<vmem>>, vector<1x1x16x128xf32>
    %521 = vector.shape_cast %520 : vector<1x1x16x128xf32> to vector<16x128xf32>
    %522 = arith.subf %521, %493 : vector<16x128xf32>
    %523 = math.exp %522 : vector<16x128xf32>
    %524 = arith.addf %510, %523 : vector<16x128xf32>
    %cst_327 = arith.constant 2.000000e+00 : f32
    %525 = vector.broadcast %cst_327 : f32 to vector<16x128xf32>
    %526 = arith.subf %443, %525 : vector<16x128xf32>
    %527 = math.absf %526 : vector<16x128xf32>
    %cst_328 = arith.constant 1.000000e+00 : f32
    %528 = vector.broadcast %cst_328 : f32 to vector<16x128xf32>
    %529 = arith.subf %528, %527 : vector<16x128xf32>
    %cst_329 = arith.constant 0.000000e+00 : f32
    %530 = vector.broadcast %cst_329 : f32 to vector<16x128xf32>
    %531 = arith.maximumf %530, %529 : vector<16x128xf32>
    %532 = arith.mulf %521, %531 : vector<16x128xf32>
    %533 = arith.addf %519, %532 : vector<16x128xf32>
    %c0_330 = arith.constant 0 : index
    %c20_331 = arith.constant 20 : index
    %c0_332 = arith.constant 0 : index
    %c0_333 = arith.constant 0 : index
    %534 = vector.load %arg2[%c0_330, %c20_331, %c0_332, %c0_333] : memref<1x68x16x128xf32, #tpu.memory_space<vmem>>, vector<1x1x16x128xf32>
    %535 = vector.shape_cast %534 : vector<1x1x16x128xf32> to vector<16x128xf32>
    %536 = arith.subf %535, %493 : vector<16x128xf32>
    %537 = math.exp %536 : vector<16x128xf32>
    %538 = arith.addf %524, %537 : vector<16x128xf32>
    %cst_334 = arith.constant 3.000000e+00 : f32
    %539 = vector.broadcast %cst_334 : f32 to vector<16x128xf32>
    %540 = arith.subf %443, %539 : vector<16x128xf32>
    %541 = math.absf %540 : vector<16x128xf32>
    %cst_335 = arith.constant 1.000000e+00 : f32
    %542 = vector.broadcast %cst_335 : f32 to vector<16x128xf32>
    %543 = arith.subf %542, %541 : vector<16x128xf32>
    %cst_336 = arith.constant 0.000000e+00 : f32
    %544 = vector.broadcast %cst_336 : f32 to vector<16x128xf32>
    %545 = arith.maximumf %544, %543 : vector<16x128xf32>
    %546 = arith.mulf %535, %545 : vector<16x128xf32>
    %547 = arith.addf %533, %546 : vector<16x128xf32>
    %c0_337 = arith.constant 0 : index
    %c21_338 = arith.constant 21 : index
    %c0_339 = arith.constant 0 : index
    %c0_340 = arith.constant 0 : index
    %548 = vector.load %arg2[%c0_337, %c21_338, %c0_339, %c0_340] : memref<1x68x16x128xf32, #tpu.memory_space<vmem>>, vector<1x1x16x128xf32>
    %549 = vector.shape_cast %548 : vector<1x1x16x128xf32> to vector<16x128xf32>
    %550 = arith.subf %549, %493 : vector<16x128xf32>
    %551 = math.exp %550 : vector<16x128xf32>
    %552 = arith.addf %538, %551 : vector<16x128xf32>
    %cst_341 = arith.constant 4.000000e+00 : f32
    %553 = vector.broadcast %cst_341 : f32 to vector<16x128xf32>
    %554 = arith.subf %443, %553 : vector<16x128xf32>
    %555 = math.absf %554 : vector<16x128xf32>
    %cst_342 = arith.constant 1.000000e+00 : f32
    %556 = vector.broadcast %cst_342 : f32 to vector<16x128xf32>
    %557 = arith.subf %556, %555 : vector<16x128xf32>
    %cst_343 = arith.constant 0.000000e+00 : f32
    %558 = vector.broadcast %cst_343 : f32 to vector<16x128xf32>
    %559 = arith.maximumf %558, %557 : vector<16x128xf32>
    %560 = arith.mulf %549, %559 : vector<16x128xf32>
    %561 = arith.addf %547, %560 : vector<16x128xf32>
    %c0_344 = arith.constant 0 : index
    %c22_345 = arith.constant 22 : index
    %c0_346 = arith.constant 0 : index
    %c0_347 = arith.constant 0 : index
    %562 = vector.load %arg2[%c0_344, %c22_345, %c0_346, %c0_347] : memref<1x68x16x128xf32, #tpu.memory_space<vmem>>, vector<1x1x16x128xf32>
    %563 = vector.shape_cast %562 : vector<1x1x16x128xf32> to vector<16x128xf32>
    %564 = arith.subf %563, %493 : vector<16x128xf32>
    %565 = math.exp %564 : vector<16x128xf32>
    %566 = arith.addf %552, %565 : vector<16x128xf32>
    %cst_348 = arith.constant 5.000000e+00 : f32
    %567 = vector.broadcast %cst_348 : f32 to vector<16x128xf32>
    %568 = arith.subf %443, %567 : vector<16x128xf32>
    %569 = math.absf %568 : vector<16x128xf32>
    %cst_349 = arith.constant 1.000000e+00 : f32
    %570 = vector.broadcast %cst_349 : f32 to vector<16x128xf32>
    %571 = arith.subf %570, %569 : vector<16x128xf32>
    %cst_350 = arith.constant 0.000000e+00 : f32
    %572 = vector.broadcast %cst_350 : f32 to vector<16x128xf32>
    %573 = arith.maximumf %572, %571 : vector<16x128xf32>
    %574 = arith.mulf %563, %573 : vector<16x128xf32>
    %575 = arith.addf %561, %574 : vector<16x128xf32>
    %c0_351 = arith.constant 0 : index
    %c23_352 = arith.constant 23 : index
    %c0_353 = arith.constant 0 : index
    %c0_354 = arith.constant 0 : index
    %576 = vector.load %arg2[%c0_351, %c23_352, %c0_353, %c0_354] : memref<1x68x16x128xf32, #tpu.memory_space<vmem>>, vector<1x1x16x128xf32>
    %577 = vector.shape_cast %576 : vector<1x1x16x128xf32> to vector<16x128xf32>
    %578 = arith.subf %577, %493 : vector<16x128xf32>
    %579 = math.exp %578 : vector<16x128xf32>
    %580 = arith.addf %566, %579 : vector<16x128xf32>
    %cst_355 = arith.constant 6.000000e+00 : f32
    %581 = vector.broadcast %cst_355 : f32 to vector<16x128xf32>
    %582 = arith.subf %443, %581 : vector<16x128xf32>
    %583 = math.absf %582 : vector<16x128xf32>
    %cst_356 = arith.constant 1.000000e+00 : f32
    %584 = vector.broadcast %cst_356 : f32 to vector<16x128xf32>
    %585 = arith.subf %584, %583 : vector<16x128xf32>
    %cst_357 = arith.constant 0.000000e+00 : f32
    %586 = vector.broadcast %cst_357 : f32 to vector<16x128xf32>
    %587 = arith.maximumf %586, %585 : vector<16x128xf32>
    %588 = arith.mulf %577, %587 : vector<16x128xf32>
    %589 = arith.addf %575, %588 : vector<16x128xf32>
    %c0_358 = arith.constant 0 : index
    %c24_359 = arith.constant 24 : index
    %c0_360 = arith.constant 0 : index
    %c0_361 = arith.constant 0 : index
    %590 = vector.load %arg2[%c0_358, %c24_359, %c0_360, %c0_361] : memref<1x68x16x128xf32, #tpu.memory_space<vmem>>, vector<1x1x16x128xf32>
    %591 = vector.shape_cast %590 : vector<1x1x16x128xf32> to vector<16x128xf32>
    %592 = arith.subf %591, %493 : vector<16x128xf32>
    %593 = math.exp %592 : vector<16x128xf32>
    %594 = arith.addf %580, %593 : vector<16x128xf32>
    %cst_362 = arith.constant 7.000000e+00 : f32
    %595 = vector.broadcast %cst_362 : f32 to vector<16x128xf32>
    %596 = arith.subf %443, %595 : vector<16x128xf32>
    %597 = math.absf %596 : vector<16x128xf32>
    %cst_363 = arith.constant 1.000000e+00 : f32
    %598 = vector.broadcast %cst_363 : f32 to vector<16x128xf32>
    %599 = arith.subf %598, %597 : vector<16x128xf32>
    %cst_364 = arith.constant 0.000000e+00 : f32
    %600 = vector.broadcast %cst_364 : f32 to vector<16x128xf32>
    %601 = arith.maximumf %600, %599 : vector<16x128xf32>
    %602 = arith.mulf %591, %601 : vector<16x128xf32>
    %603 = arith.addf %589, %602 : vector<16x128xf32>
    %c0_365 = arith.constant 0 : index
    %c25_366 = arith.constant 25 : index
    %c0_367 = arith.constant 0 : index
    %c0_368 = arith.constant 0 : index
    %604 = vector.load %arg2[%c0_365, %c25_366, %c0_367, %c0_368] : memref<1x68x16x128xf32, #tpu.memory_space<vmem>>, vector<1x1x16x128xf32>
    %605 = vector.shape_cast %604 : vector<1x1x16x128xf32> to vector<16x128xf32>
    %606 = arith.subf %605, %493 : vector<16x128xf32>
    %607 = math.exp %606 : vector<16x128xf32>
    %608 = arith.addf %594, %607 : vector<16x128xf32>
    %cst_369 = arith.constant 8.000000e+00 : f32
    %609 = vector.broadcast %cst_369 : f32 to vector<16x128xf32>
    %610 = arith.subf %443, %609 : vector<16x128xf32>
    %611 = math.absf %610 : vector<16x128xf32>
    %cst_370 = arith.constant 1.000000e+00 : f32
    %612 = vector.broadcast %cst_370 : f32 to vector<16x128xf32>
    %613 = arith.subf %612, %611 : vector<16x128xf32>
    %cst_371 = arith.constant 0.000000e+00 : f32
    %614 = vector.broadcast %cst_371 : f32 to vector<16x128xf32>
    %615 = arith.maximumf %614, %613 : vector<16x128xf32>
    %616 = arith.mulf %605, %615 : vector<16x128xf32>
    %617 = arith.addf %603, %616 : vector<16x128xf32>
    %c0_372 = arith.constant 0 : index
    %c26_373 = arith.constant 26 : index
    %c0_374 = arith.constant 0 : index
    %c0_375 = arith.constant 0 : index
    %618 = vector.load %arg2[%c0_372, %c26_373, %c0_374, %c0_375] : memref<1x68x16x128xf32, #tpu.memory_space<vmem>>, vector<1x1x16x128xf32>
    %619 = vector.shape_cast %618 : vector<1x1x16x128xf32> to vector<16x128xf32>
    %620 = arith.subf %619, %493 : vector<16x128xf32>
    %621 = math.exp %620 : vector<16x128xf32>
    %622 = arith.addf %608, %621 : vector<16x128xf32>
    %cst_376 = arith.constant 9.000000e+00 : f32
    %623 = vector.broadcast %cst_376 : f32 to vector<16x128xf32>
    %624 = arith.subf %443, %623 : vector<16x128xf32>
    %625 = math.absf %624 : vector<16x128xf32>
    %cst_377 = arith.constant 1.000000e+00 : f32
    %626 = vector.broadcast %cst_377 : f32 to vector<16x128xf32>
    %627 = arith.subf %626, %625 : vector<16x128xf32>
    %cst_378 = arith.constant 0.000000e+00 : f32
    %628 = vector.broadcast %cst_378 : f32 to vector<16x128xf32>
    %629 = arith.maximumf %628, %627 : vector<16x128xf32>
    %630 = arith.mulf %619, %629 : vector<16x128xf32>
    %631 = arith.addf %617, %630 : vector<16x128xf32>
    %c0_379 = arith.constant 0 : index
    %c27_380 = arith.constant 27 : index
    %c0_381 = arith.constant 0 : index
    %c0_382 = arith.constant 0 : index
    %632 = vector.load %arg2[%c0_379, %c27_380, %c0_381, %c0_382] : memref<1x68x16x128xf32, #tpu.memory_space<vmem>>, vector<1x1x16x128xf32>
    %633 = vector.shape_cast %632 : vector<1x1x16x128xf32> to vector<16x128xf32>
    %634 = arith.subf %633, %493 : vector<16x128xf32>
    %635 = math.exp %634 : vector<16x128xf32>
    %636 = arith.addf %622, %635 : vector<16x128xf32>
    %cst_383 = arith.constant 1.000000e+01 : f32
    %637 = vector.broadcast %cst_383 : f32 to vector<16x128xf32>
    %638 = arith.subf %443, %637 : vector<16x128xf32>
    %639 = math.absf %638 : vector<16x128xf32>
    %cst_384 = arith.constant 1.000000e+00 : f32
    %640 = vector.broadcast %cst_384 : f32 to vector<16x128xf32>
    %641 = arith.subf %640, %639 : vector<16x128xf32>
    %cst_385 = arith.constant 0.000000e+00 : f32
    %642 = vector.broadcast %cst_385 : f32 to vector<16x128xf32>
    %643 = arith.maximumf %642, %641 : vector<16x128xf32>
    %644 = arith.mulf %633, %643 : vector<16x128xf32>
    %645 = arith.addf %631, %644 : vector<16x128xf32>
    %c0_386 = arith.constant 0 : index
    %c28_387 = arith.constant 28 : index
    %c0_388 = arith.constant 0 : index
    %c0_389 = arith.constant 0 : index
    %646 = vector.load %arg2[%c0_386, %c28_387, %c0_388, %c0_389] : memref<1x68x16x128xf32, #tpu.memory_space<vmem>>, vector<1x1x16x128xf32>
    %647 = vector.shape_cast %646 : vector<1x1x16x128xf32> to vector<16x128xf32>
    %648 = arith.subf %647, %493 : vector<16x128xf32>
    %649 = math.exp %648 : vector<16x128xf32>
    %650 = arith.addf %636, %649 : vector<16x128xf32>
    %cst_390 = arith.constant 1.100000e+01 : f32
    %651 = vector.broadcast %cst_390 : f32 to vector<16x128xf32>
    %652 = arith.subf %443, %651 : vector<16x128xf32>
    %653 = math.absf %652 : vector<16x128xf32>
    %cst_391 = arith.constant 1.000000e+00 : f32
    %654 = vector.broadcast %cst_391 : f32 to vector<16x128xf32>
    %655 = arith.subf %654, %653 : vector<16x128xf32>
    %cst_392 = arith.constant 0.000000e+00 : f32
    %656 = vector.broadcast %cst_392 : f32 to vector<16x128xf32>
    %657 = arith.maximumf %656, %655 : vector<16x128xf32>
    %658 = arith.mulf %647, %657 : vector<16x128xf32>
    %659 = arith.addf %645, %658 : vector<16x128xf32>
    %c0_393 = arith.constant 0 : index
    %c29_394 = arith.constant 29 : index
    %c0_395 = arith.constant 0 : index
    %c0_396 = arith.constant 0 : index
    %660 = vector.load %arg2[%c0_393, %c29_394, %c0_395, %c0_396] : memref<1x68x16x128xf32, #tpu.memory_space<vmem>>, vector<1x1x16x128xf32>
    %661 = vector.shape_cast %660 : vector<1x1x16x128xf32> to vector<16x128xf32>
    %662 = arith.subf %661, %493 : vector<16x128xf32>
    %663 = math.exp %662 : vector<16x128xf32>
    %664 = arith.addf %650, %663 : vector<16x128xf32>
    %cst_397 = arith.constant 1.200000e+01 : f32
    %665 = vector.broadcast %cst_397 : f32 to vector<16x128xf32>
    %666 = arith.subf %443, %665 : vector<16x128xf32>
    %667 = math.absf %666 : vector<16x128xf32>
    %cst_398 = arith.constant 1.000000e+00 : f32
    %668 = vector.broadcast %cst_398 : f32 to vector<16x128xf32>
    %669 = arith.subf %668, %667 : vector<16x128xf32>
    %cst_399 = arith.constant 0.000000e+00 : f32
    %670 = vector.broadcast %cst_399 : f32 to vector<16x128xf32>
    %671 = arith.maximumf %670, %669 : vector<16x128xf32>
    %672 = arith.mulf %661, %671 : vector<16x128xf32>
    %673 = arith.addf %659, %672 : vector<16x128xf32>
    %c0_400 = arith.constant 0 : index
    %c30_401 = arith.constant 30 : index
    %c0_402 = arith.constant 0 : index
    %c0_403 = arith.constant 0 : index
    %674 = vector.load %arg2[%c0_400, %c30_401, %c0_402, %c0_403] : memref<1x68x16x128xf32, #tpu.memory_space<vmem>>, vector<1x1x16x128xf32>
    %675 = vector.shape_cast %674 : vector<1x1x16x128xf32> to vector<16x128xf32>
    %676 = arith.subf %675, %493 : vector<16x128xf32>
    %677 = math.exp %676 : vector<16x128xf32>
    %678 = arith.addf %664, %677 : vector<16x128xf32>
    %cst_404 = arith.constant 1.300000e+01 : f32
    %679 = vector.broadcast %cst_404 : f32 to vector<16x128xf32>
    %680 = arith.subf %443, %679 : vector<16x128xf32>
    %681 = math.absf %680 : vector<16x128xf32>
    %cst_405 = arith.constant 1.000000e+00 : f32
    %682 = vector.broadcast %cst_405 : f32 to vector<16x128xf32>
    %683 = arith.subf %682, %681 : vector<16x128xf32>
    %cst_406 = arith.constant 0.000000e+00 : f32
    %684 = vector.broadcast %cst_406 : f32 to vector<16x128xf32>
    %685 = arith.maximumf %684, %683 : vector<16x128xf32>
    %686 = arith.mulf %675, %685 : vector<16x128xf32>
    %687 = arith.addf %673, %686 : vector<16x128xf32>
    %c0_407 = arith.constant 0 : index
    %c31_408 = arith.constant 31 : index
    %c0_409 = arith.constant 0 : index
    %c0_410 = arith.constant 0 : index
    %688 = vector.load %arg2[%c0_407, %c31_408, %c0_409, %c0_410] : memref<1x68x16x128xf32, #tpu.memory_space<vmem>>, vector<1x1x16x128xf32>
    %689 = vector.shape_cast %688 : vector<1x1x16x128xf32> to vector<16x128xf32>
    %690 = arith.subf %689, %493 : vector<16x128xf32>
    %691 = math.exp %690 : vector<16x128xf32>
    %692 = arith.addf %678, %691 : vector<16x128xf32>
    %cst_411 = arith.constant 1.400000e+01 : f32
    %693 = vector.broadcast %cst_411 : f32 to vector<16x128xf32>
    %694 = arith.subf %443, %693 : vector<16x128xf32>
    %695 = math.absf %694 : vector<16x128xf32>
    %cst_412 = arith.constant 1.000000e+00 : f32
    %696 = vector.broadcast %cst_412 : f32 to vector<16x128xf32>
    %697 = arith.subf %696, %695 : vector<16x128xf32>
    %cst_413 = arith.constant 0.000000e+00 : f32
    %698 = vector.broadcast %cst_413 : f32 to vector<16x128xf32>
    %699 = arith.maximumf %698, %697 : vector<16x128xf32>
    %700 = arith.mulf %689, %699 : vector<16x128xf32>
    %701 = arith.addf %687, %700 : vector<16x128xf32>
    %c0_414 = arith.constant 0 : index
    %c32_415 = arith.constant 32 : index
    %c0_416 = arith.constant 0 : index
    %c0_417 = arith.constant 0 : index
    %702 = vector.load %arg2[%c0_414, %c32_415, %c0_416, %c0_417] : memref<1x68x16x128xf32, #tpu.memory_space<vmem>>, vector<1x1x16x128xf32>
    %703 = vector.shape_cast %702 : vector<1x1x16x128xf32> to vector<16x128xf32>
    %704 = arith.subf %703, %493 : vector<16x128xf32>
    %705 = math.exp %704 : vector<16x128xf32>
    %706 = arith.addf %692, %705 : vector<16x128xf32>
    %cst_418 = arith.constant 1.500000e+01 : f32
    %707 = vector.broadcast %cst_418 : f32 to vector<16x128xf32>
    %708 = arith.subf %443, %707 : vector<16x128xf32>
    %709 = math.absf %708 : vector<16x128xf32>
    %cst_419 = arith.constant 1.000000e+00 : f32
    %710 = vector.broadcast %cst_419 : f32 to vector<16x128xf32>
    %711 = arith.subf %710, %709 : vector<16x128xf32>
    %cst_420 = arith.constant 0.000000e+00 : f32
    %712 = vector.broadcast %cst_420 : f32 to vector<16x128xf32>
    %713 = arith.maximumf %712, %711 : vector<16x128xf32>
    %714 = arith.mulf %703, %713 : vector<16x128xf32>
    %715 = arith.addf %701, %714 : vector<16x128xf32>
    %c0_421 = arith.constant 0 : index
    %c33_422 = arith.constant 33 : index
    %c0_423 = arith.constant 0 : index
    %c0_424 = arith.constant 0 : index
    %716 = vector.load %arg2[%c0_421, %c33_422, %c0_423, %c0_424] : memref<1x68x16x128xf32, #tpu.memory_space<vmem>>, vector<1x1x16x128xf32>
    %717 = vector.shape_cast %716 : vector<1x1x16x128xf32> to vector<16x128xf32>
    %718 = arith.subf %717, %493 : vector<16x128xf32>
    %719 = math.exp %718 : vector<16x128xf32>
    %720 = arith.addf %706, %719 : vector<16x128xf32>
    %cst_425 = arith.constant 1.600000e+01 : f32
    %721 = vector.broadcast %cst_425 : f32 to vector<16x128xf32>
    %722 = arith.subf %443, %721 : vector<16x128xf32>
    %723 = math.absf %722 : vector<16x128xf32>
    %cst_426 = arith.constant 1.000000e+00 : f32
    %724 = vector.broadcast %cst_426 : f32 to vector<16x128xf32>
    %725 = arith.subf %724, %723 : vector<16x128xf32>
    %cst_427 = arith.constant 0.000000e+00 : f32
    %726 = vector.broadcast %cst_427 : f32 to vector<16x128xf32>
    %727 = arith.maximumf %726, %725 : vector<16x128xf32>
    %728 = arith.mulf %717, %727 : vector<16x128xf32>
    %729 = arith.addf %715, %728 : vector<16x128xf32>
    %730 = math.log %720 : vector<16x128xf32>
    %731 = arith.addf %493, %730 : vector<16x128xf32>
    %732 = arith.subf %731, %729 : vector<16x128xf32>
    %733 = arith.addf %439, %732 : vector<16x128xf32>
    %cst_428 = arith.constant 0.000000e+00 : f32
    %cst_429 = arith.constant 1.599000e+01 : f32
    %734 = vector.broadcast %cst_428 : f32 to vector<16x128xf32>
    %735 = arith.maximumf %734, %144 : vector<16x128xf32>
    %736 = vector.broadcast %cst_429 : f32 to vector<16x128xf32>
    %737 = arith.minimumf %736, %735 : vector<16x128xf32>
    %c0_430 = arith.constant 0 : index
    %c34 = arith.constant 34 : index
    %c0_431 = arith.constant 0 : index
    %c0_432 = arith.constant 0 : index
    %738 = vector.load %arg2[%c0_430, %c34, %c0_431, %c0_432] : memref<1x68x16x128xf32, #tpu.memory_space<vmem>>, vector<1x1x16x128xf32>
    %739 = vector.shape_cast %738 : vector<1x1x16x128xf32> to vector<16x128xf32>
    %c0_433 = arith.constant 0 : index
    %c35 = arith.constant 35 : index
    %c0_434 = arith.constant 0 : index
    %c0_435 = arith.constant 0 : index
    %740 = vector.load %arg2[%c0_433, %c35, %c0_434, %c0_435] : memref<1x68x16x128xf32, #tpu.memory_space<vmem>>, vector<1x1x16x128xf32>
    %741 = vector.shape_cast %740 : vector<1x1x16x128xf32> to vector<16x128xf32>
    %742 = arith.maximumf %739, %741 : vector<16x128xf32>
    %c0_436 = arith.constant 0 : index
    %c36 = arith.constant 36 : index
    %c0_437 = arith.constant 0 : index
    %c0_438 = arith.constant 0 : index
    %743 = vector.load %arg2[%c0_436, %c36, %c0_437, %c0_438] : memref<1x68x16x128xf32, #tpu.memory_space<vmem>>, vector<1x1x16x128xf32>
    %744 = vector.shape_cast %743 : vector<1x1x16x128xf32> to vector<16x128xf32>
    %745 = arith.maximumf %742, %744 : vector<16x128xf32>
    %c0_439 = arith.constant 0 : index
    %c37 = arith.constant 37 : index
    %c0_440 = arith.constant 0 : index
    %c0_441 = arith.constant 0 : index
    %746 = vector.load %arg2[%c0_439, %c37, %c0_440, %c0_441] : memref<1x68x16x128xf32, #tpu.memory_space<vmem>>, vector<1x1x16x128xf32>
    %747 = vector.shape_cast %746 : vector<1x1x16x128xf32> to vector<16x128xf32>
    %748 = arith.maximumf %745, %747 : vector<16x128xf32>
    %c0_442 = arith.constant 0 : index
    %c38 = arith.constant 38 : index
    %c0_443 = arith.constant 0 : index
    %c0_444 = arith.constant 0 : index
    %749 = vector.load %arg2[%c0_442, %c38, %c0_443, %c0_444] : memref<1x68x16x128xf32, #tpu.memory_space<vmem>>, vector<1x1x16x128xf32>
    %750 = vector.shape_cast %749 : vector<1x1x16x128xf32> to vector<16x128xf32>
    %751 = arith.maximumf %748, %750 : vector<16x128xf32>
    %c0_445 = arith.constant 0 : index
    %c39 = arith.constant 39 : index
    %c0_446 = arith.constant 0 : index
    %c0_447 = arith.constant 0 : index
    %752 = vector.load %arg2[%c0_445, %c39, %c0_446, %c0_447] : memref<1x68x16x128xf32, #tpu.memory_space<vmem>>, vector<1x1x16x128xf32>
    %753 = vector.shape_cast %752 : vector<1x1x16x128xf32> to vector<16x128xf32>
    %754 = arith.maximumf %751, %753 : vector<16x128xf32>
    %c0_448 = arith.constant 0 : index
    %c40 = arith.constant 40 : index
    %c0_449 = arith.constant 0 : index
    %c0_450 = arith.constant 0 : index
    %755 = vector.load %arg2[%c0_448, %c40, %c0_449, %c0_450] : memref<1x68x16x128xf32, #tpu.memory_space<vmem>>, vector<1x1x16x128xf32>
    %756 = vector.shape_cast %755 : vector<1x1x16x128xf32> to vector<16x128xf32>
    %757 = arith.maximumf %754, %756 : vector<16x128xf32>
    %c0_451 = arith.constant 0 : index
    %c41 = arith.constant 41 : index
    %c0_452 = arith.constant 0 : index
    %c0_453 = arith.constant 0 : index
    %758 = vector.load %arg2[%c0_451, %c41, %c0_452, %c0_453] : memref<1x68x16x128xf32, #tpu.memory_space<vmem>>, vector<1x1x16x128xf32>
    %759 = vector.shape_cast %758 : vector<1x1x16x128xf32> to vector<16x128xf32>
    %760 = arith.maximumf %757, %759 : vector<16x128xf32>
    %c0_454 = arith.constant 0 : index
    %c42 = arith.constant 42 : index
    %c0_455 = arith.constant 0 : index
    %c0_456 = arith.constant 0 : index
    %761 = vector.load %arg2[%c0_454, %c42, %c0_455, %c0_456] : memref<1x68x16x128xf32, #tpu.memory_space<vmem>>, vector<1x1x16x128xf32>
    %762 = vector.shape_cast %761 : vector<1x1x16x128xf32> to vector<16x128xf32>
    %763 = arith.maximumf %760, %762 : vector<16x128xf32>
    %c0_457 = arith.constant 0 : index
    %c43 = arith.constant 43 : index
    %c0_458 = arith.constant 0 : index
    %c0_459 = arith.constant 0 : index
    %764 = vector.load %arg2[%c0_457, %c43, %c0_458, %c0_459] : memref<1x68x16x128xf32, #tpu.memory_space<vmem>>, vector<1x1x16x128xf32>
    %765 = vector.shape_cast %764 : vector<1x1x16x128xf32> to vector<16x128xf32>
    %766 = arith.maximumf %763, %765 : vector<16x128xf32>
    %c0_460 = arith.constant 0 : index
    %c44 = arith.constant 44 : index
    %c0_461 = arith.constant 0 : index
    %c0_462 = arith.constant 0 : index
    %767 = vector.load %arg2[%c0_460, %c44, %c0_461, %c0_462] : memref<1x68x16x128xf32, #tpu.memory_space<vmem>>, vector<1x1x16x128xf32>
    %768 = vector.shape_cast %767 : vector<1x1x16x128xf32> to vector<16x128xf32>
    %769 = arith.maximumf %766, %768 : vector<16x128xf32>
    %c0_463 = arith.constant 0 : index
    %c45 = arith.constant 45 : index
    %c0_464 = arith.constant 0 : index
    %c0_465 = arith.constant 0 : index
    %770 = vector.load %arg2[%c0_463, %c45, %c0_464, %c0_465] : memref<1x68x16x128xf32, #tpu.memory_space<vmem>>, vector<1x1x16x128xf32>
    %771 = vector.shape_cast %770 : vector<1x1x16x128xf32> to vector<16x128xf32>
    %772 = arith.maximumf %769, %771 : vector<16x128xf32>
    %c0_466 = arith.constant 0 : index
    %c46 = arith.constant 46 : index
    %c0_467 = arith.constant 0 : index
    %c0_468 = arith.constant 0 : index
    %773 = vector.load %arg2[%c0_466, %c46, %c0_467, %c0_468] : memref<1x68x16x128xf32, #tpu.memory_space<vmem>>, vector<1x1x16x128xf32>
    %774 = vector.shape_cast %773 : vector<1x1x16x128xf32> to vector<16x128xf32>
    %775 = arith.maximumf %772, %774 : vector<16x128xf32>
    %c0_469 = arith.constant 0 : index
    %c47 = arith.constant 47 : index
    %c0_470 = arith.constant 0 : index
    %c0_471 = arith.constant 0 : index
    %776 = vector.load %arg2[%c0_469, %c47, %c0_470, %c0_471] : memref<1x68x16x128xf32, #tpu.memory_space<vmem>>, vector<1x1x16x128xf32>
    %777 = vector.shape_cast %776 : vector<1x1x16x128xf32> to vector<16x128xf32>
    %778 = arith.maximumf %775, %777 : vector<16x128xf32>
    %c0_472 = arith.constant 0 : index
    %c48 = arith.constant 48 : index
    %c0_473 = arith.constant 0 : index
    %c0_474 = arith.constant 0 : index
    %779 = vector.load %arg2[%c0_472, %c48, %c0_473, %c0_474] : memref<1x68x16x128xf32, #tpu.memory_space<vmem>>, vector<1x1x16x128xf32>
    %780 = vector.shape_cast %779 : vector<1x1x16x128xf32> to vector<16x128xf32>
    %781 = arith.maximumf %778, %780 : vector<16x128xf32>
    %c0_475 = arith.constant 0 : index
    %c49 = arith.constant 49 : index
    %c0_476 = arith.constant 0 : index
    %c0_477 = arith.constant 0 : index
    %782 = vector.load %arg2[%c0_475, %c49, %c0_476, %c0_477] : memref<1x68x16x128xf32, #tpu.memory_space<vmem>>, vector<1x1x16x128xf32>
    %783 = vector.shape_cast %782 : vector<1x1x16x128xf32> to vector<16x128xf32>
    %784 = arith.maximumf %781, %783 : vector<16x128xf32>
    %c0_478 = arith.constant 0 : index
    %c50 = arith.constant 50 : index
    %c0_479 = arith.constant 0 : index
    %c0_480 = arith.constant 0 : index
    %785 = vector.load %arg2[%c0_478, %c50, %c0_479, %c0_480] : memref<1x68x16x128xf32, #tpu.memory_space<vmem>>, vector<1x1x16x128xf32>
    %786 = vector.shape_cast %785 : vector<1x1x16x128xf32> to vector<16x128xf32>
    %787 = arith.maximumf %784, %786 : vector<16x128xf32>
    %c0_481 = arith.constant 0 : index
    %c34_482 = arith.constant 34 : index
    %c0_483 = arith.constant 0 : index
    %c0_484 = arith.constant 0 : index
    %788 = vector.load %arg2[%c0_481, %c34_482, %c0_483, %c0_484] : memref<1x68x16x128xf32, #tpu.memory_space<vmem>>, vector<1x1x16x128xf32>
    %789 = vector.shape_cast %788 : vector<1x1x16x128xf32> to vector<16x128xf32>
    %790 = arith.subf %789, %787 : vector<16x128xf32>
    %791 = math.exp %790 : vector<16x128xf32>
    %cst_485 = arith.constant 0.000000e+00 : f32
    %792 = vector.broadcast %cst_485 : f32 to vector<16x128xf32>
    %793 = arith.subf %737, %792 : vector<16x128xf32>
    %794 = math.absf %793 : vector<16x128xf32>
    %cst_486 = arith.constant 1.000000e+00 : f32
    %795 = vector.broadcast %cst_486 : f32 to vector<16x128xf32>
    %796 = arith.subf %795, %794 : vector<16x128xf32>
    %cst_487 = arith.constant 0.000000e+00 : f32
    %797 = vector.broadcast %cst_487 : f32 to vector<16x128xf32>
    %798 = arith.maximumf %797, %796 : vector<16x128xf32>
    %799 = arith.mulf %789, %798 : vector<16x128xf32>
    %c0_488 = arith.constant 0 : index
    %c35_489 = arith.constant 35 : index
    %c0_490 = arith.constant 0 : index
    %c0_491 = arith.constant 0 : index
    %800 = vector.load %arg2[%c0_488, %c35_489, %c0_490, %c0_491] : memref<1x68x16x128xf32, #tpu.memory_space<vmem>>, vector<1x1x16x128xf32>
    %801 = vector.shape_cast %800 : vector<1x1x16x128xf32> to vector<16x128xf32>
    %802 = arith.subf %801, %787 : vector<16x128xf32>
    %803 = math.exp %802 : vector<16x128xf32>
    %804 = arith.addf %791, %803 : vector<16x128xf32>
    %cst_492 = arith.constant 1.000000e+00 : f32
    %805 = vector.broadcast %cst_492 : f32 to vector<16x128xf32>
    %806 = arith.subf %737, %805 : vector<16x128xf32>
    %807 = math.absf %806 : vector<16x128xf32>
    %cst_493 = arith.constant 1.000000e+00 : f32
    %808 = vector.broadcast %cst_493 : f32 to vector<16x128xf32>
    %809 = arith.subf %808, %807 : vector<16x128xf32>
    %cst_494 = arith.constant 0.000000e+00 : f32
    %810 = vector.broadcast %cst_494 : f32 to vector<16x128xf32>
    %811 = arith.maximumf %810, %809 : vector<16x128xf32>
    %812 = arith.mulf %801, %811 : vector<16x128xf32>
    %813 = arith.addf %799, %812 : vector<16x128xf32>
    %c0_495 = arith.constant 0 : index
    %c36_496 = arith.constant 36 : index
    %c0_497 = arith.constant 0 : index
    %c0_498 = arith.constant 0 : index
    %814 = vector.load %arg2[%c0_495, %c36_496, %c0_497, %c0_498] : memref<1x68x16x128xf32, #tpu.memory_space<vmem>>, vector<1x1x16x128xf32>
    %815 = vector.shape_cast %814 : vector<1x1x16x128xf32> to vector<16x128xf32>
    %816 = arith.subf %815, %787 : vector<16x128xf32>
    %817 = math.exp %816 : vector<16x128xf32>
    %818 = arith.addf %804, %817 : vector<16x128xf32>
    %cst_499 = arith.constant 2.000000e+00 : f32
    %819 = vector.broadcast %cst_499 : f32 to vector<16x128xf32>
    %820 = arith.subf %737, %819 : vector<16x128xf32>
    %821 = math.absf %820 : vector<16x128xf32>
    %cst_500 = arith.constant 1.000000e+00 : f32
    %822 = vector.broadcast %cst_500 : f32 to vector<16x128xf32>
    %823 = arith.subf %822, %821 : vector<16x128xf32>
    %cst_501 = arith.constant 0.000000e+00 : f32
    %824 = vector.broadcast %cst_501 : f32 to vector<16x128xf32>
    %825 = arith.maximumf %824, %823 : vector<16x128xf32>
    %826 = arith.mulf %815, %825 : vector<16x128xf32>
    %827 = arith.addf %813, %826 : vector<16x128xf32>
    %c0_502 = arith.constant 0 : index
    %c37_503 = arith.constant 37 : index
    %c0_504 = arith.constant 0 : index
    %c0_505 = arith.constant 0 : index
    %828 = vector.load %arg2[%c0_502, %c37_503, %c0_504, %c0_505] : memref<1x68x16x128xf32, #tpu.memory_space<vmem>>, vector<1x1x16x128xf32>
    %829 = vector.shape_cast %828 : vector<1x1x16x128xf32> to vector<16x128xf32>
    %830 = arith.subf %829, %787 : vector<16x128xf32>
    %831 = math.exp %830 : vector<16x128xf32>
    %832 = arith.addf %818, %831 : vector<16x128xf32>
    %cst_506 = arith.constant 3.000000e+00 : f32
    %833 = vector.broadcast %cst_506 : f32 to vector<16x128xf32>
    %834 = arith.subf %737, %833 : vector<16x128xf32>
    %835 = math.absf %834 : vector<16x128xf32>
    %cst_507 = arith.constant 1.000000e+00 : f32
    %836 = vector.broadcast %cst_507 : f32 to vector<16x128xf32>
    %837 = arith.subf %836, %835 : vector<16x128xf32>
    %cst_508 = arith.constant 0.000000e+00 : f32
    %838 = vector.broadcast %cst_508 : f32 to vector<16x128xf32>
    %839 = arith.maximumf %838, %837 : vector<16x128xf32>
    %840 = arith.mulf %829, %839 : vector<16x128xf32>
    %841 = arith.addf %827, %840 : vector<16x128xf32>
    %c0_509 = arith.constant 0 : index
    %c38_510 = arith.constant 38 : index
    %c0_511 = arith.constant 0 : index
    %c0_512 = arith.constant 0 : index
    %842 = vector.load %arg2[%c0_509, %c38_510, %c0_511, %c0_512] : memref<1x68x16x128xf32, #tpu.memory_space<vmem>>, vector<1x1x16x128xf32>
    %843 = vector.shape_cast %842 : vector<1x1x16x128xf32> to vector<16x128xf32>
    %844 = arith.subf %843, %787 : vector<16x128xf32>
    %845 = math.exp %844 : vector<16x128xf32>
    %846 = arith.addf %832, %845 : vector<16x128xf32>
    %cst_513 = arith.constant 4.000000e+00 : f32
    %847 = vector.broadcast %cst_513 : f32 to vector<16x128xf32>
    %848 = arith.subf %737, %847 : vector<16x128xf32>
    %849 = math.absf %848 : vector<16x128xf32>
    %cst_514 = arith.constant 1.000000e+00 : f32
    %850 = vector.broadcast %cst_514 : f32 to vector<16x128xf32>
    %851 = arith.subf %850, %849 : vector<16x128xf32>
    %cst_515 = arith.constant 0.000000e+00 : f32
    %852 = vector.broadcast %cst_515 : f32 to vector<16x128xf32>
    %853 = arith.maximumf %852, %851 : vector<16x128xf32>
    %854 = arith.mulf %843, %853 : vector<16x128xf32>
    %855 = arith.addf %841, %854 : vector<16x128xf32>
    %c0_516 = arith.constant 0 : index
    %c39_517 = arith.constant 39 : index
    %c0_518 = arith.constant 0 : index
    %c0_519 = arith.constant 0 : index
    %856 = vector.load %arg2[%c0_516, %c39_517, %c0_518, %c0_519] : memref<1x68x16x128xf32, #tpu.memory_space<vmem>>, vector<1x1x16x128xf32>
    %857 = vector.shape_cast %856 : vector<1x1x16x128xf32> to vector<16x128xf32>
    %858 = arith.subf %857, %787 : vector<16x128xf32>
    %859 = math.exp %858 : vector<16x128xf32>
    %860 = arith.addf %846, %859 : vector<16x128xf32>
    %cst_520 = arith.constant 5.000000e+00 : f32
    %861 = vector.broadcast %cst_520 : f32 to vector<16x128xf32>
    %862 = arith.subf %737, %861 : vector<16x128xf32>
    %863 = math.absf %862 : vector<16x128xf32>
    %cst_521 = arith.constant 1.000000e+00 : f32
    %864 = vector.broadcast %cst_521 : f32 to vector<16x128xf32>
    %865 = arith.subf %864, %863 : vector<16x128xf32>
    %cst_522 = arith.constant 0.000000e+00 : f32
    %866 = vector.broadcast %cst_522 : f32 to vector<16x128xf32>
    %867 = arith.maximumf %866, %865 : vector<16x128xf32>
    %868 = arith.mulf %857, %867 : vector<16x128xf32>
    %869 = arith.addf %855, %868 : vector<16x128xf32>
    %c0_523 = arith.constant 0 : index
    %c40_524 = arith.constant 40 : index
    %c0_525 = arith.constant 0 : index
    %c0_526 = arith.constant 0 : index
    %870 = vector.load %arg2[%c0_523, %c40_524, %c0_525, %c0_526] : memref<1x68x16x128xf32, #tpu.memory_space<vmem>>, vector<1x1x16x128xf32>
    %871 = vector.shape_cast %870 : vector<1x1x16x128xf32> to vector<16x128xf32>
    %872 = arith.subf %871, %787 : vector<16x128xf32>
    %873 = math.exp %872 : vector<16x128xf32>
    %874 = arith.addf %860, %873 : vector<16x128xf32>
    %cst_527 = arith.constant 6.000000e+00 : f32
    %875 = vector.broadcast %cst_527 : f32 to vector<16x128xf32>
    %876 = arith.subf %737, %875 : vector<16x128xf32>
    %877 = math.absf %876 : vector<16x128xf32>
    %cst_528 = arith.constant 1.000000e+00 : f32
    %878 = vector.broadcast %cst_528 : f32 to vector<16x128xf32>
    %879 = arith.subf %878, %877 : vector<16x128xf32>
    %cst_529 = arith.constant 0.000000e+00 : f32
    %880 = vector.broadcast %cst_529 : f32 to vector<16x128xf32>
    %881 = arith.maximumf %880, %879 : vector<16x128xf32>
    %882 = arith.mulf %871, %881 : vector<16x128xf32>
    %883 = arith.addf %869, %882 : vector<16x128xf32>
    %c0_530 = arith.constant 0 : index
    %c41_531 = arith.constant 41 : index
    %c0_532 = arith.constant 0 : index
    %c0_533 = arith.constant 0 : index
    %884 = vector.load %arg2[%c0_530, %c41_531, %c0_532, %c0_533] : memref<1x68x16x128xf32, #tpu.memory_space<vmem>>, vector<1x1x16x128xf32>
    %885 = vector.shape_cast %884 : vector<1x1x16x128xf32> to vector<16x128xf32>
    %886 = arith.subf %885, %787 : vector<16x128xf32>
    %887 = math.exp %886 : vector<16x128xf32>
    %888 = arith.addf %874, %887 : vector<16x128xf32>
    %cst_534 = arith.constant 7.000000e+00 : f32
    %889 = vector.broadcast %cst_534 : f32 to vector<16x128xf32>
    %890 = arith.subf %737, %889 : vector<16x128xf32>
    %891 = math.absf %890 : vector<16x128xf32>
    %cst_535 = arith.constant 1.000000e+00 : f32
    %892 = vector.broadcast %cst_535 : f32 to vector<16x128xf32>
    %893 = arith.subf %892, %891 : vector<16x128xf32>
    %cst_536 = arith.constant 0.000000e+00 : f32
    %894 = vector.broadcast %cst_536 : f32 to vector<16x128xf32>
    %895 = arith.maximumf %894, %893 : vector<16x128xf32>
    %896 = arith.mulf %885, %895 : vector<16x128xf32>
    %897 = arith.addf %883, %896 : vector<16x128xf32>
    %c0_537 = arith.constant 0 : index
    %c42_538 = arith.constant 42 : index
    %c0_539 = arith.constant 0 : index
    %c0_540 = arith.constant 0 : index
    %898 = vector.load %arg2[%c0_537, %c42_538, %c0_539, %c0_540] : memref<1x68x16x128xf32, #tpu.memory_space<vmem>>, vector<1x1x16x128xf32>
    %899 = vector.shape_cast %898 : vector<1x1x16x128xf32> to vector<16x128xf32>
    %900 = arith.subf %899, %787 : vector<16x128xf32>
    %901 = math.exp %900 : vector<16x128xf32>
    %902 = arith.addf %888, %901 : vector<16x128xf32>
    %cst_541 = arith.constant 8.000000e+00 : f32
    %903 = vector.broadcast %cst_541 : f32 to vector<16x128xf32>
    %904 = arith.subf %737, %903 : vector<16x128xf32>
    %905 = math.absf %904 : vector<16x128xf32>
    %cst_542 = arith.constant 1.000000e+00 : f32
    %906 = vector.broadcast %cst_542 : f32 to vector<16x128xf32>
    %907 = arith.subf %906, %905 : vector<16x128xf32>
    %cst_543 = arith.constant 0.000000e+00 : f32
    %908 = vector.broadcast %cst_543 : f32 to vector<16x128xf32>
    %909 = arith.maximumf %908, %907 : vector<16x128xf32>
    %910 = arith.mulf %899, %909 : vector<16x128xf32>
    %911 = arith.addf %897, %910 : vector<16x128xf32>
    %c0_544 = arith.constant 0 : index
    %c43_545 = arith.constant 43 : index
    %c0_546 = arith.constant 0 : index
    %c0_547 = arith.constant 0 : index
    %912 = vector.load %arg2[%c0_544, %c43_545, %c0_546, %c0_547] : memref<1x68x16x128xf32, #tpu.memory_space<vmem>>, vector<1x1x16x128xf32>
    %913 = vector.shape_cast %912 : vector<1x1x16x128xf32> to vector<16x128xf32>
    %914 = arith.subf %913, %787 : vector<16x128xf32>
    %915 = math.exp %914 : vector<16x128xf32>
    %916 = arith.addf %902, %915 : vector<16x128xf32>
    %cst_548 = arith.constant 9.000000e+00 : f32
    %917 = vector.broadcast %cst_548 : f32 to vector<16x128xf32>
    %918 = arith.subf %737, %917 : vector<16x128xf32>
    %919 = math.absf %918 : vector<16x128xf32>
    %cst_549 = arith.constant 1.000000e+00 : f32
    %920 = vector.broadcast %cst_549 : f32 to vector<16x128xf32>
    %921 = arith.subf %920, %919 : vector<16x128xf32>
    %cst_550 = arith.constant 0.000000e+00 : f32
    %922 = vector.broadcast %cst_550 : f32 to vector<16x128xf32>
    %923 = arith.maximumf %922, %921 : vector<16x128xf32>
    %924 = arith.mulf %913, %923 : vector<16x128xf32>
    %925 = arith.addf %911, %924 : vector<16x128xf32>
    %c0_551 = arith.constant 0 : index
    %c44_552 = arith.constant 44 : index
    %c0_553 = arith.constant 0 : index
    %c0_554 = arith.constant 0 : index
    %926 = vector.load %arg2[%c0_551, %c44_552, %c0_553, %c0_554] : memref<1x68x16x128xf32, #tpu.memory_space<vmem>>, vector<1x1x16x128xf32>
    %927 = vector.shape_cast %926 : vector<1x1x16x128xf32> to vector<16x128xf32>
    %928 = arith.subf %927, %787 : vector<16x128xf32>
    %929 = math.exp %928 : vector<16x128xf32>
    %930 = arith.addf %916, %929 : vector<16x128xf32>
    %cst_555 = arith.constant 1.000000e+01 : f32
    %931 = vector.broadcast %cst_555 : f32 to vector<16x128xf32>
    %932 = arith.subf %737, %931 : vector<16x128xf32>
    %933 = math.absf %932 : vector<16x128xf32>
    %cst_556 = arith.constant 1.000000e+00 : f32
    %934 = vector.broadcast %cst_556 : f32 to vector<16x128xf32>
    %935 = arith.subf %934, %933 : vector<16x128xf32>
    %cst_557 = arith.constant 0.000000e+00 : f32
    %936 = vector.broadcast %cst_557 : f32 to vector<16x128xf32>
    %937 = arith.maximumf %936, %935 : vector<16x128xf32>
    %938 = arith.mulf %927, %937 : vector<16x128xf32>
    %939 = arith.addf %925, %938 : vector<16x128xf32>
    %c0_558 = arith.constant 0 : index
    %c45_559 = arith.constant 45 : index
    %c0_560 = arith.constant 0 : index
    %c0_561 = arith.constant 0 : index
    %940 = vector.load %arg2[%c0_558, %c45_559, %c0_560, %c0_561] : memref<1x68x16x128xf32, #tpu.memory_space<vmem>>, vector<1x1x16x128xf32>
    %941 = vector.shape_cast %940 : vector<1x1x16x128xf32> to vector<16x128xf32>
    %942 = arith.subf %941, %787 : vector<16x128xf32>
    %943 = math.exp %942 : vector<16x128xf32>
    %944 = arith.addf %930, %943 : vector<16x128xf32>
    %cst_562 = arith.constant 1.100000e+01 : f32
    %945 = vector.broadcast %cst_562 : f32 to vector<16x128xf32>
    %946 = arith.subf %737, %945 : vector<16x128xf32>
    %947 = math.absf %946 : vector<16x128xf32>
    %cst_563 = arith.constant 1.000000e+00 : f32
    %948 = vector.broadcast %cst_563 : f32 to vector<16x128xf32>
    %949 = arith.subf %948, %947 : vector<16x128xf32>
    %cst_564 = arith.constant 0.000000e+00 : f32
    %950 = vector.broadcast %cst_564 : f32 to vector<16x128xf32>
    %951 = arith.maximumf %950, %949 : vector<16x128xf32>
    %952 = arith.mulf %941, %951 : vector<16x128xf32>
    %953 = arith.addf %939, %952 : vector<16x128xf32>
    %c0_565 = arith.constant 0 : index
    %c46_566 = arith.constant 46 : index
    %c0_567 = arith.constant 0 : index
    %c0_568 = arith.constant 0 : index
    %954 = vector.load %arg2[%c0_565, %c46_566, %c0_567, %c0_568] : memref<1x68x16x128xf32, #tpu.memory_space<vmem>>, vector<1x1x16x128xf32>
    %955 = vector.shape_cast %954 : vector<1x1x16x128xf32> to vector<16x128xf32>
    %956 = arith.subf %955, %787 : vector<16x128xf32>
    %957 = math.exp %956 : vector<16x128xf32>
    %958 = arith.addf %944, %957 : vector<16x128xf32>
    %cst_569 = arith.constant 1.200000e+01 : f32
    %959 = vector.broadcast %cst_569 : f32 to vector<16x128xf32>
    %960 = arith.subf %737, %959 : vector<16x128xf32>
    %961 = math.absf %960 : vector<16x128xf32>
    %cst_570 = arith.constant 1.000000e+00 : f32
    %962 = vector.broadcast %cst_570 : f32 to vector<16x128xf32>
    %963 = arith.subf %962, %961 : vector<16x128xf32>
    %cst_571 = arith.constant 0.000000e+00 : f32
    %964 = vector.broadcast %cst_571 : f32 to vector<16x128xf32>
    %965 = arith.maximumf %964, %963 : vector<16x128xf32>
    %966 = arith.mulf %955, %965 : vector<16x128xf32>
    %967 = arith.addf %953, %966 : vector<16x128xf32>
    %c0_572 = arith.constant 0 : index
    %c47_573 = arith.constant 47 : index
    %c0_574 = arith.constant 0 : index
    %c0_575 = arith.constant 0 : index
    %968 = vector.load %arg2[%c0_572, %c47_573, %c0_574, %c0_575] : memref<1x68x16x128xf32, #tpu.memory_space<vmem>>, vector<1x1x16x128xf32>
    %969 = vector.shape_cast %968 : vector<1x1x16x128xf32> to vector<16x128xf32>
    %970 = arith.subf %969, %787 : vector<16x128xf32>
    %971 = math.exp %970 : vector<16x128xf32>
    %972 = arith.addf %958, %971 : vector<16x128xf32>
    %cst_576 = arith.constant 1.300000e+01 : f32
    %973 = vector.broadcast %cst_576 : f32 to vector<16x128xf32>
    %974 = arith.subf %737, %973 : vector<16x128xf32>
    %975 = math.absf %974 : vector<16x128xf32>
    %cst_577 = arith.constant 1.000000e+00 : f32
    %976 = vector.broadcast %cst_577 : f32 to vector<16x128xf32>
    %977 = arith.subf %976, %975 : vector<16x128xf32>
    %cst_578 = arith.constant 0.000000e+00 : f32
    %978 = vector.broadcast %cst_578 : f32 to vector<16x128xf32>
    %979 = arith.maximumf %978, %977 : vector<16x128xf32>
    %980 = arith.mulf %969, %979 : vector<16x128xf32>
    %981 = arith.addf %967, %980 : vector<16x128xf32>
    %c0_579 = arith.constant 0 : index
    %c48_580 = arith.constant 48 : index
    %c0_581 = arith.constant 0 : index
    %c0_582 = arith.constant 0 : index
    %982 = vector.load %arg2[%c0_579, %c48_580, %c0_581, %c0_582] : memref<1x68x16x128xf32, #tpu.memory_space<vmem>>, vector<1x1x16x128xf32>
    %983 = vector.shape_cast %982 : vector<1x1x16x128xf32> to vector<16x128xf32>
    %984 = arith.subf %983, %787 : vector<16x128xf32>
    %985 = math.exp %984 : vector<16x128xf32>
    %986 = arith.addf %972, %985 : vector<16x128xf32>
    %cst_583 = arith.constant 1.400000e+01 : f32
    %987 = vector.broadcast %cst_583 : f32 to vector<16x128xf32>
    %988 = arith.subf %737, %987 : vector<16x128xf32>
    %989 = math.absf %988 : vector<16x128xf32>
    %cst_584 = arith.constant 1.000000e+00 : f32
    %990 = vector.broadcast %cst_584 : f32 to vector<16x128xf32>
    %991 = arith.subf %990, %989 : vector<16x128xf32>
    %cst_585 = arith.constant 0.000000e+00 : f32
    %992 = vector.broadcast %cst_585 : f32 to vector<16x128xf32>
    %993 = arith.maximumf %992, %991 : vector<16x128xf32>
    %994 = arith.mulf %983, %993 : vector<16x128xf32>
    %995 = arith.addf %981, %994 : vector<16x128xf32>
    %c0_586 = arith.constant 0 : index
    %c49_587 = arith.constant 49 : index
    %c0_588 = arith.constant 0 : index
    %c0_589 = arith.constant 0 : index
    %996 = vector.load %arg2[%c0_586, %c49_587, %c0_588, %c0_589] : memref<1x68x16x128xf32, #tpu.memory_space<vmem>>, vector<1x1x16x128xf32>
    %997 = vector.shape_cast %996 : vector<1x1x16x128xf32> to vector<16x128xf32>
    %998 = arith.subf %997, %787 : vector<16x128xf32>
    %999 = math.exp %998 : vector<16x128xf32>
    %1000 = arith.addf %986, %999 : vector<16x128xf32>
    %cst_590 = arith.constant 1.500000e+01 : f32
    %1001 = vector.broadcast %cst_590 : f32 to vector<16x128xf32>
    %1002 = arith.subf %737, %1001 : vector<16x128xf32>
    %1003 = math.absf %1002 : vector<16x128xf32>
    %cst_591 = arith.constant 1.000000e+00 : f32
    %1004 = vector.broadcast %cst_591 : f32 to vector<16x128xf32>
    %1005 = arith.subf %1004, %1003 : vector<16x128xf32>
    %cst_592 = arith.constant 0.000000e+00 : f32
    %1006 = vector.broadcast %cst_592 : f32 to vector<16x128xf32>
    %1007 = arith.maximumf %1006, %1005 : vector<16x128xf32>
    %1008 = arith.mulf %997, %1007 : vector<16x128xf32>
    %1009 = arith.addf %995, %1008 : vector<16x128xf32>
    %c0_593 = arith.constant 0 : index
    %c50_594 = arith.constant 50 : index
    %c0_595 = arith.constant 0 : index
    %c0_596 = arith.constant 0 : index
    %1010 = vector.load %arg2[%c0_593, %c50_594, %c0_595, %c0_596] : memref<1x68x16x128xf32, #tpu.memory_space<vmem>>, vector<1x1x16x128xf32>
    %1011 = vector.shape_cast %1010 : vector<1x1x16x128xf32> to vector<16x128xf32>
    %1012 = arith.subf %1011, %787 : vector<16x128xf32>
    %1013 = math.exp %1012 : vector<16x128xf32>
    %1014 = arith.addf %1000, %1013 : vector<16x128xf32>
    %cst_597 = arith.constant 1.600000e+01 : f32
    %1015 = vector.broadcast %cst_597 : f32 to vector<16x128xf32>
    %1016 = arith.subf %737, %1015 : vector<16x128xf32>
    %1017 = math.absf %1016 : vector<16x128xf32>
    %cst_598 = arith.constant 1.000000e+00 : f32
    %1018 = vector.broadcast %cst_598 : f32 to vector<16x128xf32>
    %1019 = arith.subf %1018, %1017 : vector<16x128xf32>
    %cst_599 = arith.constant 0.000000e+00 : f32
    %1020 = vector.broadcast %cst_599 : f32 to vector<16x128xf32>
    %1021 = arith.maximumf %1020, %1019 : vector<16x128xf32>
    %1022 = arith.mulf %1011, %1021 : vector<16x128xf32>
    %1023 = arith.addf %1009, %1022 : vector<16x128xf32>
    %1024 = math.log %1014 : vector<16x128xf32>
    %1025 = arith.addf %787, %1024 : vector<16x128xf32>
    %1026 = arith.subf %1025, %1023 : vector<16x128xf32>
    %1027 = arith.addf %733, %1026 : vector<16x128xf32>
    %cst_600 = arith.constant 0.000000e+00 : f32
    %cst_601 = arith.constant 1.599000e+01 : f32
    %1028 = vector.broadcast %cst_600 : f32 to vector<16x128xf32>
    %1029 = arith.maximumf %1028, %146 : vector<16x128xf32>
    %1030 = vector.broadcast %cst_601 : f32 to vector<16x128xf32>
    %1031 = arith.minimumf %1030, %1029 : vector<16x128xf32>
    %c0_602 = arith.constant 0 : index
    %c51 = arith.constant 51 : index
    %c0_603 = arith.constant 0 : index
    %c0_604 = arith.constant 0 : index
    %1032 = vector.load %arg2[%c0_602, %c51, %c0_603, %c0_604] : memref<1x68x16x128xf32, #tpu.memory_space<vmem>>, vector<1x1x16x128xf32>
    %1033 = vector.shape_cast %1032 : vector<1x1x16x128xf32> to vector<16x128xf32>
    %c0_605 = arith.constant 0 : index
    %c52 = arith.constant 52 : index
    %c0_606 = arith.constant 0 : index
    %c0_607 = arith.constant 0 : index
    %1034 = vector.load %arg2[%c0_605, %c52, %c0_606, %c0_607] : memref<1x68x16x128xf32, #tpu.memory_space<vmem>>, vector<1x1x16x128xf32>
    %1035 = vector.shape_cast %1034 : vector<1x1x16x128xf32> to vector<16x128xf32>
    %1036 = arith.maximumf %1033, %1035 : vector<16x128xf32>
    %c0_608 = arith.constant 0 : index
    %c53 = arith.constant 53 : index
    %c0_609 = arith.constant 0 : index
    %c0_610 = arith.constant 0 : index
    %1037 = vector.load %arg2[%c0_608, %c53, %c0_609, %c0_610] : memref<1x68x16x128xf32, #tpu.memory_space<vmem>>, vector<1x1x16x128xf32>
    %1038 = vector.shape_cast %1037 : vector<1x1x16x128xf32> to vector<16x128xf32>
    %1039 = arith.maximumf %1036, %1038 : vector<16x128xf32>
    %c0_611 = arith.constant 0 : index
    %c54 = arith.constant 54 : index
    %c0_612 = arith.constant 0 : index
    %c0_613 = arith.constant 0 : index
    %1040 = vector.load %arg2[%c0_611, %c54, %c0_612, %c0_613] : memref<1x68x16x128xf32, #tpu.memory_space<vmem>>, vector<1x1x16x128xf32>
    %1041 = vector.shape_cast %1040 : vector<1x1x16x128xf32> to vector<16x128xf32>
    %1042 = arith.maximumf %1039, %1041 : vector<16x128xf32>
    %c0_614 = arith.constant 0 : index
    %c55 = arith.constant 55 : index
    %c0_615 = arith.constant 0 : index
    %c0_616 = arith.constant 0 : index
    %1043 = vector.load %arg2[%c0_614, %c55, %c0_615, %c0_616] : memref<1x68x16x128xf32, #tpu.memory_space<vmem>>, vector<1x1x16x128xf32>
    %1044 = vector.shape_cast %1043 : vector<1x1x16x128xf32> to vector<16x128xf32>
    %1045 = arith.maximumf %1042, %1044 : vector<16x128xf32>
    %c0_617 = arith.constant 0 : index
    %c56 = arith.constant 56 : index
    %c0_618 = arith.constant 0 : index
    %c0_619 = arith.constant 0 : index
    %1046 = vector.load %arg2[%c0_617, %c56, %c0_618, %c0_619] : memref<1x68x16x128xf32, #tpu.memory_space<vmem>>, vector<1x1x16x128xf32>
    %1047 = vector.shape_cast %1046 : vector<1x1x16x128xf32> to vector<16x128xf32>
    %1048 = arith.maximumf %1045, %1047 : vector<16x128xf32>
    %c0_620 = arith.constant 0 : index
    %c57 = arith.constant 57 : index
    %c0_621 = arith.constant 0 : index
    %c0_622 = arith.constant 0 : index
    %1049 = vector.load %arg2[%c0_620, %c57, %c0_621, %c0_622] : memref<1x68x16x128xf32, #tpu.memory_space<vmem>>, vector<1x1x16x128xf32>
    %1050 = vector.shape_cast %1049 : vector<1x1x16x128xf32> to vector<16x128xf32>
    %1051 = arith.maximumf %1048, %1050 : vector<16x128xf32>
    %c0_623 = arith.constant 0 : index
    %c58 = arith.constant 58 : index
    %c0_624 = arith.constant 0 : index
    %c0_625 = arith.constant 0 : index
    %1052 = vector.load %arg2[%c0_623, %c58, %c0_624, %c0_625] : memref<1x68x16x128xf32, #tpu.memory_space<vmem>>, vector<1x1x16x128xf32>
    %1053 = vector.shape_cast %1052 : vector<1x1x16x128xf32> to vector<16x128xf32>
    %1054 = arith.maximumf %1051, %1053 : vector<16x128xf32>
    %c0_626 = arith.constant 0 : index
    %c59 = arith.constant 59 : index
    %c0_627 = arith.constant 0 : index
    %c0_628 = arith.constant 0 : index
    %1055 = vector.load %arg2[%c0_626, %c59, %c0_627, %c0_628] : memref<1x68x16x128xf32, #tpu.memory_space<vmem>>, vector<1x1x16x128xf32>
    %1056 = vector.shape_cast %1055 : vector<1x1x16x128xf32> to vector<16x128xf32>
    %1057 = arith.maximumf %1054, %1056 : vector<16x128xf32>
    %c0_629 = arith.constant 0 : index
    %c60 = arith.constant 60 : index
    %c0_630 = arith.constant 0 : index
    %c0_631 = arith.constant 0 : index
    %1058 = vector.load %arg2[%c0_629, %c60, %c0_630, %c0_631] : memref<1x68x16x128xf32, #tpu.memory_space<vmem>>, vector<1x1x16x128xf32>
    %1059 = vector.shape_cast %1058 : vector<1x1x16x128xf32> to vector<16x128xf32>
    %1060 = arith.maximumf %1057, %1059 : vector<16x128xf32>
    %c0_632 = arith.constant 0 : index
    %c61 = arith.constant 61 : index
    %c0_633 = arith.constant 0 : index
    %c0_634 = arith.constant 0 : index
    %1061 = vector.load %arg2[%c0_632, %c61, %c0_633, %c0_634] : memref<1x68x16x128xf32, #tpu.memory_space<vmem>>, vector<1x1x16x128xf32>
    %1062 = vector.shape_cast %1061 : vector<1x1x16x128xf32> to vector<16x128xf32>
    %1063 = arith.maximumf %1060, %1062 : vector<16x128xf32>
    %c0_635 = arith.constant 0 : index
    %c62 = arith.constant 62 : index
    %c0_636 = arith.constant 0 : index
    %c0_637 = arith.constant 0 : index
    %1064 = vector.load %arg2[%c0_635, %c62, %c0_636, %c0_637] : memref<1x68x16x128xf32, #tpu.memory_space<vmem>>, vector<1x1x16x128xf32>
    %1065 = vector.shape_cast %1064 : vector<1x1x16x128xf32> to vector<16x128xf32>
    %1066 = arith.maximumf %1063, %1065 : vector<16x128xf32>
    %c0_638 = arith.constant 0 : index
    %c63 = arith.constant 63 : index
    %c0_639 = arith.constant 0 : index
    %c0_640 = arith.constant 0 : index
    %1067 = vector.load %arg2[%c0_638, %c63, %c0_639, %c0_640] : memref<1x68x16x128xf32, #tpu.memory_space<vmem>>, vector<1x1x16x128xf32>
    %1068 = vector.shape_cast %1067 : vector<1x1x16x128xf32> to vector<16x128xf32>
    %1069 = arith.maximumf %1066, %1068 : vector<16x128xf32>
    %c0_641 = arith.constant 0 : index
    %c64 = arith.constant 64 : index
    %c0_642 = arith.constant 0 : index
    %c0_643 = arith.constant 0 : index
    %1070 = vector.load %arg2[%c0_641, %c64, %c0_642, %c0_643] : memref<1x68x16x128xf32, #tpu.memory_space<vmem>>, vector<1x1x16x128xf32>
    %1071 = vector.shape_cast %1070 : vector<1x1x16x128xf32> to vector<16x128xf32>
    %1072 = arith.maximumf %1069, %1071 : vector<16x128xf32>
    %c0_644 = arith.constant 0 : index
    %c65 = arith.constant 65 : index
    %c0_645 = arith.constant 0 : index
    %c0_646 = arith.constant 0 : index
    %1073 = vector.load %arg2[%c0_644, %c65, %c0_645, %c0_646] : memref<1x68x16x128xf32, #tpu.memory_space<vmem>>, vector<1x1x16x128xf32>
    %1074 = vector.shape_cast %1073 : vector<1x1x16x128xf32> to vector<16x128xf32>
    %1075 = arith.maximumf %1072, %1074 : vector<16x128xf32>
    %c0_647 = arith.constant 0 : index
    %c66 = arith.constant 66 : index
    %c0_648 = arith.constant 0 : index
    %c0_649 = arith.constant 0 : index
    %1076 = vector.load %arg2[%c0_647, %c66, %c0_648, %c0_649] : memref<1x68x16x128xf32, #tpu.memory_space<vmem>>, vector<1x1x16x128xf32>
    %1077 = vector.shape_cast %1076 : vector<1x1x16x128xf32> to vector<16x128xf32>
    %1078 = arith.maximumf %1075, %1077 : vector<16x128xf32>
    %c0_650 = arith.constant 0 : index
    %c67 = arith.constant 67 : index
    %c0_651 = arith.constant 0 : index
    %c0_652 = arith.constant 0 : index
    %1079 = vector.load %arg2[%c0_650, %c67, %c0_651, %c0_652] : memref<1x68x16x128xf32, #tpu.memory_space<vmem>>, vector<1x1x16x128xf32>
    %1080 = vector.shape_cast %1079 : vector<1x1x16x128xf32> to vector<16x128xf32>
    %1081 = arith.maximumf %1078, %1080 : vector<16x128xf32>
    %c0_653 = arith.constant 0 : index
    %c51_654 = arith.constant 51 : index
    %c0_655 = arith.constant 0 : index
    %c0_656 = arith.constant 0 : index
    %1082 = vector.load %arg2[%c0_653, %c51_654, %c0_655, %c0_656] : memref<1x68x16x128xf32, #tpu.memory_space<vmem>>, vector<1x1x16x128xf32>
    %1083 = vector.shape_cast %1082 : vector<1x1x16x128xf32> to vector<16x128xf32>
    %1084 = arith.subf %1083, %1081 : vector<16x128xf32>
    %1085 = math.exp %1084 : vector<16x128xf32>
    %cst_657 = arith.constant 0.000000e+00 : f32
    %1086 = vector.broadcast %cst_657 : f32 to vector<16x128xf32>
    %1087 = arith.subf %1031, %1086 : vector<16x128xf32>
    %1088 = math.absf %1087 : vector<16x128xf32>
    %cst_658 = arith.constant 1.000000e+00 : f32
    %1089 = vector.broadcast %cst_658 : f32 to vector<16x128xf32>
    %1090 = arith.subf %1089, %1088 : vector<16x128xf32>
    %cst_659 = arith.constant 0.000000e+00 : f32
    %1091 = vector.broadcast %cst_659 : f32 to vector<16x128xf32>
    %1092 = arith.maximumf %1091, %1090 : vector<16x128xf32>
    %1093 = arith.mulf %1083, %1092 : vector<16x128xf32>
    %c0_660 = arith.constant 0 : index
    %c52_661 = arith.constant 52 : index
    %c0_662 = arith.constant 0 : index
    %c0_663 = arith.constant 0 : index
    %1094 = vector.load %arg2[%c0_660, %c52_661, %c0_662, %c0_663] : memref<1x68x16x128xf32, #tpu.memory_space<vmem>>, vector<1x1x16x128xf32>
    %1095 = vector.shape_cast %1094 : vector<1x1x16x128xf32> to vector<16x128xf32>
    %1096 = arith.subf %1095, %1081 : vector<16x128xf32>
    %1097 = math.exp %1096 : vector<16x128xf32>
    %1098 = arith.addf %1085, %1097 : vector<16x128xf32>
    %cst_664 = arith.constant 1.000000e+00 : f32
    %1099 = vector.broadcast %cst_664 : f32 to vector<16x128xf32>
    %1100 = arith.subf %1031, %1099 : vector<16x128xf32>
    %1101 = math.absf %1100 : vector<16x128xf32>
    %cst_665 = arith.constant 1.000000e+00 : f32
    %1102 = vector.broadcast %cst_665 : f32 to vector<16x128xf32>
    %1103 = arith.subf %1102, %1101 : vector<16x128xf32>
    %cst_666 = arith.constant 0.000000e+00 : f32
    %1104 = vector.broadcast %cst_666 : f32 to vector<16x128xf32>
    %1105 = arith.maximumf %1104, %1103 : vector<16x128xf32>
    %1106 = arith.mulf %1095, %1105 : vector<16x128xf32>
    %1107 = arith.addf %1093, %1106 : vector<16x128xf32>
    %c0_667 = arith.constant 0 : index
    %c53_668 = arith.constant 53 : index
    %c0_669 = arith.constant 0 : index
    %c0_670 = arith.constant 0 : index
    %1108 = vector.load %arg2[%c0_667, %c53_668, %c0_669, %c0_670] : memref<1x68x16x128xf32, #tpu.memory_space<vmem>>, vector<1x1x16x128xf32>
    %1109 = vector.shape_cast %1108 : vector<1x1x16x128xf32> to vector<16x128xf32>
    %1110 = arith.subf %1109, %1081 : vector<16x128xf32>
    %1111 = math.exp %1110 : vector<16x128xf32>
    %1112 = arith.addf %1098, %1111 : vector<16x128xf32>
    %cst_671 = arith.constant 2.000000e+00 : f32
    %1113 = vector.broadcast %cst_671 : f32 to vector<16x128xf32>
    %1114 = arith.subf %1031, %1113 : vector<16x128xf32>
    %1115 = math.absf %1114 : vector<16x128xf32>
    %cst_672 = arith.constant 1.000000e+00 : f32
    %1116 = vector.broadcast %cst_672 : f32 to vector<16x128xf32>
    %1117 = arith.subf %1116, %1115 : vector<16x128xf32>
    %cst_673 = arith.constant 0.000000e+00 : f32
    %1118 = vector.broadcast %cst_673 : f32 to vector<16x128xf32>
    %1119 = arith.maximumf %1118, %1117 : vector<16x128xf32>
    %1120 = arith.mulf %1109, %1119 : vector<16x128xf32>
    %1121 = arith.addf %1107, %1120 : vector<16x128xf32>
    %c0_674 = arith.constant 0 : index
    %c54_675 = arith.constant 54 : index
    %c0_676 = arith.constant 0 : index
    %c0_677 = arith.constant 0 : index
    %1122 = vector.load %arg2[%c0_674, %c54_675, %c0_676, %c0_677] : memref<1x68x16x128xf32, #tpu.memory_space<vmem>>, vector<1x1x16x128xf32>
    %1123 = vector.shape_cast %1122 : vector<1x1x16x128xf32> to vector<16x128xf32>
    %1124 = arith.subf %1123, %1081 : vector<16x128xf32>
    %1125 = math.exp %1124 : vector<16x128xf32>
    %1126 = arith.addf %1112, %1125 : vector<16x128xf32>
    %cst_678 = arith.constant 3.000000e+00 : f32
    %1127 = vector.broadcast %cst_678 : f32 to vector<16x128xf32>
    %1128 = arith.subf %1031, %1127 : vector<16x128xf32>
    %1129 = math.absf %1128 : vector<16x128xf32>
    %cst_679 = arith.constant 1.000000e+00 : f32
    %1130 = vector.broadcast %cst_679 : f32 to vector<16x128xf32>
    %1131 = arith.subf %1130, %1129 : vector<16x128xf32>
    %cst_680 = arith.constant 0.000000e+00 : f32
    %1132 = vector.broadcast %cst_680 : f32 to vector<16x128xf32>
    %1133 = arith.maximumf %1132, %1131 : vector<16x128xf32>
    %1134 = arith.mulf %1123, %1133 : vector<16x128xf32>
    %1135 = arith.addf %1121, %1134 : vector<16x128xf32>
    %c0_681 = arith.constant 0 : index
    %c55_682 = arith.constant 55 : index
    %c0_683 = arith.constant 0 : index
    %c0_684 = arith.constant 0 : index
    %1136 = vector.load %arg2[%c0_681, %c55_682, %c0_683, %c0_684] : memref<1x68x16x128xf32, #tpu.memory_space<vmem>>, vector<1x1x16x128xf32>
    %1137 = vector.shape_cast %1136 : vector<1x1x16x128xf32> to vector<16x128xf32>
    %1138 = arith.subf %1137, %1081 : vector<16x128xf32>
    %1139 = math.exp %1138 : vector<16x128xf32>
    %1140 = arith.addf %1126, %1139 : vector<16x128xf32>
    %cst_685 = arith.constant 4.000000e+00 : f32
    %1141 = vector.broadcast %cst_685 : f32 to vector<16x128xf32>
    %1142 = arith.subf %1031, %1141 : vector<16x128xf32>
    %1143 = math.absf %1142 : vector<16x128xf32>
    %cst_686 = arith.constant 1.000000e+00 : f32
    %1144 = vector.broadcast %cst_686 : f32 to vector<16x128xf32>
    %1145 = arith.subf %1144, %1143 : vector<16x128xf32>
    %cst_687 = arith.constant 0.000000e+00 : f32
    %1146 = vector.broadcast %cst_687 : f32 to vector<16x128xf32>
    %1147 = arith.maximumf %1146, %1145 : vector<16x128xf32>
    %1148 = arith.mulf %1137, %1147 : vector<16x128xf32>
    %1149 = arith.addf %1135, %1148 : vector<16x128xf32>
    %c0_688 = arith.constant 0 : index
    %c56_689 = arith.constant 56 : index
    %c0_690 = arith.constant 0 : index
    %c0_691 = arith.constant 0 : index
    %1150 = vector.load %arg2[%c0_688, %c56_689, %c0_690, %c0_691] : memref<1x68x16x128xf32, #tpu.memory_space<vmem>>, vector<1x1x16x128xf32>
    %1151 = vector.shape_cast %1150 : vector<1x1x16x128xf32> to vector<16x128xf32>
    %1152 = arith.subf %1151, %1081 : vector<16x128xf32>
    %1153 = math.exp %1152 : vector<16x128xf32>
    %1154 = arith.addf %1140, %1153 : vector<16x128xf32>
    %cst_692 = arith.constant 5.000000e+00 : f32
    %1155 = vector.broadcast %cst_692 : f32 to vector<16x128xf32>
    %1156 = arith.subf %1031, %1155 : vector<16x128xf32>
    %1157 = math.absf %1156 : vector<16x128xf32>
    %cst_693 = arith.constant 1.000000e+00 : f32
    %1158 = vector.broadcast %cst_693 : f32 to vector<16x128xf32>
    %1159 = arith.subf %1158, %1157 : vector<16x128xf32>
    %cst_694 = arith.constant 0.000000e+00 : f32
    %1160 = vector.broadcast %cst_694 : f32 to vector<16x128xf32>
    %1161 = arith.maximumf %1160, %1159 : vector<16x128xf32>
    %1162 = arith.mulf %1151, %1161 : vector<16x128xf32>
    %1163 = arith.addf %1149, %1162 : vector<16x128xf32>
    %c0_695 = arith.constant 0 : index
    %c57_696 = arith.constant 57 : index
    %c0_697 = arith.constant 0 : index
    %c0_698 = arith.constant 0 : index
    %1164 = vector.load %arg2[%c0_695, %c57_696, %c0_697, %c0_698] : memref<1x68x16x128xf32, #tpu.memory_space<vmem>>, vector<1x1x16x128xf32>
    %1165 = vector.shape_cast %1164 : vector<1x1x16x128xf32> to vector<16x128xf32>
    %1166 = arith.subf %1165, %1081 : vector<16x128xf32>
    %1167 = math.exp %1166 : vector<16x128xf32>
    %1168 = arith.addf %1154, %1167 : vector<16x128xf32>
    %cst_699 = arith.constant 6.000000e+00 : f32
    %1169 = vector.broadcast %cst_699 : f32 to vector<16x128xf32>
    %1170 = arith.subf %1031, %1169 : vector<16x128xf32>
    %1171 = math.absf %1170 : vector<16x128xf32>
    %cst_700 = arith.constant 1.000000e+00 : f32
    %1172 = vector.broadcast %cst_700 : f32 to vector<16x128xf32>
    %1173 = arith.subf %1172, %1171 : vector<16x128xf32>
    %cst_701 = arith.constant 0.000000e+00 : f32
    %1174 = vector.broadcast %cst_701 : f32 to vector<16x128xf32>
    %1175 = arith.maximumf %1174, %1173 : vector<16x128xf32>
    %1176 = arith.mulf %1165, %1175 : vector<16x128xf32>
    %1177 = arith.addf %1163, %1176 : vector<16x128xf32>
    %c0_702 = arith.constant 0 : index
    %c58_703 = arith.constant 58 : index
    %c0_704 = arith.constant 0 : index
    %c0_705 = arith.constant 0 : index
    %1178 = vector.load %arg2[%c0_702, %c58_703, %c0_704, %c0_705] : memref<1x68x16x128xf32, #tpu.memory_space<vmem>>, vector<1x1x16x128xf32>
    %1179 = vector.shape_cast %1178 : vector<1x1x16x128xf32> to vector<16x128xf32>
    %1180 = arith.subf %1179, %1081 : vector<16x128xf32>
    %1181 = math.exp %1180 : vector<16x128xf32>
    %1182 = arith.addf %1168, %1181 : vector<16x128xf32>
    %cst_706 = arith.constant 7.000000e+00 : f32
    %1183 = vector.broadcast %cst_706 : f32 to vector<16x128xf32>
    %1184 = arith.subf %1031, %1183 : vector<16x128xf32>
    %1185 = math.absf %1184 : vector<16x128xf32>
    %cst_707 = arith.constant 1.000000e+00 : f32
    %1186 = vector.broadcast %cst_707 : f32 to vector<16x128xf32>
    %1187 = arith.subf %1186, %1185 : vector<16x128xf32>
    %cst_708 = arith.constant 0.000000e+00 : f32
    %1188 = vector.broadcast %cst_708 : f32 to vector<16x128xf32>
    %1189 = arith.maximumf %1188, %1187 : vector<16x128xf32>
    %1190 = arith.mulf %1179, %1189 : vector<16x128xf32>
    %1191 = arith.addf %1177, %1190 : vector<16x128xf32>
    %c0_709 = arith.constant 0 : index
    %c59_710 = arith.constant 59 : index
    %c0_711 = arith.constant 0 : index
    %c0_712 = arith.constant 0 : index
    %1192 = vector.load %arg2[%c0_709, %c59_710, %c0_711, %c0_712] : memref<1x68x16x128xf32, #tpu.memory_space<vmem>>, vector<1x1x16x128xf32>
    %1193 = vector.shape_cast %1192 : vector<1x1x16x128xf32> to vector<16x128xf32>
    %1194 = arith.subf %1193, %1081 : vector<16x128xf32>
    %1195 = math.exp %1194 : vector<16x128xf32>
    %1196 = arith.addf %1182, %1195 : vector<16x128xf32>
    %cst_713 = arith.constant 8.000000e+00 : f32
    %1197 = vector.broadcast %cst_713 : f32 to vector<16x128xf32>
    %1198 = arith.subf %1031, %1197 : vector<16x128xf32>
    %1199 = math.absf %1198 : vector<16x128xf32>
    %cst_714 = arith.constant 1.000000e+00 : f32
    %1200 = vector.broadcast %cst_714 : f32 to vector<16x128xf32>
    %1201 = arith.subf %1200, %1199 : vector<16x128xf32>
    %cst_715 = arith.constant 0.000000e+00 : f32
    %1202 = vector.broadcast %cst_715 : f32 to vector<16x128xf32>
    %1203 = arith.maximumf %1202, %1201 : vector<16x128xf32>
    %1204 = arith.mulf %1193, %1203 : vector<16x128xf32>
    %1205 = arith.addf %1191, %1204 : vector<16x128xf32>
    %c0_716 = arith.constant 0 : index
    %c60_717 = arith.constant 60 : index
    %c0_718 = arith.constant 0 : index
    %c0_719 = arith.constant 0 : index
    %1206 = vector.load %arg2[%c0_716, %c60_717, %c0_718, %c0_719] : memref<1x68x16x128xf32, #tpu.memory_space<vmem>>, vector<1x1x16x128xf32>
    %1207 = vector.shape_cast %1206 : vector<1x1x16x128xf32> to vector<16x128xf32>
    %1208 = arith.subf %1207, %1081 : vector<16x128xf32>
    %1209 = math.exp %1208 : vector<16x128xf32>
    %1210 = arith.addf %1196, %1209 : vector<16x128xf32>
    %cst_720 = arith.constant 9.000000e+00 : f32
    %1211 = vector.broadcast %cst_720 : f32 to vector<16x128xf32>
    %1212 = arith.subf %1031, %1211 : vector<16x128xf32>
    %1213 = math.absf %1212 : vector<16x128xf32>
    %cst_721 = arith.constant 1.000000e+00 : f32
    %1214 = vector.broadcast %cst_721 : f32 to vector<16x128xf32>
    %1215 = arith.subf %1214, %1213 : vector<16x128xf32>
    %cst_722 = arith.constant 0.000000e+00 : f32
    %1216 = vector.broadcast %cst_722 : f32 to vector<16x128xf32>
    %1217 = arith.maximumf %1216, %1215 : vector<16x128xf32>
    %1218 = arith.mulf %1207, %1217 : vector<16x128xf32>
    %1219 = arith.addf %1205, %1218 : vector<16x128xf32>
    %c0_723 = arith.constant 0 : index
    %c61_724 = arith.constant 61 : index
    %c0_725 = arith.constant 0 : index
    %c0_726 = arith.constant 0 : index
    %1220 = vector.load %arg2[%c0_723, %c61_724, %c0_725, %c0_726] : memref<1x68x16x128xf32, #tpu.memory_space<vmem>>, vector<1x1x16x128xf32>
    %1221 = vector.shape_cast %1220 : vector<1x1x16x128xf32> to vector<16x128xf32>
    %1222 = arith.subf %1221, %1081 : vector<16x128xf32>
    %1223 = math.exp %1222 : vector<16x128xf32>
    %1224 = arith.addf %1210, %1223 : vector<16x128xf32>
    %cst_727 = arith.constant 1.000000e+01 : f32
    %1225 = vector.broadcast %cst_727 : f32 to vector<16x128xf32>
    %1226 = arith.subf %1031, %1225 : vector<16x128xf32>
    %1227 = math.absf %1226 : vector<16x128xf32>
    %cst_728 = arith.constant 1.000000e+00 : f32
    %1228 = vector.broadcast %cst_728 : f32 to vector<16x128xf32>
    %1229 = arith.subf %1228, %1227 : vector<16x128xf32>
    %cst_729 = arith.constant 0.000000e+00 : f32
    %1230 = vector.broadcast %cst_729 : f32 to vector<16x128xf32>
    %1231 = arith.maximumf %1230, %1229 : vector<16x128xf32>
    %1232 = arith.mulf %1221, %1231 : vector<16x128xf32>
    %1233 = arith.addf %1219, %1232 : vector<16x128xf32>
    %c0_730 = arith.constant 0 : index
    %c62_731 = arith.constant 62 : index
    %c0_732 = arith.constant 0 : index
    %c0_733 = arith.constant 0 : index
    %1234 = vector.load %arg2[%c0_730, %c62_731, %c0_732, %c0_733] : memref<1x68x16x128xf32, #tpu.memory_space<vmem>>, vector<1x1x16x128xf32>
    %1235 = vector.shape_cast %1234 : vector<1x1x16x128xf32> to vector<16x128xf32>
    %1236 = arith.subf %1235, %1081 : vector<16x128xf32>
    %1237 = math.exp %1236 : vector<16x128xf32>
    %1238 = arith.addf %1224, %1237 : vector<16x128xf32>
    %cst_734 = arith.constant 1.100000e+01 : f32
    %1239 = vector.broadcast %cst_734 : f32 to vector<16x128xf32>
    %1240 = arith.subf %1031, %1239 : vector<16x128xf32>
    %1241 = math.absf %1240 : vector<16x128xf32>
    %cst_735 = arith.constant 1.000000e+00 : f32
    %1242 = vector.broadcast %cst_735 : f32 to vector<16x128xf32>
    %1243 = arith.subf %1242, %1241 : vector<16x128xf32>
    %cst_736 = arith.constant 0.000000e+00 : f32
    %1244 = vector.broadcast %cst_736 : f32 to vector<16x128xf32>
    %1245 = arith.maximumf %1244, %1243 : vector<16x128xf32>
    %1246 = arith.mulf %1235, %1245 : vector<16x128xf32>
    %1247 = arith.addf %1233, %1246 : vector<16x128xf32>
    %c0_737 = arith.constant 0 : index
    %c63_738 = arith.constant 63 : index
    %c0_739 = arith.constant 0 : index
    %c0_740 = arith.constant 0 : index
    %1248 = vector.load %arg2[%c0_737, %c63_738, %c0_739, %c0_740] : memref<1x68x16x128xf32, #tpu.memory_space<vmem>>, vector<1x1x16x128xf32>
    %1249 = vector.shape_cast %1248 : vector<1x1x16x128xf32> to vector<16x128xf32>
    %1250 = arith.subf %1249, %1081 : vector<16x128xf32>
    %1251 = math.exp %1250 : vector<16x128xf32>
    %1252 = arith.addf %1238, %1251 : vector<16x128xf32>
    %cst_741 = arith.constant 1.200000e+01 : f32
    %1253 = vector.broadcast %cst_741 : f32 to vector<16x128xf32>
    %1254 = arith.subf %1031, %1253 : vector<16x128xf32>
    %1255 = math.absf %1254 : vector<16x128xf32>
    %cst_742 = arith.constant 1.000000e+00 : f32
    %1256 = vector.broadcast %cst_742 : f32 to vector<16x128xf32>
    %1257 = arith.subf %1256, %1255 : vector<16x128xf32>
    %cst_743 = arith.constant 0.000000e+00 : f32
    %1258 = vector.broadcast %cst_743 : f32 to vector<16x128xf32>
    %1259 = arith.maximumf %1258, %1257 : vector<16x128xf32>
    %1260 = arith.mulf %1249, %1259 : vector<16x128xf32>
    %1261 = arith.addf %1247, %1260 : vector<16x128xf32>
    %c0_744 = arith.constant 0 : index
    %c64_745 = arith.constant 64 : index
    %c0_746 = arith.constant 0 : index
    %c0_747 = arith.constant 0 : index
    %1262 = vector.load %arg2[%c0_744, %c64_745, %c0_746, %c0_747] : memref<1x68x16x128xf32, #tpu.memory_space<vmem>>, vector<1x1x16x128xf32>
    %1263 = vector.shape_cast %1262 : vector<1x1x16x128xf32> to vector<16x128xf32>
    %1264 = arith.subf %1263, %1081 : vector<16x128xf32>
    %1265 = math.exp %1264 : vector<16x128xf32>
    %1266 = arith.addf %1252, %1265 : vector<16x128xf32>
    %cst_748 = arith.constant 1.300000e+01 : f32
    %1267 = vector.broadcast %cst_748 : f32 to vector<16x128xf32>
    %1268 = arith.subf %1031, %1267 : vector<16x128xf32>
    %1269 = math.absf %1268 : vector<16x128xf32>
    %cst_749 = arith.constant 1.000000e+00 : f32
    %1270 = vector.broadcast %cst_749 : f32 to vector<16x128xf32>
    %1271 = arith.subf %1270, %1269 : vector<16x128xf32>
    %cst_750 = arith.constant 0.000000e+00 : f32
    %1272 = vector.broadcast %cst_750 : f32 to vector<16x128xf32>
    %1273 = arith.maximumf %1272, %1271 : vector<16x128xf32>
    %1274 = arith.mulf %1263, %1273 : vector<16x128xf32>
    %1275 = arith.addf %1261, %1274 : vector<16x128xf32>
    %c0_751 = arith.constant 0 : index
    %c65_752 = arith.constant 65 : index
    %c0_753 = arith.constant 0 : index
    %c0_754 = arith.constant 0 : index
    %1276 = vector.load %arg2[%c0_751, %c65_752, %c0_753, %c0_754] : memref<1x68x16x128xf32, #tpu.memory_space<vmem>>, vector<1x1x16x128xf32>
    %1277 = vector.shape_cast %1276 : vector<1x1x16x128xf32> to vector<16x128xf32>
    %1278 = arith.subf %1277, %1081 : vector<16x128xf32>
    %1279 = math.exp %1278 : vector<16x128xf32>
    %1280 = arith.addf %1266, %1279 : vector<16x128xf32>
    %cst_755 = arith.constant 1.400000e+01 : f32
    %1281 = vector.broadcast %cst_755 : f32 to vector<16x128xf32>
    %1282 = arith.subf %1031, %1281 : vector<16x128xf32>
    %1283 = math.absf %1282 : vector<16x128xf32>
    %cst_756 = arith.constant 1.000000e+00 : f32
    %1284 = vector.broadcast %cst_756 : f32 to vector<16x128xf32>
    %1285 = arith.subf %1284, %1283 : vector<16x128xf32>
    %cst_757 = arith.constant 0.000000e+00 : f32
    %1286 = vector.broadcast %cst_757 : f32 to vector<16x128xf32>
    %1287 = arith.maximumf %1286, %1285 : vector<16x128xf32>
    %1288 = arith.mulf %1277, %1287 : vector<16x128xf32>
    %1289 = arith.addf %1275, %1288 : vector<16x128xf32>
    %c0_758 = arith.constant 0 : index
    %c66_759 = arith.constant 66 : index
    %c0_760 = arith.constant 0 : index
    %c0_761 = arith.constant 0 : index
    %1290 = vector.load %arg2[%c0_758, %c66_759, %c0_760, %c0_761] : memref<1x68x16x128xf32, #tpu.memory_space<vmem>>, vector<1x1x16x128xf32>
    %1291 = vector.shape_cast %1290 : vector<1x1x16x128xf32> to vector<16x128xf32>
    %1292 = arith.subf %1291, %1081 : vector<16x128xf32>
    %1293 = math.exp %1292 : vector<16x128xf32>
    %1294 = arith.addf %1280, %1293 : vector<16x128xf32>
    %cst_762 = arith.constant 1.500000e+01 : f32
    %1295 = vector.broadcast %cst_762 : f32 to vector<16x128xf32>
    %1296 = arith.subf %1031, %1295 : vector<16x128xf32>
    %1297 = math.absf %1296 : vector<16x128xf32>
    %cst_763 = arith.constant 1.000000e+00 : f32
    %1298 = vector.broadcast %cst_763 : f32 to vector<16x128xf32>
    %1299 = arith.subf %1298, %1297 : vector<16x128xf32>
    %cst_764 = arith.constant 0.000000e+00 : f32
    %1300 = vector.broadcast %cst_764 : f32 to vector<16x128xf32>
    %1301 = arith.maximumf %1300, %1299 : vector<16x128xf32>
    %1302 = arith.mulf %1291, %1301 : vector<16x128xf32>
    %1303 = arith.addf %1289, %1302 : vector<16x128xf32>
    %c0_765 = arith.constant 0 : index
    %c67_766 = arith.constant 67 : index
    %c0_767 = arith.constant 0 : index
    %c0_768 = arith.constant 0 : index
    %1304 = vector.load %arg2[%c0_765, %c67_766, %c0_767, %c0_768] : memref<1x68x16x128xf32, #tpu.memory_space<vmem>>, vector<1x1x16x128xf32>
    %1305 = vector.shape_cast %1304 : vector<1x1x16x128xf32> to vector<16x128xf32>
    %1306 = arith.subf %1305, %1081 : vector<16x128xf32>
    %1307 = math.exp %1306 : vector<16x128xf32>
    %1308 = arith.addf %1294, %1307 : vector<16x128xf32>
    %cst_769 = arith.constant 1.600000e+01 : f32
    %1309 = vector.broadcast %cst_769 : f32 to vector<16x128xf32>
    %1310 = arith.subf %1031, %1309 : vector<16x128xf32>
    %1311 = math.absf %1310 : vector<16x128xf32>
    %cst_770 = arith.constant 1.000000e+00 : f32
    %1312 = vector.broadcast %cst_770 : f32 to vector<16x128xf32>
    %1313 = arith.subf %1312, %1311 : vector<16x128xf32>
    %cst_771 = arith.constant 0.000000e+00 : f32
    %1314 = vector.broadcast %cst_771 : f32 to vector<16x128xf32>
    %1315 = arith.maximumf %1314, %1313 : vector<16x128xf32>
    %1316 = arith.mulf %1305, %1315 : vector<16x128xf32>
    %1317 = arith.addf %1303, %1316 : vector<16x128xf32>
    %1318 = math.log %1308 : vector<16x128xf32>
    %1319 = arith.addf %1081, %1318 : vector<16x128xf32>
    %1320 = arith.subf %1319, %1317 : vector<16x128xf32>
    %1321 = arith.addf %1027, %1320 : vector<16x128xf32>
    %cst_772 = arith.constant 2.500000e-01 : f32
    %1322 = vector.broadcast %cst_772 : f32 to vector<16x128xf32>
    %1323 = arith.mulf %1321, %1322 : vector<16x128xf32>
    %1324 = arith.mulf %1323, %1 : vector<16x128xf32>
    %1325 = vector.extract_strided_slice %122 {offsets = [0, 0], sizes = [8, 128], strides = [1, 1]} : vector<16x128xf32> to vector<8x128xf32>
    %1326 = vector.extract_strided_slice %122 {offsets = [8, 0], sizes = [8, 128], strides = [1, 1]} : vector<16x128xf32> to vector<8x128xf32>
    %1327 = arith.addf %1325, %1326 : vector<8x128xf32>
    %c0_773 = arith.constant 0 : index
    %c0_774 = arith.constant 0 : index
    %c0_775 = arith.constant 0 : index
    %1328 = vector.load %arg7[%c0_773, %c0_774, %c0_775] : memref<1x8x128xf32, #tpu.memory_space<vmem>>, vector<1x8x128xf32>
    %1329 = vector.shape_cast %1328 : vector<1x8x128xf32> to vector<8x128xf32>
    %1330 = vector.shape_cast %1327 : vector<8x128xf32> to vector<1x8x128xf32>
    tpu.vector_store %arg7[%c0_773, %c0_774, %c0_775], %1330 {strides = array<i32>} : memref<1x8x128xf32, #tpu.memory_space<vmem>>, vector<1x8x128xf32>,
    %1331 = vector.extract_strided_slice %1324 {offsets = [0, 0], sizes = [8, 128], strides = [1, 1]} : vector<16x128xf32> to vector<8x128xf32>
    %1332 = vector.extract_strided_slice %1324 {offsets = [8, 0], sizes = [8, 128], strides = [1, 1]} : vector<16x128xf32> to vector<8x128xf32>
    %1333 = arith.addf %1331, %1332 : vector<8x128xf32>
    %c0_776 = arith.constant 0 : index
    %c0_777 = arith.constant 0 : index
    %c0_778 = arith.constant 0 : index
    %1334 = vector.load %arg8[%c0_776, %c0_777, %c0_778] : memref<1x8x128xf32, #tpu.memory_space<vmem>>, vector<1x8x128xf32>
    %1335 = vector.shape_cast %1334 : vector<1x8x128xf32> to vector<8x128xf32>
    %1336 = vector.shape_cast %1333 : vector<8x128xf32> to vector<1x8x128xf32>
    tpu.vector_store %arg8[%c0_776, %c0_777, %c0_778], %1336 {strides = array<i32>} : memref<1x8x128xf32, #tpu.memory_space<vmem>>, vector<1x8x128xf32>,
    return
  }
  func.func @transform_0(%arg0: i32, %arg1: i32) -> (i32, i32, i32, i32) {
    %c0_i32 = arith.constant 0 : i32
    %c0_i32_0 = arith.constant 0 : i32
    %c0_i32_1 = arith.constant 0 : i32
    return %arg0, %c0_i32, %arg1, %c0_i32_0 : i32, i32, i32, i32
  }
  func.func @transform_1(%arg0: i32, %arg1: i32) -> (i32, i32, i32, i32) {
    %c0_i32 = arith.constant 0 : i32
    %c0_i32_0 = arith.constant 0 : i32
    %c0_i32_1 = arith.constant 0 : i32
    return %arg0, %c0_i32, %arg1, %c0_i32_0 : i32, i32, i32, i32
  }
  func.func @transform_2(%arg0: i32, %arg1: i32) -> (i32, i32, i32) {
    %c0_i32 = arith.constant 0 : i32
    %c0_i32_0 = arith.constant 0 : i32
    %c0_i32_1 = arith.constant 0 : i32
    return %c0_i32, %arg1, %c0_i32_0 : i32, i32, i32
  }
  func.func @transform_3(%arg0: i32, %arg1: i32) -> (i32, i32, i32, i32) {
    %c0_i32 = arith.constant 0 : i32
    %c0_i32_0 = arith.constant 0 : i32
    %c0_i32_1 = arith.constant 0 : i32
    return %arg0, %c0_i32, %arg1, %c0_i32_0 : i32, i32, i32, i32
  }
  func.func @transform_4(%arg0: i32, %arg1: i32) -> (i32, i32, i32) {
    %c0_i32 = arith.constant 0 : i32
    %c0_i32_0 = arith.constant 0 : i32
    return %arg0, %arg1, %c0_i32 : i32, i32, i32
  }
  func.func @transform_5(%arg0: i32, %arg1: i32) -> (i32, i32, i32) {
    %c0_i32 = arith.constant 0 : i32
    %c0_i32_0 = arith.constant 0 : i32
    return %arg0, %arg1, %c0_i32 : i32, i32, i32
  }
  func.func @transform_6(%arg0: i32, %arg1: i32) -> (i32, i32, i32) {
    %c0_i32 = arith.constant 0 : i32
    %c0_i32_0 = arith.constant 0 : i32
    return %arg0, %arg1, %c0_i32 : i32, i32, i32
  }
}

</mosaic_0001>

<bundles_post_ra>
// kernel: tpu_custom_call.1
= control target key start
LH: loop header
LB: loop body
LE: loop exit
PB: predicated region body
PF: predicated region fallthrough
CT: control target
= control target key end

     0   :  { %s7006_s0 = inlined_call_operand.hbm [shape: f32[2,68,16,128], index: 0, kind: input, shape index: {}]   ;;  %s7007_s1 = inlined_call_operand.hbm [shape: f32[2,5,16,128], index: 1, kind: input, shape index: {}]   ;;  %s7008_s2 = inlined_call_operand.hbm [shape: f32[2,16,128], index: 2, kind: input, shape index: {}]   ;;  %s7009_s3 = inlined_call_operand.hbm [shape: f32[2,5,16,128], index: 3, kind: input, shape index: {}]   ;;  %s7010_s4 = inlined_call_operand.hbm [shape: f32[2,16,128], index: 4, kind: input, shape index: {}]   ;;  %s7011_s5 = inlined_call_operand.hbm [shape: f32[2,8,128], index: 5, kind: output, shape index: {0}]   ;;  %s7012_s6 = inlined_call_operand.hbm [shape: f32[2,8,128], index: 6, kind: output, shape index: {1}]  }
   0x1   :  { %7076 = sst [smem:[#allocation49_spill]] %s7008_s2 }
   0x2   :  { %7077 = sst [smem:[#allocation50_spill]] %s7009_s3 }
   0x3   :  { %7078 = sst [smem:[#allocation51_spill]] %s7011_s5 }
   0x4   :  { %7079 = sst [smem:[#allocation52_spill]] %s7012_s6 }
   0x5   :  { %12 = vsyncpa [#allocation3], 0 }
   0x6   :  { %14 = vsyncpa [#allocation3 + $0x1], 0 }
   0x7   :  { %15 = vsyncpa [#allocation6], 0 }
   0x8   :  { %17 = vsyncpa [#allocation6 + $0x1], 0 }
   0x9   :  { %18 = vsyncpa [#allocation9], 0 }
   0xa   :  { %20 = vsyncpa [#allocation9 + $0x1], 0 }
   0xb   :  { %21 = vsyncpa [#allocation4], 0 }
   0xc   :  { %23 = vsyncpa [#allocation4 + $0x1], 0 }
   0xd   :  { %24 = vsyncpa [#allocation13], 0 }
   0xe   :  { %26 = vsyncpa [#allocation13 + $0x1], 0  ;;  %s4612_s21 = smov 0   ;;  %s4614_s22 = smov 0  }
   0xf   :  { %s4616_s23 = smov 0   ;;  %s4618_s24 = smov 0  }
  0x10   :  { %s4620_s25 = smov 0   ;;  %s4622_s26 = smov 0  }
  0x11 LB: > { %7080 = sst [smem:[#allocation20_spill]] %s4540_s21  ;;  %s4643_s27 = sadd.s32 4294967295, %s4560_s26   ;;  %s4560_s26 = sphi %s4622_s26, %s32_s26   ;;  %s4556_s25 = sphi %s4620_s25, %s7208_s25   ;;  %s4552_s24 = sphi %s4618_s24, %s7207_s24   ;;  %s4548_s23 = sphi %s4616_s23, %s7203_s23   ;;  %s4544_s22 = sphi %s4614_s22, %s7206_s22   ;;  %s4540_s21 = sphi %s4612_s21, %s7205_s21  }
  0x12   : > { %7081 = sst [smem:[#allocation21_spill]] %s4548_s23  ;;  %s3491_s28 = sadd.s32 4294967294, %s4560_s26  }
  0x13   : > { %p60_p0 = scmp.ne.s32.totalorder %s4548_s23, %s4544_s22  ;;  %p61_p1 = scmp.eq.s32.totalorder %s4560_s26, 0 }
  0x14   : > { %p66_p2 = scmp.ne.s32.totalorder %s4544_s22, %s4540_s21  ;;  %p7013_p3 = scmp.eq.s32.totalorder %s4643_s27, 0 }
  0x15   : > { %p202_p4 = scmp.eq.s32.totalorder %s4643_s27, 1  ;;  %p4654_p5 = por %p61_p1, %p60_p0 }
  0x16   : > { %p208_p6 = scmp.eq.s32.totalorder %s3491_s28, 1  ;;  %p4660_p7 = por %p7013_p3, %p66_p2 }
  0x17   : > { %s7082_s30 = scalar_select %p4654_p5, 1, 0 }
  0x18   : > { %s7083_s7 = scalar_select %p4660_p7, 1, 0 }
  0x19   : > { %p4664_p8 = por %p202_p4, %p60_p0  ;;  %p4668_p9 = por %p208_p6, %p66_p2 }
  0x1a   : > { %p3492_p10 = scmp.ge.s32.totalorder %s4560_s26, 1  ;;  %p243_p11 = scmp.lt.s32.totalorder %s4560_s26, 3 }
  0x1b   : > { %s7084_s8 = scalar_select %p4664_p8, 1, 0 }
  0x1c   : > { %s7085_s9 = scalar_select %p4668_p9, 1, 0 }
  0x1d   : > { %p4674_p12 = pnand %p3492_p10, %p243_p11  ;;  %s4562_s11 = smov [#allocation7]  }
  0x1e   : > { %7086 = sst [smem:[#allocation22_spill]] %s7085_s9  ;;  %s258_s12 = sshll.u32 %s4562_s11, 4  ;;  %s4678_s12 = int_to_ptr.vmem [resolvable:$true] %s258_s12 }
  0x1f   : > { %s7087_s10 = scalar_select %p4674_p12, 1, 0 }
  0x20   : > { %p3863_p13 = pneg %p4674_p12  ;;  %s44_s14 = sadd.s32 1, %s4556_s25 }
  0x21   : > { %s4692_s15 = sand.u32 1, %s4548_s23   ;;  %p4694_p4 = scmp.ge.s32.totalorder %s44_s14, 2 }
  0x22   : > { %p4686_p2 = pnand %p3863_p13, %p7013_p3  ;;  %s7090_s2 = sld [smem:[#allocation49_spill]] }
  0x23   : > { %s7089_s16 = scalar_select %p4694_p4, 1, 0 }
  0x24   : > { %p4288_p10 = pneg %p4686_p2 }
  0x28   : > { %s4286_s19 = scalar_lea.hbm %s7090_s2, 512 }
  0x29   : > { %p4287_p6 = scmp.ne.s32.totalorder %s7090_s2, %s4286_s19  ;;  %p4293_p0 = scmp.lt.u32.totalorder %s4286_s19, %s7090_s2 }
  0x2b   : > { %p4289_p11 = pnand %p4288_p10, %p4287_p6 }
  0x2d   : > { %p4290_p13 = pneg %p4289_p11 }
  0x2f   : > { %p4295_p3 = pnand %p4293_p0, %p4290_p13 }
  0x31   : > { %4298 = shalt.err (!%p4295_p3)
}
  0x32   : > { %s4299_s9 = scalar_lea.vmem %s4678_s12, 512  ;;  %p4307_p7 = scmp.lt.s32.totalorder %s4678_s12, %s4678_s12 }
  0x33   : > { %p4300_p1 = scmp.ne.s32.totalorder %s4678_s12, %s4299_s9  ;;  %p4308_p12 = scmp.lt.s32.totalorder %s4299_s9, %s4299_s9 }
  0x35   : > { %p4302_p9 = pnand %p4300_p1, %p4288_p10  ;;  %p4309_p5 = por %p4308_p12, %p4307_p7 }
  0x37   : > { %p4303_p8 = pneg %p4302_p9 }
  0x39   : > { %p4310_p4 = pnand %p4309_p5, %p4303_p8 }
  0x3b   : > { %4313 = shalt.err (!%p4310_p4)
}
  0x3c   : > { %s7019_s17 = smov 128   ;;  %s7023_s29 = smov 8  }
  0x3d   : > { %3866 = dma.hbm_to_vmem [thread:$0]  (!%p4686_p2), %s7090_s2, 512, %s4678_s12, [#allocation6], %s7019_s17, %s7019_s17, %s7023_s29  }
  0x3e   : > { %p7091_p3 = scmp.ne.s32.totalorder %s7089_s16, 0  ;;  %p7093_p5 = scmp.ne.s32.totalorder %s7082_s30, 0 }
  0x3f   : > { %p7094_p7 = scmp.lt.s32.totalorder %s4560_s26, 2  ;;  %s7025_s20 = sand.u32 1, %s4560_s26  }
  0x40   : > { %s7210_s14 = smov (%p7091_p3, %s44_s14), 0  ;;  %s7021_s28 = smul.u32 80, %s4692_s15 }
  0x41   : > { %7092 = sst [smem:[#allocation23_spill]] %s7210_s14  ;;  %p4730_p8 = pnand %p7094_p7, %p7093_p5 }
  0x42   : > { %s48_s13 = ssub.s32 %s4556_s25, %s7210_s14  ;;  %s7096_s11 = sadd.s32 1, %s4548_s23 }
  0x43   : > { %p51_p9 = scmp.eq.s32.totalorder %s48_s13, 0  ;;  %s7022_s9 = smul.u32 1280, %s4556_s25 }
  0x44   : > { %s322_s12 = scalar_lea.vmem [#allocation8], %s7021_s28  ;;  %s7098_s3 = sld [smem:[#allocation50_spill]] }
  0x45   : > { %s4741_s21 = scalar_select %p51_p9, %s4548_s23, %s7096_s11  }
  0x46   : > { %s331_s16 = sshll.u32 %s322_s12, 4  ;;  %s4757_s13 = scalar_lea.sflag [#allocation9], %s7025_s20  ;;  %s4753_s16 = int_to_ptr.vmem [resolvable:$true] %s331_s16 }
  0x47   : > { %7097 = sst [smem:[#allocation24_spill]] %s4741_s21  ;;  %p4763_p0 = pneg %p4730_p8 }
  0x4a   : > { %s4751_s17 = scalar_lea.hbm %s7098_s3, %s7022_s9  ;;  %s4319_s28 = scalar_lea.hbm %s7098_s3, 2560 }
  0x4b   : > { %s4314_s11 = scalar_lea.hbm %s4751_s17, 1280  ;;  %p4320_p4 = scmp.lt.u32.totalorder %s4751_s17, %s7098_s3 }
  0x4c   : > { %p4315_p12 = scmp.ne.s32.totalorder %s4751_s17, %s4314_s11  ;;  %p4321_p6 = scmp.lt.u32.totalorder %s4319_s28, %s4314_s11 }
  0x4d   : > { %p4323_p11 = scmp.lt.u32.totalorder %s4314_s11, %s4751_s17 }
  0x4e   : > { %p4317_p1 = pnand %p4763_p0, %p4315_p12  ;;  %p4322_p10 = por %p4321_p6, %p4320_p4 }
  0x50   : > { %p4318_p2 = pneg %p4317_p1  ;;  %p4324_p13 = por %p4323_p11, %p4322_p10 }
  0x52   : > { %p4325_p3 = pnand %p4324_p13, %p4318_p2 }
  0x54   : > { %4328 = shalt.err (!%p4325_p3)
}
  0x55   : > { %s4329_s20 = scalar_lea.vmem %s4753_s16, 1280  ;;  %s4565_s30 = smov [#allocation8]  }
  0x56   : > { %p4330_p5 = scmp.ne.s32.totalorder %s4753_s16, %s4329_s20  ;;  %s4334_s18 = sshll.u32 %s4565_s30, 4  ;;  %s4335_s18 = int_to_ptr.vmem [resolvable:$false] %s4334_s18 }
  0x57   : > { %s4336_s29 = scalar_lea.vmem %s4335_s18, 2560  ;;  %p4337_p12 = scmp.lt.s32.totalorder %s4753_s16, %s4335_s18 }
  0x58   : > { %p4332_p7 = pnand %p4330_p5, %p4763_p0  ;;  %p4338_p1 = scmp.lt.s32.totalorder %s4336_s29, %s4329_s20 }
  0x5a   : > { %p4333_p9 = pneg %p4332_p7  ;;  %p4339_p4 = por %p4338_p1, %p4337_p12 }
  0x5c   : > { %p4340_p6 = pnand %p4339_p4, %p4333_p9 }
  0x5e   : > { %4343 = shalt.err (!%p4340_p6)
}
  0x5f   : > { %s7100_s28 = smov 8   ;;  %s7101_s9 = smov 128  }
  0x60   : > { %3876 = dma.hbm_to_vmem [thread:$0]  (!%p4730_p8), %s4751_s17, 1280, %s4753_s16, %s4757_s13, %s7101_s9, %s7101_s9, %s7100_s28  }
  0x61   : > { %s3823_s11 = smul.u32 1088, %s4692_s15  ;;  %s4349_s23 = scalar_lea.hbm %s7006_s0, 34816 }
  0x62   : > { %s3824_s20 = smul.u32 17408, %s4556_s25 }
  0x63   : > { %s7102_s30 = smul.u32 1280, %s4556_s25  ;;  %s276_s17 = scalar_lea.vmem [#allocation2], %s3823_s11 }
  0x64   : > { %s7103_s3 = smul.u32 80, %s4692_s15  ;;  %s4804_s5 = scalar_lea.hbm %s7006_s0, %s3824_s20 }
  0x65   : > { %s4797_s2 = scalar_lea.hbm %s7007_s1, %s7102_s30  ;;  %s285_s16 = sshll.u32 %s276_s17, 4  ;;  %s4806_s16 = int_to_ptr.vmem [resolvable:$true] %s285_s16 }
  0x66   : > { %s299_s14 = scalar_lea.vmem [#allocation5], %s7103_s3  ;;  %s273_s30 = scalar_lea.sflag [#allocation3], %s4692_s15 }
  0x67   : > { %s308_s21 = sshll.u32 %s299_s14, 4  ;;  %s4344_s18 = scalar_lea.hbm %s4804_s5, 17408  ;;  %s4808_s21 = int_to_ptr.vmem [resolvable:$true] %s308_s21 }
  0x68   : > { %p4345_p2 = scmp.ne.s32.totalorder %s4804_s5, %s4344_s18  ;;  %p4350_p13 = scmp.lt.u32.totalorder %s4804_s5, %s7006_s0 }
  0x69   : > { %p4351_p3 = scmp.lt.u32.totalorder %s4349_s23, %s4344_s18  ;;  %p4353_p7 = scmp.lt.u32.totalorder %s4344_s18, %s4804_s5 }
  0x6a   : > { %p4347_p10 = pnand %p4345_p2, %p4763_p0 }
  0x6b   : > { %p4352_p5 = por %p4351_p3, %p4350_p13 }
  0x6c   : > { %p4348_p11 = pneg %p4347_p10 }
  0x6d   : > { %p4354_p9 = por %p4353_p7, %p4352_p5 }
  0x6f   : > { %p4355_p12 = pnand %p4354_p9, %p4348_p11 }
  0x71   : > { %4358 = shalt.err (!%p4355_p12)
}
  0x72   : > { %s4359_s11 = scalar_lea.vmem %s4806_s16, 17408  ;;  %s4566_s29 = smov [#allocation2]  }
  0x73   : > { %p4360_p1 = scmp.ne.s32.totalorder %s4806_s16, %s4359_s11  ;;  %s4364_s17 = sshll.u32 %s4566_s29, 4  ;;  %s4365_s17 = int_to_ptr.vmem [resolvable:$false] %s4364_s17 }
  0x74   : > { %s4366_s3 = scalar_lea.vmem %s4365_s17, 34816  ;;  %p4367_p2 = scmp.lt.s32.totalorder %s4806_s16, %s4365_s17 }
  0x75   : > { %p4362_p4 = pnand %p4360_p1, %p4763_p0  ;;  %p4368_p10 = scmp.lt.s32.totalorder %s4366_s3, %s4359_s11 }
  0x77   : > { %p4363_p6 = pneg %p4362_p4  ;;  %p4369_p13 = por %p4368_p10, %p4367_p2 }
  0x79   : > { %p4370_p3 = pnand %p4369_p13, %p4363_p6 }
  0x7b   : > { %4373 = shalt.err (!%p4370_p3)
}
  0x7c   : > { %3870 = dma.hbm_to_vmem [thread:$0]  (!%p4730_p8), %s4804_s5, 17408, %s4806_s16, %s273_s30, %s7101_s9, %s7101_s9, %s7100_s28  }
  0x7d   : > { %s7104_s18 = sand.u32 1, %s4560_s26   ;;  %s4374_s23 = scalar_lea.hbm %s4797_s2, 1280 }
  0x7e   : > { %s4839_s6 = scalar_lea.sflag [#allocation6], %s7104_s18  ;;  %p4375_p11 = scmp.ne.s32.totalorder %s4797_s2, %s4374_s23 }
  0x7f   : > { %s4379_s11 = scalar_lea.hbm %s7007_s1, 2560  ;;  %p4380_p9 = scmp.lt.u32.totalorder %s4797_s2, %s7007_s1 }
  0x80   : > { %p4377_p5 = pnand %p4375_p11, %p4763_p0  ;;  %p4381_p12 = scmp.lt.u32.totalorder %s4379_s11, %s4374_s23 }
  0x81   : > { %p4383_p4 = scmp.lt.u32.totalorder %s4374_s23, %s4797_s2 }
  0x82   : > { %p4378_p7 = pneg %p4377_p5  ;;  %p4382_p1 = por %p4381_p12, %p4380_p9 }
  0x84   : > { %p4384_p6 = por %p4383_p4, %p4382_p1 }
  0x86   : > { %p4385_p2 = pnand %p4384_p6, %p4378_p7 }
  0x88   : > { %4388 = shalt.err (!%p4385_p2)
}
  0x89   : > { %s4389_s5 = scalar_lea.vmem %s4808_s21, 1280  ;;  %s4567_s16 = smov [#allocation5]  }
  0x8a   : > { %p4390_p10 = scmp.ne.s32.totalorder %s4808_s21, %s4389_s5  ;;  %s4394_s30 = sshll.u32 %s4567_s16, 4  ;;  %s4395_s30 = int_to_ptr.vmem [resolvable:$false] %s4394_s30 }
  0x8b   : > { %s4396_s3 = scalar_lea.vmem %s4395_s30, 2560  ;;  %p4397_p11 = scmp.lt.s32.totalorder %s4808_s21, %s4395_s30 }
  0x8c   : > { %p4392_p13 = pnand %p4390_p10, %p4763_p0  ;;  %p4398_p5 = scmp.lt.s32.totalorder %s4396_s3, %s4389_s5 }
  0x8e   : > { %p4393_p3 = pneg %p4392_p13  ;;  %p4399_p9 = por %p4398_p5, %p4397_p11 }
  0x90   : > { %p4400_p12 = pnand %p4399_p9, %p4393_p3 }
  0x92   : > { %4403 = shalt.err (!%p4400_p12)
}
  0x93   : > { %3873 = dma.hbm_to_vmem [thread:$0]  (!%p4730_p8), %s4797_s2, 1280, %s4808_s21, %s4839_s6, %s7101_s9, %s7101_s9, %s7100_s28  }
  0x94   : > { %s3498_s18 = sshll.u32 %s4692_s15, 4  ;;  %s3822_s23 = sshll.u32 %s4556_s25, 8 }
  0x95   : > { %s4871_s11 = scalar_lea.hbm %s7010_s4, %s3822_s23  ;;  %s345_s29 = scalar_lea.vmem [#allocation10], %s3498_s18 }
  0x96   : > { %s354_s17 = sshll.u32 %s345_s29, 4  ;;  %s4404_s5 = scalar_lea.hbm %s4871_s11, 256  ;;  %s4873_s17 = int_to_ptr.vmem [resolvable:$true] %s354_s17 }
  0x97   : > { %p4405_p7 = scmp.ne.s32.totalorder %s4871_s11, %s4404_s5  ;;  %s4409_s15 = scalar_lea.hbm %s7010_s4, 512 }
  0x98   : > { %p4410_p6 = scmp.lt.u32.totalorder %s4871_s11, %s7010_s4  ;;  %p4411_p2 = scmp.lt.u32.totalorder %s4409_s15, %s4404_s5 }
  0x99   : > { %p4407_p1 = pnand %p4405_p7, %p4763_p0  ;;  %p4413_p13 = scmp.lt.u32.totalorder %s4404_s5, %s4871_s11 }
  0x9a   : > { %p4412_p10 = por %p4411_p2, %p4410_p6 }
  0x9b   : > { %p4408_p4 = pneg %p4407_p1 }
  0x9c   : > { %p4414_p3 = por %p4413_p13, %p4412_p10 }
  0x9e   : > { %p4415_p11 = pnand %p4414_p3, %p4408_p4 }
  0xa0   : > { %4418 = shalt.err (!%p4415_p11)
}
  0xa1   : > { %s4419_s30 = scalar_lea.vmem %s4873_s17, 256  ;;  %s4568_s3 = smov [#allocation10]  }
  0xa2   : > { %p4420_p5 = scmp.ne.s32.totalorder %s4873_s17, %s4419_s30  ;;  %s4424_s18 = sshll.u32 %s4568_s3, 4  ;;  %s4425_s18 = int_to_ptr.vmem [resolvable:$false] %s4424_s18 }
  0xa3   : > { %s4426_s23 = scalar_lea.vmem %s4425_s18, 512  ;;  %p4427_p7 = scmp.lt.s32.totalorder %s4873_s17, %s4425_s18 }
  0xa4   : > { %p4422_p9 = pnand %p4420_p5, %p4763_p0  ;;  %p4428_p1 = scmp.lt.s32.totalorder %s4426_s23, %s4419_s30 }
  0xa6   : > { %p4423_p12 = pneg %p4422_p9  ;;  %p4429_p6 = por %p4428_p1, %p4427_p7 }
  0xa8   : > { %p4430_p2 = pnand %p4429_p6, %p4423_p12 }
  0xaa   : > { %4433 = shalt.err (!%p4430_p2)
}
  0xab   : > { %3879 = dma.hbm_to_vmem [thread:$0]  (!%p4730_p8), %s4871_s11, 256, %s4873_s17, %s4757_s13, %s7101_s9, %s7101_s9, %s7100_s28  }
  0xac   : > { %p7105_p0 = scmp.ne.s32.totalorder %s7087_s10, 0 }
  0xae   : > { %366 = sbr.rel (%p7105_p0) target bundleno = 790 (0x316), region = 40 }
  0xb5   : > { %s4903_s12 = sand.u32 1, %s4544_s22   ;;  %p7106_p4 = scmp.ne.s32.totalorder %s7083_s7, 0 }
  0xb6   : > { %s3829_s14 = smul.u32 1088, %s4903_s12  ;;  %s369_s20 = scalar_lea.sflag [#allocation3], %s4903_s12 }
  0xb8   : > { %s4907_s29 = scalar_lea.vmem [#allocation2], %s3829_s14 }
  0xb9   : > { %4515 = dma.done.wait (%p7106_p4), %s369_s20, 17408  }
  0xba   : > { %4517 = vsyncadd (%p7106_p4), %s369_s20, 4294949888  ;;  %s377_s10 = sand.u32 1, %s4643_s27   ;;  %s3830_s19 = smul.u32 80, %s4903_s12 }
  0xbb   : > { %s378_s13 = scalar_lea.sflag [#allocation6], %s377_s10 }
  0xbc   : > { %s4915_s28 = scalar_lea.vmem [#allocation5], %s3830_s19 }
  0xbd   : > { %4519 = dma.done.wait (%p7106_p4), %s378_s13, 1280  }
  0xbe   : > { %4521 = vsyncadd (%p7106_p4), %s378_s13, 4294966016  ;;  %p7107_p8 = scmp.eq.s32.totalorder %s4643_s27, 0 }
  0xc0   : > { %4523 = dma.done.wait (%p7107_p8), [#allocation6], 512   ;;  %p7108_p10 = pmov %p7107_p8 }
  0xc1   : > { %s391_s9 = scalar_lea.sflag [#allocation9], %s377_s10  ;;  %s4925_s11 = scalar_lea.vmem [#allocation8], %s3830_s19 }
  0xc2   : > { %4525 = vsyncadd (%p7108_p10), [#allocation6], 4294966784 }
  0xc3   : > { %4527 = dma.done.wait (%p7106_p4), %s391_s9, 1536  }
  0xc4   : > { %4529 = vsyncadd (%p7106_p4), %s391_s9, 4294965760  ;;  %v4932_v0 = vld [vmem:[%s4915_s28 + $0x40] sm:$0xff]  ;;  %v4935_v1 = vld [vmem:[%s4915_s28 + $0x48] sm:$0xff]  ;;  %v4569_v22 = vmov 683565275   ;;  %s3503_s27 = sshll.u32 %s4903_s12, 4 }
  0xc5   : > { %v481_v2 = vand.u32 2147483647, %v4932_v0  ;;  %v484_v3 = vand.u32 2139095040, %v4932_v0  ;;  %v584_v6 = vand.u32 2147483647, %v4935_v1  ;;  %v587_v7 = vand.u32 2139095040, %v4935_v1 }
  0xc6   : > { %v4570_v24 = vmov 2475754826   ;;  %v4571_v26 = vmov 2131351028   ;;  %v4572_v28 = vmov 2102212464  }
  0xc7   : > { %v485_v4 = vshrl.u32 %v484_v3, 23  ;;  %v488_v5 = vand.u32 8388607, %v481_v2  ;;  %v588_v9 = vshrl.u32 %v587_v7, 23  ;;  %v591_v10 = vand.u32 8388607, %v584_v6 }
  0xc8   : > { %v4573_v30 = vmov 920167782   ;;  %v4574_v37 = vmov 1326507024   ;;  %vm483_vm13 = vcmp.lt.s32.totalorder %v4932_v0, 0  ;;  %vm586_vm15 = vcmp.lt.s32.totalorder %v4935_v1, 0 }
  0xc9   : > { %v3514_v8 = vadd.s32 4294967169, %v485_v4  ;;  %v489_v12 = vor.u32 8388608, %v488_v5  ;;  %v3518_v13 = vadd.s32 4294967169, %v588_v9  ;;  %v592_v14 = vor.u32 8388608, %v591_v10  ;;  %s6576_s7 = scalar_lea.vmem [#allocation10], %s3503_s27  ;;  %s3504_s17 = sshll.u32 %s4903_s12, 3 }
  0xca   : > { %vm5041_vm14 = vcmp.le.f32.partialorder %v481_v2, 0.7853982  ;;  %s3818_s5 = sshll.u32 %s4552_s24, 7  ;;  %s444_s2 = scalar_lea.vmem [#allocation11], %s3504_s17 }
  0xcb   : > { %v491_v11 = vadd.s32 1, %v3514_v8  ;;  %v594_v16 = vadd.s32 1, %v3518_v13  ;;  %v4945_v19 = vshll.u32 %v489_v12, 8  ;;  %v4947_v20 = vshll.u32 %v592_v14, 8  ;;  %s3275_s21 = sshll.u32 %s444_s2, 4  ;;  %s7194_s16 = sld [smem:[#allocation51_spill]]  ;;  %s6665_s21 = int_to_ptr.vmem [resolvable:$true] %s3275_s21 }
  0xcc   : > { %s3256_s3 = scalar_lea.sflag [#allocation4], %s4903_s12  ;;  %s4434_s18 = scalar_lea.vmem %s6665_s21, 128 }
  0xcd   : > { %vm492_vm0 = vcmp.gt.s32.totalorder %v491_v11, 0  ;;  %vm595_vm1 = vcmp.gt.s32.totalorder %v594_v16, 0  ;;  %p4435_p13 = scmp.ne.s32.totalorder %s6665_s21, %s4434_s18  ;;  %p7195_p3 = scmp.ne.s32.totalorder %s7084_s8, 0 }
  0xce   : > { %v493_v15 = vsel %vm492_vm0, %v491_v11, 0  ;;  %v596_v42 = vsel %vm595_vm1, %v594_v16, 0  ;;  %v4987_v11 = vld [vmem:[%s4925_s11 + $0x40] sm:$0xff]  ;;  %s4575_s23 = smov [#allocation11]  }
  0xcf   : > { %v494_v17 = vshrl.u32 %v493_v15, 5  ;;  %v495_v18 = vand.u32 31, %v493_v15  ;;  %v597_v45 = vshrl.u32 %v596_v42, 5  ;;  %v598_v46 = vand.u32 31, %v596_v42  ;;  %p4436_p11 = pnand %p4435_p13, %p7195_p3  ;;  %s4438_s14 = sshll.u32 %s4575_s23, 4  ;;  %s4439_s14 = int_to_ptr.vmem [resolvable:$false] %s4438_s14 }
  0xd0   : > { %s4440_s20 = scalar_lea.vmem %s4439_s14, 256  ;;  %p4441_p9 = scmp.lt.s32.totalorder %s6665_s21, %s4439_s14 }
  0xd1   : > { %v496_v21 = vsub.s32 32, %v495_v18  ;;  %v498_v23 = vshll.u32 %v4569_v22, %v495_v18  ;;  %v501_v25 = vshll.u32 %v4570_v24, %v495_v18  ;;  %v504_v27 = vshll.u32 %v4571_v26, %v495_v18  ;;  %s6663_s30 = scalar_lea.hbm %s7194_s16, %s3818_s5  ;;  %p4437_p5 = pneg %p4436_p11 }
  0xd2   : > { %v507_v29 = vshll.u32 %v4572_v28, %v495_v18  ;;  %v510_v31 = vshll.u32 %v4573_v30, %v495_v18  ;;  %vm513_vm2 = vcmp.lt.s32.totalorder %v494_v17, 1  ;;  %vm514_vm3 = vcmp.lt.s32.totalorder %v494_v17, 2  ;;  %p4442_p12 = scmp.lt.s32.totalorder %s4440_s20, %s4434_s18 }
  0xd3   : > { %v497_v32 = vshrl.u32 %v4569_v22, %v496_v21  ;;  %v499_v33 = vshrl.u32 %v4570_v24, %v496_v21  ;;  %v502_v34 = vshrl.u32 %v4571_v26, %v496_v21  ;;  %v505_v35 = vshrl.u32 %v4572_v28, %v496_v21 }
  0xd4   : > { %v508_v36 = vshrl.u32 %v4573_v30, %v496_v21  ;;  %v511_v38 = vshrl.u32 %v4574_v37, %v496_v21  ;;  %vm515_vm4 = vcmp.lt.s32.totalorder %v494_v17, 3  ;;  %vm516_vm5 = vcmp.lt.s32.totalorder %v494_v17, 4  ;;  %p4443_p7 = por %p4442_p12, %p4441_p9 }
  0xd5   : > { %v500_v39 = vor.u32 %v499_v33, %v498_v23  ;;  %v503_v40 = vor.u32 %v502_v34, %v501_v25  ;;  %v506_v41 = vor.u32 %v505_v35, %v504_v27  ;;  %v599_v54 = vsub.s32 32, %v598_v46 }
  0xd6   : > { %v509_v43 = vor.u32 %v508_v36, %v507_v29  ;;  %v512_v44 = vor.u32 %v511_v38, %v510_v31  ;;  %v601_v58 = vshll.u32 %v4569_v22, %v598_v46  ;;  %v604_v8 = vshll.u32 %v4570_v24, %v598_v46  ;;  %p4444_p1 = pnand %p4443_p7, %p4437_p5 }
  0xd7   : > { %v517_v47 = vsel %vm513_vm2, %v497_v32, %v500_v39  ;;  %v518_v48 = vsel %vm516_vm5, %v506_v41, 2102212464  ;;  %v521_v49 = vsel %vm513_vm2, %v500_v39, %v503_v40  ;;  %v525_v50 = vsel %vm513_vm2, %v503_v40, %v506_v41 }
  0xd8   : > { %v519_v51 = vsel %vm515_vm4, %v503_v40, %v518_v48  ;;  %v522_v52 = vsel %vm516_vm5, %v509_v43, 920167782  ;;  %v526_v53 = vsel %vm516_vm5, %v512_v44, 1326507024  ;;  %v600_v62 = vshrl.u32 %v4569_v22, %v599_v54 }
  0xd9   : > { %v520_v55 = vsel %vm514_vm3, %v517_v47, %v519_v51  ;;  %v523_v56 = vsel %vm515_vm4, %v506_v41, %v522_v52  ;;  %v527_v57 = vsel %vm515_vm4, %v509_v43, %v526_v53  ;;  %v602_v7 = vshrl.u32 %v4570_v24, %v599_v54  ;;  %v5014_v53 = vld [vmem:[%s4925_s11 + $0x48] sm:$0xff] }
  0xda   : > { %v524_v59 = vsel %vm514_vm3, %v521_v49, %v523_v56  ;;  %v528_v60 = vsel %vm514_vm3, %v525_v50, %v527_v57  ;;  %v536_v61 = vmul.u32 %v4945_v19, %v520_v55  ;;  %v605_v9 = vshrl.u32 %v4571_v26, %v599_v54 }
  0xdb   : > { %v4974_v63 = vmul.u32.u64.low %v4945_v19, %v528_v60  ;;  %v4975_v3 = vmul.u32.u64.high %v4945_v19, %v528_v60, %v4974_v63  ;;  %v4978_v4 = vmul.u32.u64.low %v4945_v19, %v524_v59  ;;  %v4979_v5 = vmul.u32.u64.high %v4945_v19, %v524_v59, %v4978_v4  ;;  %v3509_v59 = vld [vmem:[%s4915_s28 + $0x28] sm:$0xff] }
  0xdc   : > { %v607_v10 = vshll.u32 %v4571_v26, %v598_v46  ;;  %v608_v12 = vshrl.u32 %v4572_v28, %v599_v54  ;;  %v610_v13 = vshll.u32 %v4572_v28, %v598_v46  ;;  %v611_v14 = vshrl.u32 %v4573_v30, %v599_v54  ;;  %v3511_v63 = vld [vmem:[%s4915_s28 + $0x38] sm:$0xff] }
  0xdd   : > { %v613_v15 = vshll.u32 %v4573_v30, %v598_v46  ;;  %v603_v16 = vor.u32 %v602_v7, %v601_v58  ;;  %v606_v17 = vor.u32 %v605_v9, %v604_v8  ;;  %v614_v18 = vshrl.u32 %v4574_v37, %v599_v54 }
  0xde   : > { %vm616_vm6 = vcmp.lt.s32.totalorder %v597_v45, 1  ;;  %vm538_vm7 = vc.u32 %v4975_v3, %v4978_v4  ;;  %v539_v19 = vadd.s32 1, %v4979_v5  ;;  %v609_v21 = vor.u32 %v608_v12, %v607_v10 }
  0xdf   : > { %v942_v23 = vand.u32 2139095040, %v4987_v11  ;;  %v612_v25 = vor.u32 %v611_v14, %v610_v13  ;;  %v615_v27 = vor.u32 %v614_v18, %v613_v15  ;;  %vm617_vm8 = vcmp.lt.s32.totalorder %v597_v45, 2 }
  0xe0   : > { %vm618_vm9 = vcmp.lt.s32.totalorder %v597_v45, 3  ;;  %v540_v29 = vsel %vm538_vm7, %v539_v19, %v4979_v5  ;;  %vm619_vm10 = vcmp.lt.s32.totalorder %v597_v45, 4  ;;  %v620_v31 = vsel %vm616_vm6, %v600_v62, %v603_v16  ;;  %v3508_v45 = vld [vmem:[%s4915_s28 + $0x20] sm:$0xff]  ;;  %v3510_v62 = vld [vmem:[%s4915_s28 + $0x30] sm:$0xff] }
  0xe1   : > { %v624_v32 = vsel %vm616_vm6, %v603_v16, %v606_v17  ;;  %v541_v33 = vadd.s32 %v540_v29, %v536_v61  ;;  %v621_v34 = vsel %vm619_vm10, %v609_v21, 2102212464  ;;  %v625_v35 = vsel %vm619_vm10, %v612_v25, 920167782 }
  0xe2   : > { %v628_v36 = vsel %vm616_vm6, %v606_v17, %v609_v21  ;;  %v622_v38 = vsel %vm618_vm9, %v606_v17, %v621_v34  ;;  %v626_v39 = vsel %vm618_vm9, %v609_v21, %v625_v35  ;;  %v629_v40 = vsel %vm619_vm10, %v615_v27, 1326507024 }
  0xe3   : > { %v542_v41 = vadd.s32 536870912, %v541_v33  ;;  %v627_v42 = vsel %vm617_vm8, %v624_v32, %v626_v39  ;;  %v630_v43 = vsel %vm618_vm9, %v612_v25, %v629_v40  ;;  %v623_v44 = vsel %vm617_vm8, %v620_v31, %v622_v38 }
  0xe4   : > { %v631_v46 = vsel %vm617_vm8, %v628_v36, %v630_v43  ;;  %v5006_v47 = vmul.u32.u64.low %v4947_v20, %v627_v42  ;;  %v5007_v48 = vmul.u32.u64.high %v4947_v20, %v627_v42, %v5006_v47  ;;  %v943_v52 = vshrl.u32 %v942_v23, 23 }
  0xe5   : > { %v543_v49 = vshrl.u32 %v542_v41, 30  ;;  %v5010_v50 = vmul.u32.u64.low %v4947_v20, %v631_v46  ;;  %v5011_v51 = vmul.u32.u64.high %v4947_v20, %v631_v46, %v5010_v50  ;;  %v639_v55 = vmul.u32 %v4947_v20, %v623_v44 }
  0xe6   : > { %v3538_v56 = vadd.s32 4294967169, %v943_v52  ;;  %v642_v57 = vadd.s32 1, %v5007_v48  ;;  %v939_v58 = vand.u32 2147483647, %v4987_v11  ;;  %v1045_v61 = vand.u32 2139095040, %v5014_v53 }
  0xe7   : > { %v544_v54 = vshll.u32 %v543_v49, 30  ;;  %vm641_vm11 = vc.u32 %v5011_v51, %v5006_v47  ;;  %v473_v8 = vmul.f32 %v3508_v45, %v3508_v45  ;;  %v474_v10 = vmul.f32 %v3509_v59, %v3509_v59 }
  0xe8   : > { %v643_v5 = vsel %vm641_vm11, %v642_v57, %v5007_v48  ;;  %v949_v7 = vadd.s32 1, %v3538_v56  ;;  %v567_v12 = vsub.s32 4, %v543_v49  ;;  %v946_v13 = vand.u32 8388607, %v939_v58 }
  0xe9   : > { %v545_v60 = vsub.s32 %v541_v33, %v544_v54  ;;  %v644_v20 = vadd.s32 %v643_v5, %v639_v55  ;;  %v477_v14 = vmul.f32 %v3510_v62, %v3510_v62  ;;  %v478_v15 = vmul.f32 %v3511_v63, %v3511_v63 }
  0xea   : > { %vm950_vm12 = vcmp.gt.s32.totalorder %v949_v7, 0  ;;  %v1046_v17 = vshrl.u32 %v1045_v61, 23  ;;  %v5028_v21 = vmul.f32 0.083333336, %v473_v8  ;;  %v5031_v27 = vmul.f32 0.083333336, %v474_v10 }
  0xeb   : > { %v547_v9 = vsub.s32 0, %v545_v60  ;;  %v645_v18 = vadd.s32 536870912, %v644_v20  ;;  %v951_v19 = vsel %vm950_vm12, %v949_v7, 0  ;;  %v568_v29 = vsel %vm483_vm13, %v567_v12, %v543_v49 }
  0xec   : > { %v953_v25 = vand.u32 31, %v951_v19  ;;  %v947_v32 = vor.u32 8388608, %v946_v13  ;;  %v5035_v33 = vmul.f32 0.083333336, %v477_v14  ;;  %v5037_v34 = vmul.f32 0.083333336, %v478_v15 }
  0xed   : > { %v3515_v16 = vmin.u32 %v547_v9, %v545_v60  ;;  %v646_v31 = vshrl.u32 %v645_v18, 30  ;;  %v3542_v36 = vadd.s32 4294967169, %v1046_v17  ;;  %v537_v39 = vadd.s32 %v4978_v4, %v4975_v3 }
  0xee   : > { %v5050_v41 = vsel %vm5041_vm14, 0, %v568_v29  ;;  %v640_v42 = vadd.s32 %v5006_v47, %v5011_v51  ;;  %v954_v43 = vsub.s32 32, %v953_v25  ;;  %v5055_v2 = vshrl.u32 %v951_v19, 5 }
  0xef   : > { %v549_v23 = vclz %v3515_v16  ;;  %v647_v40 = vshll.u32 %v646_v31, 30  ;;  %v5057_v48 = vshll.u32 %v947_v32, 8  ;;  %v5059_v50 = vadd.s32 1, %v3542_v36 }
  0xf0   : > { %v670_v54 = vsub.s32 4, %v646_v31  ;;  %v956_v55 = vshll.u32 %v4569_v22, %v953_v25  ;;  %v959_v47 = vshll.u32 %v4570_v24, %v953_v25  ;;  %v957_v45 = vshrl.u32 %v4570_v24, %v954_v43 }
  0xf1   : > { %v3516_v35 = vadd.s32 4294967294, %v549_v23  ;;  %v5053_v46 = vsub.s32 %v644_v20, %v647_v40  ;;  %v960_v57 = vshrl.u32 %v4571_v26, %v954_v43  ;;  %v963_v61 = vshrl.u32 %v4572_v28, %v954_v43 }
  0xf2   : > { %v965_v62 = vshll.u32 %v4572_v28, %v953_v25  ;;  %v955_v7 = vshrl.u32 %v4569_v22, %v954_v43  ;;  %v966_v8 = vshrl.u32 %v4573_v30, %v954_v43  ;;  %v671_v20 = vsel %vm586_vm15, %v670_v54, %v646_v31 }
  0xf3   : > { %vm3517_vm0 = vcmp.lt.s32.totalorder %v3516_v35, 0  ;;  %v650_v52 = vsub.s32 0, %v5053_v46  ;;  %v968_v10 = vshll.u32 %v4573_v30, %v953_v25  ;;  %v969_v12 = vshrl.u32 %v4574_v37, %v954_v43 }
  0xf4   : > { %v552_v44 = vsel %vm3517_vm0, 0, %v3516_v35  ;;  %v958_v15 = vor.u32 %v957_v45, %v956_v55  ;;  %v961_v16 = vor.u32 %v960_v57, %v959_v47  ;;  %v967_v19 = vor.u32 %v966_v8, %v965_v62  ;;  %v5114_v62 = vld [vmem:[%s4925_s11 + $0x20] sm:$0xff] }
  0xf5   : > { %v553_v49 = vsub.s32 32, %v552_v44  ;;  %v554_v3 = vshll.u32 %v545_v60, %v552_v44  ;;  %v557_v4 = vsub.s32 4294967266, %v552_v44  ;;  %v3519_v59 = vmin.u32 %v650_v52, %v5053_v46 }
  0xf6   : > { %v962_v60 = vshll.u32 %v4571_v26, %v953_v25  ;;  %vm971_vm1 = vcmp.lt.s32.totalorder %v5055_v2, 1  ;;  %v970_v29 = vor.u32 %v969_v12, %v968_v10  ;;  %vm972_vm2 = vcmp.lt.s32.totalorder %v5055_v2, 2  ;;  %v5130_v10 = vld [vmem:[%s4925_s11 + $0x28] sm:$0xff] }
  0xf7   : > { %v555_v51 = vshrl.u32 %v537_v39, %v553_v49  ;;  %v558_v56 = vadd.s32 127, %v557_v4  ;;  %v652_v9 = vclz %v3519_v59  ;;  %vm974_vm3 = vcmp.lt.s32.totalorder %v5055_v2, 4 }
  0xf8   : > { %v964_v18 = vor.u32 %v963_v61, %v962_v60  ;;  %vm973_vm5 = vcmp.lt.s32.totalorder %v5055_v2, 3  ;;  %v975_v25 = vsel %vm971_vm1, %v955_v7, %v958_v15  ;;  %v979_v36 = vsel %vm971_vm1, %v958_v15, %v961_v16  ;;  %v5133_v2 = vld [vmem:[%s4925_s11 + $0x30] sm:$0xff] }
  0xf9   : > { %v556_v63 = vor.u32 %v555_v51, %v554_v3  ;;  %v559_v5 = vshll.u32 %v558_v56, 23  ;;  %v3520_v17 = vadd.s32 4294967294, %v652_v9  ;;  %v980_v39 = vsel %vm974_vm3, %v967_v19, 920167782 }
  0xfa   : > { %v976_v31 = vsel %vm974_vm3, %v964_v18, 2102212464  ;;  %v981_v4 = vsel %vm973_vm5, %v964_v18, %v980_v39  ;;  %v983_v52 = vsel %vm971_vm1, %v961_v16, %v964_v18  ;;  %v984_v54 = vsel %vm974_vm3, %v970_v29, 1326507024  ;;  %v5154_v29 = vld [vmem:[%s4925_s11 + $0x38] sm:$0xff] }
  0xfb   : > { %v560_v13 = vor.u32 4788187, %v559_v5  ;;  %v563_v14 = vcvt.s32.f32 %v556_v63  ;;  %vm3521_vm4 = vcmp.lt.s32.totalorder %v3520_v17, 0  ;;  %v977_v49 = vsel %vm973_vm5, %v961_v16, %v976_v31 }
  0xfc   : > { %v655_v35 = vsel %vm3521_vm4, 0, %v3520_v17  ;;  %v985_v51 = vsel %vm973_vm5, %v967_v19, %v984_v54  ;;  %v978_v63 = vsel %vm972_vm2, %v975_v25, %v977_v49  ;;  %vm1053_vm6 = vcmp.gt.s32.totalorder %v5059_v50, 0 }
  0xfd   : > { %v561_v23 = vand.u32 2147483647, %v560_v13  ;;  %v656_v40 = vsub.s32 32, %v655_v35  ;;  %v657_v43 = vshll.u32 %v5053_v46, %v655_v35  ;;  %v660_v44 = vsub.s32 4294967266, %v655_v35 }
  0xfe   : > { %v982_v46 = vsel %vm972_vm2, %v979_v36, %v981_v4  ;;  %v986_v45 = vsel %vm972_vm2, %v983_v52, %v985_v51  ;;  %vm5125_vm7 = vcmp.le.f32.partialorder %v584_v6, 0.7853982  ;;  %v931_v12 = vmul.f32 %v5114_v62, %v5114_v62 }
  0xff   : > { %v564_v32 = vmul.f32 %v563_v14, %v561_v23  ;;  %v658_v55 = vshrl.u32 %v640_v42, %v656_v40  ;;  %v661_v47 = vadd.s32 127, %v660_v44  ;;  %v994_v13 = vmul.u32 %v5057_v48, %v978_v63 }
 0x100   : > { %v5106_v57 = vmul.u32.u64.low %v5057_v48, %v982_v46  ;;  %v5107_v59 = vmul.u32.u64.high %v5057_v48, %v982_v46, %v5106_v57  ;;  %v5119_v5 = vmul.u32.u64.low %v5057_v48, %v986_v45  ;;  %v5120_v7 = vmul.u32.u64.high %v5057_v48, %v986_v45, %v5119_v5 }
 0x101   : > { %v565_v3 = vxor.u32 2147483648, %v564_v32  ;;  %v659_v60 = vor.u32 %v658_v55, %v657_v43  ;;  %v662_v61 = vshll.u32 %v661_v47, 23  ;;  %v1054_v15 = vsel %vm1053_vm6, %v5059_v50, 0 }
 0x102   : > { %v997_v14 = vadd.s32 1, %v5107_v59  ;;  %v673_v16 = vsel %vm5125_vm7, 0, %v671_v20  ;;  %v780_v17 = vadd.s32 3, %v5050_v41  ;;  %v1042_v18 = vand.u32 2147483647, %v5014_v53 }
 0x103   : > { %v566_v56 = vsel %vm483_vm13, %v565_v3, %v564_v32  ;;  %v663_v8 = vor.u32 4788187, %v662_v61  ;;  %v666_v9 = vcvt.s32.f32 %v659_v60  ;;  %v932_v19 = vmul.f32 %v5130_v10, %v5130_v10 }
 0x104   : > { %v569_v42 = vsel %vm5041_vm14, %v4932_v0, %v566_v56  ;;  %v935_v23 = vmul.f32 %v5133_v2, %v5133_v2  ;;  %vm996_vm8 = vc.u32 %v5120_v7, %v5106_v57  ;;  %v5151_v48 = vand.u32 3, %v5050_v41 }
 0x105   : > { %3948 = vcosq.f32 %v569_v42  ;;  %v664_v6 = vand.u32 2147483647, %v663_v8  ;;  %v998_v20 = vsel %vm996_vm8, %v997_v14, %v5107_v59  ;;  %v1056_v25 = vand.u32 31, %v1054_v15 }
 0x106   : > { %3950 = vsinq.f32 %v569_v42  ;;  %v884_v31 = vadd.s32 3, %v673_v16  ;;  %v911_v32 = vsub.f32 %v5028_v21, %v5035_v33  ;;  %v912_v35 = vsub.f32 %v5031_v27, %v5037_v34 }
 0x107   : > { %v667_v50 = vmul.f32 %v666_v9, %v664_v6  ;;  %v999_v36 = vadd.s32 %v998_v20, %v994_v13  ;;  %v5161_v40 = vand.u32 3, %v780_v17  ;;  %v5163_v43 = vmul.f32 0.083333336, %v931_v12 }
 0x108   : > { %v1049_v41 = vand.u32 8388607, %v1042_v18  ;;  %v5167_v44 = vmul.f32 0.083333336, %v932_v19  ;;  %v5171_v49 = vmul.f32 %v5154_v29, %v5154_v29  ;;  %v5173_v3 = vmul.f32 0.083333336, %v935_v23 }
 0x109   : > { %v668_v39 = vxor.u32 2147483648, %v667_v50  ;;  %v1000_v4 = vadd.s32 536870912, %v999_v36  ;;  %vm576_vm9 = vcmp.eq.s32.totalorder %v5151_v48, 0  ;;  %v5178_v54 = vand.u32 3, %v673_v16 }
 0x10a   : > { %v1057_v55 = vsub.s32 32, %v1056_v25  ;;  %vm575_vm10 = vcmp.lt.s32.totalorder %v5151_v48, 2  ;;  %vm579_vm11 = vcmp.eq.s32.totalorder %v5151_v48, 2  ;;  %v5185_v51 = vand.u32 3, %v884_v31 }
 0x10b   : > { %v669_v52 = vsel %vm586_vm15, %v668_v39, %v667_v50  ;;  %v5187_v56 = vshrl.u32 %v1000_v4, 30  ;;  %vm782_vm12 = vcmp.lt.s32.totalorder %v5161_v40, 2  ;;  %vm783_vm13 = vcmp.eq.s32.totalorder %v5161_v40, 0 }
 0x10c   : > { %v672_v46 = vsel %vm5125_vm7, %v4935_v1, %v669_v52  ;;  %v1050_v59 = vor.u32 8388608, %v1049_v41  ;;  %vm786_vm14 = vcmp.eq.s32.totalorder %v5161_v40, 2  ;;  %v1068_v60 = vshll.u32 %v4572_v28, %v1056_v25 }
 0x10d   : > { %3952 = vcosq.f32 %v672_v46  ;;  %v1002_v42 = vshll.u32 %v5187_v56, 30  ;;  %vm682_vm15 = vcmp.eq.s32.totalorder %v5178_v54, 2  ;;  %v1069_v63 = vshrl.u32 %v4573_v30, %v1057_v55 }
 0x10e   : > { %3954 = vsinq.f32 %v672_v46  ;;  %v1071_v5 = vshll.u32 %v4573_v30, %v1056_v25  ;;  %v1072_v38 = vshrl.u32 %v4574_v37, %v1057_v55  ;;  %vm679_vm0 = vcmp.eq.s32.totalorder %v5178_v54, 0 }
 0x10f   : > { %v3949_v47 = vpop.eup %3948  ;;  %vm887_vm1 = vcmp.eq.s32.totalorder %v5185_v51, 0  ;;  %vm890_vm2 = vcmp.eq.s32.totalorder %v5185_v51, 2  ;;  %v5201_v9 = vsub.s32 %v999_v36, %v1002_v42  ;;  %v5203_v12 = vshrl.u32 %v1054_v15, 5 }
 0x110   : > { %v3951_v45 = vpop.eup %3950  ;;  %v580_v61 = vxor.u32 2147483648, %v3949_v47  ;;  %vm573_vm3 = vweird.f32 %v4932_v0  ;;  %vm678_vm4 = vcmp.lt.s32.totalorder %v5178_v54, 2  ;;  %v1062_v13 = vshll.u32 %v4570_v24, %v1056_v25 }
 0x111   : > { %v577_v8 = vxor.u32 2147483648, %v3951_v45  ;;  %v1063_v30 = vshrl.u32 %v4571_v26, %v1057_v55  ;;  %v1065_v37 = vshll.u32 %v4571_v26, %v1056_v25  ;;  %v1066_v14 = vshrl.u32 %v4572_v28, %v1057_v55 }
 0x112   : > { %vm886_vm5 = vcmp.lt.s32.totalorder %v5185_v51, 2  ;;  %v1005_v6 = vsub.s32 0, %v5201_v9  ;;  %v1059_v16 = vshll.u32 %v4569_v22, %v1056_v25  ;;  %v1060_v15 = vshrl.u32 %v4570_v24, %v1057_v55 }
 0x113   : > { %v5215_v17 = vshll.u32 %v1050_v59, 8  ;;  %v581_v19 = vsel %vm579_vm11, %v580_v61, %v3951_v45  ;;  %v995_v23 = vadd.s32 %v5106_v57, %v5120_v7  ;;  %v1070_v50 = vor.u32 %v1069_v63, %v1068_v60 }
 0x114   : > { %v1073_v26 = vor.u32 %v1072_v38, %v1071_v5  ;;  %v578_v28 = vsel %vm576_vm9, %v3949_v47, %v577_v8  ;;  %vm676_vm6 = vweird.f32 %v4935_v1  ;;  %v785_v20 = vsel %vm783_vm13, %v3949_v47, %v577_v8 }
 0x115   : > { %v788_v24 = vsel %vm786_vm14, %v580_v61, %v3951_v45  ;;  %v3539_v25 = vmin.u32 %v1005_v6, %v5201_v9  ;;  %v1058_v31 = vshrl.u32 %v4569_v22, %v1057_v55  ;;  %v1064_v36 = vor.u32 %v1063_v30, %v1062_v13 }
 0x116   : > { %v1067_v39 = vor.u32 %v1066_v14, %v1065_v37  ;;  %vm1077_vm7 = vcmp.lt.s32.totalorder %v5203_v12, 4  ;;  %v1061_v7 = vor.u32 %v1060_v15, %v1059_v16  ;;  %vm1074_vm8 = vcmp.lt.s32.totalorder %v5203_v12, 1 }
 0x117   : > { %v1007_v57 = vclz %v3539_v25  ;;  %vm1076_vm9 = vcmp.lt.s32.totalorder %v5203_v12, 3  ;;  %v3953_v41 = vpop.eup %3952  ;;  %v582_v4 = vsel %vm575_vm10, %v578_v28, %v581_v19  ;;  %v789_v52 = vsel %vm782_vm12, %v785_v20, %v788_v24 }
 0x118   : > { %v1025_v47 = vsub.s32 4, %v5187_v56  ;;  %vm1075_vm11 = vcmp.lt.s32.totalorder %v5203_v12, 2  ;;  %v3955_v22 = vpop.eup %3954  ;;  %v683_v55 = vxor.u32 2147483648, %v3953_v41  ;;  %v1083_v45 = vsel %vm1077_vm7, %v1070_v50, 920167782 }
 0x119   : > { %v3540_v46 = vadd.s32 4294967294, %v1007_v57  ;;  %v1087_v59 = vsel %vm1077_vm7, %v1073_v26, 1326507024  ;;  %v680_v42 = vxor.u32 2147483648, %v3955_v22  ;;  %v1079_v48 = vsel %vm1077_vm7, %v1067_v39, 2102212464 }
 0x11a   : > { %v1086_v40 = vsel %vm1074_vm8, %v1064_v36, %v1067_v39  ;;  %v1088_v60 = vsel %vm1076_vm9, %v1070_v50, %v1087_v59  ;;  %v684_v61 = vsel %vm682_vm15, %v683_v55, %v3955_v22  ;;  %v892_v63 = vsel %vm890_vm2, %v683_v55, %v3955_v22 }
 0x11b   : > { %vm3541_vm10 = vcmp.lt.s32.totalorder %v3540_v46, 0  ;;  %v1082_v5 = vsel %vm1074_vm8, %v1061_v7, %v1064_v36  ;;  %v681_v38 = vsel %vm679_vm0, %v3953_v41, %v680_v42  ;;  %v889_v8 = vsel %vm887_vm1, %v3953_v41, %v680_v42 }
 0x11c   : > { %v1010_v13 = vsel %vm3541_vm10, 0, %v3540_v46  ;;  %v1084_v30 = vsel %vm1076_vm9, %v1067_v39, %v1083_v45  ;;  %v583_v37 = vsel %vm573_vm3, nan, %v582_v4  ;;  %v685_v14 = vsel %vm678_vm4, %v681_v38, %v684_v61 }
 0x11d   : > { %v1011_v6 = vsub.s32 32, %v1010_v13  ;;  %v1089_v16 = vsel %vm1075_vm11, %v1086_v40, %v1088_v60  ;;  %v790_v15 = vsel %vm573_vm3, nan, %v789_v52  ;;  %v893_v19 = vsel %vm886_vm5, %v889_v8, %v892_v63 }
 0x11e   : > { %v1012_v50 = vshll.u32 %v5201_v9, %v1010_v13  ;;  %v1015_v26 = vsub.s32 4294967266, %v1010_v13  ;;  %v1078_v20 = vsel %vm1074_vm8, %v1058_v31, %v1061_v7  ;;  %v1080_v54 = vsel %vm1076_vm9, %v1064_v36, %v1079_v48  ;;  %v5335_v13 = vld [vmem:[%s4915_s28] sm:$0xff] }
 0x11f   : > { %v1013_v28 = vshrl.u32 %v995_v23, %v1011_v6  ;;  %v1085_v24 = vsel %vm1075_vm11, %v1082_v5, %v1084_v30  ;;  %v686_v0 = vsel %vm676_vm6, nan, %v685_v14  ;;  %v894_v9 = vsel %vm676_vm6, nan, %v893_v19  ;;  %v5343_v6 = vld [vmem:[%s4915_s28 + $0x8] sm:$0xff] }
 0x120   : > { %v1016_v25 = vadd.s32 127, %v1015_v26  ;;  %v5281_v51 = vmul.u32.u64.low %v5215_v17, %v1089_v16  ;;  %v5282_v39 = vmul.u32.u64.high %v5215_v17, %v1089_v16, %v5281_v51  ;;  %v895_v23 = vmul.f32 %v583_v37, %v583_v37 }
 0x121   : > { %v897_v57 = vmul.f32 %v790_v15, %v790_v15  ;;  %vm941_vm12 = vcmp.lt.s32.totalorder %v4987_v11, 0  ;;  %v5288_v31 = vmul.f32 0.083333336, %v5171_v49  ;;  %v1014_v36 = vor.u32 %v1013_v28, %v1012_v50  ;;  %v5359_v28 = vld [vmem:[%s4925_s11 + $0x8] sm:$0xff]  ;;  %v5375_v51 = vld [vmem:[%s4907_s29] sm:$0xff] }
 0x122   : > { %v1017_v7 = vshll.u32 %v1016_v25, 23  ;;  %v1026_v41 = vsel %vm941_vm12, %v1025_v47, %v5187_v56  ;;  %v896_v4 = vmul.f32 %v686_v0, %v686_v0  ;;  %v1081_v52 = vsel %vm1075_vm11, %v1078_v20, %v1080_v54 }
 0x123   : > { %v5296_v1 = vmul.u32.u64.low %v5215_v17, %v1085_v24  ;;  %v5297_v22 = vmul.u32.u64.high %v5215_v17, %v1085_v24, %v5296_v1  ;;  %v898_v55 = vmul.f32 %v894_v9, %v894_v9  ;;  %vm5302_vm13 = vcmp.le.f32.partialorder %v939_v58, 0.7853982 }
 0x124   : > { %v1018_v46 = vor.u32 4788187, %v1017_v7  ;;  %v1021_v45 = vcvt.s32.f32 %v1014_v36  ;;  %v899_v56 = vmul.f32 %v895_v23, %v5028_v21  ;;  %v901_v47 = vmul.f32 %v897_v57, %v5035_v33  ;;  %v1501_v7 = vld [vmem:[#allocation7] sm:$0xff] }
 0x125   : > { %v913_v12 = vmul.f32 %v911_v32, %v583_v37  ;;  %v1028_v59 = vsel %vm5302_vm13, 0, %v1026_v41  ;;  %v905_v42 = vmul.f32 %v897_v57, %v5028_v21  ;;  %v1097_v48 = vmul.u32 %v5215_v17, %v1081_v52  ;;  %v5340_v37 = vld [vmem:[%s4925_s11] sm:$0xff]  ;;  %v3506_v52 = vld [vmem:[%s4915_s28 + $0x10] sm:$0xff] }
 0x126   : > { %v1019_v58 = vand.u32 2147483647, %v1018_v46  ;;  %vm1099_vm14 = vc.u32 %v5282_v39, %v5296_v1  ;;  %v900_v40 = vmul.f32 %v896_v4, %v5031_v27  ;;  %v907_v60 = vmul.f32 %v895_v23, %v5035_v33  ;;  %v5389_v41 = vld [vmem:[%s4907_s29 + $0x10] sm:$0xff] }
 0x127   : > { %v914_v32 = vmul.f32 %v912_v35, %v686_v0  ;;  %v1100_v61 = vadd.s32 1, %v5297_v22  ;;  %v902_v21 = vmul.f32 %v898_v55, %v5037_v34  ;;  %v906_v63 = vmul.f32 %v898_v55, %v5031_v27 }
 0x128   : > { %v908_v17 = vmul.f32 %v896_v4, %v5037_v34  ;;  %v1022_v5 = vmul.f32 %v1021_v45, %v1019_v58  ;;  %v5326_v38 = vand.u32 3, %v1028_v59  ;;  %v5332_v35 = vmul.f32 0.5, %v5114_v62  ;;  %v5392_v4 = vld [vmem:[%s4907_s29 + $0x18] sm:$0xff]  ;;  %v3530_v58 = vld [vmem:[%s4925_s11 + $0x10] sm:$0xff] }
 0x129   : > { %v1101_v8 = vsel %vm1099_vm14, %v1100_v61, %v5297_v22  ;;  %v5337_v30 = vmul.f32 %v913_v12, %v790_v15  ;;  %v1238_v14 = vadd.s32 3, %v1028_v59  ;;  %v5345_v16 = vadd.f32 %v901_v47, %v899_v56  ;;  %v1502_v47 = vld [vmem:[#allocation7 + $0x8] sm:$0xff]  ;;  %v5412_v59 = vld [vmem:[%s4907_s29 + $0x20] sm:$0xff] }
 0x12a   : > { %v1023_v27 = vxor.u32 2147483648, %v1022_v5  ;;  %v1102_v34 = vadd.s32 %v1101_v8, %v1097_v48  ;;  %v5347_v19 = vadd.f32 %v907_v60, %v905_v42  ;;  %v5349_v50 = vmul.f32 %v914_v32, %v894_v9  ;;  %v5378_v9 = vld [vmem:[%s4907_s29 + $0x8] sm:$0xff] }
 0x12b   : > { %v5352_v62 = vmul.f32 0.5, %v5130_v10  ;;  %v5354_v15 = vadd.f32 %v902_v21, %v900_v40  ;;  %v5356_v26 = vadd.f32 %v908_v17, %v906_v63  ;;  %v5370_v0 = vsub.f32 %v5335_v13, %v5340_v37  ;;  %v5415_v42 = vld [vmem:[%s4907_s29 + $0x28] sm:$0xff]  ;;  %v5442_v63 = vld [vmem:[%s4907_s29 + $0x30] sm:$0xff]  ;;  %v5445_v17 = vld [vmem:[%s4907_s29 + $0x38] sm:$0xff] }
 0x12c   : > { %v1024_v20 = vsel %vm941_vm12, %v1023_v27, %v1022_v5  ;;  %v1103_v54 = vadd.s32 536870912, %v1102_v34  ;;  %v1510_v25 = vsub.f32 %v5340_v37, %v5332_v35  ;;  %v5382_v57 = vand.u32 3, %v1238_v14  ;;  %v3531_v32 = vld [vmem:[%s4925_s11 + $0x18] sm:$0xff]  ;;  %v5475_v10 = vld [vmem:[%s4907_s29 + $0x50] sm:$0xff] }
 0x12d   : > { %v1027_v24 = vsel %vm5302_vm13, %v4987_v11, %v1024_v20  ;;  %v5386_v36 = vsub.f32 %v5343_v6, %v5359_v28  ;;  %vm1044_vm15 = vcmp.lt.s32.totalorder %v5014_v53, 0  ;;  %v1419_v22 = vmul.f32 %v5347_v19, %v5345_v16 }
 0x12e   : > { %3956 = vcosq.f32 %v1027_v24  ;;  %v5380_v23 = vshrl.u32 %v1103_v54, 30  ;;  %v1421_v55 = vmul.f32 %v5337_v30, %v5337_v30  ;;  %v1511_v49 = vsub.f32 %v5359_v28, %v5352_v62 }
 0x12f   : > { %3958 = vsinq.f32 %v1027_v24  ;;  %vm1037_vm0 = vcmp.eq.s32.totalorder %v5326_v38, 2  ;;  %v1420_v45 = vmul.f32 %v5356_v26, %v5354_v15  ;;  %v1422_v56 = vmul.f32 %v5349_v50, %v5349_v50 }
 0x130   : > { %v1105_v46 = vshll.u32 %v5380_v23, 30  ;;  %v5409_v12 = vmul.f32 0.5, %v5133_v2  ;;  %vm1034_vm1 = vcmp.eq.s32.totalorder %v5326_v38, 0  ;;  %v5420_v48 = vmul.f32 0.5, %v5154_v29 }
 0x131   : > { %v1512_v40 = vsub.f32 %v1501_v7, %v1510_v25  ;;  %v1535_v60 = vmax.f32 %v5375_v51, %v5389_v41  ;;  %v1536_v2 = vmax.f32 %v5378_v9, %v5392_v4  ;;  %vm1033_vm2 = vcmp.lt.s32.totalorder %v5326_v38, 2  ;;  %v5455_v25 = vld [vmem:[%s4907_s29 + $0x40] sm:$0xff]  ;;  %v5458_v7 = vld [vmem:[%s4907_s29 + $0x48] sm:$0xff] }
 0x132   : > { %7115 = vst [vmem:[#allocation25_spill] sm:$0xff] %v5409_v12  ;;  %7116 = vst [vmem:[#allocation26_spill] sm:$0xff] %v5420_v48  ;;  %vm5430_vm3 = vcmp.le.f32.partialorder %v1042_v18, 0.7853982  ;;  %v5434_v21 = vsub.s32 %v1102_v34, %v1105_v46  ;;  %vm1240_vm4 = vcmp.lt.s32.totalorder %v5382_v57, 2  ;;  %vm1241_vm5 = vcmp.eq.s32.totalorder %v5382_v57, 0 }
 0x133   : > { %vm1244_vm6 = vcmp.eq.s32.totalorder %v5382_v57, 2  ;;  %v5439_v29 = vsub.f32 %v3506_v52, %v3530_v58  ;;  %v3507_v18 = vld [vmem:[%s4915_s28 + $0x18] sm:$0xff]  ;;  %vm1031_vm7 = vweird.f32 %v4987_v11  ;;  %v1423_v5 = vsub.f32 %v1419_v22, %v1421_v55  ;;  %7119 = vst [vmem:[#allocation27_spill] sm:$0xff] %v5458_v7 }
 0x134   : > { %v1513_v8 = vsub.f32 %v1502_v47, %v1511_v49  ;;  %v1540_v27 = vmax.f32 %v1535_v60, %v5412_v59  ;;  %v1541_v34 = vmax.f32 %v1536_v2, %v5415_v42  ;;  %v1108_v14 = vsub.s32 0, %v5434_v21  ;;  %v1505_v60 = vld [vmem:[#allocation7 + $0x18] sm:$0xff] }
 0x135   : > { %v1128_v20 = vsub.s32 4, %v5380_v23  ;;  %v1424_v54 = vsub.f32 %v1420_v45, %v1422_v56  ;;  %v1514_v24 = vsub.f32 %v3530_v58, %v5409_v12  ;;  %v1515_v52 = vsub.f32 %v3531_v32, %v5420_v48  ;;  %v1504_v58 = vld [vmem:[#allocation7 + $0x10] sm:$0xff]  ;;  %v5494_v48 = vld [vmem:[%s4907_s29 + $0x60] sm:$0xff] }
 0x136   : > { %v1526_v22 = vmax.f32 %v1512_v40, 0.0  ;;  %v1545_v55 = vmax.f32 %v1540_v27, %v5442_v63  ;;  %v1546_v49 = vmax.f32 %v1541_v34, %v5445_v17  ;;  %v1098_v46 = vadd.s32 %v5296_v1, %v5282_v39  ;;  %v5478_v39 = vld [vmem:[%s4907_s29 + $0x58] sm:$0xff] }
 0x137   : > { %v3543_v45 = vmin.u32 %v1108_v14, %v5434_v21  ;;  %v5466_v56 = vsub.f32 %v3507_v18, %v3531_v32  ;;  %v1527_v40 = vmax.f32 %v1513_v8, 0.0  ;;  %v1129_v18 = vsel %vm1044_vm15, %v1128_v20, %v5380_v23 }
 0x138   : > { %v1550_v27 = vmax.f32 %v1545_v55, %v5455_v25  ;;  %v1551_v34 = vmax.f32 %v1546_v49, %v5458_v7  ;;  %v3957_v1 = vpop.eup %3956  ;;  %v5483_v14 = vmax.f32 %v1423_v5, 0.0  ;;  %v5485_v2 = vmax.f32 %v1424_v54, 0.0  ;;  %v5499_v5 = vld [vmem:[%s4907_s29 + $0x68] sm:$0xff] }
 0x139   : > { %v1110_v32 = vclz %v3543_v45  ;;  %v3959_v8 = vpop.eup %3958  ;;  %v1038_v47 = vxor.u32 2147483648, %v3957_v1  ;;  %v5487_v55 = vsub.f32 %v1504_v58, %v1514_v24  ;;  %v5489_v49 = vsub.f32 %v1505_v60, %v1515_v52 }
 0x13a   : > { %v5491_v33 = vmin.f32 %v1526_v22, 15.99  ;;  %v1035_v45 = vxor.u32 2147483648, %v3959_v8  ;;  %v1555_v7 = vmax.f32 %v1550_v27, %v5475_v10  ;;  %v1556_v23 = vmax.f32 %v1551_v34, %v5478_v39  ;;  %v5517_v27 = vld [vmem:[%s4907_s29 + $0x70] sm:$0xff] }
 0x13b   : > { %7120 = vst [vmem:[#allocation28_spill] sm:$0xff] %v5487_v55  ;;  %7121 = vst [vmem:[#allocation29_spill] sm:$0xff] %v5489_v49  ;;  %v3544_v12 = vadd.s32 4294967294, %v1110_v32  ;;  %v1039_v20 = vsel %vm1037_vm0, %v1038_v47, %v3959_v8  ;;  %v5505_v54 = vsel %vm5430_vm3, 0, %v1129_v18  ;;  %v1246_v24 = vsel %vm1244_vm6, %v1038_v47, %v3959_v8  ;;  %v5525_v18 = vld [vmem:[%s4907_s29 + $0x78] sm:$0xff]  ;;  %v5531_v49 = vld [vmem:[%s4907_s29 + $0x80] sm:$0xff] }
 0x13c   : > { %v5509_v52 = vmin.f32 %v1527_v40, 15.99  ;;  %v1036_v22 = vsel %vm1034_vm1, %v3957_v1, %v1035_v45  ;;  %v1243_v58 = vsel %vm1241_vm5, %v3957_v1, %v1035_v45  ;;  %v1560_v60 = vmax.f32 %v1555_v7, %v5494_v48  ;;  %7122 = vst [vmem:[#allocation30_spill] sm:$0xff] %v5525_v18  ;;  %7123 = vst [vmem:[#allocation31_spill] sm:$0xff] %v5531_v49 }
 0x13d   : > { %vm3545_vm8 = vcmp.lt.s32.totalorder %v3544_v12, 0  ;;  %v1040_v34 = vsel %vm1033_vm2, %v1036_v22, %v1039_v20  ;;  %v1247_v47 = vsel %vm1240_vm4, %v1243_v58, %v1246_v24  ;;  %v1561_v40 = vmax.f32 %v1556_v23, %v5499_v5 }
 0x13e   : > { %v1113_v32 = vsel %vm3545_vm8, 0, %v3544_v12  ;;  %v1041_v1 = vsel %vm1031_vm7, nan, %v1040_v34  ;;  %v1248_v38 = vsel %vm1031_vm7, nan, %v1247_v47  ;;  %v7124_v12 = vsub.f32 %v5163_v43, %v5173_v3  ;;  %v5541_v34 = vld [vmem:[%s4907_s29 + $0x88] sm:$0xff] }
 0x13f   : > { %v1114_v8 = vsub.s32 32, %v1113_v32  ;;  %v1115_v7 = vshll.u32 %v5434_v21, %v1113_v32  ;;  %v1118_v45 = vsub.s32 4294967266, %v1113_v32  ;;  %v1353_v57 = vmul.f32 %v1041_v1, %v1041_v1  ;;  %7125 = vst [vmem:[#allocation32_spill] sm:$0xff] %v5541_v34  ;;  %v5544_v32 = vld [vmem:[%s4907_s29 + $0x90] sm:$0xff] }
 0x140   : > { %v1371_v23 = vmul.f32 %v7124_v12, %v1041_v1  ;;  %v1565_v20 = vmax.f32 %v1560_v60, %v5517_v27  ;;  %v1355_v58 = vmul.f32 %v1248_v38, %v1248_v38  ;;  %v1566_v21 = vmax.f32 %v1561_v40, %v5525_v18  ;;  %7126 = vst [vmem:[#allocation33_spill] sm:$0xff] %v5544_v32  ;;  %v5552_v40 = vld [vmem:[%s4907_s29 + $0x98] sm:$0xff] }
 0x141   : > { %v1116_v24 = vshrl.u32 %v1098_v46, %v1114_v8  ;;  %v1119_v22 = vadd.s32 127, %v1118_v45  ;;  %v1357_v11 = vmul.f32 %v1353_v57, %v5163_v43  ;;  %v1365_v47 = vmul.f32 %v1353_v57, %v5173_v3  ;;  %7127 = vst [vmem:[#allocation34_spill] sm:$0xff] %v5552_v40  ;;  %v5555_v45 = vld [vmem:[%s4907_s29 + $0xa0] sm:$0xff] }
 0x142   : > { %v1373_v55 = vmul.f32 %v1371_v23, %v1248_v38  ;;  %v1570_v1 = vmax.f32 %v1565_v20, %v5531_v49  ;;  %v1359_v46 = vmul.f32 %v1355_v58, %v5173_v3  ;;  %v1363_v8 = vmul.f32 %v1355_v58, %v5163_v43  ;;  %7128 = vst [vmem:[#allocation35_spill] sm:$0xff] %v5555_v45  ;;  %v5564_v43 = vld [vmem:[%s4907_s29 + $0xa8] sm:$0xff] }
 0x143   : > { %v1117_v60 = vor.u32 %v1116_v24, %v1115_v7  ;;  %v1120_v12 = vshll.u32 %v1119_v22, 23  ;;  %v1571_v57 = vmax.f32 %v1566_v21, %v5541_v34  ;;  %v1618_v23 = vand.u32 2147483647, %v5491_v33  ;;  %7129 = vst [vmem:[#allocation36_spill] sm:$0xff] %v5564_v43  ;;  %v5567_v22 = vld [vmem:[%s4907_s29 + $0xb0] sm:$0xff] }
 0x144   : > { %v5558_v18 = vadd.f32 %v1373_v55, %v5337_v30  ;;  %v1575_v38 = vmax.f32 %v1570_v1, %v5544_v32  ;;  %v1361_v3 = vadd.f32 %v1359_v46, %v1357_v11  ;;  %v1367_v24 = vadd.f32 %v1365_v47, %v1363_v8  ;;  %7130 = vst [vmem:[#allocation37_spill] sm:$0xff] %v5567_v22  ;;  %v5575_v47 = vld [vmem:[%s4907_s29 + $0xb8] sm:$0xff] }
 0x145   : > { %v1121_v7 = vor.u32 4788187, %v1120_v12  ;;  %v1124_v20 = vcvt.s32.f32 %v1117_v60  ;;  %v1429_v58 = vmul.f32 %v1373_v55, %v1373_v55  ;;  %v1576_v30 = vmax.f32 %v1571_v57, %v5552_v40  ;;  %7131 = vst [vmem:[#allocation38_spill] sm:$0xff] %v5575_v47  ;;  %v5578_v12 = vld [vmem:[%s4907_s29 + $0xc0] sm:$0xff] }
 0x146   : > { %v1580_v21 = vmax.f32 %v1575_v38, %v5555_v45  ;;  %v1619_v1 = vand.u32 2147483647, %v5509_v52  ;;  %v1379_v34 = vadd.f32 %v1361_v3, %v5345_v16  ;;  %v1381_v60 = vadd.f32 %v1367_v24, %v5347_v19  ;;  %7132 = vst [vmem:[#allocation39_spill] sm:$0xff] %v5578_v12  ;;  %v5587_v19 = vld [vmem:[%s4907_s29 + $0xc8] sm:$0xff]  ;;  %v5606_v40 = vld [vmem:[%s4907_s29 + $0xe0] sm:$0xff] }
 0x147   : > { %v1122_v32 = vand.u32 2147483647, %v1121_v7  ;;  %v1427_v11 = vmul.f32 %v1367_v24, %v1361_v3  ;;  %v1342_v55 = vadd.s32 3, %v5505_v54  ;;  %v1581_v46 = vmax.f32 %v1576_v30, %v5564_v43  ;;  %v5590_v3 = vld [vmem:[%s4907_s29 + $0xd0] sm:$0xff]  ;;  %v5603_v43 = vld [vmem:[%s4907_s29 + $0xd8] sm:$0xff]  ;;  %7136 = vst [vmem:[#allocation43_spill] sm:$0xff] %v5606_v40 }
 0x148   : > { %v1585_v8 = vmax.f32 %v1580_v21, %v5567_v22  ;;  %v3586_v57 = vadd.f32 -1.0, %v5491_v33  ;;  %v1385_v7 = vmul.f32 %v1381_v60, %v1379_v34  ;;  %v1387_v16 = vmul.f32 %v5558_v18, %v5558_v18  ;;  %7133 = vst [vmem:[#allocation40_spill] sm:$0xff] %v5590_v3  ;;  %7135 = vst [vmem:[#allocation42_spill] sm:$0xff] %v5603_v43 }
 0x149   : > { %v1125_v38 = vmul.f32 %v1124_v20, %v1122_v32  ;;  %v3587_v24 = vadd.f32 -1.0, %v5509_v52  ;;  %v1431_v45 = vsub.f32 %v1427_v11, %v1429_v58  ;;  %v5595_v30 = vadd.f32 %v5332_v35, %v5340_v37 }
 0x14a   : > { %v1586_v21 = vmax.f32 %v1581_v46, %v5575_v47  ;;  %v1590_v22 = vmax.f32 %v1585_v8, %v5578_v12  ;;  %v5600_v20 = vand.u32 3, %v5505_v54  ;;  %v1620_v49 = vsub.f32 1.0, %v1618_v23 }
 0x14b   : > { %7134 = vst [vmem:[#allocation41_spill] sm:$0xff] %v5595_v30  ;;  %v1126_v32 = vxor.u32 2147483648, %v1125_v38  ;;  %v1621_v58 = vsub.f32 1.0, %v1619_v1  ;;  %v1433_v11 = vmax.f32 %v1431_v45, 0.0  ;;  %v1636_v46 = vand.u32 2147483647, %v3586_v57 }
 0x14c   : > { %v1591_v35 = vmax.f32 %v1586_v21, %v5587_v19  ;;  %v1595_v30 = vmax.f32 %v1590_v22, %v5590_v3  ;;  %v5612_v54 = vand.u32 3, %v1342_v55  ;;  %v5614_v12 = vsub.f32 %v1385_v7, %v1387_v16  ;;  %v5624_v1 = vld [vmem:[%s4907_s29 + $0xe8] sm:$0xff]  ;;  %v5634_v16 = vld [vmem:[%s4907_s29 + $0xf8] sm:$0xff] }
 0x14d   : > { %v1127_v8 = vsel %vm1044_vm15, %v1126_v32, %v1125_v38  ;;  %v1637_v47 = vand.u32 2147483647, %v3587_v24  ;;  %v5620_v45 = vmul.f32 %v1433_v11, %v5483_v14  ;;  %7137 = vst [vmem:[#allocation44_spill] sm:$0xff] %v5624_v1  ;;  %v5628_v38 = vld [vmem:[%s4907_s29 + $0xf0] sm:$0xff]  ;;  %v1395_v55 = vmul.f32 %v1379_v34, %v5439_v29  ;;  %7139 = vst [vmem:[#allocation46_spill] sm:$0xff] %v5634_v16  ;;  %v5637_v14 = vld [vmem:[%s4907_s29 + $0x100] sm:$0xff] }
 0x14e   : > { %v1130_v23 = vsel %vm5430_vm3, %v5014_v53, %v1127_v8  ;;  %v1596_v22 = vmax.f32 %v1591_v35, %v5603_v43  ;;  %v1600_v57 = vmax.f32 %v1595_v30, %v5606_v40  ;;  %7138 = vst [vmem:[#allocation45_spill] sm:$0xff] %v5628_v38  ;;  %v1399_v7 = vmul.f32 %v1381_v60, %v5370_v0 }
 0x14f   : > { %3960 = vcosq.f32 %v1130_v23  ;;  %v3588_v61 = vadd.f32 -2.0, %v5491_v33  ;;  %7140 = vst [vmem:[#allocation47_spill] sm:$0xff] %v5637_v14  ;;  %v1622_v24 = vmax.f32 %v1620_v49, 0.0  ;;  %v1623_v21 = vmax.f32 %v1621_v58, 0.0  ;;  %v5650_v49 = vld [vmem:[%s4907_s29 + $0x108] sm:$0xff] }
 0x150   : > { %3962 = vsinq.f32 %v1130_v23  ;;  %v1638_v32 = vsub.f32 1.0, %v1636_v46  ;;  %vm1140_vm9 = vcmp.eq.s32.totalorder %v5600_v20, 2  ;;  %v7141_v30 = vsub.f32 %v5340_v37, %v5335_v13  ;;  %7142 = vst [vmem:[#allocation48_spill] sm:$0xff] %v5650_v49 }
 0x151   : > { %v1601_v60 = vmax.f32 %v1596_v22, %v5624_v1  ;;  %v1605_v11 = vmax.f32 %v1600_v57, %v5628_v38  ;;  %v1639_v35 = vsub.f32 1.0, %v1637_v47  ;;  %vm1137_vm11 = vcmp.eq.s32.totalorder %v5600_v20, 0 }
 0x152   : > { %v1411_v34 = vmul.f32 %v7141_v30, %v5558_v18  ;;  %v1391_v8 = vadd.f32 1e-07, %v5614_v12  ;;  %3964 = vrsqrt.f32 %v5620_v45  ;;  %v3589_v58 = vadd.f32 -2.0, %v5509_v52 }
 0x153   : > { %v1656_v46 = vand.u32 2147483647, %v3588_v61  ;;  %vm1136_vm10 = vcmp.lt.s32.totalorder %v5600_v20, 2  ;;  %vm1344_vm12 = vcmp.lt.s32.totalorder %v5612_v54, 2  ;;  %v1397_v13 = vmul.f32 %v1395_v55, %v5439_v29 }
 0x154   : > { %v1401_v37 = vmul.f32 %v1399_v7, %v5370_v0  ;;  %v1606_v18 = vmax.f32 %v1601_v60, %v5634_v16  ;;  %v5659_v47 = vmax.f32 %v1605_v11, %v5637_v14  ;;  %vm1134_vm13 = vweird.f32 %v5014_v53 }
 0x155   : > { %vm1345_vm14 = vcmp.eq.s32.totalorder %v5612_v54, 0  ;;  %vm1348_vm15 = vcmp.eq.s32.totalorder %v5612_v54, 2  ;;  %v1640_v23 = vmax.f32 %v1638_v32, 0.0  ;;  %v1657_v22 = vand.u32 2147483647, %v3589_v58 }
 0x156   : > { %v5665_v57 = vmul.f32 %v1411_v34, %v5439_v29  ;;  %v5668_v55 = vmax.f32 %v1606_v18, %v5650_v49  ;;  %v5671_v0 = vmul.f32 %v1622_v24, %v5375_v51  ;;  %v1641_v7 = vmax.f32 %v1639_v35, 0.0 }
 0x157   : > { %3966 = vrcp.f32 %v1391_v8  ;;  %v1612_v61 = vsub.f32 %v5375_v51, %v5659_v47  ;;  %v5676_v30 = vmul.f32 %v1623_v21, %v5378_v9  ;;  %v5678_v60 = vsub.f32 1.0, %v1656_v46 }
 0x158   : > { %v1403_v32 = vadd.f32 %v1401_v37, %v1397_v13  ;;  %vm1439_vm0 = vcmp.eq.f32.partialorder %v5620_v45, inf  ;;  %vm1441_vm1 = vcmp.eq.f32.partialorder %v5620_v45, 0.0  ;;  %v1626_v29 = vsub.f32 %v5389_v41, %v5659_v47 }
 0x159   : > { %v1442_v24 = vand.u32 2147483648, %v5620_v45  ;;  %v5686_v34 = vmul.f32 %v5389_v41, %v1640_v23  ;;  %v1646_v51 = vsub.f32 %v5412_v59, %v5659_v47  ;;  %v5690_v21 = vsub.f32 1.0, %v1657_v22  ;;  %v3961_v11 = vpop.eup %3960 }
 0x15a   : > { %v1613_v35 = vsub.f32 %v5378_v9, %v5668_v55  ;;  %v1643_v8 = vmul.f32 %v5392_v4, %v1641_v7  ;;  %v5696_v58 = vadd.f32 -3.0, %v5491_v33  ;;  %v5699_v46 = vadd.f32 -3.0, %v5509_v52  ;;  %v3963_v13 = vpop.eup %3962 }
 0x15b   : > { %v1141_v41 = vxor.u32 2147483648, %v3961_v11  ;;  %v1614_v37 = vmul.f32 1.442695, %v1612_v61  ;;  %v1627_v18 = vsub.f32 %v5392_v4, %v5668_v55  ;;  %v1660_v23 = vmax.f32 %v5678_v60, 0.0 }
 0x15c   : > { %v1138_v22 = vxor.u32 2147483648, %v3963_v13  ;;  %v1628_v49 = vmul.f32 1.442695, %v1626_v29  ;;  %v1647_v9 = vsub.f32 %v5415_v42, %v5668_v55  ;;  %v1666_v7 = vsub.f32 %v5442_v63, %v5659_v47  ;;  %v3965_v14 = vpop.eup %3964 }
 0x15d   : > { %v1142_v16 = vsel %vm1140_vm9, %v1141_v41, %v3963_v13  ;;  %v1350_v61 = vsel %vm1348_vm15, %v1141_v41, %v3963_v13  ;;  %v1648_v38 = vmul.f32 1.442695, %v1646_v51  ;;  %v1661_v4 = vmax.f32 %v5690_v21, 0.0 }
 0x15e   : > { %v1139_v60 = vsel %vm1137_vm11, %v3961_v11, %v1138_v22  ;;  %v1347_v29 = vsel %vm1345_vm14, %v3961_v11, %v1138_v22  ;;  %v1438_v1 = vmul.f32 %v3965_v14, %v5620_v45  ;;  %v1616_v40 = vmul.f32 1.442695, %v1613_v35 }
 0x15f   : > { %v1143_v43 = vsel %vm1136_vm10, %v1139_v60, %v1142_v16  ;;  %v1351_v3 = vsel %vm1344_vm12, %v1347_v29, %v1350_v61  ;;  %3968 = vpow2.f32 %v1614_v37  ;;  %v1630_v13 = vmul.f32 1.442695, %v1627_v18 }
 0x160   : > { %v1144_v51 = vsel %vm1134_vm13, nan, %v1143_v43  ;;  %v1352_v21 = vsel %vm1134_vm13, nan, %v1351_v3  ;;  %v1440_v11 = vsel %vm1439_vm0, %v5620_v45, %v1438_v1  ;;  %3970 = vpow2.f32 %v1628_v49 }
 0x161   : > { %v3967_v14 = vpop.eup %3966  ;;  %v1354_v35 = vmul.f32 %v1144_v51, %v1144_v51  ;;  %v1356_v20 = vmul.f32 %v1352_v21, %v1352_v21  ;;  %v7143_v54 = vsub.f32 %v5167_v44, %v5288_v31  ;;  %v1443_v41 = vsel %vm1441_vm1, %v1442_v24, %v1440_v11 }
 0x162   : > { %v1451_v37 = vmul.f32 4.0, %v1443_v41  ;;  %3972 = vpow2.f32 %v1616_v40  ;;  %v1650_v43 = vmul.f32 1.442695, %v1647_v9  ;;  %v1667_v53 = vsub.f32 %v5445_v17, %v5668_v55 }
 0x163   : > { %v1372_v16 = vmul.f32 %v7143_v54, %v1144_v51  ;;  %v1358_v3 = vmul.f32 %v1354_v35, %v5167_v44  ;;  %v1360_v1 = vmul.f32 %v1356_v20, %v5288_v31  ;;  %v1364_v49 = vmul.f32 %v1356_v20, %v5167_v44 }
 0x164   : > { %v1366_v18 = vmul.f32 %v1354_v35, %v5288_v31  ;;  %v1405_v61 = vmul.f32 %v3967_v14, %v1403_v32  ;;  %v1453_v60 = vadd.f32 1e-07, %v1451_v37  ;;  %3974 = vpow2.f32 %v1630_v13 }
 0x165   : > { %v1374_v22 = vmul.f32 %v1372_v16, %v1352_v21  ;;  %v1362_v45 = vadd.f32 %v1360_v1, %v1358_v3  ;;  %v1415_v40 = vmul.f32 %v3967_v14, %v5665_v57  ;;  %3976 = vpow2.f32 %v1648_v38 }
 0x166   : > { %v1368_v24 = vadd.f32 %v1366_v18, %v1364_v49  ;;  %3978 = vrcp.f32 %v1453_v60  ;;  %v1676_v51 = vand.u32 2147483647, %v5696_v58  ;;  %v1677_v32 = vand.u32 2147483647, %v5699_v46 }
 0x167   : > { %v1384_v9 = vadd.f32 %v1374_v22, %v5349_v50  ;;  %v1430_v29 = vmul.f32 %v1374_v22, %v1374_v22  ;;  %v1380_v11 = vadd.f32 %v1362_v45, %v5354_v15  ;;  %v1644_v13 = vadd.f32 %v5686_v34, %v5671_v0 }
 0x168   : > { %v1382_v44 = vadd.f32 %v1368_v24, %v5356_v26  ;;  %v1428_v31 = vmul.f32 %v1368_v24, %v1362_v45  ;;  %v1645_v57 = vadd.f32 %v1643_v8, %v5676_v30  ;;  %v1662_v38 = vmul.f32 %v5412_v59, %v1660_v23 }
 0x169   : > { %v1388_v21 = vmul.f32 %v1384_v9, %v1384_v9  ;;  %v3969_v50 = vpop.eup %3968  ;;  %v1407_v35 = vmul.f32 0.25, %v1405_v61  ;;  %v1417_v20 = vmul.f32 0.5, %v1415_v40  ;;  %3980 = vpow2.f32 %v1650_v43 }
 0x16a   : > { %v1386_v14 = vmul.f32 %v1382_v44, %v1380_v11  ;;  %v1432_v58 = vsub.f32 %v1428_v31, %v1430_v29  ;;  %v3971_v54 = vpop.eup %3970  ;;  %v1663_v15 = vmul.f32 %v5415_v42, %v1661_v4  ;;  %v1668_v26 = vmul.f32 1.442695, %v1666_v7 }
 0x16b   : > { %v1670_v16 = vmul.f32 1.442695, %v1667_v53  ;;  %v1678_v37 = vsub.f32 1.0, %v1676_v51  ;;  %v1679_v0 = vsub.f32 1.0, %v1677_v32  ;;  %v1396_v30 = vmul.f32 %v1380_v11, %v5466_v56 }
 0x16c   : > { %v5751_v46 = vsub.f32 %v1386_v14, %v1388_v21  ;;  %v1434_v41 = vmax.f32 %v1432_v58, 0.0  ;;  %v3973_v34 = vpop.eup %3972  ;;  %v1400_v59 = vmul.f32 %v1382_v44, %v5386_v36  ;;  %v5757_v8 = vadd.f32 %v5352_v62, %v5359_v28  ;;  %v7145_v62 = vld [vmem:[#allocation27_spill] sm:$0xff] }
 0x16d   : > { %v1664_v23 = vadd.f32 %v1662_v38, %v1644_v13  ;;  %v5763_v7 = vadd.f32 %v1417_v20, %v1407_v35  ;;  %v1686_v4 = vsub.f32 %v5455_v25, %v5659_v47  ;;  %v7144_v3 = vsub.f32 %v5359_v28, %v5343_v6 }
 0x16e   : > { %v1392_v43 = vadd.f32 1e-07, %v5751_v46  ;;  %v5761_v42 = vmul.f32 %v1434_v41, %v5485_v2  ;;  %v3975_v53 = vpop.eup %3974  ;;  %v1665_v49 = vadd.f32 %v1663_v15, %v1645_v57  ;;  %3982 = vpow2.f32 %v1668_v26 }
 0x16f   : > { %v1412_v1 = vmul.f32 %v7144_v3, %v1384_v9  ;;  %v1687_v18 = vsub.f32 %v7145_v62, %v5668_v55  ;;  %v3977_v22 = vpop.eup %3976  ;;  %v1632_v61 = vadd.f32 %v3971_v54, %v3969_v50  ;;  %3984 = vpow2.f32 %v1670_v16 }
 0x170   : > { %v1680_v2 = vmax.f32 %v1678_v37, 0.0  ;;  %v1681_v60 = vmax.f32 %v1679_v0, 0.0  ;;  %v3979_v45 = vpop.eup %3978  ;;  %v1398_v24 = vmul.f32 %v1396_v30, %v5466_v56  ;;  %v1402_v40 = vmul.f32 %v1400_v59, %v5386_v36 }
 0x171   : > { %3986 = vrsqrt.f32 %v5761_v42  ;;  %v3592_v6 = vadd.f32 -4.0, %v5491_v33  ;;  %v1457_v28 = vmul.f32 %v3979_v45, %v5614_v12  ;;  %v1688_v9 = vmul.f32 1.442695, %v1686_v4 }
 0x172   : > { %3988 = vrcp.f32 %v1392_v43  ;;  %v3593_v29 = vadd.f32 -4.0, %v5509_v52  ;;  %v5779_v51 = vmul.f32 %v1412_v1, %v5466_v56  ;;  %v1633_v11 = vadd.f32 %v3975_v53, %v3973_v34 }
 0x173   : > { %v1690_v44 = vmul.f32 1.442695, %v1687_v18  ;;  %v1696_v31 = vand.u32 2147483647, %v3592_v6  ;;  %v1459_v32 = vadd.f32 1e-07, %v1457_v28  ;;  %v1652_v21 = vadd.f32 %v3977_v22, %v1632_v61  ;;  %v3981_v57 = vpop.eup %3980 }
 0x174   : > { %v1697_v13 = vand.u32 2147483647, %v3593_v29  ;;  %v1706_v36 = vsub.f32 %v5475_v10, %v5659_v47  ;;  %v1682_v38 = vmul.f32 %v5442_v63, %v1680_v2  ;;  %v3594_v12 = vadd.f32 -5.0, %v5491_v33 }
 0x175   : > { %v1698_v50 = vsub.f32 1.0, %v1696_v31  ;;  %v3595_v14 = vadd.f32 -5.0, %v5509_v52  ;;  %v1404_v35 = vadd.f32 %v1402_v40, %v1398_v24  ;;  %v1683_v56 = vmul.f32 %v5445_v17, %v1681_v60 }
 0x176   : > { %3990 = vpow2.f32 %v1688_v9  ;;  %v1707_v20 = vsub.f32 %v5478_v39, %v5668_v55  ;;  %v1699_v58 = vsub.f32 1.0, %v1697_v13  ;;  %v1716_v54 = vand.u32 2147483647, %v3594_v12 }
 0x177   : > { %3992 = vpow2.f32 %v1690_v44  ;;  %v1726_v15 = vsub.f32 %v5494_v48, %v5659_v47  ;;  %v1708_v63 = vmul.f32 1.442695, %v1706_v36  ;;  %v1717_v26 = vand.u32 2147483647, %v3595_v14 }
 0x178   : > { %3994 = vlog2.f32 %v1459_v32  ;;  %v1727_v16 = vsub.f32 %v5499_v5, %v5668_v55  ;;  %v3983_v41 = vpop.eup %3982  ;;  %v1653_v37 = vadd.f32 %v3981_v57, %v1633_v11  ;;  %v1700_v0 = vmax.f32 %v1698_v50, 0.0 }
 0x179   : > { %v1718_v17 = vsub.f32 1.0, %v1716_v54  ;;  %v3596_v34 = vadd.f32 -6.0, %v5491_v33  ;;  %v3985_v30 = vpop.eup %3984  ;;  %vm1446_vm2 = vcmp.eq.f32.partialorder %v5761_v42, inf  ;;  %v1684_v59 = vadd.f32 %v1682_v38, %v1664_v23 }
 0x17a   : > { %v1710_v43 = vmul.f32 1.442695, %v1707_v20  ;;  %v3597_v4 = vadd.f32 -6.0, %v5509_v52  ;;  %vm1448_vm3 = vcmp.eq.f32.partialorder %v5761_v42, 0.0  ;;  %v1449_v3 = vand.u32 2147483648, %v5761_v42 }
 0x17b   : > { %v3987_v53 = vpop.eup %3986  ;;  %v1701_v1 = vmax.f32 %v1699_v58, 0.0  ;;  %v1728_v18 = vmul.f32 1.442695, %v1726_v15  ;;  %3996 = vpow2.f32 %v1708_v63  ;;  %v1719_v2 = vsub.f32 1.0, %v1717_v26  ;;  %v7146_v58 = vld [vmem:[#allocation30_spill] sm:$0xff] }
 0x17c   : > { %v3989_v22 = vpop.eup %3988  ;;  %v1445_v61 = vmul.f32 %v3987_v53, %v5761_v42  ;;  %v1730_v60 = vmul.f32 1.442695, %v1727_v16  ;;  %v1685_v45 = vadd.f32 %v1683_v56, %v1665_v49  ;;  %v1702_v24 = vmul.f32 %v5455_v25, %v1700_v0 }
 0x17d   : > { %v1720_v23 = vmax.f32 %v1718_v17, 0.0  ;;  %v1736_v40 = vand.u32 2147483647, %v3596_v34  ;;  %v1672_v28 = vadd.f32 %v3983_v41, %v1652_v21  ;;  %3998 = vpow2.f32 %v1710_v43 }
 0x17e   : > { %v1447_v6 = vsel %vm1446_vm2, %v5761_v42, %v1445_v61  ;;  %v1737_v9 = vand.u32 2147483647, %v3597_v4  ;;  %v1406_v29 = vmul.f32 %v3989_v22, %v1404_v35  ;;  %v1703_v44 = vmul.f32 %v7145_v62, %v1701_v1  ;;  %v7148_v4 = vld [vmem:[#allocation32_spill] sm:$0xff] }
 0x17f   : > { %v1450_v11 = vsel %vm1448_vm3, %v1449_v3, %v1447_v6  ;;  %4000 = vpow2.f32 %v1728_v18  ;;  %v1673_v32 = vadd.f32 %v3985_v30, %v1653_v37  ;;  %v1721_v25 = vmax.f32 %v1719_v2, 0.0  ;;  %v7147_v30 = vld [vmem:[#allocation31_spill] sm:$0xff]  ;;  %v7149_v2 = vld [vmem:[#allocation33_spill] sm:$0xff] }
 0x180   : > { %v3991_v31 = vpop.eup %3990  ;;  %v1452_v49 = vmul.f32 4.0, %v1450_v11  ;;  %4002 = vpow2.f32 %v1730_v60  ;;  %v1704_v36 = vadd.f32 %v1702_v24, %v1684_v59  ;;  %v1722_v57 = vmul.f32 %v5475_v10, %v1720_v23 }
 0x181   : > { %v3993_v13 = vpop.eup %3992  ;;  %v1738_v38 = vsub.f32 1.0, %v1736_v40  ;;  %v1746_v21 = vsub.f32 %v5517_v27, %v5659_v47  ;;  %v1416_v42 = vmul.f32 %v3989_v22, %v5779_v51  ;;  %v1739_v14 = vsub.f32 1.0, %v1737_v9 }
 0x182   : > { %v3995_v50 = vpop.eup %3994  ;;  %v1454_v12 = vadd.f32 1e-07, %v1452_v49  ;;  %v3598_v62 = vadd.f32 -7.0, %v5491_v33  ;;  %v5811_v35 = vmul.f32 0.25, %v1406_v29  ;;  %v1692_v56 = vadd.f32 %v3991_v31, %v1672_v28 }
 0x183   : > { %v1705_v20 = vadd.f32 %v1703_v44, %v1685_v45  ;;  %v1747_v54 = vsub.f32 %v7146_v58, %v5668_v55  ;;  %v1693_v10 = vadd.f32 %v3993_v13, %v1673_v32  ;;  %v1723_v15 = vmul.f32 %v5478_v39, %v1721_v25 }
 0x184   : > { %4004 = vrcp.f32 %v1454_v12  ;;  %v3599_v63 = vadd.f32 -7.0, %v5509_v52  ;;  %v1462_v26 = vmul.f32 0.6931472, %v3995_v50  ;;  %v1724_v16 = vadd.f32 %v1722_v57, %v1704_v36 }
 0x185   : > { %v1740_v51 = vmax.f32 %v1738_v38, 0.0  ;;  %v1748_v41 = vmul.f32 1.442695, %v1746_v21  ;;  %v3997_v37 = vpop.eup %3996  ;;  %v1741_v0 = vmax.f32 %v1739_v14, 0.0  ;;  %v1756_v17 = vand.u32 2147483647, %v3598_v62 }
 0x186   : > { %v1757_v34 = vand.u32 2147483647, %v3599_v63  ;;  %v1766_v59 = vsub.f32 %v7147_v30, %v5659_v47  ;;  %v1750_v43 = vmul.f32 1.442695, %v1747_v54  ;;  %v1767_v53 = vsub.f32 %v7148_v4, %v5668_v55 }
 0x187   : > { %v3600_v3 = vadd.f32 -8.0, %v5491_v33  ;;  %v3601_v39 = vadd.f32 -8.0, %v5509_v52  ;;  %v3999_v1 = vpop.eup %3998  ;;  %v1725_v18 = vadd.f32 %v1723_v15, %v1705_v20  ;;  %v1758_v22 = vsub.f32 1.0, %v1756_v17 }
 0x188   : > { %v1759_v61 = vsub.f32 1.0, %v1757_v34  ;;  %v1786_v60 = vsub.f32 %v7149_v2, %v5659_v47  ;;  %v1712_v24 = vadd.f32 %v3997_v37, %v1692_v56  ;;  %4006 = vpow2.f32 %v1748_v41 }
 0x189   : > { %v4001_v45 = vpop.eup %4000  ;;  %v1768_v23 = vmul.f32 1.442695, %v1766_v59  ;;  %v1776_v40 = vand.u32 2147483647, %v3600_v3  ;;  %v1465_v28 = vmul.f32 0.5, %v1462_v26  ;;  %v1742_v9 = vmul.f32 %v5494_v48, %v1740_v51 }
 0x18a   : > { %v4003_v6 = vpop.eup %4002  ;;  %v1743_v29 = vmul.f32 %v5499_v5, %v1741_v0  ;;  %v1777_v11 = vand.u32 2147483647, %v3601_v39  ;;  %v1418_v44 = vmul.f32 0.5, %v1416_v42  ;;  %4008 = vpow2.f32 %v1750_v43  ;;  %v7150_v5 = vld [vmem:[#allocation34_spill] sm:$0xff] }
 0x18b   : > { %v1760_v31 = vmax.f32 %v1758_v22, 0.0  ;;  %v1770_v49 = vmul.f32 1.442695, %v1767_v53  ;;  %v1713_v32 = vadd.f32 %v3999_v1, %v1693_v10  ;;  %v1761_v25 = vmax.f32 %v1759_v61, 0.0 }
 0x18c   : > { %v1778_v13 = vsub.f32 1.0, %v1776_v40  ;;  %v1788_v36 = vmul.f32 1.442695, %v1786_v60  ;;  %v1732_v57 = vadd.f32 %v4001_v45, %v1712_v24  ;;  %4010 = vpow2.f32 %v1768_v23 }
 0x18d   : > { %v1779_v38 = vsub.f32 1.0, %v1777_v11  ;;  %v3602_v21 = vadd.f32 -9.0, %v5491_v33  ;;  %v1469_v12 = vadd.f32 %v5763_v7, %v1465_v28  ;;  %v1744_v48 = vadd.f32 %v1742_v9, %v1724_v16  ;;  %v7151_v16 = vld [vmem:[#allocation35_spill] sm:$0xff] }
 0x18e   : > { %v4005_v50 = vpop.eup %4004  ;;  %v1745_v14 = vadd.f32 %v1743_v29, %v1725_v18  ;;  %v1787_v42 = vsub.f32 %v7150_v5, %v5668_v55  ;;  %v1762_v56 = vmul.f32 %v5517_v27, %v1760_v31  ;;  %4012 = vpow2.f32 %v1770_v49  ;;  %v7153_v29 = vld [vmem:[#allocation37_spill] sm:$0xff] }
 0x18f   : > { %v1458_v62 = vmul.f32 %v4005_v50, %v5751_v46  ;;  %v3603_v20 = vadd.f32 -9.0, %v5509_v52  ;;  %v1763_v54 = vmul.f32 %v7146_v58, %v1761_v25  ;;  %v1780_v10 = vmax.f32 %v1778_v13, 0.0  ;;  %v7152_v46 = vld [vmem:[#allocation36_spill] sm:$0xff] }
 0x190   : > { %4014 = vpow2.f32 %v1788_v36  ;;  %v1796_v15 = vand.u32 2147483647, %v3602_v21  ;;  %v1781_v26 = vmax.f32 %v1779_v38, 0.0  ;;  %v1806_v51 = vsub.f32 %v7151_v16, %v5659_v47 }
 0x191   : > { %v1460_v63 = vadd.f32 1e-07, %v1458_v62  ;;  %v1797_v7 = vand.u32 2147483647, %v3603_v20  ;;  %v1471_v41 = vmax.f32 %v1469_v12, 1e-07  ;;  %v1807_v27 = vsub.f32 %v7152_v46, %v5668_v55 }
 0x192   : > { %v1790_v37 = vmul.f32 1.442695, %v1787_v42  ;;  %v1798_v0 = vsub.f32 1.0, %v1796_v15  ;;  %v4007_v17 = vpop.eup %4006  ;;  %v3604_v58 = vadd.f32 -10.0, %v5491_v33  ;;  %v3605_v59 = vadd.f32 -10.0, %v5509_v52 }
 0x193   : > { %4016 = vlog2.f32 %v1460_v63  ;;  %v1799_v34 = vsub.f32 1.0, %v1797_v7  ;;  %v1733_v43 = vadd.f32 %v4003_v6, %v1713_v32  ;;  %v1764_v53 = vadd.f32 %v1762_v56, %v1744_v48 }
 0x194   : > { %v1765_v3 = vadd.f32 %v1763_v54, %v1745_v14  ;;  %v1782_v39 = vmul.f32 %v7147_v30, %v1780_v10  ;;  %v4009_v1 = vpop.eup %4008  ;;  %v1783_v18 = vmul.f32 %v7148_v4, %v1781_v26  ;;  %v1808_v22 = vmul.f32 1.442695, %v1806_v51  ;;  %v7154_v4 = vld [vmem:[#allocation38_spill] sm:$0xff]  ;;  %v7155_v14 = vld [vmem:[#allocation39_spill] sm:$0xff] }
 0x195   : > { %v1816_v61 = vand.u32 2147483647, %v3604_v58  ;;  %v1817_v60 = vand.u32 2147483647, %v3605_v59  ;;  %v1468_v45 = vadd.f32 %v1418_v44, %v5811_v35  ;;  %v1752_v24 = vadd.f32 %v4007_v17, %v1732_v57 }
 0x196   : > { %4018 = vpow2.f32 %v1790_v37  ;;  %v1800_v23 = vmax.f32 %v1798_v0, 0.0  ;;  %v4011_v40 = vpop.eup %4010  ;;  %v5844_v28 = vmin.f32 %v1471_v41, 100.0  ;;  %v1801_v9 = vmax.f32 %v1799_v34, 0.0 }
 0x197   : > { %v1810_v6 = vmul.f32 1.442695, %v1807_v27  ;;  %v1826_v11 = vsub.f32 %v7153_v29, %v5659_v47  ;;  %v1753_v30 = vadd.f32 %v4009_v1, %v1733_v43  ;;  %v1784_v31 = vadd.f32 %v1782_v39, %v1764_v53 }
 0x198   : > { %v1827_v49 = vsub.f32 %v7154_v4, %v5668_v55  ;;  %v3606_v32 = vadd.f32 -11.0, %v5491_v33  ;;  %v4013_v25 = vpop.eup %4012  ;;  %v1785_v35 = vadd.f32 %v1783_v18, %v1765_v3  ;;  %4020 = vpow2.f32 %v1808_v22 }
 0x199   : > { %v1818_v44 = vsub.f32 1.0, %v1816_v61  ;;  %v1819_v13 = vsub.f32 1.0, %v1817_v60  ;;  %v1772_v57 = vadd.f32 %v4011_v40, %v1752_v24  ;;  %v1802_v38 = vmul.f32 %v7149_v2, %v1800_v23  ;;  %v7156_v61 = vld [vmem:[#allocation40_spill] sm:$0xff] }
 0x19a   : > { %v4015_v36 = vpop.eup %4014  ;;  %v3607_v21 = vadd.f32 -11.0, %v5509_v52  ;;  %v1836_v50 = vand.u32 2147483647, %v3606_v32  ;;  %v1803_v12 = vmul.f32 %v7150_v5, %v1801_v9  ;;  %4022 = vpow2.f32 %v1810_v6 }
 0x19b   : > { %v1828_v48 = vmul.f32 1.442695, %v1826_v11  ;;  %v1846_v42 = vsub.f32 %v7155_v14, %v5659_v47  ;;  %v1475_v62 = vsub.f32 0.0, %v5844_v28  ;;  %v1830_v56 = vmul.f32 1.442695, %v1827_v49  ;;  %v7157_v28 = vld [vmem:[#allocation42_spill] sm:$0xff] }
 0x19c   : > { %v1837_v20 = vand.u32 2147483647, %v3607_v21  ;;  %v1847_v54 = vsub.f32 %v5587_v19, %v5668_v55  ;;  %v1820_v15 = vmax.f32 %v1818_v44, 0.0  ;;  %v1821_v2 = vmax.f32 %v1819_v13, 0.0 }
 0x19d   : > { %v4017_v10 = vpop.eup %4016  ;;  %v1838_v63 = vsub.f32 1.0, %v1836_v50  ;;  %v3608_v26 = vadd.f32 -12.0, %v5491_v33  ;;  %v1773_v5 = vadd.f32 %v4013_v25, %v1753_v30  ;;  %v1792_v51 = vadd.f32 %v4015_v36, %v1772_v57  ;;  %v7158_v50 = vld [vmem:[#allocation43_spill] sm:$0xff] }
 0x19e   : > { %v1464_v7 = vmul.f32 0.6931472, %v4017_v10  ;;  %v1804_v41 = vadd.f32 %v1802_v38, %v1784_v31  ;;  %v1805_v37 = vadd.f32 %v1803_v12, %v1785_v35  ;;  %4024 = vpow2.f32 %v1828_v48  ;;  %v7159_v48 = vld [vmem:[#allocation44_spill] sm:$0xff] }
 0x19f   : > { %v1839_v0 = vsub.f32 1.0, %v1837_v20  ;;  %v1848_v27 = vmul.f32 1.442695, %v1846_v42  ;;  %4026 = vpow2.f32 %v1830_v56  ;;  %v1850_v58 = vmul.f32 1.442695, %v1847_v54 }
 0x1a0   : > { %v4019_v17 = vpop.eup %4018  ;;  %v1466_v34 = vmul.f32 0.5, %v1464_v7  ;;  %v3609_v59 = vadd.f32 -12.0, %v5509_v52  ;;  %v1822_v43 = vmul.f32 %v7151_v16, %v1820_v15  ;;  %v1823_v53 = vmul.f32 %v7152_v46, %v1821_v2  ;;  %v7160_v2 = vld [vmem:[#allocation28_spill] sm:$0xff] }
 0x1a1   : > { %v1840_v3 = vmax.f32 %v1838_v63, 0.0  ;;  %v1856_v39 = vand.u32 2147483647, %v3608_v26  ;;  %v1841_v18 = vmax.f32 %v1839_v0, 0.0  ;;  %v1866_v60 = vsub.f32 %v7156_v61, %v5659_v47 }
 0x1a2   : > { %v1470_v1 = vadd.f32 %v1468_v45, %v1466_v34  ;;  %v1857_v22 = vand.u32 2147483647, %v3609_v59  ;;  %v4021_v24 = vpop.eup %4020  ;;  %v1793_v23 = vadd.f32 %v4019_v17, %v1773_v5  ;;  %4028 = vpow2.f32 %v1848_v27 }
 0x1a3   : > { %v1858_v40 = vsub.f32 1.0, %v1856_v39  ;;  %v1867_v9 = vsub.f32 %v7157_v28, %v5668_v55  ;;  %4030 = vpow2.f32 %v1850_v58  ;;  %v1868_v16 = vmul.f32 1.442695, %v1866_v60 }
 0x1a4   : > { %v1859_v6 = vsub.f32 1.0, %v1857_v22  ;;  %v3610_v46 = vadd.f32 -13.0, %v5491_v33  ;;  %v4023_v11 = vpop.eup %4022  ;;  %v1472_v30 = vmax.f32 %v1470_v1, 1e-07  ;;  %v1477_v45 = vmul.f32 1.442695, %v1475_v62 }
 0x1a5   : > { %v1824_v31 = vadd.f32 %v1822_v43, %v1804_v41  ;;  %v1870_v49 = vmul.f32 1.442695, %v1867_v9  ;;  %v1812_v32 = vadd.f32 %v4021_v24, %v1792_v51  ;;  %v1825_v25 = vadd.f32 %v1823_v53, %v1805_v37 }
 0x1a6   : > { %v1842_v35 = vmul.f32 %v7153_v29, %v1840_v3  ;;  %v1843_v44 = vmul.f32 %v7154_v4, %v1841_v18  ;;  %v1860_v13 = vmax.f32 %v1858_v40, 0.0  ;;  %v1861_v36 = vmax.f32 %v1859_v6, 0.0  ;;  %v7162_v18 = vld [vmem:[#allocation46_spill] sm:$0xff] }
 0x1a7   : > { %v3611_v57 = vadd.f32 -13.0, %v5509_v52  ;;  %v1876_v38 = vand.u32 2147483647, %v3610_v46  ;;  %v1813_v21 = vadd.f32 %v4023_v11, %v1793_v23  ;;  %4032 = vpow2.f32 %v1868_v16 }
 0x1a8   : > { %v1886_v12 = vsub.f32 %v7158_v50, %v5659_v47  ;;  %v1887_v42 = vsub.f32 %v7159_v48, %v5668_v55  ;;  %v4025_v62 = vpop.eup %4024  ;;  %v1474_v56 = vmin.f32 %v1472_v30, 100.0  ;;  %4034 = vpow2.f32 %v1870_v49 }
 0x1a9   : > { %v1877_v20 = vand.u32 2147483647, %v3611_v57  ;;  %v1878_v29 = vsub.f32 1.0, %v1876_v38  ;;  %v4027_v54 = vpop.eup %4026  ;;  %v1844_v4 = vadd.f32 %v1842_v35, %v1824_v31  ;;  %v1845_v10 = vadd.f32 %v1843_v44, %v1825_v25  ;;  %v7163_v35 = vld [vmem:[#allocation47_spill] sm:$0xff] }
 0x1aa   : > { %v1888_v15 = vmul.f32 1.442695, %v1886_v12  ;;  %v1954_v63 = vmax.f32 %v7160_v2, 0.0  ;;  %v1862_v26 = vmul.f32 %v7155_v14, %v1860_v13  ;;  %v1863_v7 = vmul.f32 %v5587_v19, %v1861_v36  ;;  %v7161_v14 = vld [vmem:[#allocation45_spill] sm:$0xff]  ;;  %v7164_v36 = vld [vmem:[#allocation48_spill] sm:$0xff] }
 0x1ab   : > { %v1879_v5 = vsub.f32 1.0, %v1877_v20  ;;  %v1890_v51 = vmul.f32 1.442695, %v1887_v42  ;;  %4036 = vpow2.f32 %v1477_v45  ;;  %v1832_v41 = vadd.f32 %v4025_v62, %v1812_v32 }
 0x1ac   : > { %v3612_v37 = vadd.f32 -14.0, %v5491_v33  ;;  %v3613_v0 = vadd.f32 -14.0, %v5509_v52  ;;  %v4029_v27 = vpop.eup %4028  ;;  %v1476_v17 = vsub.f32 0.0, %v1474_v56  ;;  %v1833_v34 = vadd.f32 %v4027_v54, %v1813_v21  ;;  %v7165_v21 = vld [vmem:[#allocation29_spill] sm:$0xff] }
 0x1ad   : > { %v1880_v58 = vmax.f32 %v1878_v29, 0.0  ;;  %v1881_v59 = vmax.f32 %v1879_v5, 0.0  ;;  %v4031_v43 = vpop.eup %4030  ;;  %4038 = vpow2.f32 %v1888_v15  ;;  %v1906_v19 = vsub.f32 %v7161_v14, %v5659_v47 }
 0x1ae   : > { %v1896_v53 = vand.u32 2147483647, %v3612_v37  ;;  %v1897_v3 = vand.u32 2147483647, %v3613_v0  ;;  %v1864_v39 = vadd.f32 %v1862_v26, %v1844_v4  ;;  %v1865_v1 = vadd.f32 %v1863_v7, %v1845_v10  ;;  %v5899_v37 = vld [vmem:[#allocation7] sm:$0xff] }
 0x1af   : > { %4040 = vpow2.f32 %v1890_v51  ;;  %v1907_v22 = vsub.f32 %v7162_v18, %v5668_v55  ;;  %v1908_v23 = vmul.f32 1.442695, %v1906_v19  ;;  %v3614_v40 = vadd.f32 -15.0, %v5491_v33 }
 0x1b0   : > { %v1898_v60 = vsub.f32 1.0, %v1896_v53  ;;  %v1899_v24 = vsub.f32 1.0, %v1897_v3  ;;  %v1852_v9 = vadd.f32 %v4029_v27, %v1832_v41  ;;  %v1853_v6 = vadd.f32 %v4031_v43, %v1833_v34  ;;  %v4277_v27 = vld [vmem:[%s4925_s11 + $0x10] sm:$0xff]  ;;  %v5914_v53 = vld [vmem:[#allocation7 + $0x8] sm:$0xff]  ;;  %v6059_v3 = vld [vmem:[%s4907_s29 + $0x1d8] sm:$0xff] }
 0x1b1   : > { %v1910_v16 = vmul.f32 1.442695, %v1907_v22  ;;  %v3615_v46 = vadd.f32 -15.0, %v5509_v52  ;;  %v4033_v11 = vpop.eup %4032  ;;  %v1882_v30 = vmul.f32 %v7156_v61, %v1880_v58  ;;  %v1883_v45 = vmul.f32 %v7157_v28, %v1881_v59  ;;  %v7170_v58 = vld [vmem:[#allocation26_spill] sm:$0xff]  ;;  %v5912_v43 = vld [vmem:[%s4907_s29 + $0x110] sm:$0xff]  ;;  %7172 = vst [vmem:[#allocation32_spill] sm:$0xff] %v5914_v53 }
 0x1b2   : > { %v1900_v31 = vmax.f32 %v1898_v60, 0.0  ;;  %4042 = vpow2.f32 %v1908_v23  ;;  %v4035_v49 = vpop.eup %4034  ;;  %v1916_v32 = vand.u32 2147483647, %v3614_v40  ;;  %v1926_v44 = vsub.f32 %v7163_v35, %v5659_v47  ;;  %v5919_v22 = vld [vmem:[%s4907_s29 + $0x118] sm:$0xff]  ;;  %v5922_v60 = vld [vmem:[%s4907_s29 + $0x120] sm:$0xff] }
 0x1b3   : > { %4044 = vpow2.f32 %v1910_v16  ;;  %v1917_v25 = vand.u32 2147483647, %v3615_v46  ;;  %v1901_v13 = vmax.f32 %v1899_v24, 0.0  ;;  %v1927_v57 = vsub.f32 %v7164_v36, %v5668_v55  ;;  %v5925_v24 = vld [vmem:[%s4907_s29 + $0x128] sm:$0xff] }
 0x1b4   : > { %v3616_v38 = vadd.f32 -16.0, %v5491_v33  ;;  %v1955_v12 = vmax.f32 %v7165_v21, 0.0  ;;  %v1479_v61 = vmul.f32 1.442695, %v1476_v17  ;;  %v1918_v42 = vsub.f32 1.0, %v1916_v32  ;;  %v7168_v17 = vld [vmem:[#allocation25_spill] sm:$0xff] }
 0x1b5   : > { %v1919_v28 = vsub.f32 1.0, %v1917_v25  ;;  %v1928_v62 = vmul.f32 1.442695, %v1926_v44  ;;  %v5894_v56 = vpop.eup %4036  ;;  %v1872_v20 = vadd.f32 %v4033_v11, %v1852_v9  ;;  %v1873_v29 = vadd.f32 %v4035_v49, %v1853_v6  ;;  %v5959_v36 = vld [vmem:[%s4907_s29 + $0x148] sm:$0xff] }
 0x1b6   : > { %7166 = vst [vmem:[#allocation27_spill] sm:$0xff] %v5894_v56  ;;  %v1930_v54 = vmul.f32 1.442695, %v1927_v57  ;;  %v3617_v4 = vadd.f32 -16.0, %v5509_v52  ;;  %v1884_v10 = vadd.f32 %v1882_v30, %v1864_v39  ;;  %v1885_v15 = vadd.f32 %v1883_v45, %v1865_v1  ;;  %v7167_v52 = vld [vmem:[#allocation41_spill] sm:$0xff]  ;;  %v5940_v45 = vld [vmem:[%s4907_s29 + $0x130] sm:$0xff] }
 0x1b7   : > { %v1902_v33 = vmul.f32 %v7158_v50, %v1900_v31  ;;  %4046 = vpow2.f32 %v1928_v62  ;;  %v4039_v26 = vpop.eup %4038  ;;  %v1903_v7 = vmul.f32 %v7159_v48, %v1901_v13  ;;  %v1920_v5 = vmax.f32 %v1918_v42, 0.0  ;;  %v4278_v50 = vld [vmem:[%s4925_s11 + $0x18] sm:$0xff]  ;;  %v5956_v13 = vld [vmem:[%s4907_s29 + $0x140] sm:$0xff] }
 0x1b8   : > { %4048 = vpow2.f32 %v1930_v54  ;;  %v1936_v51 = vand.u32 2147483647, %v3616_v38  ;;  %v5905_v34 = vadd.f32 %v4277_v27, %v7168_v17  ;;  %v5909_v59 = vadd.f32 %v4278_v50, %v7170_v58  ;;  %v5943_v31 = vld [vmem:[%s4907_s29 + $0x138] sm:$0xff] }
 0x1b9   : > { %v4041_v41 = vpop.eup %4040  ;;  %v1921_v48 = vmax.f32 %v1919_v28, 0.0  ;;  %v1892_v19 = vadd.f32 %v4039_v26, %v1872_v20  ;;  %v1937_v1 = vand.u32 2147483647, %v3617_v4  ;;  %4050 = vpow2.f32 %v1479_v61  ;;  %v5969_v28 = vld [vmem:[%s4907_s29 + $0x150] sm:$0xff]  ;;  %v5972_v62 = vld [vmem:[%s4907_s29 + $0x158] sm:$0xff] }
 0x1ba   : > { %7169 = vst [vmem:[#allocation30_spill] sm:$0xff] %v5905_v34  ;;  %7171 = vst [vmem:[#allocation31_spill] sm:$0xff] %v5909_v59  ;;  %v1893_v39 = vadd.f32 %v4041_v41, %v1873_v29  ;;  %v1904_v40 = vadd.f32 %v1902_v33, %v1884_v10  ;;  %v5930_v9 = vmin.f32 %v1954_v63, 15.99  ;;  %v5932_v16 = vadd.f32 %v1903_v7, %v1885_v15  ;;  %v6067_v59 = vld [vmem:[%s4907_s29 + $0x1e8] sm:$0xff] }
 0x1bb   : > { %v1922_v46 = vmul.f32 %v7161_v14, %v1920_v5  ;;  %v5935_v11 = vsub.f32 1.0, %v1936_v51  ;;  %v5937_v30 = vmin.f32 %v1955_v12, 15.99  ;;  %v5946_v2 = vmul.f32 %v7162_v18, %v1921_v48  ;;  %v5979_v5 = vld [vmem:[%s4907_s29 + $0x160] sm:$0xff]  ;;  %v5982_v51 = vld [vmem:[%s4907_s29 + $0x168] sm:$0xff] }
 0x1bc   : > { %v4043_v6 = vpop.eup %4042  ;;  %v1964_v63 = vmax.f32 %v5912_v43, %v5922_v60  ;;  %v1965_v14 = vmax.f32 %v5919_v22, %v5925_v24  ;;  %v2047_v32 = vand.u32 2147483647, %v5930_v9  ;;  %v5953_v44 = vsub.f32 1.0, %v1937_v1  ;;  %v5989_v1 = vld [vmem:[%s4907_s29 + $0x170] sm:$0xff] }
 0x1bd   : > { %v4045_v49 = vpop.eup %4044  ;;  %v1912_v25 = vadd.f32 %v4043_v6, %v1892_v19  ;;  %v2048_v18 = vand.u32 2147483647, %v5937_v30  ;;  %v3652_v12 = vadd.f32 -1.0, %v5930_v9  ;;  %v5965_v61 = vadd.f32 %v1922_v46, %v1904_v40  ;;  %v5992_v40 = vld [vmem:[%s4907_s29 + $0x178] sm:$0xff] }
 0x1be   : > { %v1913_v35 = vadd.f32 %v4045_v49, %v1893_v39  ;;  %v1969_v57 = vmax.f32 %v1964_v63, %v5940_v45  ;;  %v1970_v38 = vmax.f32 %v1965_v14, %v5943_v31  ;;  %v2049_v21 = vsub.f32 1.0, %v2047_v32  ;;  %v5999_v32 = vld [vmem:[%s4907_s29 + $0x180] sm:$0xff] }
 0x1bf   : > { %v1940_v42 = vmax.f32 %v5935_v11, 0.0  ;;  %v2050_v20 = vsub.f32 1.0, %v2048_v18  ;;  %v3653_v29 = vadd.f32 -1.0, %v5937_v30  ;;  %v2065_v15 = vand.u32 2147483647, %v3652_v12 }
 0x1c0   : > { %v1974_v4 = vmax.f32 %v1969_v57, %v5956_v13  ;;  %v1975_v10 = vmax.f32 %v1970_v38, %v5959_v36  ;;  %v3654_v33 = vadd.f32 -2.0, %v5930_v9  ;;  %v2051_v41 = vmax.f32 %v2049_v21, 0.0 }
 0x1c1   : > { %v4047_v54 = vpop.eup %4046  ;;  %v2066_v27 = vand.u32 2147483647, %v3653_v29  ;;  %v3655_v17 = vadd.f32 -2.0, %v5937_v30  ;;  %v2052_v19 = vmax.f32 %v2050_v20, 0.0  ;;  %v1941_v39 = vmax.f32 %v5953_v44, 0.0  ;;  %v6009_v29 = vld [vmem:[%s4907_s29 + $0x190] sm:$0xff] }
 0x1c2   : > { %v4049_v26 = vpop.eup %4048  ;;  %v1932_v7 = vadd.f32 %v4047_v54, %v1912_v25  ;;  %v1979_v58 = vmax.f32 %v1974_v4, %v5969_v28  ;;  %v1980_v48 = vmax.f32 %v1975_v10, %v5972_v62  ;;  %v2067_v6 = vsub.f32 1.0, %v2065_v15  ;;  %v6002_v25 = vld [vmem:[%s4907_s29 + $0x188] sm:$0xff]  ;;  %v6012_v54 = vld [vmem:[%s4907_s29 + $0x198] sm:$0xff] }
 0x1c3   : > { %v1933_v50 = vadd.f32 %v4049_v26, %v1913_v35  ;;  %v2068_v46 = vsub.f32 1.0, %v2066_v27  ;;  %v5994_v11 = vpop.eup %4050  ;;  %v2085_v14 = vand.u32 2147483647, %v3654_v33  ;;  %v2053_v35 = vmul.f32 %v5912_v43, %v2051_v41 }
 0x1c4   : > { %4052 = vlog2.f32 %v1932_v7  ;;  %7173 = vst [vmem:[#allocation33_spill] sm:$0xff] %v5994_v11  ;;  %v1984_v49 = vmax.f32 %v1979_v58, %v5979_v5  ;;  %v1985_v63 = vmax.f32 %v1980_v48, %v5982_v51  ;;  %v2069_v44 = vmax.f32 %v2067_v6, 0.0  ;;  %v4281_v58 = vld [vmem:[%s4907_s29 + $0x108] sm:$0xff] }
 0x1c5   : > { %4054 = vlog2.f32 %v1933_v50  ;;  %v2070_v18 = vmax.f32 %v2068_v46, 0.0  ;;  %v2086_v57 = vand.u32 2147483647, %v3655_v17  ;;  %v2054_v12 = vmul.f32 %v5919_v22, %v2052_v19  ;;  %v4280_v17 = vld [vmem:[%s4907_s29 + $0x100] sm:$0xff]  ;;  %v6027_v6 = vld [vmem:[%s4907_s29 + $0x1a8] sm:$0xff] }
 0x1c6   : > { %v1989_v38 = vmax.f32 %v1984_v49, %v5989_v1  ;;  %v1990_v21 = vmax.f32 %v1985_v63, %v5992_v40  ;;  %v2087_v20 = vsub.f32 1.0, %v2085_v14  ;;  %v2071_v4 = vmul.f32 %v5922_v60, %v2069_v44  ;;  %v6024_v19 = vld [vmem:[%s4907_s29 + $0x1a0] sm:$0xff]  ;;  %v6034_v44 = vld [vmem:[%s4907_s29 + $0x1b0] sm:$0xff] }
 0x1c7   : > { %v2072_v10 = vmul.f32 %v5925_v24, %v2070_v18  ;;  %v2088_v15 = vsub.f32 1.0, %v2086_v57  ;;  %v3656_v33 = vadd.f32 -3.0, %v5930_v9  ;;  %v1925_v26 = vadd.f32 %v5946_v2, %v5932_v16 }
 0x1c8   : > { %v1994_v7 = vmax.f32 %v1989_v38, %v5999_v32  ;;  %v1995_v41 = vmax.f32 %v1990_v21, %v6002_v25  ;;  %v2089_v27 = vmax.f32 %v2087_v20, 0.0  ;;  %v1942_v50 = vmul.f32 %v4280_v17, %v1940_v42  ;;  %v6037_v42 = vld [vmem:[%s4907_s29 + $0x1b8] sm:$0xff]  ;;  %v6044_v20 = vld [vmem:[%s4907_s29 + $0x1c0] sm:$0xff] }
 0x1c9   : > { %v1943_v48 = vmul.f32 %v4281_v58, %v1941_v39  ;;  %v2073_v46 = vadd.f32 %v2071_v4, %v2053_v35  ;;  %v2090_v49 = vmax.f32 %v2088_v15, 0.0  ;;  %v3657_v14 = vadd.f32 -3.0, %v5937_v30 }
 0x1ca   : > { %v1999_v16 = vmax.f32 %v1994_v7, %v6009_v29  ;;  %v2000_v2 = vmax.f32 %v1995_v41, %v6012_v54  ;;  %v2091_v63 = vmul.f32 %v5940_v45, %v2089_v27  ;;  %v2074_v39 = vadd.f32 %v2072_v10, %v2054_v12  ;;  %v6051_v12 = vld [vmem:[%s4907_s29 + $0x1c8] sm:$0xff] }
 0x1cb   : > { %v2105_v18 = vand.u32 2147483647, %v3656_v33  ;;  %v3658_v57 = vadd.f32 -4.0, %v5930_v9  ;;  %v3659_v35 = vadd.f32 -4.0, %v5937_v30  ;;  %v2092_v4 = vmul.f32 %v5943_v31, %v2090_v49 }
 0x1cc   : > { %v2004_v38 = vmax.f32 %v1999_v16, %v6024_v19  ;;  %v2005_v21 = vmax.f32 %v2000_v2, %v6027_v6  ;;  %v2106_v15 = vand.u32 2147483647, %v3657_v14  ;;  %v6048_v41 = vadd.f32 %v1942_v50, %v5965_v61  ;;  %v6056_v2 = vld [vmem:[%s4907_s29 + $0x1d0] sm:$0xff] }
 0x1cd   : > { %v2107_v10 = vsub.f32 1.0, %v2105_v18  ;;  %v2125_v33 = vand.u32 2147483647, %v3658_v57  ;;  %v2126_v27 = vand.u32 2147483647, %v3659_v35  ;;  %v2093_v49 = vadd.f32 %v2091_v63, %v2073_v46 }
 0x1ce   : > { %v4053_v7 = vpop.eup %4052  ;;  %7174 = vst [vmem:[#allocation34_spill] sm:$0xff] %v6048_v41  ;;  %v2009_v58 = vmax.f32 %v2004_v38, %v6034_v44  ;;  %v2010_v16 = vmax.f32 %v2005_v21, %v6037_v42  ;;  %v2108_v14 = vsub.f32 1.0, %v2106_v15  ;;  %v2094_v35 = vadd.f32 %v2092_v4, %v2074_v39  ;;  %v6064_v21 = vld [vmem:[%s4907_s29 + $0x1e0] sm:$0xff] }
 0x1cf   : > { %v4055_v17 = vpop.eup %4054  ;;  %v1947_v23 = vmul.f32 0.6931472, %v4053_v7  ;;  %v2109_v61 = vmax.f32 %v2107_v10, 0.0  ;;  %v2127_v50 = vsub.f32 1.0, %v2125_v33  ;;  %v2128_v0 = vsub.f32 1.0, %v2126_v27  ;;  %v6079_v27 = vld [vmem:[%s4907_s29 + $0x1f0] sm:$0xff] }
 0x1d0   : > { %v2014_v18 = vmax.f32 %v2009_v58, %v6044_v20  ;;  %v2015_v57 = vmax.f32 %v2010_v16, %v6051_v12  ;;  %v2110_v38 = vmax.f32 %v2108_v14, 0.0  ;;  %v1949_v11 = vmul.f32 0.6931472, %v4055_v17  ;;  %v6082_v17 = vld [vmem:[%s4907_s29 + $0x1f8] sm:$0xff] }
 0x1d1   : > { %v2111_v46 = vmul.f32 %v5956_v13, %v2109_v61  ;;  %v2129_v63 = vmax.f32 %v2127_v50, 0.0  ;;  %v2130_v15 = vmax.f32 %v2128_v0, 0.0  ;;  %v6070_v7 = vadd.f32 %v1943_v48, %v1925_v26  ;;  %v6096_v50 = vld [vmem:[%s4907_s29 + $0x208] sm:$0xff] }
 0x1d2   : > { %v2019_v10 = vmax.f32 %v2014_v18, %v6056_v2  ;;  %v2020_v33 = vmax.f32 %v2015_v57, %v6059_v3  ;;  %v2112_v39 = vmul.f32 %v5959_v36, %v2110_v38  ;;  %v6076_v4 = vadd.f32 %v1947_v23, %v5659_v47  ;;  %v6093_v23 = vld [vmem:[%s4907_s29 + $0x200] sm:$0xff] }
 0x1d3   : > { %7175 = vst [vmem:[#allocation35_spill] sm:$0xff] %v6070_v7  ;;  %v2113_v58 = vadd.f32 %v2111_v46, %v2093_v49  ;;  %v2131_v0 = vmul.f32 %v5969_v28, %v2129_v63  ;;  %v2132_v26 = vmul.f32 %v5972_v62, %v2130_v15  ;;  %v3660_v61 = vadd.f32 -5.0, %v5930_v9  ;;  %v6107_v63 = vld [vmem:[%s4907_s29 + $0x218] sm:$0xff] }
 0x1d4   : > { %7176 = vst [vmem:[#allocation36_spill] sm:$0xff] %v6076_v4  ;;  %v2024_v48 = vmax.f32 %v2019_v10, %v6064_v21  ;;  %v2025_v16 = vmax.f32 %v2020_v33, %v6067_v59  ;;  %v2114_v14 = vadd.f32 %v2112_v39, %v2094_v35  ;;  %v6090_v47 = vadd.f32 %v1949_v11, %v5668_v55  ;;  %v6104_v35 = vld [vmem:[%s4907_s29 + $0x210] sm:$0xff] }
 0x1d5   : > { %v3661_v49 = vadd.f32 -5.0, %v5937_v30  ;;  %v3662_v18 = vadd.f32 -6.0, %v5930_v9  ;;  %v3663_v57 = vadd.f32 -6.0, %v5937_v30  ;;  %v2133_v55 = vadd.f32 %v2131_v0, %v2113_v58 }
 0x1d6   : > { %7177 = vst [vmem:[#allocation37_spill] sm:$0xff] %v6090_v47  ;;  %v2029_v38 = vmax.f32 %v2024_v48, %v6079_v27  ;;  %v2030_v46 = vmax.f32 %v2025_v16, %v6082_v17  ;;  %v2145_v11 = vand.u32 2147483647, %v3660_v61  ;;  %v2134_v15 = vadd.f32 %v2132_v26, %v2114_v14 }
 0x1d7   : > { %v2146_v10 = vand.u32 2147483647, %v3661_v49  ;;  %v2165_v33 = vand.u32 2147483647, %v3662_v18  ;;  %v2166_v39 = vand.u32 2147483647, %v3663_v57 }
 0x1d8   : > { %v2034_v34 = vmax.f32 %v2029_v38, %v6093_v23  ;;  %v2035_v56 = vmax.f32 %v2030_v46, %v6096_v50  ;;  %v2147_v47 = vsub.f32 1.0, %v2145_v11  ;;  %v3664_v7 = vadd.f32 -7.0, %v5930_v9 }
 0x1d9   : > { %v2148_v48 = vsub.f32 1.0, %v2146_v10  ;;  %v2167_v4 = vsub.f32 1.0, %v2165_v33  ;;  %v2168_v16 = vsub.f32 1.0, %v2166_v39  ;;  %v3665_v41 = vadd.f32 -7.0, %v5937_v30 }
 0x1da   : > { %v6114_v53 = vmax.f32 %v2034_v34, %v6104_v35  ;;  %v6117_v58 = vmax.f32 %v2035_v56, %v6107_v63  ;;  %v2149_v0 = vmax.f32 %v2147_v47, 0.0  ;;  %v2185_v26 = vand.u32 2147483647, %v3664_v7 }
 0x1db   : > { %v2150_v14 = vmax.f32 %v2148_v48, 0.0  ;;  %v2169_v61 = vmax.f32 %v2167_v4, 0.0  ;;  %v2170_v49 = vmax.f32 %v2168_v16, 0.0  ;;  %v2186_v18 = vand.u32 2147483647, %v3665_v41 }
 0x1dc   : > { %v2041_v57 = vsub.f32 %v5912_v43, %v6114_v53  ;;  %v2042_v38 = vsub.f32 %v5919_v22, %v6117_v58  ;;  %v2055_v46 = vsub.f32 %v5922_v60, %v6114_v53  ;;  %v2056_v34 = vsub.f32 %v5925_v24, %v6117_v58 }
 0x1dd   : > { %v2075_v56 = vsub.f32 %v5940_v45, %v6114_v53  ;;  %v2076_v7 = vsub.f32 %v5943_v31, %v6117_v58  ;;  %v2095_v41 = vsub.f32 %v5956_v13, %v6114_v53  ;;  %v2096_v43 = vsub.f32 %v5959_v36, %v6117_v58 }
 0x1de   : > { %v2043_v4 = vmul.f32 1.442695, %v2041_v57  ;;  %v2045_v22 = vmul.f32 1.442695, %v2042_v38  ;;  %v2057_v47 = vmul.f32 1.442695, %v2055_v46  ;;  %v2115_v60 = vsub.f32 %v5969_v28, %v6114_v53 }
 0x1df   : > { %v2059_v11 = vmul.f32 1.442695, %v2056_v34  ;;  %v2077_v24 = vmul.f32 1.442695, %v2075_v56  ;;  %v2079_v10 = vmul.f32 1.442695, %v2076_v7  ;;  %v2116_v45 = vsub.f32 %v5972_v62, %v6117_v58 }
 0x1e0   : > { %4056 = vpow2.f32 %v2043_v4  ;;  %v2097_v31 = vmul.f32 1.442695, %v2095_v41  ;;  %v2099_v33 = vmul.f32 1.442695, %v2096_v43  ;;  %v2117_v39 = vmul.f32 1.442695, %v2115_v60 }
 0x1e1   : > { %4058 = vpow2.f32 %v2045_v22  ;;  %v2119_v13 = vmul.f32 1.442695, %v2116_v45  ;;  %v2135_v36 = vsub.f32 %v5979_v5, %v6114_v53  ;;  %v2136_v48 = vsub.f32 %v5982_v51, %v6117_v58 }
 0x1e2   : > { %4060 = vpow2.f32 %v2057_v47  ;;  %v2151_v28 = vmul.f32 %v5979_v5, %v2149_v0  ;;  %v2152_v16 = vmul.f32 %v5982_v51, %v2150_v14  ;;  %v2155_v62 = vsub.f32 %v5989_v1, %v6114_v53 }
 0x1e3   : > { %4062 = vpow2.f32 %v2059_v11  ;;  %v2137_v57 = vmul.f32 1.442695, %v2135_v36  ;;  %v2139_v38 = vmul.f32 1.442695, %v2136_v48  ;;  %v2156_v46 = vsub.f32 %v5992_v40, %v6117_v58 }
 0x1e4   : > { %4064 = vpow2.f32 %v2077_v24  ;;  %v2153_v34 = vadd.f32 %v2151_v28, %v2133_v55  ;;  %v2154_v56 = vadd.f32 %v2152_v16, %v2134_v15  ;;  %v2157_v7 = vmul.f32 1.442695, %v2155_v62 }
 0x1e5   : > { %4066 = vpow2.f32 %v2079_v10  ;;  %v2159_v41 = vmul.f32 1.442695, %v2156_v46  ;;  %v2171_v43 = vmul.f32 %v5989_v1, %v2169_v61  ;;  %v2172_v5 = vmul.f32 %v5992_v40, %v2170_v49 }
 0x1e6   : > { %4068 = vpow2.f32 %v2097_v31  ;;  %v2175_v51 = vsub.f32 %v5999_v32, %v6114_v53  ;;  %v2176_v0 = vsub.f32 %v6002_v25, %v6117_v58  ;;  %v2187_v14 = vsub.f32 1.0, %v2185_v26 }
 0x1e7   : > { %4070 = vpow2.f32 %v2099_v33  ;;  %v2173_v4 = vadd.f32 %v2171_v43, %v2153_v34  ;;  %v2174_v22 = vadd.f32 %v2172_v5, %v2154_v56  ;;  %v2188_v55 = vsub.f32 1.0, %v2186_v18 }
 0x1e8   : > { %4072 = vpow2.f32 %v2117_v39  ;;  %v2177_v15 = vmul.f32 1.442695, %v2175_v51  ;;  %v2179_v47 = vmul.f32 1.442695, %v2176_v0  ;;  %v2189_v60 = vmax.f32 %v2187_v14, 0.0 }
 0x1e9   : > { %4074 = vpow2.f32 %v2119_v13  ;;  %v2190_v1 = vmax.f32 %v2188_v55, 0.0  ;;  %v2195_v40 = vsub.f32 %v6009_v29, %v6114_v53  ;;  %v2196_v61 = vsub.f32 %v6012_v54, %v6117_v58 }
 0x1ea   : > { %v4057_v49 = vpop.eup %4056  ;;  %4076 = vpow2.f32 %v2137_v57  ;;  %v2191_v26 = vmul.f32 %v5999_v32, %v2189_v60  ;;  %v3666_v11 = vadd.f32 -8.0, %v5930_v9  ;;  %v3667_v18 = vadd.f32 -8.0, %v5937_v30 }
 0x1eb   : > { %v4059_v24 = vpop.eup %4058  ;;  %4078 = vpow2.f32 %v2139_v38  ;;  %v2192_v10 = vmul.f32 %v6002_v25, %v2190_v1  ;;  %v2197_v45 = vmul.f32 1.442695, %v2195_v40  ;;  %v2199_v31 = vmul.f32 1.442695, %v2196_v61 }
 0x1ec   : > { %v4061_v33 = vpop.eup %4060  ;;  %4080 = vpow2.f32 %v2157_v7  ;;  %v2193_v39 = vadd.f32 %v2191_v26, %v2173_v4  ;;  %v2205_v13 = vand.u32 2147483647, %v3666_v11  ;;  %v2206_v36 = vand.u32 2147483647, %v3667_v18 }
 0x1ed   : > { %v4063_v48 = vpop.eup %4062  ;;  %v2061_v28 = vadd.f32 %v4061_v33, %v4057_v49  ;;  %4082 = vpow2.f32 %v2159_v41  ;;  %v2194_v16 = vadd.f32 %v2192_v10, %v2174_v22  ;;  %v2215_v32 = vsub.f32 %v6024_v19, %v6114_v53 }
 0x1ee   : > { %v4065_v62 = vpop.eup %4064  ;;  %v2062_v57 = vadd.f32 %v4063_v48, %v4059_v24  ;;  %4084 = vpow2.f32 %v2177_v15  ;;  %v2207_v38 = vsub.f32 1.0, %v2205_v13  ;;  %v2208_v46 = vsub.f32 1.0, %v2206_v36 }
 0x1ef   : > { %v4067_v25 = vpop.eup %4066  ;;  %v2081_v34 = vadd.f32 %v4065_v62, %v2061_v28  ;;  %4086 = vpow2.f32 %v2179_v47  ;;  %v2216_v56 = vsub.f32 %v6027_v6, %v6117_v58  ;;  %v2217_v7 = vmul.f32 1.442695, %v2215_v32 }
 0x1f0   : > { %v4069_v43 = vpop.eup %4068  ;;  %v2082_v5 = vadd.f32 %v4067_v25, %v2062_v57  ;;  %4088 = vpow2.f32 %v2197_v45  ;;  %v2209_v41 = vmax.f32 %v2207_v38, 0.0  ;;  %v2210_v51 = vmax.f32 %v2208_v46, 0.0 }
 0x1f1   : > { %v4071_v0 = vpop.eup %4070  ;;  %v2101_v14 = vadd.f32 %v4069_v43, %v2081_v34  ;;  %4090 = vpow2.f32 %v2199_v31  ;;  %v2219_v4 = vmul.f32 1.442695, %v2216_v56  ;;  %v3668_v22 = vadd.f32 -9.0, %v5930_v9 }
 0x1f2   : > { %v4073_v55 = vpop.eup %4072  ;;  %v2102_v15 = vadd.f32 %v4071_v0, %v2082_v5  ;;  %v2211_v60 = vmul.f32 %v6009_v29, %v2209_v41  ;;  %v2212_v47 = vmul.f32 %v6012_v54, %v2210_v51  ;;  %4092 = vpow2.f32 %v2217_v7 }
 0x1f3   : > { %v4075_v1 = vpop.eup %4074  ;;  %v2121_v40 = vadd.f32 %v4073_v55, %v2101_v14  ;;  %4094 = vpow2.f32 %v2219_v4  ;;  %v3669_v61 = vadd.f32 -9.0, %v5937_v30  ;;  %v2225_v49 = vand.u32 2147483647, %v3668_v22 }
 0x1f4   : > { %v4077_v26 = vpop.eup %4076  ;;  %v2122_v11 = vadd.f32 %v4075_v1, %v2102_v15  ;;  %v2213_v18 = vadd.f32 %v2211_v60, %v2193_v39  ;;  %v2214_v24 = vadd.f32 %v2212_v47, %v2194_v16  ;;  %v2235_v10 = vsub.f32 %v6034_v44, %v6114_v53 }
 0x1f5   : > { %v4079_v45 = vpop.eup %4078  ;;  %v2141_v31 = vadd.f32 %v4077_v26, %v2121_v40  ;;  %v2226_v33 = vand.u32 2147483647, %v3669_v61  ;;  %v2227_v29 = vsub.f32 1.0, %v2225_v49  ;;  %v2236_v54 = vsub.f32 %v6037_v42, %v6117_v58 }
 0x1f6   : > { %v4081_v13 = vpop.eup %4080  ;;  %v2142_v36 = vadd.f32 %v4079_v45, %v2122_v11  ;;  %v2237_v48 = vmul.f32 1.442695, %v2235_v10  ;;  %v3670_v28 = vadd.f32 -10.0, %v5930_v9  ;;  %v3671_v32 = vadd.f32 -10.0, %v5937_v30 }
 0x1f7   : > { %v4083_v62 = vpop.eup %4082  ;;  %v2161_v39 = vadd.f32 %v4081_v13, %v2141_v31  ;;  %v2228_v16 = vsub.f32 1.0, %v2226_v33  ;;  %v2229_v57 = vmax.f32 %v2227_v29, 0.0  ;;  %v2239_v38 = vmul.f32 1.442695, %v2236_v54 }
 0x1f8   : > { %v4085_v46 = vpop.eup %4084  ;;  %v2162_v25 = vadd.f32 %v4083_v62, %v2142_v36  ;;  %4096 = vpow2.f32 %v2237_v48  ;;  %v2245_v34 = vand.u32 2147483647, %v3670_v28  ;;  %v2246_v56 = vand.u32 2147483647, %v3671_v32 }
 0x1f9   : > { %v4087_v7 = vpop.eup %4086  ;;  %v2181_v43 = vadd.f32 %v4085_v46, %v2161_v39  ;;  %v2230_v5 = vmax.f32 %v2228_v16, 0.0  ;;  %v2231_v41 = vmul.f32 %v6024_v19, %v2229_v57  ;;  %4098 = vpow2.f32 %v2239_v38 }
 0x1fa   : > { %v4089_v51 = vpop.eup %4088  ;;  %v2182_v0 = vadd.f32 %v4087_v7, %v2162_v25  ;;  %v2247_v14 = vsub.f32 1.0, %v2245_v34  ;;  %v2248_v4 = vsub.f32 1.0, %v2246_v56  ;;  %v2255_v22 = vsub.f32 %v6044_v20, %v6114_v53 }
 0x1fb   : > { %v4091_v55 = vpop.eup %4090  ;;  %v2201_v15 = vadd.f32 %v4089_v51, %v2181_v43  ;;  %v2232_v60 = vmul.f32 %v6027_v6, %v2230_v5  ;;  %v2233_v47 = vadd.f32 %v2231_v41, %v2213_v18  ;;  %v2256_v1 = vsub.f32 %v6051_v12, %v6117_v58 }
 0x1fc   : > { %v4093_v40 = vpop.eup %4092  ;;  %v2202_v61 = vadd.f32 %v4091_v55, %v2182_v0  ;;  %v2249_v49 = vmax.f32 %v2247_v14, 0.0  ;;  %v2250_v19 = vmax.f32 %v2248_v4, 0.0  ;;  %v2257_v26 = vmul.f32 1.442695, %v2255_v22 }
 0x1fd   : > { %v4095_v11 = vpop.eup %4094  ;;  %v2221_v10 = vadd.f32 %v4093_v40, %v2201_v15  ;;  %v2234_v45 = vadd.f32 %v2232_v60, %v2214_v24  ;;  %v2259_v31 = vmul.f32 1.442695, %v2256_v1  ;;  %v3672_v33 = vadd.f32 -11.0, %v5930_v9  ;;  %v6201_v1 = vld [vmem:[%s4907_s29 + $0x220] sm:$0xff]  ;;  %v6204_v40 = vld [vmem:[%s4907_s29 + $0x230] sm:$0xff] }
 0x1fe   : > { %v2222_v29 = vadd.f32 %v4095_v11, %v2202_v61  ;;  %v2251_v54 = vmul.f32 %v6034_v44, %v2249_v49  ;;  %v2252_v6 = vmul.f32 %v6037_v42, %v2250_v19  ;;  %4100 = vpow2.f32 %v2257_v26 }
 0x1ff   : > { %4102 = vpow2.f32 %v2259_v31  ;;  %v3673_v18 = vadd.f32 -11.0, %v5937_v30  ;;  %v2265_v13 = vand.u32 2147483647, %v3672_v33  ;;  %v2275_v36 = vsub.f32 %v6056_v2, %v6114_v53 }
 0x200   : > { %v2253_v48 = vadd.f32 %v2251_v54, %v2233_v47  ;;  %v2254_v28 = vadd.f32 %v2252_v6, %v2234_v45  ;;  %v2276_v24 = vsub.f32 %v6059_v3, %v6117_v58  ;;  %v3674_v32 = vadd.f32 -12.0, %v5930_v9 }
 0x201   : > { %v2266_v62 = vand.u32 2147483647, %v3673_v18  ;;  %v2267_v39 = vsub.f32 1.0, %v2265_v13  ;;  %v2277_v44 = vmul.f32 1.442695, %v2275_v36  ;;  %v3675_v42 = vadd.f32 -12.0, %v5937_v30 }
 0x202   : > { %v4097_v16 = vpop.eup %4096  ;;  %v2279_v57 = vmul.f32 1.442695, %v2276_v24  ;;  %v2285_v38 = vand.u32 2147483647, %v3674_v32  ;;  %v2295_v46 = vsub.f32 %v6064_v21, %v6114_v53  ;;  %v2296_v25 = vsub.f32 %v6067_v59, %v6117_v58 }
 0x203   : > { %v4099_v34 = vpop.eup %4098  ;;  %v2241_v56 = vadd.f32 %v4097_v16, %v2221_v10  ;;  %v2268_v7 = vsub.f32 1.0, %v2266_v62  ;;  %v2269_v43 = vmax.f32 %v2267_v39, 0.0  ;;  %4104 = vpow2.f32 %v2277_v44 }
 0x204   : > { %v2242_v5 = vadd.f32 %v4099_v34, %v2222_v29  ;;  %4106 = vpow2.f32 %v2279_v57  ;;  %v2286_v41 = vand.u32 2147483647, %v3675_v42  ;;  %v2287_v51 = vsub.f32 1.0, %v2285_v38 }
 0x205   : > { %v2270_v0 = vmax.f32 %v2268_v7, 0.0  ;;  %v2271_v14 = vmul.f32 %v6044_v20, %v2269_v43  ;;  %v2297_v4 = vmul.f32 1.442695, %v2295_v46  ;;  %v2299_v22 = vmul.f32 1.442695, %v2296_v25 }
 0x206   : > { %v2288_v55 = vsub.f32 1.0, %v2286_v41  ;;  %v2289_v15 = vmax.f32 %v2287_v51, 0.0  ;;  %v3676_v60 = vadd.f32 -13.0, %v5930_v9  ;;  %v3677_v47 = vadd.f32 -13.0, %v5937_v30 }
 0x207   : > { %v2272_v61 = vmul.f32 %v6051_v12, %v2270_v0  ;;  %v2273_v49 = vadd.f32 %v2271_v14, %v2253_v48  ;;  %4108 = vpow2.f32 %v2297_v4  ;;  %v2315_v19 = vsub.f32 %v6079_v27, %v6114_v53 }
 0x208   : > { %v4101_v20 = vpop.eup %4100  ;;  %v2290_v26 = vmax.f32 %v2288_v55, 0.0  ;;  %v2291_v11 = vmul.f32 %v6056_v2, %v2289_v15  ;;  %4110 = vpow2.f32 %v2299_v22  ;;  %v2305_v10 = vand.u32 2147483647, %v3676_v60 }
 0x209   : > { %v4103_v45 = vpop.eup %4102  ;;  %v2261_v31 = vadd.f32 %v4101_v20, %v2241_v56  ;;  %v2306_v33 = vand.u32 2147483647, %v3677_v47  ;;  %v2316_v29 = vsub.f32 %v6082_v17, %v6117_v58  ;;  %v2395_v12 = vmax.f32 %v6201_v1, %v6204_v40 }
 0x20a   : > { %v2262_v54 = vadd.f32 %v4103_v45, %v2242_v5  ;;  %v2274_v6 = vadd.f32 %v2272_v61, %v2254_v28  ;;  %v2292_v18 = vmul.f32 %v6059_v3, %v2290_v26  ;;  %v2307_v13 = vsub.f32 1.0, %v2305_v10 }
 0x20b   : > { %v2308_v36 = vsub.f32 1.0, %v2306_v33  ;;  %v2317_v48 = vmul.f32 1.442695, %v2315_v19  ;;  %v2319_v24 = vmul.f32 1.442695, %v2316_v29  ;;  %v3678_v2 = vadd.f32 -14.0, %v5930_v9 }
 0x20c   : > { %v2293_v32 = vadd.f32 %v2291_v11, %v2273_v49  ;;  %v2309_v62 = vmax.f32 %v2307_v13, 0.0  ;;  %v3679_v39 = vadd.f32 -14.0, %v5937_v30  ;;  %v2335_v44 = vsub.f32 %v6093_v23, %v6114_v53 }
 0x20d   : > { %v4105_v42 = vpop.eup %4104  ;;  %v2310_v16 = vmax.f32 %v2308_v36, 0.0  ;;  %4112 = vpow2.f32 %v2317_v48  ;;  %v2325_v57 = vand.u32 2147483647, %v3678_v2  ;;  %v2336_v3 = vsub.f32 %v6096_v50, %v6117_v58  ;;  %v6240_v2 = vld [vmem:[%s4907_s29 + $0x238] sm:$0xff] }
 0x20e   : > { %v4107_v28 = vpop.eup %4106  ;;  %v2294_v38 = vadd.f32 %v2292_v18, %v2274_v6  ;;  %v2311_v46 = vmul.f32 %v6064_v21, %v2309_v62  ;;  %4114 = vpow2.f32 %v2319_v24  ;;  %v2326_v25 = vand.u32 2147483647, %v3679_v39 }
 0x20f   : > { %v2281_v34 = vadd.f32 %v4105_v42, %v2261_v31  ;;  %v2312_v56 = vmul.f32 %v6067_v59, %v2310_v16  ;;  %v2327_v7 = vsub.f32 1.0, %v2325_v57  ;;  %v2337_v43 = vmul.f32 1.442695, %v2335_v44  ;;  %v6244_v44 = vld [vmem:[%s4907_s29 + $0x240] sm:$0xff] }
 0x210   : > { %v2282_v5 = vadd.f32 %v4107_v28, %v2262_v54  ;;  %v2328_v41 = vsub.f32 1.0, %v2326_v25  ;;  %v2339_v51 = vmul.f32 1.442695, %v2336_v3  ;;  %v3680_v0 = vadd.f32 -15.0, %v5930_v9  ;;  %v6251_v28 = vld [vmem:[%s4907_s29 + $0x248] sm:$0xff] }
 0x211   : > { %v4109_v14 = vpop.eup %4108  ;;  %v2313_v4 = vadd.f32 %v2311_v46, %v2293_v32  ;;  %v2329_v22 = vmax.f32 %v2327_v7, 0.0  ;;  %4116 = vpow2.f32 %v2337_v43  ;;  %v3681_v55 = vadd.f32 -15.0, %v5937_v30  ;;  %v7182_v7 = vld [vmem:[#allocation36_spill] sm:$0xff] }
 0x212   : > { %v4111_v15 = vpop.eup %4110  ;;  %v2314_v21 = vadd.f32 %v2312_v56, %v2294_v38  ;;  %v2330_v60 = vmax.f32 %v2328_v41, 0.0  ;;  %4118 = vpow2.f32 %v2339_v51  ;;  %v2345_v47 = vand.u32 2147483647, %v3680_v0  ;;  %v6269_v51 = vld [vmem:[%s4907_s29 + $0x258] sm:$0xff] }
 0x213   : > { %v2301_v61 = vadd.f32 %v4109_v14, %v2281_v34  ;;  %v2331_v59 = vmul.f32 %v6079_v27, %v2329_v22  ;;  %v2346_v49 = vand.u32 2147483647, %v3681_v55  ;;  %v2355_v19 = vsub.f32 %v6104_v35, %v6114_v53  ;;  %v6258_v34 = vld [vmem:[%s4907_s29 + $0x250] sm:$0xff]  ;;  %v6277_v55 = vld [vmem:[%s4907_s29 + $0x260] sm:$0xff] }
 0x214   : > { %v2332_v20 = vmul.f32 %v6082_v17, %v2330_v60  ;;  %v2347_v26 = vsub.f32 1.0, %v2345_v47  ;;  %v2356_v11 = vsub.f32 %v6107_v63, %v6117_v58  ;;  %v3682_v10 = vadd.f32 -16.0, %v5930_v9  ;;  %v6237_v9 = vld [vmem:[%s4907_s29 + $0x228] sm:$0xff] }
 0x215   : > { %v2302_v45 = vadd.f32 %v4111_v15, %v2282_v5  ;;  %v2348_v31 = vsub.f32 1.0, %v2346_v49  ;;  %v2357_v33 = vmul.f32 1.442695, %v2355_v19  ;;  %v3683_v29 = vadd.f32 -16.0, %v5937_v30  ;;  %v6285_v47 = vld [vmem:[%s4907_s29 + $0x268] sm:$0xff]  ;;  %v6290_v19 = vld [vmem:[%s4907_s29 + $0x270] sm:$0xff] }
 0x216   : > { %v2333_v27 = vadd.f32 %v2331_v59, %v2313_v4  ;;  %v2349_v54 = vmax.f32 %v2347_v26, 0.0  ;;  %v2359_v6 = vmul.f32 1.442695, %v2356_v11  ;;  %v2365_v18 = vand.u32 2147483647, %v3682_v10  ;;  %v6298_v10 = vld [vmem:[%s4907_s29 + $0x278] sm:$0xff] }
 0x217   : > { %v4113_v13 = vpop.eup %4112  ;;  %v2350_v17 = vmax.f32 %v2348_v31, 0.0  ;;  %4120 = vpow2.f32 %v2357_v33  ;;  %v2366_v36 = vand.u32 2147483647, %v3683_v29  ;;  %v7178_v48 = vsub.f32 %v7167_v52, %v5899_v37  ;;  %v7179_v37 = vld [vmem:[#allocation32_spill] sm:$0xff]  ;;  %v6303_v29 = vld [vmem:[%s4907_s29 + $0x280] sm:$0xff] }
 0x218   : > { %v4115_v30 = vpop.eup %4114  ;;  %v2334_v32 = vadd.f32 %v2332_v20, %v2314_v21  ;;  %v2351_v62 = vmul.f32 %v6093_v23, %v2349_v54  ;;  %4122 = vpow2.f32 %v2359_v6  ;;  %v2367_v39 = vsub.f32 1.0, %v2365_v18 }
 0x219   : > { %v2385_v24 = vmax.f32 %v7178_v48, 0.0  ;;  %v2321_v42 = vadd.f32 %v4113_v13, %v2301_v61  ;;  %v2352_v16 = vmul.f32 %v6096_v50, %v2350_v17  ;;  %v2368_v57 = vsub.f32 1.0, %v2366_v36  ;;  %v7181_v50 = vld [vmem:[#allocation34_spill] sm:$0xff] }
 0x21a   : > { %v7180_v52 = vsub.f32 %v5757_v8, %v7179_v37  ;;  %v2322_v38 = vadd.f32 %v4115_v30, %v2302_v45  ;;  %v2369_v46 = vmax.f32 %v2367_v39, 0.0  ;;  %v2396_v23 = vmax.f32 %v6237_v9, %v6240_v2  ;;  %v6308_v13 = vld [vmem:[%s4907_s29 + $0x288] sm:$0xff]  ;;  %v6318_v37 = vld [vmem:[%s4907_s29 + $0x298] sm:$0xff] }
 0x21b   : > { %v6253_v25 = vmin.f32 %v2385_v24, 15.99  ;;  %v4117_v56 = vpop.eup %4116  ;;  %v1952_v43 = vsub.f32 %v7182_v7, %v7181_v50  ;;  %v2370_v5 = vmax.f32 %v2368_v57, 0.0  ;;  %v2400_v41 = vmax.f32 %v2395_v12, %v6244_v44  ;;  %v7188_v50 = vld [vmem:[#allocation30_spill] sm:$0xff] }
 0x21c   : > { %v2386_v3 = vmax.f32 %v7180_v52, 0.0  ;;  %v4119_v0 = vpop.eup %4118  ;;  %v6271_v14 = vadd.f32 %v2351_v62, %v2333_v27  ;;  %v6273_v4 = vadd.f32 %v2352_v16, %v2334_v32  ;;  %v2401_v22 = vmax.f32 %v2396_v23, %v6251_v28  ;;  %v6313_v62 = vld [vmem:[%s4907_s29 + $0x290] sm:$0xff] }
 0x21d   : > { %v2478_v15 = vand.u32 2147483647, %v6253_v25  ;;  %v2341_v21 = vadd.f32 %v4117_v56, %v2321_v42  ;;  %v6281_v60 = vmul.f32 %v6104_v35, %v2369_v46  ;;  %v2405_v12 = vmax.f32 %v2400_v41, %v6258_v34  ;;  %v6323_v46 = vld [vmem:[%s4907_s29 + $0x2a0] sm:$0xff]  ;;  %v6327_v41 = vld [vmem:[%s4907_s29 + $0x2a8] sm:$0xff] }
 0x21e   : > { %v6262_v8 = vmin.f32 %v2386_v3, 15.99  ;;  %v2342_v59 = vadd.f32 %v4119_v0, %v2322_v38  ;;  %v2406_v49 = vmax.f32 %v2401_v22, %v6269_v51  ;;  %v3718_v26 = vadd.f32 -1.0, %v6253_v25 }
 0x21f   : > { %v2480_v20 = vsub.f32 1.0, %v2478_v15  ;;  %v6294_v11 = vmul.f32 %v6107_v63, %v2370_v5  ;;  %v2410_v35 = vmax.f32 %v2405_v12, %v6277_v55  ;;  %v3720_v6 = vadd.f32 -2.0, %v6253_v25 }
 0x220   : > { %v2479_v61 = vand.u32 2147483647, %v6262_v8  ;;  %v3719_v31 = vadd.f32 -1.0, %v6262_v8  ;;  %v2411_v33 = vmax.f32 %v2406_v49, %v6285_v47  ;;  %v2496_v54 = vand.u32 2147483647, %v3718_v26 }
 0x221   : > { %v2482_v27 = vmax.f32 %v2480_v20, 0.0  ;;  %v4121_v18 = vpop.eup %4120  ;;  %v2415_v63 = vmax.f32 %v2410_v35, %v6290_v19  ;;  %v3721_v48 = vadd.f32 -2.0, %v6262_v8  ;;  %v2516_v56 = vand.u32 2147483647, %v3720_v6  ;;  %v6337_v20 = vld [vmem:[%s4907_s29 + $0x2b8] sm:$0xff] }
 0x222   : > { %v2481_v45 = vsub.f32 1.0, %v2479_v61  ;;  %v2497_v36 = vand.u32 2147483647, %v3719_v31  ;;  %v4123_v24 = vpop.eup %4122  ;;  %v2361_v30 = vadd.f32 %v4121_v18, %v2341_v21  ;;  %v2416_v32 = vmax.f32 %v2411_v33, %v6298_v10  ;;  %v6331_v21 = vld [vmem:[%s4907_s29 + $0x2b0] sm:$0xff]  ;;  %v6343_v33 = vld [vmem:[%s4907_s29 + $0x2c0] sm:$0xff] }
 0x223   : > { %v2484_v39 = vmul.f32 %v6201_v1, %v2482_v27  ;;  %v2498_v42 = vsub.f32 1.0, %v2496_v54  ;;  %v2362_v16 = vadd.f32 %v4123_v24, %v2342_v59  ;;  %v2420_v57 = vmax.f32 %v2415_v63, %v6303_v29  ;;  %v6347_v63 = vld [vmem:[%s4907_s29 + $0x2c8] sm:$0xff] }
 0x224   : > { %v2483_v17 = vmax.f32 %v2481_v45, 0.0  ;;  %v2499_v3 = vsub.f32 1.0, %v2497_v36  ;;  %4124 = vlog2.f32 %v2361_v30  ;;  %v2421_v38 = vmax.f32 %v2416_v32, %v6308_v13  ;;  %v6351_v30 = vld [vmem:[%s4907_s29 + $0x2d0] sm:$0xff] }
 0x225   : > { %v2500_v23 = vmax.f32 %v2498_v42, 0.0  ;;  %4126 = vlog2.f32 %v2362_v16  ;;  %v2425_v5 = vmax.f32 %v2420_v57, %v6313_v62  ;;  %v2517_v22 = vand.u32 2147483647, %v3721_v48  ;;  %v6357_v57 = vld [vmem:[%s4907_s29 + $0x2d8] sm:$0xff] }
 0x226   : > { %v2485_v52 = vmul.f32 %v6237_v9, %v2483_v17  ;;  %v2501_v0 = vmax.f32 %v2499_v3, 0.0  ;;  %v2426_v15 = vmax.f32 %v2421_v38, %v6318_v37  ;;  %v2518_v61 = vsub.f32 1.0, %v2516_v56 }
 0x227   : > { %v2502_v12 = vmul.f32 %v6204_v40, %v2500_v23  ;;  %v3722_v59 = vadd.f32 -3.0, %v6253_v25  ;;  %v2430_v49 = vmax.f32 %v2425_v5, %v6323_v46  ;;  %v2519_v35 = vsub.f32 1.0, %v2517_v22  ;;  %v6365_v5 = vld [vmem:[%s4907_s29 + $0x2e0] sm:$0xff] }
 0x228   : > { %v2503_v26 = vmul.f32 %v6240_v2, %v2501_v0  ;;  %v3723_v45 = vadd.f32 -3.0, %v6262_v8  ;;  %v2431_v31 = vmax.f32 %v2426_v15, %v6327_v41  ;;  %v2520_v54 = vmax.f32 %v2518_v61, 0.0  ;;  %v6371_v61 = vld [vmem:[%s4907_s29 + $0x2e8] sm:$0xff] }
 0x229   : > { %v2504_v27 = vadd.f32 %v2502_v12, %v2484_v39  ;;  %v2536_v6 = vand.u32 2147483647, %v3722_v59  ;;  %v2435_v18 = vmax.f32 %v2430_v49, %v6331_v21  ;;  %v2521_v36 = vmax.f32 %v2519_v35, 0.0 }
 0x22a   : > { %v2505_v17 = vadd.f32 %v2503_v26, %v2485_v52  ;;  %v2537_v48 = vand.u32 2147483647, %v3723_v45  ;;  %v2436_v24 = vmax.f32 %v2431_v31, %v6337_v20  ;;  %v2522_v32 = vmul.f32 %v6244_v44, %v2520_v54 }
 0x22b   : > { %v2538_v42 = vsub.f32 1.0, %v2536_v6  ;;  %v3724_v39 = vadd.f32 -4.0, %v6253_v25  ;;  %v2440_v16 = vmax.f32 %v2435_v18, %v6343_v33  ;;  %v2523_v3 = vmul.f32 %v6251_v28, %v2521_v36 }
 0x22c   : > { %v2539_v52 = vsub.f32 1.0, %v2537_v48  ;;  %v3725_v38 = vadd.f32 -4.0, %v6262_v8  ;;  %v2373_v23 = vadd.f32 %v6281_v60, %v6271_v14  ;;  %v2441_v56 = vmax.f32 %v2436_v24, %v6347_v63  ;;  %v6375_v60 = vld [vmem:[%s4907_s29 + $0x2f0] sm:$0xff] }
 0x22d   : > { %v2540_v0 = vmax.f32 %v2538_v42, 0.0  ;;  %v2556_v22 = vand.u32 2147483647, %v3724_v39  ;;  %v2374_v15 = vadd.f32 %v6294_v11, %v6273_v4  ;;  %v2445_v12 = vmax.f32 %v2440_v16, %v6351_v30  ;;  %v6379_v11 = vld [vmem:[%s4907_s29 + $0x2f8] sm:$0xff]  ;;  %v6384_v42 = vld [vmem:[%s4907_s29 + $0x300] sm:$0xff]  ;;  %v6390_v16 = vld [vmem:[%s4907_s29 + $0x308] sm:$0xff] }
 0x22e   : > { %v2541_v59 = vmax.f32 %v2539_v52, 0.0  ;;  %v2557_v49 = vand.u32 2147483647, %v3725_v38  ;;  %v4125_v26 = vpop.eup %4124  ;;  %v2446_v14 = vmax.f32 %v2441_v56, %v6357_v57  ;;  %v2524_v35 = vadd.f32 %v2522_v32, %v2504_v27  ;;  %v7183_v38 = vld [vmem:[#allocation35_spill] sm:$0xff]  ;;  %v7184_v56 = vld [vmem:[#allocation37_spill] sm:$0xff] }
 0x22f   : > { %v2525_v45 = vadd.f32 %v2523_v3, %v2505_v17  ;;  %v2558_v31 = vsub.f32 1.0, %v2556_v22  ;;  %v4127_v54 = vpop.eup %4126  ;;  %v2376_v6 = vmul.f32 0.6931472, %v4125_v26  ;;  %v2450_v4 = vmax.f32 %v2445_v12, %v6365_v5  ;;  %v7185_v26 = vld [vmem:[#allocation27_spill] sm:$0xff] }
 0x230   : > { %v2542_v18 = vmul.f32 %v6258_v34, %v2540_v0  ;;  %v2559_v36 = vsub.f32 1.0, %v2557_v49  ;;  %v2378_v48 = vmul.f32 0.6931472, %v4127_v54  ;;  %v2451_v24 = vmax.f32 %v2446_v14, %v6371_v61  ;;  %v6398_v49 = vld [vmem:[%s4907_s29 + $0x310] sm:$0xff] }
 0x231   : > { %v2560_v27 = vmax.f32 %v2558_v31, 0.0  ;;  %v3726_v17 = vadd.f32 -5.0, %v6253_v25  ;;  %v2379_v32 = vadd.f32 %v2376_v6, %v6114_v53  ;;  %v2455_v39 = vmax.f32 %v2450_v4, %v6375_v60  ;;  %v6407_v6 = vld [vmem:[%s4907_s29 + $0x318] sm:$0xff] }
 0x232   : > { %v2543_v3 = vmul.f32 %v6269_v51, %v2541_v59  ;;  %v2561_v52 = vmax.f32 %v2559_v36, 0.0  ;;  %v1953_v0 = vsub.f32 %v7184_v56, %v7183_v38  ;;  %v2380_v22 = vadd.f32 %v2378_v48, %v6117_v58  ;;  %v6411_v48 = vld [vmem:[%s4907_s29 + $0x320] sm:$0xff] }
 0x233   : > { %v2456_v12 = vmax.f32 %v2451_v24, %v6379_v11  ;;  %v3727_v53 = vadd.f32 -5.0, %v6262_v8  ;;  %v7186_v14 = vsub.f32 1.0, %v7185_v26  ;;  %v2381_v54 = vsub.f32 %v2379_v32, %v2373_v23  ;;  %v6421_v32 = vld [vmem:[%s4907_s29 + $0x328] sm:$0xff] }
 0x234   : > { %v2460_v59 = vmax.f32 %v2455_v39, %v6384_v42  ;;  %v2544_v4 = vadd.f32 %v2542_v18, %v2524_v35  ;;  %v2382_v36 = vsub.f32 %v2380_v22, %v2374_v15  ;;  %v2562_v24 = vmul.f32 %v6277_v55, %v2560_v27  ;;  %v6428_v27 = vld [vmem:[#allocation7 + $0x10] sm:$0xff] }
 0x235   : > { %v6403_v31 = vadd.f32 1e-07, %v7186_v14  ;;  %v2461_v58 = vmax.f32 %v2456_v12, %v6390_v16  ;;  %v2576_v38 = vand.u32 2147483647, %v3726_v17  ;;  %v6417_v56 = vadd.f32 %v2381_v54, %v1952_v43  ;;  %v6432_v43 = vld [vmem:[#allocation7 + $0x18] sm:$0xff]  ;;  %v7189_v17 = vld [vmem:[#allocation31_spill] sm:$0xff] }
 0x236   : > { %v2465_v23 = vmax.f32 %v2460_v59, %v6398_v49  ;;  %v2545_v39 = vadd.f32 %v2543_v3, %v2525_v45  ;;  %v2563_v35 = vmul.f32 %v6285_v47, %v2561_v52  ;;  %v6424_v15 = vadd.f32 %v2382_v36, %v1953_v0  ;;  %v7190_v3 = vld [vmem:[#allocation33_spill] sm:$0xff] }
 0x237   : > { %v2466_v18 = vmax.f32 %v2461_v58, %v6407_v6  ;;  %v2577_v22 = vand.u32 2147483647, %v3727_v53  ;;  %4128 = vrsqrt.f32 %v6403_v31  ;;  %v1482_v52 = vsub.f32 1.0, %v7190_v3 }
 0x238   : > { %7187 = vst [vmem:[#allocation38_spill] sm:$0xff] %v6424_v15  ;;  %v6437_v45 = vmax.f32 %v2465_v23, %v6411_v48  ;;  %v6443_v53 = vadd.f32 %v2562_v24, %v2544_v4  ;;  %v2578_v26 = vsub.f32 1.0, %v2576_v38  ;;  %v6451_v36 = vadd.f32 %v2563_v35, %v2545_v39 }
 0x239   : > { %v6441_v0 = vmax.f32 %v2466_v18, %v6421_v32  ;;  %v2579_v24 = vsub.f32 1.0, %v2577_v22  ;;  %v3728_v18 = vadd.f32 -6.0, %v6253_v25  ;;  %vm1487_vm4 = vcmp.eq.f32.partialorder %v6403_v31, inf }
 0x23a   : > { %v2472_v14 = vsub.f32 %v6201_v1, %v6437_v45  ;;  %v2486_v54 = vsub.f32 %v6204_v40, %v6437_v45  ;;  %v2506_v59 = vsub.f32 %v6244_v44, %v6437_v45  ;;  %v2526_v40 = vsub.f32 %v6258_v34, %v6437_v45 }
 0x23b   : > { %v2473_v58 = vsub.f32 %v6237_v9, %v6441_v0  ;;  %v2487_v23 = vsub.f32 %v6240_v2, %v6441_v0  ;;  %v2507_v4 = vsub.f32 %v6251_v28, %v6441_v0  ;;  %v2527_v35 = vsub.f32 %v6269_v51, %v6441_v0 }
 0x23c   : > { %v2474_v38 = vmul.f32 1.442695, %v2472_v14  ;;  %v2488_v1 = vmul.f32 1.442695, %v2486_v54  ;;  %v2580_v9 = vmax.f32 %v2578_v26, 0.0  ;;  %v2546_v2 = vsub.f32 %v6277_v55, %v6437_v45 }
 0x23d   : > { %v2476_v44 = vmul.f32 1.442695, %v2473_v58  ;;  %v2490_v39 = vmul.f32 1.442695, %v2487_v23  ;;  %v2508_v3 = vmul.f32 1.442695, %v2506_v59  ;;  %v2547_v34 = vsub.f32 %v6285_v47, %v6441_v0 }
 0x23e   : > { %4130 = vpow2.f32 %v2474_v38  ;;  %v3729_v28 = vadd.f32 -6.0, %v6262_v8  ;;  %v2510_v22 = vmul.f32 1.442695, %v2507_v4  ;;  %v2581_v14 = vmax.f32 %v2579_v24, 0.0 }
 0x23f   : > { %4132 = vpow2.f32 %v2476_v44  ;;  %v2528_v54 = vmul.f32 1.442695, %v2526_v40  ;;  %v2566_v58 = vsub.f32 %v6290_v19, %v6437_v45  ;;  %v2596_v51 = vand.u32 2147483647, %v3728_v18 }
 0x240   : > { %4134 = vpow2.f32 %v2488_v1  ;;  %v2530_v26 = vmul.f32 1.442695, %v2527_v35  ;;  %v2567_v59 = vsub.f32 %v6298_v10, %v6441_v0  ;;  %v3730_v55 = vadd.f32 -7.0, %v6253_v25 }
 0x241   : > { %4136 = vpow2.f32 %v2490_v39  ;;  %v4129_v23 = vpop.eup %4128  ;;  %v2548_v4 = vmul.f32 1.442695, %v2546_v2  ;;  %v2586_v47 = vsub.f32 %v6303_v29, %v6437_v45  ;;  %v3731_v24 = vadd.f32 -7.0, %v6262_v8 }
 0x242   : > { %4138 = vpow2.f32 %v2508_v3  ;;  %v2550_v38 = vmul.f32 1.442695, %v2547_v34  ;;  %v2582_v1 = vmul.f32 %v6290_v19, %v2580_v9  ;;  %v2597_v40 = vand.u32 2147483647, %v3729_v28 }
 0x243   : > { %4140 = vpow2.f32 %v2510_v22  ;;  %v2568_v18 = vmul.f32 1.442695, %v2566_v58  ;;  %v2583_v44 = vmul.f32 %v6298_v10, %v2581_v14  ;;  %v2598_v39 = vsub.f32 1.0, %v2596_v51 }
 0x244   : > { %4142 = vpow2.f32 %v2528_v54  ;;  %v2570_v35 = vmul.f32 1.442695, %v2567_v59  ;;  %v2587_v3 = vsub.f32 %v6308_v13, %v6441_v0  ;;  %v2616_v2 = vand.u32 2147483647, %v3730_v55 }
 0x245   : > { %4144 = vpow2.f32 %v2530_v26  ;;  %v2588_v12 = vmul.f32 1.442695, %v2586_v47  ;;  %v2599_v7 = vsub.f32 1.0, %v2597_v40  ;;  %v2606_v22 = vsub.f32 %v6313_v62, %v6437_v45 }
 0x246   : > { %4146 = vpow2.f32 %v2548_v4  ;;  %v2607_v9 = vsub.f32 %v6318_v37, %v6441_v0  ;;  %v2617_v10 = vand.u32 2147483647, %v3731_v24  ;;  %v6486_v34 = vadd.f32 1e-07, %v1482_v52 }
 0x247   : > { %4148 = vpow2.f32 %v2550_v38  ;;  %v6489_v14 = vmul.f32 %v4129_v23, %v6403_v31  ;;  %v2600_v54 = vmax.f32 %v2598_v39, 0.0  ;;  %v2584_v51 = vadd.f32 %v2582_v1, %v6443_v53 }
 0x248   : > { %v4131_v28 = vpop.eup %4130  ;;  %4150 = vpow2.f32 %v2568_v18  ;;  %v2590_v26 = vmul.f32 1.442695, %v2587_v3  ;;  %v2618_v59 = vsub.f32 1.0, %v2616_v2  ;;  %v2585_v4 = vadd.f32 %v2583_v44, %v6451_v36 }
 0x249   : > { %v4133_v58 = vpop.eup %4132  ;;  %4152 = vpow2.f32 %v2570_v35  ;;  %v2601_v47 = vmax.f32 %v2599_v7, 0.0  ;;  %v2608_v24 = vmul.f32 1.442695, %v2606_v22  ;;  %v2610_v23 = vmul.f32 1.442695, %v2607_v9 }
 0x24a   : > { %v4135_v55 = vpop.eup %4134  ;;  %4154 = vpow2.f32 %v2588_v12  ;;  %v2619_v40 = vsub.f32 1.0, %v2617_v10  ;;  %v2626_v18 = vsub.f32 %v6323_v46, %v6437_v45  ;;  %v2602_v53 = vmul.f32 %v6303_v29, %v2600_v54 }
 0x24b   : > { %v4137_v38 = vpop.eup %4136  ;;  %v2492_v52 = vadd.f32 %v4135_v55, %v4131_v28  ;;  %v2627_v1 = vsub.f32 %v6327_v41, %v6441_v0  ;;  %v3732_v12 = vadd.f32 -8.0, %v6253_v25  ;;  %4156 = vpow2.f32 %v2590_v26 }
 0x24c   : > { %v4139_v39 = vpop.eup %4138  ;;  %v2493_v35 = vadd.f32 %v4137_v38, %v4133_v58  ;;  %v2620_v44 = vmax.f32 %v2618_v59, 0.0  ;;  %v3733_v3 = vadd.f32 -8.0, %v6262_v8  ;;  %v2603_v9 = vmul.f32 %v6308_v13, %v2601_v47 }
 0x24d   : > { %v4141_v7 = vpop.eup %4140  ;;  %v2512_v36 = vadd.f32 %v4139_v39, %v2492_v52  ;;  %4158 = vpow2.f32 %v2608_v24  ;;  %v2636_v10 = vand.u32 2147483647, %v3732_v12  ;;  %v2621_v29 = vmax.f32 %v2619_v40, 0.0 }
 0x24e   : > { %v4143_v2 = vpop.eup %4142  ;;  %v2513_v22 = vadd.f32 %v4141_v7, %v2493_v35  ;;  %v2628_v54 = vmul.f32 1.442695, %v2626_v18  ;;  %v2646_v55 = vsub.f32 %v6331_v21, %v6437_v45  ;;  %v2630_v52 = vmul.f32 1.442695, %v2627_v1 }
 0x24f   : > { %v4145_v28 = vpop.eup %4144  ;;  %v2532_v58 = vadd.f32 %v4143_v2, %v2512_v36  ;;  %v2637_v26 = vand.u32 2147483647, %v3733_v3  ;;  %v3734_v59 = vadd.f32 -9.0, %v6253_v25  ;;  %4160 = vpow2.f32 %v2610_v23 }
 0x250   : > { %v4147_v38 = vpop.eup %4146  ;;  %v2533_v19 = vadd.f32 %v4145_v28, %v2513_v22  ;;  %v2638_v35 = vsub.f32 1.0, %v2636_v10  ;;  %v2647_v13 = vsub.f32 %v6337_v20, %v6441_v0  ;;  %v2604_v40 = vadd.f32 %v2602_v53, %v2584_v51 }
 0x251   : > { %v4149_v39 = vpop.eup %4148  ;;  %v2552_v15 = vadd.f32 %v4147_v38, %v2532_v58  ;;  %v2622_v18 = vmul.f32 %v6313_v62, %v2620_v44  ;;  %v3735_v12 = vadd.f32 -9.0, %v6262_v8  ;;  %vm1489_vm5 = vcmp.eq.f32.partialorder %v6403_v31, 0.0 }
 0x252   : > { %v4151_v47 = vpop.eup %4150  ;;  %v2553_v24 = vadd.f32 %v4149_v39, %v2533_v19  ;;  %4162 = vpow2.f32 %v2628_v54  ;;  %v2648_v36 = vmul.f32 1.442695, %v2646_v55  ;;  %v2656_v3 = vand.u32 2147483647, %v3734_v59 }
 0x253   : > { %v4153_v7 = vpop.eup %4152  ;;  %v2572_v1 = vadd.f32 %v4151_v47, %v2552_v15  ;;  %v2605_v23 = vadd.f32 %v2603_v9, %v2585_v4  ;;  %v2623_v22 = vmul.f32 %v6318_v37, %v2621_v29  ;;  %v2639_v10 = vsub.f32 1.0, %v2637_v26 }
 0x254   : > { %v4155_v2 = vpop.eup %4154  ;;  %v2666_v19 = vsub.f32 %v6343_v33, %v6437_v45  ;;  %4164 = vpow2.f32 %v2630_v52  ;;  %v2640_v51 = vmax.f32 %v2638_v35, 0.0  ;;  %v2650_v62 = vmul.f32 1.442695, %v2647_v13 }
 0x255   : > { %v2667_v53 = vsub.f32 %v6347_v63, %v6441_v0  ;;  %v1488_v15 = vsel %vm1487_vm4, %v6403_v31, %v6489_v14  ;;  %4166 = vrsqrt.f32 %v6486_v34  ;;  %v2573_v4 = vadd.f32 %v4153_v7, %v2553_v24  ;;  %v4157_v37 = vpop.eup %4156 }
 0x256   : > { %v2657_v44 = vand.u32 2147483647, %v3735_v12  ;;  %v2592_v9 = vadd.f32 %v4155_v2, %v2572_v1  ;;  %4168 = vpow2.f32 %v2648_v36  ;;  %v2658_v28 = vsub.f32 1.0, %v2656_v3 }
 0x257   : > { %v2668_v58 = vmul.f32 1.442695, %v2666_v19  ;;  %v4159_v29 = vpop.eup %4158  ;;  %v2624_v54 = vadd.f32 %v2622_v18, %v2604_v40  ;;  %v2625_v55 = vadd.f32 %v2623_v22, %v2605_v23  ;;  %v2641_v38 = vmax.f32 %v2639_v10, 0.0 }
 0x258   : > { %v3736_v52 = vadd.f32 -10.0, %v6253_v25  ;;  %v2642_v26 = vmul.f32 %v6323_v46, %v2640_v51  ;;  %4170 = vpow2.f32 %v2650_v62  ;;  %v2670_v59 = vmul.f32 1.442695, %v2667_v53 }
 0x259   : > { %v3737_v14 = vadd.f32 -10.0, %v6262_v8  ;;  %v2593_v39 = vadd.f32 %v4157_v37, %v2573_v4  ;;  %v2659_v35 = vsub.f32 1.0, %v2657_v44  ;;  %v2686_v47 = vsub.f32 %v6351_v30, %v6437_v45  ;;  %v4161_v24 = vpop.eup %4160 }
 0x25a   : > { %v2676_v13 = vand.u32 2147483647, %v3736_v52  ;;  %v2612_v12 = vadd.f32 %v4159_v29, %v2592_v9  ;;  %v2660_v7 = vmax.f32 %v2658_v28, 0.0  ;;  %4172 = vpow2.f32 %v2668_v58 }
 0x25b   : > { %v2687_v40 = vsub.f32 %v6357_v57, %v6441_v0  ;;  %v2677_v18 = vand.u32 2147483647, %v3737_v14  ;;  %v2688_v1 = vmul.f32 1.442695, %v2686_v47  ;;  %v3738_v46 = vadd.f32 -11.0, %v6253_v25 }
 0x25c   : > { %v2706_v36 = vsub.f32 %v6365_v5, %v6437_v45  ;;  %v4163_v3 = vpop.eup %4162  ;;  %v2643_v2 = vmul.f32 %v6327_v41, %v2641_v38  ;;  %4174 = vpow2.f32 %v2670_v59  ;;  %v3739_v22 = vadd.f32 -11.0, %v6262_v8 }
 0x25d   : > { %v2690_v23 = vmul.f32 1.442695, %v2687_v40  ;;  %v7191_v10 = vand.u32 2147483648, %v6403_v31  ;;  %v2613_v51 = vadd.f32 %v4161_v24, %v2593_v39  ;;  %v2661_v62 = vmax.f32 %v2659_v35, 0.0 }
 0x25e   : > { %v2678_v53 = vsub.f32 1.0, %v2676_v13  ;;  %v4165_v4 = vpop.eup %4164  ;;  %vm1494_vm6 = vcmp.eq.f32.partialorder %v6486_v34, inf  ;;  %v2644_v44 = vadd.f32 %v2642_v26, %v2624_v54  ;;  %v2662_v37 = vmul.f32 %v6331_v21, %v2660_v7 }
 0x25f   : > { %v6536_v19 = vsel %vm1489_vm5, %v7191_v10, %v1488_v15  ;;  %4176 = vpow2.f32 %v2688_v1  ;;  %v2707_v41 = vsub.f32 %v6371_v61, %v6441_v0  ;;  %v4167_v9 = vpop.eup %4166  ;;  %v2632_v28 = vadd.f32 %v4163_v3, %v2612_v12 }
 0x260   : > { %v2679_v58 = vsub.f32 1.0, %v2677_v18  ;;  %v2696_v29 = vand.u32 2147483647, %v3738_v46  ;;  %v2708_v31 = vmul.f32 1.442695, %v2706_v36  ;;  %v4169_v15 = vpop.eup %4168  ;;  %v2645_v38 = vadd.f32 %v2643_v2, %v2625_v55 }
 0x261   : > { %4178 = vpow2.f32 %v2690_v23  ;;  %v2697_v52 = vand.u32 2147483647, %v3739_v22  ;;  %v2710_v59 = vmul.f32 1.442695, %v2707_v41  ;;  %v2633_v14 = vadd.f32 %v4165_v4, %v2613_v51 }
 0x262   : > { %v2663_v39 = vmul.f32 %v6337_v20, %v2661_v62  ;;  %v2680_v54 = vmax.f32 %v2678_v53, 0.0  ;;  %v3740_v21 = vadd.f32 -12.0, %v6253_v25  ;;  %v4171_v26 = vpop.eup %4170  ;;  %v1493_v35 = vmul.f32 %v4167_v9, %v6486_v34 }
 0x263   : > { %v1497_v13 = vand.u32 2147483648, %v6486_v34  ;;  %4180 = vpow2.f32 %v2708_v31  ;;  %v3741_v47 = vadd.f32 -12.0, %v6262_v8  ;;  %vm1496_vm7 = vcmp.eq.f32.partialorder %v6486_v34, 0.0 }
 0x264   : > { %v2652_v55 = vadd.f32 %v4169_v15, %v2632_v28  ;;  %v2664_v24 = vadd.f32 %v2662_v37, %v2644_v44  ;;  %v2681_v12 = vmax.f32 %v2679_v58, 0.0  ;;  %v2698_v7 = vsub.f32 1.0, %v2696_v29  ;;  %v4173_v40 = vpop.eup %4172 }
 0x265   : > { %v2699_v18 = vsub.f32 1.0, %v2697_v52  ;;  %4182 = vpow2.f32 %v2710_v59  ;;  %v2726_v20 = vsub.f32 %v6375_v60, %v6437_v45  ;;  %v2727_v1 = vsub.f32 %v6379_v11, %v6441_v0 }
 0x266   : > { %v2653_v46 = vadd.f32 %v4171_v26, %v2633_v14  ;;  %v2665_v36 = vadd.f32 %v2663_v39, %v2645_v38  ;;  %v2682_v3 = vmul.f32 %v6343_v33, %v2680_v54  ;;  %v2716_v2 = vand.u32 2147483647, %v3740_v21  ;;  %v4175_v23 = vpop.eup %4174 }
 0x267   : > { %v2717_v22 = vand.u32 2147483647, %v3741_v47  ;;  %v2728_v10 = vmul.f32 1.442695, %v2726_v20  ;;  %v2730_v51 = vmul.f32 1.442695, %v2727_v1  ;;  %v2746_v62 = vsub.f32 %v6384_v42, %v6437_v45 }
 0x268   : > { %v2672_v53 = vadd.f32 %v4173_v40, %v2652_v55  ;;  %v2683_v4 = vmul.f32 %v6347_v63, %v2681_v12  ;;  %v3742_v44 = vadd.f32 -13.0, %v6253_v25  ;;  %v2747_v37 = vsub.f32 %v6390_v16, %v6441_v0 }
 0x269   : > { %v4177_v41 = vpop.eup %4176  ;;  %v2700_v9 = vmax.f32 %v2698_v7, 0.0  ;;  %v2701_v33 = vmax.f32 %v2699_v18, 0.0  ;;  %4184 = vpow2.f32 %v2728_v10  ;;  %v2748_v28 = vmul.f32 1.442695, %v2746_v62 }
 0x26a   : > { %v1495_v58 = vsel %vm1494_vm6, %v6486_v34, %v1493_v35  ;;  %v2673_v29 = vadd.f32 %v4175_v23, %v2653_v46  ;;  %v2718_v31 = vsub.f32 1.0, %v2716_v2  ;;  %4186 = vpow2.f32 %v2730_v51  ;;  %v457_v34 = vld [vmem:[%s6576_s7] sm:$0xff] }
 0x26b   : > { %v4179_v15 = vpop.eup %4178  ;;  %v2719_v63 = vsub.f32 1.0, %v2717_v22  ;;  %v3743_v38 = vadd.f32 -13.0, %v6262_v8  ;;  %4188 = vpow2.f32 %v2748_v28  ;;  %v2750_v52 = vmul.f32 1.442695, %v2747_v37 }
 0x26c   : > { %v2684_v59 = vadd.f32 %v2682_v3, %v2664_v24  ;;  %v2692_v14 = vadd.f32 %v4177_v41, %v2672_v53  ;;  %v2736_v39 = vand.u32 2147483647, %v3742_v44  ;;  %v2766_v54 = vsub.f32 %v6398_v49, %v6437_v45  ;;  %v458_v53 = vld [vmem:[%s6576_s7 + $0x8] sm:$0xff] }
 0x26d   : > { %v4181_v21 = vpop.eup %4180  ;;  %v2685_v26 = vadd.f32 %v2683_v4, %v2665_v36  ;;  %v2702_v35 = vmul.f32 %v6351_v30, %v2700_v9  ;;  %v2703_v47 = vmul.f32 %v6357_v57, %v2701_v33  ;;  %4190 = vpow2.f32 %v2750_v52 }
 0x26e   : > { %v2693_v55 = vadd.f32 %v4179_v15, %v2673_v29  ;;  %v2720_v12 = vmax.f32 %v2718_v31, 0.0  ;;  %v3744_v7 = vadd.f32 -14.0, %v6253_v25  ;;  %v2767_v40 = vsub.f32 %v6407_v6, %v6441_v0 }
 0x26f   : > { %v4183_v24 = vpop.eup %4182  ;;  %v1498_v18 = vsel %vm1496_vm7, %v1497_v13, %v1495_v58  ;;  %v2721_v20 = vmax.f32 %v2719_v63, 0.0  ;;  %v2737_v1 = vand.u32 2147483647, %v3743_v38  ;;  %v2768_v46 = vmul.f32 1.442695, %v2766_v54 }
 0x270   : > { %v2712_v36 = vadd.f32 %v4181_v21, %v2692_v14  ;;  %v2738_v3 = vsub.f32 1.0, %v2736_v39  ;;  %v3745_v30 = vadd.f32 -14.0, %v6262_v8  ;;  %v2770_v57 = vmul.f32 1.442695, %v2767_v40  ;;  %v6589_v14 = vld [vmem:[%s4907_s29 + $0x330] sm:$0xff]  ;;  %v6592_v39 = vld [vmem:[%s4907_s29 + $0x340] sm:$0xff] }
 0x271   : > { %v2704_v2 = vadd.f32 %v2702_v35, %v2684_v59  ;;  %v2705_v23 = vadd.f32 %v2703_v47, %v2685_v26  ;;  %4192 = vpow2.f32 %v2768_v46  ;;  %v2786_v22 = vsub.f32 %v6411_v48, %v6437_v45  ;;  %v6598_v35 = vld [vmem:[%s4907_s29 + $0x338] sm:$0xff]  ;;  %v6601_v47 = vld [vmem:[%s4907_s29 + $0x348] sm:$0xff] }
 0x272   : > { %v2713_v13 = vadd.f32 %v4183_v24, %v2693_v55  ;;  %v2722_v10 = vmul.f32 %v6365_v5, %v2720_v12  ;;  %v2756_v51 = vand.u32 2147483647, %v3744_v7  ;;  %4194 = vpow2.f32 %v2770_v57  ;;  %v6607_v24 = vld [vmem:[%s4907_s29 + $0x350] sm:$0xff] }
 0x273   : > { %v4185_v62 = vpop.eup %4184  ;;  %v2723_v4 = vmul.f32 %v6371_v61, %v2721_v20  ;;  %v3746_v44 = vadd.f32 -15.0, %v6253_v25  ;;  %v2787_v37 = vsub.f32 %v6421_v32, %v6441_v0  ;;  %v2788_v41 = vmul.f32 1.442695, %v2786_v22 }
 0x274   : > { %v4187_v9 = vpop.eup %4186  ;;  %v2732_v33 = vadd.f32 %v4185_v62, %v2712_v36  ;;  %v2739_v28 = vsub.f32 1.0, %v2737_v1  ;;  %v2740_v58 = vmax.f32 %v2738_v3, 0.0  ;;  %v2757_v5 = vand.u32 2147483647, %v3745_v30  ;;  %v6618_v36 = vld [vmem:[%s4907_s29 + $0x358] sm:$0xff] }
 0x275   : > { %v4189_v29 = vpop.eup %4188  ;;  %v1499_v31 = vmul.f32 %v6536_v19, %v457_v34  ;;  %v3747_v15 = vadd.f32 -15.0, %v6262_v8  ;;  %4196 = vpow2.f32 %v2788_v41  ;;  %v2790_v61 = vmul.f32 1.442695, %v2787_v37  ;;  %v6632_v34 = vld [vmem:[%s4907_s29 + $0x368] sm:$0xff] }
 0x276   : > { %v1500_v63 = vmul.f32 %v1498_v18, %v458_v53  ;;  %v2724_v38 = vadd.f32 %v2722_v10, %v2704_v2  ;;  %v2733_v52 = vadd.f32 %v4187_v9, %v2713_v13  ;;  %v2758_v59 = vsub.f32 1.0, %v2756_v51  ;;  %v6638_v53 = vld [vmem:[%s4907_s29 + $0x370] sm:$0xff] }
 0x277   : > { %v4191_v54 = vpop.eup %4190  ;;  %v6594_v21 = vadd.f32 %v2723_v4, %v2705_v23  ;;  %v2776_v19 = vand.u32 2147483647, %v3746_v44  ;;  %4198 = vpow2.f32 %v2790_v61  ;;  %v3748_v26 = vadd.f32 -16.0, %v6253_v25  ;;  %v6641_v4 = vld [vmem:[%s4907_s29 + $0x378] sm:$0xff] }
 0x278   : > { %v2741_v55 = vmax.f32 %v2739_v28, 0.0  ;;  %v2742_v12 = vmul.f32 %v6375_v60, %v2740_v58  ;;  %v2752_v7 = vadd.f32 %v4189_v29, %v2732_v33  ;;  %v6604_v40 = vsub.f32 1.0, %v2757_v5  ;;  %v6656_v5 = vld [vmem:[%s4907_s29 + $0x380] sm:$0xff] }
 0x279   : > { %v2777_v18 = vand.u32 2147483647, %v3747_v15  ;;  %v6610_v20 = vadd.f32 -16.0, %v6262_v8  ;;  %v7192_v25 = vsub.f32 %v7188_v50, %v6428_v27  ;;  %v2826_v46 = vmax.f32 %v6589_v14, %v6592_v39  ;;  %v6626_v27 = vld [vmem:[%s4907_s29 + $0x360] sm:$0xff] }
 0x27a   : > { %v2753_v60 = vadd.f32 %v4191_v54, %v2733_v52  ;;  %v2760_v3 = vmax.f32 %v2758_v59, 0.0  ;;  %v7193_v30 = vsub.f32 %v7189_v17, %v6432_v43  ;;  %v2827_v8 = vmax.f32 %v6598_v35, %v6601_v47 }
 0x27b   : > { %v2816_v1 = vmax.f32 %v7192_v25, 0.0  ;;  %v4193_v50 = vpop.eup %4192  ;;  %v6628_v2 = vsub.f32 1.0, %v2776_v19  ;;  %v2796_v23 = vand.u32 2147483647, %v3748_v26  ;;  %v2831_v22 = vmax.f32 %v2826_v46, %v6607_v24 }
 0x27c   : > { %v2817_v57 = vmax.f32 %v7193_v30, 0.0  ;;  %v3251_v13 = vadd.f32 %v1500_v63, %v1499_v31  ;;  %v4195_v10 = vpop.eup %4194  ;;  %v2743_v43 = vmul.f32 %v6379_v11, %v2741_v55  ;;  %v2761_v17 = vmax.f32 %v6604_v40, 0.0 }
 0x27d   : > { %v2772_v51 = vadd.f32 %v4193_v50, %v2752_v7  ;;  %v2832_v62 = vmax.f32 %v2827_v8, %v6618_v36  ;;  %v6646_v44 = vsub.f32 1.0, %v2777_v18  ;;  %v2797_v37 = vand.u32 2147483647, %v6610_v20 }
 0x27e   : > { %v6649_v11 = vmin.f32 %v2816_v1, 15.99  ;;  %v2836_v41 = vmax.f32 %v2831_v22, %v6626_v27  ;;  %3252 = vst [vmem:[%s444_s2] sm:$0xff] %v3251_v13  ;;  %v2744_v9 = vadd.f32 %v2742_v12, %v2724_v38  ;;  %v2773_v33 = vadd.f32 %v4195_v10, %v2753_v60  ;;  %v6673_v38 = vld [vmem:[%s4907_s29 + $0x388] sm:$0xff] }
 0x27f   : > { %v6652_v28 = vmin.f32 %v2817_v57, 15.99  ;;  %v2837_v58 = vmax.f32 %v2832_v62, %v6632_v34  ;;  %v4197_v29 = vpop.eup %4196  ;;  %v2762_v31 = vmul.f32 %v6384_v42, %v2760_v3  ;;  %v2780_v15 = vmax.f32 %v6628_v2, 0.0 }
 0x280   : > { %v6669_v61 = vsub.f32 1.0, %v2796_v23  ;;  %v2841_v63 = vmax.f32 %v2836_v41, %v6638_v53 }
 0x281   : > { %4447 = shalt.err (!%p4444_p1)
}
 0x282   : > { %s4448_s10 = scalar_lea.hbm %s6663_s30, 128  ;;  %s4452_s28 = scalar_lea.hbm %s7194_s16, 256 }
 0x283   : > { %p4449_p6 = scmp.ne.s32.totalorder %s6663_s30, %s4448_s10  ;;  %p4453_p4 = scmp.lt.u32.totalorder %s6663_s30, %s7194_s16 }
 0x284   : > { %p4454_p8 = scmp.lt.u32.totalorder %s4452_s28, %s4448_s10  ;;  %p4456_p13 = scmp.lt.u32.totalorder %s4448_s10, %s6663_s30 }
 0x285   : > { %p4450_p2 = pnand %p4449_p6, %p7195_p3 }
 0x286   : > { %p4455_p10 = por %p4454_p8, %p4453_p4 }
 0x287   : > { %p4451_p0 = pneg %p4450_p2 }
 0x288   : > { %p4457_p11 = por %p4456_p13, %p4455_p10 }
 0x28a   : > { %p4458_p5 = pnand %p4457_p11, %p4451_p0 }
 0x28c   : > { %4461 = shalt.err (!%p4458_p5)
}
 0x28d   : > { %3859 = dma.vmem_to_hbm [thread:$0]  (%p7195_p3), %s6665_s21, 128, %s6663_s30, %s3256_s3   ;;  %v2745_v42 = vadd.f32 %v2743_v43, %v6594_v21  ;;  %v2763_v52 = vmul.f32 %v6390_v16, %v2761_v17  ;;  %v2792_v59 = vadd.f32 %v4197_v29, %v2772_v51  ;;  %v2842_v54 = vmax.f32 %v2837_v58, %v6641_v4  ;;  %v6701_v19 = vld [vmem:[%s4907_s29 + $0x390] sm:$0xff]  ;;  %v4199_v26 = vpop.eup %4198  ;;  %v6706_v40 = vld [vmem:[%s4907_s29 + $0x398] sm:$0xff]  ;;  %v6711_v20 = vld [vmem:[%s4907_s29 + $0x3a0] sm:$0xff] }
 0x28e   : > { %v2781_v55 = vmax.f32 %v6646_v44, 0.0  ;;  %v2799_v12 = vsub.f32 1.0, %v2797_v37  ;;  %v2846_v7 = vmax.f32 %v2841_v63, %v6656_v5  ;;  %v3784_v18 = vadd.f32 -1.0, %v6649_v11  ;;  %v6718_v30 = vld [vmem:[%s4907_s29 + $0x3a8] sm:$0xff]  ;;  %v6722_v50 = vld [vmem:[%s4907_s29 + $0x3b0] sm:$0xff]  ;;  %v6728_v13 = vld [vmem:[%s4907_s29 + $0x3b8] sm:$0xff] }
 0x28f   : > { %v2793_v21 = vadd.f32 %v4199_v26, %v2773_v33  ;;  %4200 = vlog2.f32 %v2792_v59  ;;  %v2847_v16 = vmax.f32 %v2842_v54, %v6673_v38  ;;  %v3785_v25 = vadd.f32 -1.0, %v6652_v28  ;;  %v6733_v17 = vld [vmem:[%s4907_s29 + $0x3c0] sm:$0xff]  ;;  %v6738_v41 = vld [vmem:[%s4907_s29 + $0x3c8] sm:$0xff]  ;;  %v6743_v58 = vld [vmem:[%s4907_s29 + $0x3d0] sm:$0xff]  ;;  %s7197_s15 = sld [smem:[#allocation52_spill]]  ;;  %s3261_s30 = scalar_lea.sflag [#allocation13], %s4903_s12 }
 0x290   : > { %v2764_v1 = vadd.f32 %v2762_v31, %v2744_v9  ;;  %v2782_v46 = vmul.f32 %v6398_v49, %v2780_v15  ;;  %v2800_v60 = vmax.f32 %v6669_v61, 0.0  ;;  %v2851_v3 = vmax.f32 %v2846_v7, %v6701_v19  ;;  %v6749_v63 = vld [vmem:[%s4907_s29 + $0x3d8] sm:$0xff]  ;;  %v6753_v59 = vld [vmem:[%s4907_s29 + $0x3e0] sm:$0xff] }
 0x291   : > { %v2765_v57 = vadd.f32 %v2763_v52, %v2745_v42  ;;  %4202 = vlog2.f32 %v2793_v21  ;;  %v2852_v8 = vmax.f32 %v2847_v16, %v6706_v40  ;;  %v2909_v2 = vand.u32 2147483647, %v6649_v11 }
 0x292   : > { %v2783_v23 = vmul.f32 %v6407_v6, %v2781_v55  ;;  %v2801_v22 = vmax.f32 %v2799_v12, 0.0  ;;  %v2856_v49 = vmax.f32 %v2851_v3, %v6711_v20  ;;  %v2910_v10 = vand.u32 2147483647, %v6652_v28 }
 0x293   : > { %v2857_v43 = vmax.f32 %v2852_v8, %v6718_v30  ;;  %v2927_v51 = vand.u32 2147483647, %v3784_v18  ;;  %v2928_v62 = vand.u32 2147483647, %v3785_v25  ;;  %v2784_v44 = vadd.f32 %v2782_v46, %v2764_v1  ;;  %v6758_v18 = vld [vmem:[%s4907_s29 + $0x3e8] sm:$0xff]  ;;  %v6762_v25 = vld [vmem:[%s4907_s29 + $0x3f0] sm:$0xff] }
 0x294   : > { %v2802_v37 = vmul.f32 %v6411_v48, %v2800_v60  ;;  %v2861_v6 = vmax.f32 %v2856_v49, %v6722_v50  ;;  %v3786_v9 = vadd.f32 -2.0, %v6649_v11  ;;  %v2911_v29 = vsub.f32 1.0, %v2909_v2  ;;  %v6767_v2 = vld [vmem:[%s4907_s29 + $0x3f8] sm:$0xff] }
 0x295   : > { %v2862_v33 = vmax.f32 %v2857_v43, %v6728_v13  ;;  %v3787_v31 = vadd.f32 -2.0, %v6652_v28  ;;  %v2785_v15 = vadd.f32 %v2783_v23, %v2765_v57  ;;  %v2803_v61 = vmul.f32 %v6421_v32, %v2801_v22  ;;  %s6957_s6 = scalar_lea.hbm %s7197_s15, %s3818_s5 }
 0x296   : > { %v2866_v48 = vmax.f32 %v2861_v6, %v6733_v17  ;;  %v2912_v42 = vsub.f32 1.0, %v2910_v10  ;;  %v2929_v54 = vsub.f32 1.0, %v2927_v51  ;;  %v2930_v26 = vsub.f32 1.0, %v2928_v62  ;;  %v6771_v10 = vld [vmem:[%s4907_s29 + $0x400] sm:$0xff] }
 0x297   : > { %v2867_v52 = vmax.f32 %v2862_v33, %v6738_v41  ;;  %v3788_v55 = vadd.f32 -3.0, %v6649_v11  ;;  %v2804_v12 = vadd.f32 %v2802_v37, %v2784_v44  ;;  %v2947_v32 = vand.u32 2147483647, %v3786_v9  ;;  %v6776_v9 = vld [vmem:[%s4907_s29 + $0x408] sm:$0xff] }
 0x298   : > { %v2871_v7 = vmax.f32 %v2866_v48, %v6743_v58  ;;  %v2913_v1 = vmax.f32 %v2911_v29, 0.0  ;;  %v2948_v46 = vand.u32 2147483647, %v3787_v31  ;;  %v3789_v60 = vadd.f32 -3.0, %v6652_v28  ;;  %v6780_v31 = vld [vmem:[%s4907_s29 + $0x410] sm:$0xff] }
 0x299   : > { %v4201_v21 = vpop.eup %4200  ;;  %v2872_v16 = vmax.f32 %v2867_v52, %v6749_v63  ;;  %v2805_v3 = vadd.f32 %v2803_v61, %v2785_v15  ;;  %v2914_v23 = vmax.f32 %v2912_v42, 0.0  ;;  %v2931_v43 = vmax.f32 %v2929_v54, 0.0  ;;  %v6786_v54 = vld [vmem:[%s4907_s29 + $0x418] sm:$0xff] }
 0x29a   : > { %v2807_v57 = vmul.f32 0.6931472, %v4201_v21  ;;  %v2876_v8 = vmax.f32 %v2871_v7, %v6753_v59  ;;  %v2932_v51 = vmax.f32 %v2930_v26, 0.0  ;;  %v2967_v62 = vand.u32 2147483647, %v3788_v55  ;;  %v6791_v7 = vld [vmem:[%s4907_s29 + $0x420] sm:$0xff] }
 0x29b   : > { %v4203_v22 = vpop.eup %4202  ;;  %v2877_v49 = vmax.f32 %v2872_v16, %v6758_v18  ;;  %v2949_v33 = vsub.f32 1.0, %v2947_v32  ;;  %v2915_v15 = vmul.f32 %v6589_v14, %v2913_v1  ;;  %v2950_v61 = vsub.f32 1.0, %v2948_v46  ;;  %v6800_v46 = vld [vmem:[%s4907_s29 + $0x428] sm:$0xff] }
 0x29c   : > { %v2809_v44 = vmul.f32 0.6931472, %v4203_v22  ;;  %v2810_v37 = vadd.f32 %v2807_v57, %v6437_v45  ;;  %v2881_v6 = vmax.f32 %v2876_v8, %v6762_v25  ;;  %v2968_v48 = vand.u32 2147483647, %v3789_v60  ;;  %v6804_v8 = vld [vmem:[%s4907_s29 + $0x430] sm:$0xff] }
 0x29d   : > { %v2882_v29 = vmax.f32 %v2877_v49, %v6767_v2  ;;  %v2916_v26 = vmul.f32 %v6598_v35, %v2914_v23  ;;  %v2933_v32 = vmul.f32 %v6592_v39, %v2931_v43  ;;  %v2934_v21 = vmul.f32 %v6601_v47, %v2932_v51  ;;  %v7196_v49 = vld [vmem:[#allocation38_spill] sm:$0xff] }
 0x29e   : > { %v2811_v42 = vadd.f32 %v2809_v44, %v6441_v0  ;;  %v2812_v52 = vsub.f32 %v2810_v37, %v2804_v12  ;;  %v2886_v45 = vmax.f32 %v2881_v6, %v6771_v10  ;;  %v2969_v16 = vsub.f32 1.0, %v2967_v62 }
 0x29f   : > { %v2887_v55 = vmax.f32 %v2882_v29, %v6776_v9  ;;  %v2951_v60 = vmax.f32 %v2949_v33, 0.0  ;;  %v2952_v23 = vmax.f32 %v2950_v61, 0.0  ;;  %v2970_v22 = vsub.f32 1.0, %v2968_v48 }
 0x2a0   : > { %v2813_v1 = vsub.f32 %v2811_v42, %v2805_v3  ;;  %v6796_v0 = vadd.f32 %v2812_v52, %v6417_v56  ;;  %v2891_v12 = vmax.f32 %v2886_v45, %v6780_v31  ;;  %v6811_v3 = vld [vmem:[%s4907_s29 + $0x438] sm:$0xff]  ;;  %v3790_v56 = vadd.f32 -4.0, %v6649_v11  ;;  %s451_s29 = scalar_lea.vmem [#allocation12], %s3504_s17 }
 0x2a1   : > { %v2892_v57 = vmax.f32 %v2887_v55, %v6786_v54  ;;  %v2971_v44 = vmax.f32 %v2969_v16, 0.0  ;;  %v2935_v6 = vadd.f32 %v2933_v32, %v2915_v15  ;;  %v2936_v33 = vadd.f32 %v2934_v21, %v2916_v26  ;;  %s3289_s27 = sshll.u32 %s451_s29, 4  ;;  %s6959_s27 = int_to_ptr.vmem [resolvable:$true] %s3289_s27 }
 0x2a2   : > { %v6807_v43 = vadd.f32 %v2813_v1, %v7196_v49  ;;  %v2896_v51 = vmax.f32 %v2891_v12, %v6791_v7  ;;  %v2953_v29 = vmul.f32 %v6607_v24, %v2951_v60  ;;  %v2954_v48 = vmul.f32 %v6618_v36, %v2952_v23  ;;  %s4462_s3 = scalar_lea.vmem %s6959_s27, 128 }
 0x2a3   : > { %v2897_v62 = vmax.f32 %v2892_v57, %v6800_v46  ;;  %v2972_v42 = vmax.f32 %v2970_v22, 0.0  ;;  %v3791_v52 = vadd.f32 -4.0, %v6652_v28  ;;  %v2987_v26 = vand.u32 2147483647, %v3790_v56  ;;  %p4463_p9 = scmp.ne.s32.totalorder %s6959_s27, %s4462_s3 }
 0x2a4   : > { %v6816_v37 = vmax.f32 %v2896_v51, %v6804_v8  ;;  %v2973_v1 = vmul.f32 %v6626_v27, %v2971_v44  ;;  %v2955_v60 = vadd.f32 %v2953_v29, %v2935_v6  ;;  %v3792_v56 = vadd.f32 -5.0, %v6649_v11 }
 0x2a5   : > { %v6820_v61 = vmax.f32 %v2897_v62, %v6811_v3  ;;  %p4464_p12 = pnand %p4463_p9, %p7195_p3 }
 0x2a6   : > { %v2903_v45 = vsub.f32 %v6589_v14, %v6816_v37  ;;  %v2917_v55 = vsub.f32 %v6592_v39, %v6816_v37  ;;  %v2937_v15 = vsub.f32 %v6607_v24, %v6816_v37  ;;  %v2957_v39 = vsub.f32 %v6626_v27, %v6816_v37 }
 0x2a7   : > { %v2904_v32 = vsub.f32 %v6598_v35, %v6820_v61  ;;  %v2918_v21 = vsub.f32 %v6601_v47, %v6820_v61  ;;  %v2938_v16 = vsub.f32 %v6618_v36, %v6820_v61  ;;  %v2958_v23 = vsub.f32 %v6632_v34, %v6820_v61  ;;  %p4465_p7 = pneg %p4464_p12 }
 0x2a8   : > { %v2905_v12 = vmul.f32 1.442695, %v2903_v45  ;;  %v2919_v14 = vmul.f32 1.442695, %v2917_v55  ;;  %v2988_v35 = vand.u32 2147483647, %v3791_v52  ;;  %v2977_v47 = vsub.f32 %v6638_v53, %v6816_v37 }
 0x2a9   : > { %v2907_v57 = vmul.f32 1.442695, %v2904_v32  ;;  %v2921_v24 = vmul.f32 1.442695, %v2918_v21  ;;  %v2939_v22 = vmul.f32 1.442695, %v2937_v15  ;;  %v2978_v51 = vsub.f32 %v6641_v4, %v6820_v61 }
 0x2aa   : > { %4204 = vpow2.f32 %v2905_v12  ;;  %v2989_v36 = vsub.f32 1.0, %v2987_v26  ;;  %v2941_v49 = vmul.f32 1.442695, %v2938_v16  ;;  %v2956_v27 = vadd.f32 %v2954_v48, %v2936_v33 }
 0x2ab   : > { %4206 = vpow2.f32 %v2907_v57  ;;  %v2959_v62 = vmul.f32 1.442695, %v2957_v39  ;;  %v2997_v44 = vsub.f32 %v6656_v5, %v6816_v37  ;;  %v2961_v6 = vmul.f32 1.442695, %v2958_v23 }
 0x2ac   : > { %4208 = vpow2.f32 %v2919_v14  ;;  %v2990_v29 = vsub.f32 1.0, %v2988_v35  ;;  %v3793_v52 = vadd.f32 -5.0, %v6652_v28  ;;  %v2979_v45 = vmul.f32 1.442695, %v2977_v47 }
 0x2ad   : > { %4210 = vpow2.f32 %v2921_v24  ;;  %v2991_v55 = vmax.f32 %v2989_v36, 0.0  ;;  %v2998_v15 = vsub.f32 %v6673_v38, %v6820_v61  ;;  %v2974_v26 = vmul.f32 %v6632_v34, %v2972_v42 }
 0x2ae   : > { %4212 = vpow2.f32 %v2939_v22  ;;  %v2981_v32 = vmul.f32 1.442695, %v2978_v51  ;;  %v3007_v33 = vand.u32 2147483647, %v3792_v56  ;;  %v2975_v48 = vadd.f32 %v2973_v1, %v2955_v60 }
 0x2af   : > { %4214 = vpow2.f32 %v2941_v49  ;;  %v2999_v21 = vmul.f32 1.442695, %v2997_v44  ;;  %v3017_v16 = vsub.f32 %v6701_v19, %v6816_v37  ;;  %v2992_v12 = vmax.f32 %v2990_v29, 0.0 }
 0x2b0   : > { %4216 = vpow2.f32 %v2959_v62  ;;  %v3008_v14 = vand.u32 2147483647, %v3793_v52  ;;  %v3794_v39 = vadd.f32 -6.0, %v6649_v11  ;;  %v2993_v57 = vmul.f32 %v6638_v53, %v2991_v55 }
 0x2b1   : > { %4218 = vpow2.f32 %v2961_v6  ;;  %v3001_v24 = vmul.f32 1.442695, %v2998_v15  ;;  %v3018_v34 = vsub.f32 %v6706_v40, %v6820_v61  ;;  %v3009_v42 = vsub.f32 1.0, %v3007_v33 }
 0x2b2   : > { %4220 = vpow2.f32 %v2979_v45  ;;  %v3795_v1 = vadd.f32 -6.0, %v6652_v28  ;;  %v3019_v23 = vmul.f32 1.442695, %v3017_v16  ;;  %v3037_v35 = vsub.f32 %v6711_v20, %v6816_v37 }
 0x2b3   : > { %4222 = vpow2.f32 %v2981_v32  ;;  %v2976_v47 = vadd.f32 %v2974_v26, %v2956_v27  ;;  %v2994_v36 = vmul.f32 %v6641_v4, %v2992_v12  ;;  %v3010_v49 = vsub.f32 1.0, %v3008_v14 }
 0x2b4   : > { %v4205_v60 = vpop.eup %4204  ;;  %4224 = vpow2.f32 %v2999_v21  ;;  %v3027_v53 = vand.u32 2147483647, %v3794_v39  ;;  %v2995_v56 = vadd.f32 %v2993_v57, %v2975_v48  ;;  %v3021_v62 = vmul.f32 1.442695, %v3018_v34 }
 0x2b5   : > { %v4207_v22 = vpop.eup %4206  ;;  %4226 = vpow2.f32 %v3001_v24  ;;  %v3038_v44 = vsub.f32 %v6718_v30, %v6820_v61  ;;  %v3011_v52 = vmax.f32 %v3009_v42, 0.0  ;;  %v3028_v45 = vand.u32 2147483647, %v3795_v1 }
 0x2b6   : > { %v4209_v51 = vpop.eup %4208  ;;  %v3796_v55 = vadd.f32 -7.0, %v6649_v11  ;;  %4228 = vpow2.f32 %v3019_v23  ;;  %v3039_v27 = vmul.f32 1.442695, %v3037_v35  ;;  %v3057_v4 = vsub.f32 %v6722_v50, %v6816_v37 }
 0x2b7   : > { %v4211_v6 = vpop.eup %4210  ;;  %v2923_v29 = vadd.f32 %v4209_v51, %v4205_v60  ;;  %v3012_v48 = vmax.f32 %v3010_v49, 0.0  ;;  %v3029_v21 = vsub.f32 1.0, %v3027_v53  ;;  %v3797_v16 = vadd.f32 -7.0, %v6652_v28 }
 0x2b8   : > { %v4213_v15 = vpop.eup %4212  ;;  %v2924_v32 = vadd.f32 %v4211_v6, %v4207_v22  ;;  %4230 = vpow2.f32 %v3021_v62  ;;  %v3041_v39 = vmul.f32 1.442695, %v3038_v44  ;;  %v3058_v57 = vsub.f32 %v6728_v13, %v6820_v61 }
 0x2b9   : > { %v4215_v26 = vpop.eup %4214  ;;  %v2943_v33 = vadd.f32 %v4213_v15, %v2923_v29  ;;  %v3013_v42 = vmul.f32 %v6656_v5, %v3011_v52  ;;  %v3030_v1 = vsub.f32 1.0, %v3028_v45  ;;  %v3047_v60 = vand.u32 2147483647, %v3796_v55 }
 0x2ba   : > { %v4217_v12 = vpop.eup %4216  ;;  %v2944_v14 = vadd.f32 %v4215_v26, %v2924_v32  ;;  %4232 = vpow2.f32 %v3039_v27  ;;  %v3059_v22 = vmul.f32 1.442695, %v3057_v4  ;;  %v3077_v49 = vsub.f32 %v6733_v17, %v6816_v37 }
 0x2bb   : > { %v4219_v24 = vpop.eup %4218  ;;  %v2963_v34 = vadd.f32 %v4217_v12, %v2943_v33  ;;  %v2996_v62 = vadd.f32 %v2994_v36, %v2976_v47  ;;  %v3031_v44 = vmax.f32 %v3029_v21, 0.0  ;;  %v3798_v6 = vadd.f32 -8.0, %v6649_v11 }
 0x2bc   : > { %v4221_v23 = vpop.eup %4220  ;;  %v2964_v35 = vadd.f32 %v4219_v24, %v2944_v14  ;;  %4234 = vpow2.f32 %v3041_v39  ;;  %v3048_v15 = vand.u32 2147483647, %v3797_v16  ;;  %v3061_v32 = vmul.f32 1.442695, %v3058_v57 }
 0x2bd   : > { %v4223_v53 = vpop.eup %4222  ;;  %v2983_v51 = vadd.f32 %v4221_v23, %v2963_v34  ;;  %v3078_v5 = vsub.f32 %v6738_v41, %v6820_v61  ;;  %v3014_v45 = vmul.f32 %v6673_v38, %v3012_v48  ;;  %v3015_v55 = vadd.f32 %v3013_v42, %v2995_v56 }
 0x2be   : > { %v4225_v29 = vpop.eup %4224  ;;  %v2984_v52 = vadd.f32 %v4223_v53, %v2964_v35  ;;  %v3032_v27 = vmax.f32 %v3030_v1, 0.0  ;;  %v3049_v26 = vsub.f32 1.0, %v3047_v60  ;;  %4236 = vpow2.f32 %v3059_v22 }
 0x2bf   : > { %v4227_v4 = vpop.eup %4226  ;;  %v3799_v47 = vadd.f32 -8.0, %v6652_v28  ;;  %v3079_v36 = vmul.f32 1.442695, %v3077_v49  ;;  %v3003_v33 = vadd.f32 %v4225_v29, %v2983_v51  ;;  %v3033_v21 = vmul.f32 %v6701_v19, %v3031_v44 }
 0x2c0   : > { %v3067_v12 = vand.u32 2147483647, %v3798_v6  ;;  %v3097_v16 = vsub.f32 %v6743_v58, %v6816_v37  ;;  %v4229_v14 = vpop.eup %4228  ;;  %v3050_v39 = vsub.f32 1.0, %v3048_v15  ;;  %4238 = vpow2.f32 %v3061_v32 }
 0x2c1   : > { %v3081_v57 = vmul.f32 1.442695, %v3078_v5  ;;  %v3098_v38 = vsub.f32 %v6749_v63, %v6820_v61  ;;  %v3004_v56 = vadd.f32 %v4227_v4, %v2984_v52  ;;  %v3016_v48 = vadd.f32 %v3014_v45, %v2996_v62 }
 0x2c2   : > { %v3800_v24 = vadd.f32 -9.0, %v6649_v11  ;;  %v4231_v34 = vpop.eup %4230  ;;  %v3051_v42 = vmax.f32 %v3049_v26, 0.0  ;;  %v3068_v1 = vand.u32 2147483647, %v3799_v47  ;;  %4240 = vpow2.f32 %v3079_v36 }
 0x2c3   : > { %v3099_v19 = vmul.f32 1.442695, %v3097_v16  ;;  %v3023_v60 = vadd.f32 %v4229_v14, %v3003_v33  ;;  %v3034_v23 = vmul.f32 %v6706_v40, %v3032_v27  ;;  %v3069_v35 = vsub.f32 1.0, %v3067_v12 }
 0x2c4   : > { %v3801_v22 = vadd.f32 -9.0, %v6652_v28  ;;  %v4233_v49 = vpop.eup %4232  ;;  %v3035_v53 = vadd.f32 %v3033_v21, %v3015_v55  ;;  %v3052_v51 = vmax.f32 %v3050_v39, 0.0  ;;  %4242 = vpow2.f32 %v3081_v57 }
 0x2c5   : > { %v3101_v44 = vmul.f32 1.442695, %v3098_v38  ;;  %v3024_v6 = vadd.f32 %v4231_v34, %v3004_v56  ;;  %v3087_v62 = vand.u32 2147483647, %v3800_v24  ;;  %v3117_v29 = vsub.f32 %v6753_v59, %v6816_v37 }
 0x2c6   : > { %v3118_v15 = vsub.f32 %v6758_v18, %v6820_v61  ;;  %v4235_v32 = vpop.eup %4234  ;;  %v3053_v5 = vmul.f32 %v6711_v20, %v3051_v42  ;;  %v3070_v40 = vsub.f32 1.0, %v3068_v1  ;;  %4244 = vpow2.f32 %v3099_v19 }
 0x2c7   : > { %v3137_v52 = vsub.f32 %v6762_v25, %v6816_v37  ;;  %v3043_v45 = vadd.f32 %v4233_v49, %v3023_v60  ;;  %v3071_v55 = vmax.f32 %v3069_v35, 0.0  ;;  %v3088_v27 = vand.u32 2147483647, %v3801_v22 }
 0x2c8   : > { %v3119_v4 = vmul.f32 1.442695, %v3117_v29  ;;  %v4237_v26 = vpop.eup %4236  ;;  %4246 = vpow2.f32 %v3101_v44  ;;  %v3802_v47 = vadd.f32 -10.0, %v6649_v11  ;;  %v3121_v36 = vmul.f32 1.442695, %v3118_v15 }
 0x2c9   : > { %v3138_v33 = vsub.f32 %v6767_v2, %v6820_v61  ;;  %v3036_v21 = vadd.f32 %v3034_v23, %v3016_v48  ;;  %v3044_v12 = vadd.f32 %v4235_v32, %v3024_v6  ;;  %v3054_v20 = vmul.f32 %v6718_v30, %v3052_v51 }
 0x2ca   : > { %v3089_v16 = vsub.f32 1.0, %v3087_v62  ;;  %v4239_v14 = vpop.eup %4238  ;;  %v3072_v39 = vmax.f32 %v3070_v40, 0.0  ;;  %v3803_v57 = vadd.f32 -10.0, %v6652_v28  ;;  %4248 = vpow2.f32 %v3119_v4 }
 0x2cb   : > { %v3139_v38 = vmul.f32 1.442695, %v3137_v52  ;;  %v3055_v56 = vadd.f32 %v3053_v5, %v3035_v53  ;;  %v3063_v24 = vadd.f32 %v4237_v26, %v3043_v45  ;;  %v3073_v34 = vmul.f32 %v6722_v50, %v3071_v55 }
 0x2cc   : > { %v4241_v42 = vpop.eup %4240  ;;  %v3090_v1 = vsub.f32 1.0, %v3088_v27  ;;  %v3107_v19 = vand.u32 2147483647, %v3802_v47  ;;  %4250 = vpow2.f32 %v3121_v36  ;;  %v3141_v60 = vmul.f32 1.442695, %v3138_v33 }
 0x2cd   : > { %v3064_v48 = vadd.f32 %v4239_v14, %v3044_v12  ;;  %v3091_v23 = vmax.f32 %v3089_v16, 0.0  ;;  %v3157_v30 = vsub.f32 %v6771_v10, %v6816_v37  ;;  %v3056_v22 = vadd.f32 %v3054_v20, %v3036_v21 }
 0x2ce   : > { %v4243_v35 = vpop.eup %4242  ;;  %v3074_v49 = vmul.f32 %v6728_v13, %v3072_v39  ;;  %v3108_v51 = vand.u32 2147483647, %v3803_v57  ;;  %4252 = vpow2.f32 %v3139_v38  ;;  %v3083_v53 = vadd.f32 %v4241_v42, %v3063_v24 }
 0x2cf   : > { %v3804_v44 = vadd.f32 -11.0, %v6649_v11  ;;  %v3158_v50 = vsub.f32 %v6776_v9, %v6820_v61  ;;  %v3159_v6 = vmul.f32 1.442695, %v3157_v30  ;;  %v3075_v29 = vadd.f32 %v3073_v34, %v3055_v56 }
 0x2d0   : > { %v4245_v62 = vpop.eup %4244  ;;  %v3092_v15 = vmax.f32 %v3090_v1, 0.0  ;;  %v3109_v32 = vsub.f32 1.0, %v3107_v19  ;;  %4254 = vpow2.f32 %v3141_v60  ;;  %v3084_v5 = vadd.f32 %v4243_v35, %v3064_v48 }
 0x2d1   : > { %v3093_v40 = vmul.f32 %v6733_v17, %v3091_v23  ;;  %v3805_v52 = vadd.f32 -11.0, %v6652_v28  ;;  %v3161_v13 = vmul.f32 1.442695, %v3158_v50  ;;  %v3110_v55 = vsub.f32 1.0, %v3108_v51 }
 0x2d2   : > { %v4247_v45 = vpop.eup %4246  ;;  %4256 = vpow2.f32 %v3159_v6  ;;  %v3177_v27 = vsub.f32 %v6780_v31, %v6816_v37  ;;  %v3178_v4 = vsub.f32 %v6786_v54, %v6820_v61  ;;  %v3076_v26 = vadd.f32 %v3074_v49, %v3056_v22 }
 0x2d3   : > { %v3103_v47 = vadd.f32 %v4245_v62, %v3083_v53  ;;  %v3127_v36 = vand.u32 2147483647, %v3804_v44  ;;  %v3806_v33 = vadd.f32 -12.0, %v6649_v11  ;;  %v3094_v17 = vmul.f32 %v6738_v41, %v3092_v15 }
 0x2d4   : > { %v4249_v21 = vpop.eup %4248  ;;  %v3111_v12 = vmax.f32 %v3109_v32, 0.0  ;;  %4258 = vpow2.f32 %v3161_v13  ;;  %v3179_v20 = vmul.f32 1.442695, %v3177_v27  ;;  %v3104_v16 = vadd.f32 %v4247_v45, %v3084_v5 }
 0x2d5   : > { %v3128_v14 = vand.u32 2147483647, %v3805_v52  ;;  %v3807_v39 = vadd.f32 -12.0, %v6652_v28  ;;  %v3181_v57 = vmul.f32 1.442695, %v3178_v4  ;;  %v3095_v56 = vadd.f32 %v3093_v40, %v3075_v29 }
 0x2d6   : > { %v4251_v38 = vpop.eup %4250  ;;  %v3112_v24 = vmax.f32 %v3110_v55, 0.0  ;;  %4260 = vpow2.f32 %v3179_v20  ;;  %v3123_v34 = vadd.f32 %v4249_v21, %v3103_v47  ;;  %v3129_v42 = vsub.f32 1.0, %v3127_v36 }
 0x2d7   : > { %v3147_v1 = vand.u32 2147483647, %v3806_v33  ;;  %v3808_v19 = vadd.f32 -13.0, %v6649_v11  ;;  %v3113_v41 = vmul.f32 %v6743_v58, %v3111_v12  ;;  %4262 = vpow2.f32 %v3181_v57 }
 0x2d8   : > { %v4253_v60 = vpop.eup %4252  ;;  %v3197_v48 = vsub.f32 %v6791_v7, %v6816_v37  ;;  %v3198_v23 = vsub.f32 %v6800_v46, %v6820_v61  ;;  %v3096_v30 = vadd.f32 %v3094_v17, %v3076_v26  ;;  %v3124_v35 = vadd.f32 %v4251_v38, %v3104_v16 }
 0x2d9   : > { %v3130_v22 = vsub.f32 1.0, %v3128_v14  ;;  %v3148_v49 = vand.u32 2147483647, %v3807_v39  ;;  %v3114_v53 = vmul.f32 %v6749_v63, %v3112_v24  ;;  %v3809_v44 = vadd.f32 -13.0, %v6652_v28 }
 0x2da   : > { %v4255_v51 = vpop.eup %4254  ;;  %v3199_v50 = vmul.f32 1.442695, %v3197_v48  ;;  %v3201_v6 = vmul.f32 1.442695, %v3198_v23  ;;  %v3131_v62 = vmax.f32 %v3129_v42, 0.0  ;;  %v3143_v58 = vadd.f32 %v4253_v60, %v3123_v34 }
 0x2db   : > { %v3149_v29 = vsub.f32 1.0, %v3147_v1  ;;  %v3167_v15 = vand.u32 2147483647, %v3808_v19  ;;  %v3115_v5 = vadd.f32 %v3113_v41, %v3095_v56  ;;  %v3810_v40 = vadd.f32 -14.0, %v6649_v11 }
 0x2dc   : > { %v4257_v32 = vpop.eup %4256  ;;  %4264 = vpow2.f32 %v3199_v50  ;;  %v3217_v52 = vsub.f32 %v6804_v8, %v6816_v37  ;;  %v3132_v13 = vmax.f32 %v3130_v22, 0.0  ;;  %v3144_v45 = vadd.f32 %v4255_v51, %v3124_v35 }
 0x2dd   : > { %v3150_v55 = vsub.f32 1.0, %v3148_v49  ;;  %4266 = vpow2.f32 %v3201_v6  ;;  %v3168_v27 = vand.u32 2147483647, %v3809_v44  ;;  %v3811_v4 = vadd.f32 -14.0, %v6652_v28 }
 0x2de   : > { %v4259_v63 = vpop.eup %4258  ;;  %v3218_v26 = vsub.f32 %v6811_v3, %v6820_v61  ;;  %v3219_v47 = vmul.f32 1.442695, %v3217_v52  ;;  %v3133_v36 = vmul.f32 %v6753_v59, %v3131_v62  ;;  %v3151_v33 = vmax.f32 %v3149_v29, 0.0 }
 0x2df   : > { %v3163_v21 = vadd.f32 %v4257_v32, %v3143_v58  ;;  %v3169_v17 = vsub.f32 1.0, %v3167_v15  ;;  %v3187_v20 = vand.u32 2147483647, %v3810_v40  ;;  %v3812_v16 = vadd.f32 -15.0, %v6649_v11 }
 0x2e0   : > { %v4261_v12 = vpop.eup %4260  ;;  %4268 = vpow2.f32 %v3219_v47  ;;  %v3221_v14 = vmul.f32 1.442695, %v3218_v26  ;;  %v3116_v39 = vadd.f32 %v3114_v53, %v3096_v30  ;;  %v3134_v57 = vmul.f32 %v6758_v18, %v3132_v13 }
 0x2e1   : > { %v3152_v38 = vmax.f32 %v3150_v55, 0.0  ;;  %v3164_v56 = vadd.f32 %v4259_v63, %v3144_v45  ;;  %v4263_v24 = vpop.eup %4262  ;;  %v3170_v34 = vsub.f32 1.0, %v3168_v27  ;;  %v3188_v42 = vand.u32 2147483647, %v3811_v4 }
 0x2e2   : > { %v3813_v1 = vadd.f32 -15.0, %v6652_v28  ;;  %4270 = vpow2.f32 %v3221_v14  ;;  %v3135_v59 = vadd.f32 %v3133_v36, %v3115_v5  ;;  %v3153_v19 = vmul.f32 %v6762_v25, %v3151_v33 }
 0x2e3   : > { %v3183_v60 = vadd.f32 %v4261_v12, %v3163_v21  ;;  %v3171_v41 = vmax.f32 %v3169_v17, 0.0  ;;  %v3189_v48 = vsub.f32 1.0, %v3187_v20  ;;  %v3207_v23 = vand.u32 2147483647, %v3812_v16 }
 0x2e4   : > { %v3814_v35 = vadd.f32 -16.0, %v6649_v11  ;;  %v3136_v30 = vadd.f32 %v3134_v57, %v3116_v39  ;;  %v3154_v18 = vmul.f32 %v6767_v2, %v3152_v38  ;;  %v3184_v22 = vadd.f32 %v4263_v24, %v3164_v56 }
 0x2e5   : > { %v3172_v51 = vmax.f32 %v3170_v34, 0.0  ;;  %v3190_v53 = vsub.f32 1.0, %v3188_v42  ;;  %v3208_v44 = vand.u32 2147483647, %v3813_v1  ;;  %v3815_v50 = vadd.f32 -16.0, %v6652_v28 }
 0x2e6   : > { %v4265_v49 = vpop.eup %4264  ;;  %v3155_v62 = vadd.f32 %v3153_v19, %v3135_v59  ;;  %v3173_v25 = vmul.f32 %v6771_v10, %v3171_v41  ;;  %v3191_v29 = vmax.f32 %v3189_v48, 0.0  ;;  %v3209_v15 = vsub.f32 1.0, %v3207_v23  ;;  %v4284_v48 = vld [vmem:[%s6576_s7] sm:$0xff] }
 0x2e7   : > { %v4267_v6 = vpop.eup %4266  ;;  %v3203_v58 = vadd.f32 %v4265_v49, %v3183_v60  ;;  %v3227_v32 = vand.u32 2147483647, %v3814_v35  ;;  %v3156_v5 = vadd.f32 %v3154_v18, %v3136_v30  ;;  %v3174_v2 = vmul.f32 %v6776_v9, %v3172_v51  ;;  %v4285_v35 = vld [vmem:[%s6576_s7 + $0x8] sm:$0xff]  ;;  %s4576_s7 = smov [#allocation12]  }
 0x2e8   : > { %v3204_v11 = vadd.f32 %v4267_v6, %v3184_v22  ;;  %v3192_v52 = vmax.f32 %v3190_v53, 0.0  ;;  %v3210_v13 = vsub.f32 1.0, %v3208_v44  ;;  %v3228_v45 = vand.u32 2147483647, %v3815_v50  ;;  %s4466_s17 = sshll.u32 %s4576_s7, 4  ;;  %s4467_s17 = int_to_ptr.vmem [resolvable:$false] %s4466_s17 }
 0x2e9   : > { %v3175_v27 = vadd.f32 %v3173_v25, %v3155_v62  ;;  %v3193_v28 = vmul.f32 %v6780_v31, %v3191_v29  ;;  %v3211_v4 = vmax.f32 %v3209_v15, 0.0  ;;  %v3229_v26 = vsub.f32 1.0, %v3227_v32  ;;  %s4468_s24 = scalar_lea.vmem %s4467_s17, 256  ;;  %p4469_p1 = scmp.lt.s32.totalorder %s6959_s27, %s4467_s17 }
 0x2ea   : > { %v4269_v40 = vpop.eup %4268  ;;  %v3176_v10 = vadd.f32 %v3174_v2, %v3156_v5  ;;  %v3194_v36 = vmul.f32 %v6786_v54, %v3192_v52  ;;  %v3212_v33 = vmax.f32 %v3210_v13, 0.0  ;;  %v3230_v21 = vsub.f32 1.0, %v3228_v45  ;;  %p4470_p6 = scmp.lt.s32.totalorder %s4468_s24, %s4462_s3 }
 0x2eb   : > { %v3223_v55 = vadd.f32 %v4269_v40, %v3203_v58  ;;  %v3195_v17 = vadd.f32 %v3193_v28, %v3175_v27  ;;  %v3213_v9 = vmul.f32 %v6791_v7, %v3211_v4  ;;  %v3231_v12 = vmax.f32 %v3229_v26, 0.0 }
 0x2ec   : > { %v4271_v63 = vpop.eup %4270  ;;  %v3196_v20 = vadd.f32 %v3194_v36, %v3176_v10  ;;  %v3214_v16 = vmul.f32 %v6800_v46, %v3212_v33  ;;  %v3232_v14 = vmax.f32 %v3230_v21, 0.0  ;;  %p4471_p2 = por %p4470_p6, %p4469_p1 }
 0x2ed   : > { %v3224_v47 = vadd.f32 %v4271_v63, %v3204_v11  ;;  %4272 = vlog2.f32 %v3223_v55  ;;  %v3215_v39 = vadd.f32 %v3213_v9, %v3195_v17  ;;  %v3233_v31 = vmul.f32 %v6804_v8, %v3231_v12 }
 0x2ee   : > { %v3216_v57 = vadd.f32 %v3214_v16, %v3196_v20  ;;  %v3234_v38 = vmul.f32 %v6811_v3, %v3232_v14  ;;  %p4472_p0 = pnand %p4471_p2, %p4465_p7 }
 0x2ef   : > { %4274 = vlog2.f32 %v3224_v47  ;;  %v3235_v54 = vadd.f32 %v3233_v31, %v3215_v39 }
 0x2f0   : > { %v3236_v42 = vadd.f32 %v3234_v38, %v3216_v57 }
 0x2f7   : > { %v4273_v56 = vpop.eup %4272 }
 0x2f8   : > { %v3238_v24 = vmul.f32 0.6931472, %v4273_v56 }
 0x2f9   : > { %v4275_v34 = vpop.eup %4274 }
 0x2fa   : > { %v3240_v7 = vmul.f32 0.6931472, %v4275_v34  ;;  %v3241_v1 = vadd.f32 %v3238_v24, %v6816_v37 }
 0x2fc   : > { %v3242_v46 = vadd.f32 %v3240_v7, %v6820_v61  ;;  %v3243_v59 = vsub.f32 %v3241_v1, %v3235_v54 }
 0x2fe   : > { %v3244_v8 = vsub.f32 %v3242_v46, %v3236_v42  ;;  %v3245_v19 = vadd.f32 %v3243_v59, %v6796_v0 }
 0x300   : > { %v3246_v3 = vadd.f32 %v3244_v8, %v6807_v43  ;;  %v3247_v60 = vmul.f32 0.25, %v3245_v19 }
 0x302   : > { %v3248_v41 = vmul.f32 0.25, %v3246_v3  ;;  %v3249_v23 = vmul.f32 %v4284_v48, %v3247_v60 }
 0x304   : > { %v3250_v30 = vmul.f32 %v4285_v35, %v3248_v41 }
 0x306   : > { %v3253_v37 = vadd.f32 %v3250_v30, %v3249_v23 }
 0x308   : > { %3254 = vst [vmem:[%s451_s29] sm:$0xff] %v3253_v37 }
 0x309   : > { %4475 = shalt.err (!%p4472_p0)
}
 0x30a   : > { %s4476_s12 = scalar_lea.hbm %s6957_s6, 128  ;;  %s4480_s23 = scalar_lea.hbm %s7197_s15, 256 }
 0x30b   : > { %p4477_p4 = scmp.ne.s32.totalorder %s6957_s6, %s4476_s12  ;;  %p4481_p13 = scmp.lt.u32.totalorder %s6957_s6, %s7197_s15 }
 0x30c   : > { %p4482_p11 = scmp.lt.u32.totalorder %s4480_s23, %s4476_s12  ;;  %p4484_p9 = scmp.lt.u32.totalorder %s4476_s12, %s6957_s6 }
 0x30d   : > { %p4478_p8 = pnand %p4477_p4, %p7195_p3 }
 0x30e   : > { %p4483_p5 = por %p4482_p11, %p4481_p13 }
 0x30f   : > { %p4479_p10 = pneg %p4478_p8 }
 0x310   : > { %p4485_p12 = por %p4484_p9, %p4483_p5 }
 0x312   : > { %p4486_p7 = pnand %p4485_p12, %p4479_p10 }
 0x314   : > { %4489 = shalt.err (!%p4486_p7)
}
 0x315   : > { %3860 = dma.vmem_to_hbm [thread:$0]  (%p7195_p3), %s6959_s27, 128, %s6957_s6, %s3261_s30  }
 0x316 PF: > { %s7198_s10 = sld [smem:[#allocation20_spill]]  ;;  %s7199_s19 = sld [smem:[#allocation22_spill]] }
 0x317   : > { %p7201_p6 = scmp.ge.s32.totalorder %s4560_s26, 2 }
 0x31c   : > { %s3301_s13 = sand.u32 1, %s7198_s10   ;;  %p7200_p1 = scmp.ne.s32.totalorder %s7199_s19, 0 }
 0x31d   : > { %s3302_s28 = scalar_lea.sflag [#allocation4], %s3301_s13 }
 0x31e   : > { %p3881_p2 = pnand %p7201_p6, %p7200_p1 }
 0x320   : > { %4531 = dma.done.wait (!%p3881_p2), %s3302_s28, 128  }
 0x321   : > { %4533 = vsyncadd (!%p3881_p2), %s3302_s28, 4294967168  ;;  %s3311_s9 = scalar_lea.sflag [#allocation13], %s3301_s13 }
 0x322   : > { %4535 = dma.done.wait (!%p3881_p2), %s3311_s9, 128  }
 0x323   : > { %4537 = vsyncadd (!%p3881_p2), %s3311_s9, 4294967168  ;;  %s32_s26 = sadd.s32 1, %s4560_s26   ;;  %s7202_s8 = sld [smem:[#allocation21_spill]] }
 0x324   : > { %p29_p0 = scmp.ge.s32.totalorder %s32_s26, 4   ;;  %s7203_s23 = sld [smem:[#allocation24_spill]] }
 0x325   : > { %s7204_s11 = sld [smem:[#allocation23_spill]]  ;;  %s7205_s21 = smov %s4544_s22 }
 0x326   : > { %s7207_s24 = smov %s4556_s25  ;;  %31 = sbr.rel (!%p29_p0) target bundleno = 17 (0x11), region = 220 }
 0x329   : > { %s7206_s22 = smov %s7202_s8 }
 0x32b   : > { %s7208_s25 = smov %s7204_s11 }
 0x32d   :  { %3316 = vsyncpa [#allocation3], 1 }
 0x32e   :  { %3318 = vsyncpa [#allocation3 + $0x1], 1 }
 0x32f   :  { %3319 = vsyncpa [#allocation6], 1 }
 0x330   :  { %3321 = vsyncpa [#allocation6 + $0x1], 1 }
 0x331   :  { %3322 = vsyncpa [#allocation9], 1 }
 0x332   :  { %3324 = vsyncpa [#allocation9 + $0x1], 1 }
 0x333   :  { %3325 = vsyncpa [#allocation4], 1 }
 0x334   :  { %3327 = vsyncpa [#allocation4 + $0x1], 1 }
 0x335   :  { %3328 = vsyncpa [#allocation13], 1 }
 0x336   :  { %3330 = vsyncpa [#allocation13 + $0x1], 1 }

</bundles_post_ra>
